<compile_context>
chip_gen: v6e
topology: v6e:2x2x1
jax: 0.10.0
libtpu: 0.0.40
codegen_flags: <defaults>
</compile_context>

<pallas_src>
import functools

import numpy as np
import jax
import jax.numpy as jnp
from jax.experimental import pallas as pl
from jax.experimental.pallas import tpu as pltpu


# ----------------------------------------------------------------------------
# Pallas kernels
# ----------------------------------------------------------------------------
def _linear_kernel(x_ref, w_ref, b_ref, o_ref, *, relu):
    # x, w are bf16; accumulate in f32 on the MXU; bias/ReLU in f32.
    y = jnp.dot(x_ref[...], w_ref[...], preferred_element_type=jnp.float32)
    y = y + b_ref[...]
    if relu:
        y = jnp.maximum(y, 0.0)
    o_ref[...] = y.astype(o_ref.dtype)


def linear_pallas(x, w, b, *, relu, out_dtype, block_m=2048):
    """y = [relu](x @ w + b).  x:(M,K) bf16, w:(K,N) bf16, b:(1,N) f32.

    M is tiled with a "parallel" grid (2048-row blocks, weights stay resident);
    K and N are kept whole (they are small for every layer of this model).
    """
    M, K = x.shape
    N = w.shape[1]
    bm = M if M <= block_m else block_m          # full dim or 8-aligned block
    return pl.pallas_call(
        functools.partial(_linear_kernel, relu=relu),
        out_shape=jax.ShapeDtypeStruct((M, N), out_dtype),
        grid=(pl.cdiv(M, bm),),
        in_specs=[
            pl.BlockSpec((bm, K), lambda i: (i, 0)),
            pl.BlockSpec((K, N), lambda i: (0, 0)),
            pl.BlockSpec((1, N), lambda i: (0, 0)),
        ],
        out_specs=pl.BlockSpec((bm, N), lambda i: (i, 0)),
        compiler_params=pltpu.CompilerParams(dimension_semantics=("parallel",)),
    )(x, w, b)


def _mlp_head_kernel(x_ref, w1_ref, b1_ref, w2_ref, b2_ref, we_ref, be_ref,
                     wa1_ref, ba1_ref, wha_ref, whc_ref, bh_ref, out_ref):
    """Fused image_in (fc1->fc2) + extra_layer + actor_out + both critic heads.

    The final actor matmul and the (concatenated) critic matmul accumulate into
    one lane-dense (bb, 128) f32 buffer: actor in cols [0:A], critics in cols
    [A:A+2], remaining columns are zero and discarded by the wrapper.
    """
    f32, bf16 = jnp.float32, jnp.bfloat16
    x = x_ref[...]                                                   # (bb, 3136) bf16
    z1 = jnp.maximum(
        jnp.dot(x, w1_ref[...], preferred_element_type=f32) + b1_ref[...], 0.0)
    z2 = jnp.maximum(
        jnp.dot(z1.astype(bf16), w2_ref[...], preferred_element_type=f32)
        + b2_ref[...], 0.0)
    z2b = z2.astype(bf16)
    extra = jnp.maximum(
        jnp.dot(z2b, we_ref[...], preferred_element_type=f32) + be_ref[...], 0.0)
    s = (extra + z2).astype(bf16)                                    # residual branch
    a1 = jnp.maximum(
        jnp.dot(z2b, wa1_ref[...], preferred_element_type=f32) + ba1_ref[...], 0.0
    ).astype(bf16)
    out_ref[...] = (
        jnp.dot(a1, wha_ref[...], preferred_element_type=f32)
        + jnp.dot(s, whc_ref[...], preferred_element_type=f32)
        + bh_ref[...])


def mlp_head_pallas(flat, p, *, block_b=512):
    """One pallas_call for the whole post-conv MLP.  flat: (B, 3136) bf16.

    Returns a single lane-dense (B, head_n) f32 array; the caller slices out
    actor / critic columns.
    """
    B, K = flat.shape
    head_n = p["head_wa"].shape[1]
    bb = B if B <= block_b else block_b
    ws = [p["fc1_w"], p["fc1_b"], p["fc2_w"], p["fc2_b"],
          p["extra_w"], p["extra_b"], p["actor1_w"], p["actor1_b"],
          p["head_wa"], p["head_wc"], p["head_b"]]

    def full(a):
        return pl.BlockSpec(a.shape, lambda i: (0, 0))

    flops = 2 * B * (K * 256 + 256 * 448 + 448 * 448 + 448 * 448
                     + 448 * head_n + 448 * head_n)
    bytes_accessed = (int(flat.size) * flat.dtype.itemsize
                      + sum(int(a.size) * a.dtype.itemsize for a in ws)
                      + B * head_n * 4)

    return pl.pallas_call(
        _mlp_head_kernel,
        out_shape=jax.ShapeDtypeStruct((B, head_n), jnp.float32),
        grid=(pl.cdiv(B, bb),),
        in_specs=[pl.BlockSpec((bb, K), lambda i: (i, 0))] + [full(a) for a in ws],
        out_specs=pl.BlockSpec((bb, head_n), lambda i: (i, 0)),
        compiler_params=pltpu.CompilerParams(dimension_semantics=("parallel",)),
        cost_estimate=pl.CostEstimate(flops=flops, transcendentals=0,
                                      bytes_accessed=bytes_accessed),
    )(flat, *ws)


# ----------------------------------------------------------------------------
# Conv-as-matmul glue (channels-last, single patches op per layer).
# Patch extraction / layout permutes remain XLA glue; all conv arithmetic runs
# inside linear_pallas.
# NOTE(perf review #9): conv outputs are 32/64 lanes wide (masked stores); left
# as-is since the conv stage is small — fusing the stack is the real fix.
# ----------------------------------------------------------------------------
def _patches(x_nhwc, k, stride):
    return jax.lax.conv_general_dilated_patches(
        x_nhwc, (k, k), (stride, stride), "VALID",
        dimension_numbers=("NHWC", "HWIO", "NHWC"))


def _patch_perm(cin, k):
    """Empirically derive the patch-column ordering relative to PyTorch's
    (Cin, kh, kw) weight-flatten order (tiny one-time probe at init)."""
    idx = np.arange(cin * k * k, dtype=np.float32).reshape(cin, k, k)   # torch order
    probe = jnp.asarray(np.transpose(idx, (1, 2, 0))[None])             # (1,k,k,cin)
    out = _patches(probe, k, 1)                                         # (1,1,1,cin*k*k)
    perm = np.asarray(out, dtype=np.int64).reshape(-1)
    # Init-time guard: the probed ordering must be an exact permutation.
    if not np.array_equal(np.sort(perm), np.arange(cin * k * k, dtype=np.int64)):
        raise ValueError("conv_general_dilated_patches column ordering changed; "
                         "patch permutation probe is no longer a permutation.")
    return perm


def conv_block(x_nhwc, wmat, b, *, k, stride):
    """x_nhwc: (B,H,W,Cin) bf16; wmat: (Cin*k*k, Cout) bf16 (patch-order cols)."""
    B = x_nhwc.shape[0]
    p = _patches(x_nhwc, k, stride)                          # (B, oh, ow, Cin*k*k)
    _, oh, ow, K = p.shape
    y = linear_pallas(p.reshape(B * oh * ow, K), wmat, b,
                      relu=True, out_dtype=jnp.bfloat16)     # (B*oh*ow, Cout)
    return y.reshape(B, oh, ow, wmat.shape[1])               # stays channels-last


# ----------------------------------------------------------------------------
# Deterministic parameter init (mirrors layer_init: orthogonal weight, 0 bias)
# ----------------------------------------------------------------------------
def orthogonal_init(key, shape, gain):
    rows = shape[0]
    cols = int(np.prod(shape[1:]))
    n, m = (rows, cols) if rows >= cols else (cols, rows)
    a = jax.random.normal(key, (n, m), dtype=jnp.float32)
    q, r = jnp.linalg.qr(a)
    q = q * jnp.sign(jnp.diagonal(r))
    if rows < cols:
        q = q.T
    return (gain * q).reshape(shape).astype(jnp.float32)


def init_params(key, action_dim):
    ks = jax.random.split(key, 10)
    s2 = float(np.sqrt(2.0))
    z = lambda n: jnp.zeros((n,), jnp.float32)
    return {
        # PreprocessImage.base
        "conv1_w": orthogonal_init(ks[0], (32, 4, 8, 8), s2), "conv1_b": z(32),
        "conv2_w": orthogonal_init(ks[1], (64, 32, 4, 4), s2), "conv2_b": z(64),
        "conv3_w": orthogonal_init(ks[2], (64, 64, 3, 3), s2), "conv3_b": z(64),
        # image_in
        "fc1_w": orthogonal_init(ks[3], (256, 3136), s2), "fc1_b": z(256),
        "fc2_w": orthogonal_init(ks[4], (448, 256), s2), "fc2_b": z(448),
        # extra_layer (std=0.1)
        "extra_w": orthogonal_init(ks[5], (448, 448), 0.1), "extra_b": z(448),
        # actor_out (std=0.01)
        "actor1_w": orthogonal_init(ks[6], (448, 448), 0.01), "actor1_b": z(448),
        "actor2_w": orthogonal_init(ks[7], (action_dim, 448), 0.01),
        "actor2_b": z(action_dim),
        # critic heads (std=1)
        "cint_w": orthogonal_init(ks[8], (1, 448), 1.0), "cint_b": z(1),
        "cext_w": orthogonal_init(ks[9], (1, 448), 1.0), "cext_b": z(1),
    }


def prepare_params(params):
    """One-time re-layout of PyTorch-style params for the Pallas kernels:
    pre-transposed bf16 weight matrices, patch-order conv columns, NHWC-flatten
    fc1 columns, and a lane-dense zero-padded (448, 128) head weight pair
    (actor in cols [0:A], critic_int/critic_ext in cols [A], [A+1])."""
    bf16, f32 = jnp.bfloat16, jnp.float32
    row_bias = lambda b: b.reshape(1, -1).astype(f32)

    def conv_wmat(w):
        cout, cin, kh, _ = w.shape
        perm = _patch_perm(cin, kh)
        return w.reshape(cout, -1)[:, perm].T.astype(bf16)     # (Cin*k*k, Cout)

    # fc1 maps a NCHW (64,7,7) flatten; the conv stack emits a NHWC (7,7,64)
    # flatten, so permute the columns once here.
    fc1 = params["fc1_w"].reshape(256, 64, 7, 7).transpose(0, 2, 3, 1).reshape(256, 3136)

    A = params["actor2_w"].shape[0]
    head_n = ((A + 2 + 127) // 128) * 128          # lane-dense output width
    head_wa = jnp.zeros((448, head_n), f32).at[:, :A].set(params["actor2_w"].T)
    head_wc = (jnp.zeros((448, head_n), f32)
               .at[:, A:A + 1].set(params["cint_w"].T)
               .at[:, A + 1:A + 2].set(params["cext_w"].T))
    head_b = (jnp.zeros((1, head_n), f32)
              .at[0, :A].set(params["actor2_b"])
              .at[0, A].set(params["cint_b"][0])
              .at[0, A + 1].set(params["cext_b"][0]))

    return {
        "c1_w": conv_wmat(params["conv1_w"]), "c1_b": row_bias(params["conv1_b"]),
        "c2_w": conv_wmat(params["conv2_w"]), "c2_b": row_bias(params["conv2_b"]),
        "c3_w": conv_wmat(params["conv3_w"]), "c3_b": row_bias(params["conv3_b"]),
        "fc1_w": fc1.T.astype(bf16), "fc1_b": row_bias(params["fc1_b"]),
        "fc2_w": params["fc2_w"].T.astype(bf16), "fc2_b": row_bias(params["fc2_b"]),
        "extra_w": params["extra_w"].T.astype(bf16), "extra_b": row_bias(params["extra_b"]),
        "actor1_w": params["actor1_w"].T.astype(bf16), "actor1_b": row_bias(params["actor1_b"]),
        "head_wa": head_wa.astype(bf16),
        "head_wc": head_wc.astype(bf16),
        "head_b": head_b,                                        # f32 (1, head_n)
    }


# ----------------------------------------------------------------------------
# ActorCritic.forward
# ----------------------------------------------------------------------------
def actor_critic_forward(prep, x, *, action_dim):
    B = x.shape[0]
    # state.float() -> bf16 matmul operands; cast BEFORE the one-time
    # NCHW->NHWC layout change so the transpose moves half the bytes.
    h = jnp.transpose(x.astype(jnp.bfloat16), (0, 2, 3, 1))
    h = conv_block(h, prep["c1_w"], prep["c1_b"], k=8, stride=4)   # (B,20,20,32)
    h = conv_block(h, prep["c2_w"], prep["c2_b"], k=4, stride=2)   # (B, 9, 9,64)
    h = conv_block(h, prep["c3_w"], prep["c3_b"], k=3, stride=1)   # (B, 7, 7,64)
    flat = h.reshape(B, -1)                                        # (B, 3136) NHWC flatten
    head = mlp_head_pallas(flat, prep)                             # (B, 128) lane-dense
    actor = head[:, :action_dim]
    critic_int = head[:, action_dim:action_dim + 1]
    critic_ext = head[:, action_dim + 1:action_dim + 2]
    return actor, critic_int, critic_ext


# Pure-JAX f32 reference (exact PyTorch semantics) for the correctness check.
def reference_forward(params, x):
    def conv(x, w, b, stride):
        y = jax.lax.conv_general_dilated(
            x, w, (stride, stride), "VALID",
            dimension_numbers=("NCHW", "OIHW", "NCHW"))
        return jax.nn.relu(y + b.reshape(1, -1, 1, 1))
    x = x.astype(jnp.float32)
    h = conv(x, params["conv1_w"], params["conv1_b"], 4)
    h = conv(h, params["conv2_w"], params["conv2_b"], 2)
    h = conv(h, params["conv3_w"], params["conv3_b"], 1)
    flat = h.reshape(x.shape[0], -1)
    z = jax.nn.relu(flat @ params["fc1_w"].T + params["fc1_b"])
    z = jax.nn.relu(z @ params["fc2_w"].T + params["fc2_b"])
    extra = jax.nn.relu(z @ params["extra_w"].T + params["extra_b"])
    s = extra + z
    a1 = jax.nn.relu(z @ params["actor1_w"].T + params["actor1_b"])
    actor = a1 @ params["actor2_w"].T + params["actor2_b"]
    cint = s @ params["cint_w"].T + params["cint_b"]
    cext = s @ params["cext_w"].T + params["cext_b"]
    return actor, cint, cext


if __name__ == "__main__":
    action_dim = 6
    key = jax.random.PRNGKey(0)
    pkey, xkey = jax.random.split(key)
    params = init_params(pkey, action_dim)
    prep = prepare_params(params)      # one-time weight re-layout (bf16, pre-T, padded head)
    # 84x84 spatial is required by unpack_size == 3136 (= 64*7*7); batch=2, frames=4.
    x = jax.random.normal(xkey, (2, 4, 84, 84), dtype=jnp.float32)

    fwd = jax.jit(functools.partial(actor_critic_forward, action_dim=action_dim))
    actor, critic_int, critic_ext = jax.block_until_ready(fwd(prep, x))

    ref_a, ref_ci, ref_ce = jax.block_until_ready(reference_forward(params, x))
    assert actor.shape == (2, action_dim)
    assert critic_int.shape == (2, 1) and critic_ext.shape == (2, 1)
    # bf16 matmul operands with f32 accumulation -> slightly looser tolerance.
    np.testing.assert_allclose(np.asarray(actor), np.asarray(ref_a), rtol=2e-2, atol=2e-2)
    np.testing.assert_allclose(np.asarray(critic_int), np.asarray(ref_ci), rtol=2e-2, atol=2e-2)
    np.testing.assert_allclose(np.asarray(critic_ext), np.asarray(ref_ce), rtol=2e-2, atol=2e-2)

    print("KERNEL_OK")
</pallas_src>

<mosaic_0001>
module attributes {stable_mosaic.version = 11 : i64} {
  func.func @_linear_kernel(%arg0: i32, %arg1: memref<800x256xbf16, #tpu.memory_space<vmem>>, %arg2: memref<256x32xbf16, #tpu.memory_space<vmem>>, %arg3: memref<1x32xf32, #tpu.memory_space<vmem>>, %arg4: memref<800x32xbf16, #tpu.memory_space<vmem>>) attributes {dimension_semantics = [#tpu.dimension_semantics<parallel>], iteration_bounds = array<i64: 1>, scalar_prefetch = 0 : i64, scratch_operands = 0 : i64, tpu.core_type = #tpu.core_type<tc>, window_params = [{transform_indices = @transform_0, window_bounds = array<i64: 800, 256>}, {pipeline_mode = #tpu.pipeline_mode<synchronous>, transform_indices = @transform_1, window_bounds = array<i64: 256, 32>}, {pipeline_mode = #tpu.pipeline_mode<synchronous>, transform_indices = @transform_2, window_bounds = array<i64: 1, 32>}, {transform_indices = @transform_3, window_bounds = array<i64: 800, 32>}]} {
    %c0 = arith.constant 0 : index
    %c0_0 = arith.constant 0 : index
    %0 = vector.load %arg1[%c0, %c0_0] : memref<800x256xbf16, #tpu.memory_space<vmem>>, vector<800x256xbf16>
    %c0_1 = arith.constant 0 : index
    %c0_2 = arith.constant 0 : index
    %1 = vector.load %arg2[%c0_1, %c0_2] : memref<256x32xbf16, #tpu.memory_space<vmem>>, vector<256x32xbf16>
    %cst = arith.constant dense<0.000000e+00> : vector<800x32xf32>
    %2 = tpu.matmul %0, %1, %cst {dimension_numbers = #tpu.dot_dimension_numbers<[1], [0], [0], [1], [0, 0, 1, 1], [], []>} : vector<800x256xbf16>, vector<256x32xbf16>, vector<800x32xf32> -> vector<800x32xf32>
    %c0_3 = arith.constant 0 : index
    %c0_4 = arith.constant 0 : index
    %3 = vector.load %arg3[%c0_3, %c0_4] : memref<1x32xf32, #tpu.memory_space<vmem>>, vector<1x32xf32>
    %4 = vector.broadcast %3 : vector<1x32xf32> to vector<800x32xf32>
    %5 = arith.addf %2, %4 : vector<800x32xf32>
    %cst_5 = arith.constant 0.000000e+00 : f32
    %6 = vector.broadcast %cst_5 : f32 to vector<800x32xf32>
    %7 = arith.maximumf %5, %6 : vector<800x32xf32>
    %8 = arith.truncf %7 : vector<800x32xf32> to vector<800x32xbf16>
    %c0_6 = arith.constant 0 : index
    %c0_7 = arith.constant 0 : index
    %9 = vector.load %arg4[%c0_6, %c0_7] : memref<800x32xbf16, #tpu.memory_space<vmem>>, vector<800x32xbf16>
    tpu.vector_store %arg4[%c0_6, %c0_7], %8 {strides = array<i32>} : memref<800x32xbf16, #tpu.memory_space<vmem>>, vector<800x32xbf16>,
    return
  }
  func.func @transform_0(%arg0: i32) -> (i32, i32) {
    %c0_i32 = arith.constant 0 : i32
    %c0_i32_0 = arith.constant 0 : i32
    return %arg0, %c0_i32 : i32, i32
  }
  func.func @transform_1(%arg0: i32) -> (i32, i32) {
    %c0_i32 = arith.constant 0 : i32
    %c0_i32_0 = arith.constant 0 : i32
    %c0_i32_1 = arith.constant 0 : i32
    return %c0_i32, %c0_i32_0 : i32, i32
  }
  func.func @transform_2(%arg0: i32) -> (i32, i32) {
    %c0_i32 = arith.constant 0 : i32
    %c0_i32_0 = arith.constant 0 : i32
    %c0_i32_1 = arith.constant 0 : i32
    return %c0_i32, %c0_i32_0 : i32, i32
  }
  func.func @transform_3(%arg0: i32) -> (i32, i32) {
    %c0_i32 = arith.constant 0 : i32
    %c0_i32_0 = arith.constant 0 : i32
    return %arg0, %c0_i32 : i32, i32
  }
}

module attributes {stable_mosaic.version = 11 : i64} {
  func.func @_linear_kernel(%arg0: i32, %arg1: memref<162x512xbf16, #tpu.memory_space<vmem>>, %arg2: memref<512x64xbf16, #tpu.memory_space<vmem>>, %arg3: memref<1x64xf32, #tpu.memory_space<vmem>>, %arg4: memref<162x64xbf16, #tpu.memory_space<vmem>>) attributes {dimension_semantics = [#tpu.dimension_semantics<parallel>], iteration_bounds = array<i64: 1>, scalar_prefetch = 0 : i64, scratch_operands = 0 : i64, tpu.core_type = #tpu.core_type<tc>, window_params = [{transform_indices = @transform_0, window_bounds = array<i64: 162, 512>}, {pipeline_mode = #tpu.pipeline_mode<synchronous>, transform_indices = @transform_1, window_bounds = array<i64: 512, 64>}, {pipeline_mode = #tpu.pipeline_mode<synchronous>, transform_indices = @transform_2, window_bounds = array<i64: 1, 64>}, {transform_indices = @transform_3, window_bounds = array<i64: 162, 64>}]} {
    %c0 = arith.constant 0 : index
    %c0_0 = arith.constant 0 : index
    %0 = vector.load %arg1[%c0, %c0_0] : memref<162x512xbf16, #tpu.memory_space<vmem>>, vector<162x512xbf16>
    %c0_1 = arith.constant 0 : index
    %c0_2 = arith.constant 0 : index
    %1 = vector.load %arg2[%c0_1, %c0_2] : memref<512x64xbf16, #tpu.memory_space<vmem>>, vector<512x64xbf16>
    %cst = arith.constant dense<0.000000e+00> : vector<162x64xf32>
    %2 = tpu.matmul %0, %1, %cst {dimension_numbers = #tpu.dot_dimension_numbers<[1], [0], [0], [1], [0, 0, 1, 1], [], []>} : vector<162x512xbf16>, vector<512x64xbf16>, vector<162x64xf32> -> vector<162x64xf32>
    %c0_3 = arith.constant 0 : index
    %c0_4 = arith.constant 0 : index
    %3 = vector.load %arg3[%c0_3, %c0_4] : memref<1x64xf32, #tpu.memory_space<vmem>>, vector<1x64xf32>
    %4 = vector.broadcast %3 : vector<1x64xf32> to vector<162x64xf32>
    %5 = arith.addf %2, %4 : vector<162x64xf32>
    %cst_5 = arith.constant 0.000000e+00 : f32
    %6 = vector.broadcast %cst_5 : f32 to vector<162x64xf32>
    %7 = arith.maximumf %5, %6 : vector<162x64xf32>
    %8 = arith.truncf %7 : vector<162x64xf32> to vector<162x64xbf16>
    %c0_6 = arith.constant 0 : index
    %c0_7 = arith.constant 0 : index
    %9 = vector.load %arg4[%c0_6, %c0_7] : memref<162x64xbf16, #tpu.memory_space<vmem>>, vector<162x64xbf16>
    tpu.vector_store %arg4[%c0_6, %c0_7], %8 {strides = array<i32>} : memref<162x64xbf16, #tpu.memory_space<vmem>>, vector<162x64xbf16>,
    return
  }
  func.func @transform_0(%arg0: i32) -> (i32, i32) {
    %c0_i32 = arith.constant 0 : i32
    %c0_i32_0 = arith.constant 0 : i32
    return %arg0, %c0_i32 : i32, i32
  }
  func.func @transform_1(%arg0: i32) -> (i32, i32) {
    %c0_i32 = arith.constant 0 : i32
    %c0_i32_0 = arith.constant 0 : i32
    %c0_i32_1 = arith.constant 0 : i32
    return %c0_i32, %c0_i32_0 : i32, i32
  }
  func.func @transform_2(%arg0: i32) -> (i32, i32) {
    %c0_i32 = arith.constant 0 : i32
    %c0_i32_0 = arith.constant 0 : i32
    %c0_i32_1 = arith.constant 0 : i32
    return %c0_i32, %c0_i32_0 : i32, i32
  }
  func.func @transform_3(%arg0: i32) -> (i32, i32) {
    %c0_i32 = arith.constant 0 : i32
    %c0_i32_0 = arith.constant 0 : i32
    return %arg0, %c0_i32 : i32, i32
  }
}

module attributes {stable_mosaic.version = 11 : i64} {
  func.func @_linear_kernel(%arg0: i32, %arg1: memref<98x576xbf16, #tpu.memory_space<vmem>>, %arg2: memref<576x64xbf16, #tpu.memory_space<vmem>>, %arg3: memref<1x64xf32, #tpu.memory_space<vmem>>, %arg4: memref<98x64xbf16, #tpu.memory_space<vmem>>) attributes {dimension_semantics = [#tpu.dimension_semantics<parallel>], iteration_bounds = array<i64: 1>, scalar_prefetch = 0 : i64, scratch_operands = 0 : i64, tpu.core_type = #tpu.core_type<tc>, window_params = [{transform_indices = @transform_0, window_bounds = array<i64: 98, 576>}, {pipeline_mode = #tpu.pipeline_mode<synchronous>, transform_indices = @transform_1, window_bounds = array<i64: 576, 64>}, {pipeline_mode = #tpu.pipeline_mode<synchronous>, transform_indices = @transform_2, window_bounds = array<i64: 1, 64>}, {transform_indices = @transform_3, window_bounds = array<i64: 98, 64>}]} {
    %c0 = arith.constant 0 : index
    %c0_0 = arith.constant 0 : index
    %0 = vector.load %arg1[%c0, %c0_0] : memref<98x576xbf16, #tpu.memory_space<vmem>>, vector<98x576xbf16>
    %c0_1 = arith.constant 0 : index
    %c0_2 = arith.constant 0 : index
    %1 = vector.load %arg2[%c0_1, %c0_2] : memref<576x64xbf16, #tpu.memory_space<vmem>>, vector<576x64xbf16>
    %cst = arith.constant dense<0.000000e+00> : vector<98x64xf32>
    %2 = tpu.matmul %0, %1, %cst {dimension_numbers = #tpu.dot_dimension_numbers<[1], [0], [0], [1], [0, 0, 1, 1], [], []>} : vector<98x576xbf16>, vector<576x64xbf16>, vector<98x64xf32> -> vector<98x64xf32>
    %c0_3 = arith.constant 0 : index
    %c0_4 = arith.constant 0 : index
    %3 = vector.load %arg3[%c0_3, %c0_4] : memref<1x64xf32, #tpu.memory_space<vmem>>, vector<1x64xf32>
    %4 = vector.broadcast %3 : vector<1x64xf32> to vector<98x64xf32>
    %5 = arith.addf %2, %4 : vector<98x64xf32>
    %cst_5 = arith.constant 0.000000e+00 : f32
    %6 = vector.broadcast %cst_5 : f32 to vector<98x64xf32>
    %7 = arith.maximumf %5, %6 : vector<98x64xf32>
    %8 = arith.truncf %7 : vector<98x64xf32> to vector<98x64xbf16>
    %c0_6 = arith.constant 0 : index
    %c0_7 = arith.constant 0 : index
    %9 = vector.load %arg4[%c0_6, %c0_7] : memref<98x64xbf16, #tpu.memory_space<vmem>>, vector<98x64xbf16>
    tpu.vector_store %arg4[%c0_6, %c0_7], %8 {strides = array<i32>} : memref<98x64xbf16, #tpu.memory_space<vmem>>, vector<98x64xbf16>,
    return
  }
  func.func @transform_0(%arg0: i32) -> (i32, i32) {
    %c0_i32 = arith.constant 0 : i32
    %c0_i32_0 = arith.constant 0 : i32
    return %arg0, %c0_i32 : i32, i32
  }
  func.func @transform_1(%arg0: i32) -> (i32, i32) {
    %c0_i32 = arith.constant 0 : i32
    %c0_i32_0 = arith.constant 0 : i32
    %c0_i32_1 = arith.constant 0 : i32
    return %c0_i32, %c0_i32_0 : i32, i32
  }
  func.func @transform_2(%arg0: i32) -> (i32, i32) {
    %c0_i32 = arith.constant 0 : i32
    %c0_i32_0 = arith.constant 0 : i32
    %c0_i32_1 = arith.constant 0 : i32
    return %c0_i32, %c0_i32_0 : i32, i32
  }
  func.func @transform_3(%arg0: i32) -> (i32, i32) {
    %c0_i32 = arith.constant 0 : i32
    %c0_i32_0 = arith.constant 0 : i32
    return %arg0, %c0_i32 : i32, i32
  }
}

module attributes {stable_mosaic.version = 11 : i64} {
  func.func @_mlp_head_kernel(%arg0: i32, %arg1: memref<2x3136xbf16, #tpu.memory_space<vmem>>, %arg2: memref<3136x256xbf16, #tpu.memory_space<vmem>>, %arg3: memref<1x256xf32, #tpu.memory_space<vmem>>, %arg4: memref<256x448xbf16, #tpu.memory_space<vmem>>, %arg5: memref<1x448xf32, #tpu.memory_space<vmem>>, %arg6: memref<448x448xbf16, #tpu.memory_space<vmem>>, %arg7: memref<1x448xf32, #tpu.memory_space<vmem>>, %arg8: memref<448x448xbf16, #tpu.memory_space<vmem>>, %arg9: memref<1x448xf32, #tpu.memory_space<vmem>>, %arg10: memref<448x128xbf16, #tpu.memory_space<vmem>>, %arg11: memref<448x128xbf16, #tpu.memory_space<vmem>>, %arg12: memref<1x128xf32, #tpu.memory_space<vmem>>, %arg13: memref<2x128xf32, #tpu.memory_space<vmem>>) attributes {dimension_semantics = [#tpu.dimension_semantics<parallel>], iteration_bounds = array<i64: 1>, scalar_prefetch = 0 : i64, scratch_operands = 0 : i64, tpu.core_type = #tpu.core_type<tc>, window_params = [{transform_indices = @transform_0, window_bounds = array<i64: 2, 3136>}, {pipeline_mode = #tpu.pipeline_mode<synchronous>, transform_indices = @transform_1, window_bounds = array<i64: 3136, 256>}, {pipeline_mode = #tpu.pipeline_mode<synchronous>, transform_indices = @transform_2, window_bounds = array<i64: 1, 256>}, {pipeline_mode = #tpu.pipeline_mode<synchronous>, transform_indices = @transform_3, window_bounds = array<i64: 256, 448>}, {pipeline_mode = #tpu.pipeline_mode<synchronous>, transform_indices = @transform_4, window_bounds = array<i64: 1, 448>}, {pipeline_mode = #tpu.pipeline_mode<synchronous>, transform_indices = @transform_5, window_bounds = array<i64: 448, 448>}, {pipeline_mode = #tpu.pipeline_mode<synchronous>, transform_indices = @transform_6, window_bounds = array<i64: 1, 448>}, {pipeline_mode = #tpu.pipeline_mode<synchronous>, transform_indices = @transform_7, window_bounds = array<i64: 448, 448>}, {pipeline_mode = #tpu.pipeline_mode<synchronous>, transform_indices = @transform_8, window_bounds = array<i64: 1, 448>}, {pipeline_mode = #tpu.pipeline_mode<synchronous>, transform_indices = @transform_9, window_bounds = array<i64: 448, 128>}, {pipeline_mode = #tpu.pipeline_mode<synchronous>, transform_indices = @transform_10, window_bounds = array<i64: 448, 128>}, {pipeline_mode = #tpu.pipeline_mode<synchronous>, transform_indices = @transform_11, window_bounds = array<i64: 1, 128>}, {transform_indices = @transform_12, window_bounds = array<i64: 2, 128>}]} {
    %c0 = arith.constant 0 : index
    %c0_0 = arith.constant 0 : index
    %0 = vector.load %arg1[%c0, %c0_0] : memref<2x3136xbf16, #tpu.memory_space<vmem>>, vector<2x3136xbf16>
    %c0_1 = arith.constant 0 : index
    %c0_2 = arith.constant 0 : index
    %1 = vector.load %arg2[%c0_1, %c0_2] : memref<3136x256xbf16, #tpu.memory_space<vmem>>, vector<3136x256xbf16>
    %cst = arith.constant dense<0.000000e+00> : vector<2x256xf32>
    %2 = tpu.matmul %0, %1, %cst {dimension_numbers = #tpu.dot_dimension_numbers<[1], [0], [0], [1], [0, 0, 1, 1], [], []>} : vector<2x3136xbf16>, vector<3136x256xbf16>, vector<2x256xf32> -> vector<2x256xf32>
    %c0_3 = arith.constant 0 : index
    %c0_4 = arith.constant 0 : index
    %3 = vector.load %arg3[%c0_3, %c0_4] : memref<1x256xf32, #tpu.memory_space<vmem>>, vector<1x256xf32>
    %4 = vector.broadcast %3 : vector<1x256xf32> to vector<2x256xf32>
    %5 = arith.addf %2, %4 : vector<2x256xf32>
    %cst_5 = arith.constant 0.000000e+00 : f32
    %6 = vector.broadcast %cst_5 : f32 to vector<2x256xf32>
    %7 = arith.maximumf %5, %6 : vector<2x256xf32>
    %8 = arith.truncf %7 : vector<2x256xf32> to vector<2x256xbf16>
    %c0_6 = arith.constant 0 : index
    %c0_7 = arith.constant 0 : index
    %9 = vector.load %arg4[%c0_6, %c0_7] : memref<256x448xbf16, #tpu.memory_space<vmem>>, vector<256x448xbf16>
    %cst_8 = arith.constant dense<0.000000e+00> : vector<2x448xf32>
    %10 = tpu.matmul %8, %9, %cst_8 {dimension_numbers = #tpu.dot_dimension_numbers<[1], [0], [0], [1], [0, 0, 1, 1], [], []>} : vector<2x256xbf16>, vector<256x448xbf16>, vector<2x448xf32> -> vector<2x448xf32>
    %c0_9 = arith.constant 0 : index
    %c0_10 = arith.constant 0 : index
    %11 = vector.load %arg5[%c0_9, %c0_10] : memref<1x448xf32, #tpu.memory_space<vmem>>, vector<1x448xf32>
    %12 = vector.broadcast %11 : vector<1x448xf32> to vector<2x448xf32>
    %13 = arith.addf %10, %12 : vector<2x448xf32>
    %cst_11 = arith.constant 0.000000e+00 : f32
    %14 = vector.broadcast %cst_11 : f32 to vector<2x448xf32>
    %15 = arith.maximumf %13, %14 : vector<2x448xf32>
    %16 = arith.truncf %15 : vector<2x448xf32> to vector<2x448xbf16>
    %c0_12 = arith.constant 0 : index
    %c0_13 = arith.constant 0 : index
    %17 = vector.load %arg6[%c0_12, %c0_13] : memref<448x448xbf16, #tpu.memory_space<vmem>>, vector<448x448xbf16>
    %cst_14 = arith.constant dense<0.000000e+00> : vector<2x448xf32>
    %18 = tpu.matmul %16, %17, %cst_14 {dimension_numbers = #tpu.dot_dimension_numbers<[1], [0], [0], [1], [0, 0, 1, 1], [], []>} : vector<2x448xbf16>, vector<448x448xbf16>, vector<2x448xf32> -> vector<2x448xf32>
    %c0_15 = arith.constant 0 : index
    %c0_16 = arith.constant 0 : index
    %19 = vector.load %arg7[%c0_15, %c0_16] : memref<1x448xf32, #tpu.memory_space<vmem>>, vector<1x448xf32>
    %20 = vector.broadcast %19 : vector<1x448xf32> to vector<2x448xf32>
    %21 = arith.addf %18, %20 : vector<2x448xf32>
    %cst_17 = arith.constant 0.000000e+00 : f32
    %22 = vector.broadcast %cst_17 : f32 to vector<2x448xf32>
    %23 = arith.maximumf %21, %22 : vector<2x448xf32>
    %24 = arith.addf %23, %15 : vector<2x448xf32>
    %25 = arith.truncf %24 : vector<2x448xf32> to vector<2x448xbf16>
    %c0_18 = arith.constant 0 : index
    %c0_19 = arith.constant 0 : index
    %26 = vector.load %arg8[%c0_18, %c0_19] : memref<448x448xbf16, #tpu.memory_space<vmem>>, vector<448x448xbf16>
    %cst_20 = arith.constant dense<0.000000e+00> : vector<2x448xf32>
    %27 = tpu.matmul %16, %26, %cst_20 {dimension_numbers = #tpu.dot_dimension_numbers<[1], [0], [0], [1], [0, 0, 1, 1], [], []>} : vector<2x448xbf16>, vector<448x448xbf16>, vector<2x448xf32> -> vector<2x448xf32>
    %c0_21 = arith.constant 0 : index
    %c0_22 = arith.constant 0 : index
    %28 = vector.load %arg9[%c0_21, %c0_22] : memref<1x448xf32, #tpu.memory_space<vmem>>, vector<1x448xf32>
    %29 = vector.broadcast %28 : vector<1x448xf32> to vector<2x448xf32>
    %30 = arith.addf %27, %29 : vector<2x448xf32>
    %cst_23 = arith.constant 0.000000e+00 : f32
    %31 = vector.broadcast %cst_23 : f32 to vector<2x448xf32>
    %32 = arith.maximumf %30, %31 : vector<2x448xf32>
    %33 = arith.truncf %32 : vector<2x448xf32> to vector<2x448xbf16>
    %c0_24 = arith.constant 0 : index
    %c0_25 = arith.constant 0 : index
    %34 = vector.load %arg10[%c0_24, %c0_25] : memref<448x128xbf16, #tpu.memory_space<vmem>>, vector<448x128xbf16>
    %cst_26 = arith.constant dense<0.000000e+00> : vector<2x128xf32>
    %35 = tpu.matmul %33, %34, %cst_26 {dimension_numbers = #tpu.dot_dimension_numbers<[1], [0], [0], [1], [0, 0, 1, 1], [], []>} : vector<2x448xbf16>, vector<448x128xbf16>, vector<2x128xf32> -> vector<2x128xf32>
    %c0_27 = arith.constant 0 : index
    %c0_28 = arith.constant 0 : index
    %36 = vector.load %arg11[%c0_27, %c0_28] : memref<448x128xbf16, #tpu.memory_space<vmem>>, vector<448x128xbf16>
    %cst_29 = arith.constant dense<0.000000e+00> : vector<2x128xf32>
    %37 = tpu.matmul %25, %36, %cst_29 {dimension_numbers = #tpu.dot_dimension_numbers<[1], [0], [0], [1], [0, 0, 1, 1], [], []>} : vector<2x448xbf16>, vector<448x128xbf16>, vector<2x128xf32> -> vector<2x128xf32>
    %38 = arith.addf %35, %37 : vector<2x128xf32>
    %c0_30 = arith.constant 0 : index
    %c0_31 = arith.constant 0 : index
    %39 = vector.load %arg12[%c0_30, %c0_31] : memref<1x128xf32, #tpu.memory_space<vmem>>, vector<1x128xf32>
    %40 = vector.broadcast %39 : vector<1x128xf32> to vector<2x128xf32>
    %41 = arith.addf %38, %40 : vector<2x128xf32>
    %c0_32 = arith.constant 0 : index
    %c0_33 = arith.constant 0 : index
    %42 = vector.load %arg13[%c0_32, %c0_33] : memref<2x128xf32, #tpu.memory_space<vmem>>, vector<2x128xf32>
    tpu.vector_store %arg13[%c0_32, %c0_33], %41 {strides = array<i32>} : memref<2x128xf32, #tpu.memory_space<vmem>>, vector<2x128xf32>,
    return
  }
  func.func @transform_0(%arg0: i32) -> (i32, i32) {
    %c0_i32 = arith.constant 0 : i32
    %c0_i32_0 = arith.constant 0 : i32
    return %arg0, %c0_i32 : i32, i32
  }
  func.func @transform_1(%arg0: i32) -> (i32, i32) {
    %c0_i32 = arith.constant 0 : i32
    %c0_i32_0 = arith.constant 0 : i32
    %c0_i32_1 = arith.constant 0 : i32
    return %c0_i32, %c0_i32_0 : i32, i32
  }
  func.func @transform_2(%arg0: i32) -> (i32, i32) {
    %c0_i32 = arith.constant 0 : i32
    %c0_i32_0 = arith.constant 0 : i32
    %c0_i32_1 = arith.constant 0 : i32
    return %c0_i32, %c0_i32_0 : i32, i32
  }
  func.func @transform_3(%arg0: i32) -> (i32, i32) {
    %c0_i32 = arith.constant 0 : i32
    %c0_i32_0 = arith.constant 0 : i32
    %c0_i32_1 = arith.constant 0 : i32
    return %c0_i32, %c0_i32_0 : i32, i32
  }
  func.func @transform_4(%arg0: i32) -> (i32, i32) {
    %c0_i32 = arith.constant 0 : i32
    %c0_i32_0 = arith.constant 0 : i32
    %c0_i32_1 = arith.constant 0 : i32
    return %c0_i32, %c0_i32_0 : i32, i32
  }
  func.func @transform_5(%arg0: i32) -> (i32, i32) {
    %c0_i32 = arith.constant 0 : i32
    %c0_i32_0 = arith.constant 0 : i32
    %c0_i32_1 = arith.constant 0 : i32
    return %c0_i32, %c0_i32_0 : i32, i32
  }
  func.func @transform_6(%arg0: i32) -> (i32, i32) {
    %c0_i32 = arith.constant 0 : i32
    %c0_i32_0 = arith.constant 0 : i32
    %c0_i32_1 = arith.constant 0 : i32
    return %c0_i32, %c0_i32_0 : i32, i32
  }
  func.func @transform_7(%arg0: i32) -> (i32, i32) {
    %c0_i32 = arith.constant 0 : i32
    %c0_i32_0 = arith.constant 0 : i32
    %c0_i32_1 = arith.constant 0 : i32
    return %c0_i32, %c0_i32_0 : i32, i32
  }
  func.func @transform_8(%arg0: i32) -> (i32, i32) {
    %c0_i32 = arith.constant 0 : i32
    %c0_i32_0 = arith.constant 0 : i32
    %c0_i32_1 = arith.constant 0 : i32
    return %c0_i32, %c0_i32_0 : i32, i32
  }
  func.func @transform_9(%arg0: i32) -> (i32, i32) {
    %c0_i32 = arith.constant 0 : i32
    %c0_i32_0 = arith.constant 0 : i32
    %c0_i32_1 = arith.constant 0 : i32
    return %c0_i32, %c0_i32_0 : i32, i32
  }
  func.func @transform_10(%arg0: i32) -> (i32, i32) {
    %c0_i32 = arith.constant 0 : i32
    %c0_i32_0 = arith.constant 0 : i32
    %c0_i32_1 = arith.constant 0 : i32
    return %c0_i32, %c0_i32_0 : i32, i32
  }
  func.func @transform_11(%arg0: i32) -> (i32, i32) {
    %c0_i32 = arith.constant 0 : i32
    %c0_i32_0 = arith.constant 0 : i32
    %c0_i32_1 = arith.constant 0 : i32
    return %c0_i32, %c0_i32_0 : i32, i32
  }
  func.func @transform_12(%arg0: i32) -> (i32, i32) {
    %c0_i32 = arith.constant 0 : i32
    %c0_i32_0 = arith.constant 0 : i32
    return %arg0, %c0_i32 : i32, i32
  }
}

</mosaic_0001>

<bundles_post_ra>
// kernel: actor_critic_forward.4
= control target key start
LH: loop header
LB: loop body
LE: loop exit
PB: predicated region body
PF: predicated region fallthrough
CT: control target
= control target key end

     0   :  { %v2303_v0 = vmov 0   ;;  %vm1683_vm0 = vcmask 257024   ;;  %s3220_s1 = inlined_call_operand.vmem [shape: bf16[256,32], index: 1, kind: input, shape index: {}]   ;;  %s3221_s0 = inlined_call_operand.vmem [shape: bf16[800,256], index: 0, kind: input, shape index: {}]   ;;  %s3222_s2 = inlined_call_operand.vmem [shape: f32[1,32], index: 2, kind: input, shape index: {}]   ;;  %s3223_s3 = inlined_call_operand.vmem [shape: bf16[800,32], index: 3, kind: output, shape index: {}]  }
   0x1   :  { %750 = vmatprep.subr.bf16.mxu0 %v2303_v0  ;;  %2105 = vmatprep.subr.bf16.mxu1 %v2303_v0  ;;  %v2138_v1 = vld [vmem:[%s3220_s1 + $0x38] sm:$0xff]   ;;  %v2139_v2 = vld [vmem:[%s3220_s1 + $0x30] sm:$0xff]   ;;  %v2140_v3 = vld [vmem:[%s3220_s1 + $0x28] sm:$0xff]  }
   0x2   :  { %751 = vmatpush1.bf16.msra.mxu0 %v2138_v1  ;;  %2121 = vmatpush1.bf16.msra.mxu1 %v2138_v1  ;;  %v2141_v4 = vld [vmem:[%s3220_s1 + $0x20] sm:$0xff]   ;;  %v2142_v5 = vld [vmem:[%s3220_s1 + $0x18] sm:$0xff]   ;;  %v2143_v7 = vld [vmem:[%s3220_s1 + $0x10] sm:$0xff]  }
   0x3   :  { %752 = vmatprep.subr.bf16.mxu0 %v2303_v0  ;;  %2106 = vmatprep.subr.bf16.mxu1 %v2303_v0  ;;  %v2156_v6 = vld [vmem:[%s3221_s0 + $0x4] ss:$8 sps:$4 sm:$0xff]   ;;  %v2159_v8 = vld [vmem:[%s3221_s0 + $0x194] ss:$8 sps:$4 sm:$0xff]   ;;  %v2154_v19 = vld [vmem:[%s3221_s0] ss:$8 sps:$4 sm:$0xff]  }
   0x4   :  { %782 = vmatprep.mubr.bf16.mxu0 %v2156_v6  ;;  %982 = vmatprep.mubr.bf16.mxu1 %v2159_v8  ;;  %v2144_v9 = vld [vmem:[%s3220_s1 + $0x8] sm:$0xff]   ;;  %v2145_v10 = vld [vmem:[%s3220_s1] sm:$0xff]   ;;  %v2146_v11 = vld [vmem:[%s3220_s1 + $0x78] sm:$0xff]  }
   0x5   :  { %v2147_v12 = vld [vmem:[%s3220_s1 + $0x70] sm:$0xff]   ;;  %v2148_v13 = vld [vmem:[%s3220_s1 + $0x68] sm:$0xff]   ;;  %v2149_v14 = vld [vmem:[%s3220_s1 + $0x60] sm:$0xff]  }
   0x6   :  { %753 = vmatpush1.bf16.msra.mxu0 %v2139_v2  ;;  %2122 = vmatpush1.bf16.msra.mxu1 %v2139_v2  ;;  %v2150_v15 = vld [vmem:[%s3220_s1 + $0x58] sm:$0xff]   ;;  %v2151_v16 = vld [vmem:[%s3220_s1 + $0x50] sm:$0xff]   ;;  %v2152_v17 = vld [vmem:[%s3220_s1 + $0x48] sm:$0xff]  }
   0x7   :  { %754 = vmatprep.subr.bf16.mxu0 %v2303_v0  ;;  %2107 = vmatprep.subr.bf16.mxu1 %v2303_v0  ;;  %v2153_v18 = vld [vmem:[%s3220_s1 + $0x40] sm:$0xff]   ;;  %v2157_v20 = vld [vmem:[%s3221_s0 + $0x190] ss:$8 sps:$4 sm:$0xff]   ;;  %v2160_v21 = vld [vmem:[%s3221_s0 + $0x14] ss:$8 sps:$4 sm:$0xff]  }
   0x8   :  { %v2162_v22 = vld [vmem:[%s3221_s0 + $0x1a4] ss:$8 sps:$4 sm:$0xff]   ;;  %v2164_v23 = vld [vmem:[%s3221_s0 + $0x10] ss:$8 sps:$4 sm:$0xff]   ;;  %v2165_v24 = vld [vmem:[%s3221_s0 + $0x1a0] ss:$8 sps:$4 sm:$0xff]  }
   0x9   :  { %v2166_v25 = vld [vmem:[%s3221_s0 + $0x24] ss:$8 sps:$4 sm:$0xff]   ;;  %v2168_v26 = vld [vmem:[%s3221_s0 + $0x1b4] ss:$8 sps:$4 sm:$0xff]   ;;  %v2170_v27 = vld [vmem:[%s3221_s0 + $0x20] ss:$8 sps:$4 sm:$0xff]  }
   0xa   :  { %755 = vmatpush1.bf16.msra.mxu0 %v2140_v3  ;;  %2123 = vmatpush1.bf16.msra.mxu1 %v2140_v3  ;;  %v2171_v28 = vld [vmem:[%s3221_s0 + $0x1b0] ss:$8 sps:$4 sm:$0xff]   ;;  %v2172_v29 = vld [vmem:[%s3221_s0 + $0x34] ss:$8 sps:$4 sm:$0xff]   ;;  %v2174_v30 = vld [vmem:[%s3221_s0 + $0x1c4] ss:$8 sps:$4 sm:$0xff]  }
   0xb   :  { %756 = vmatprep.subr.bf16.mxu0 %v2303_v0  ;;  %2108 = vmatprep.subr.bf16.mxu1 %v2303_v0  ;;  %v2176_v31 = vld [vmem:[%s3221_s0 + $0x30] ss:$8 sps:$4 sm:$0xff]   ;;  %v2177_v32 = vld [vmem:[%s3221_s0 + $0x1c0] ss:$8 sps:$4 sm:$0xff]   ;;  %v2178_v33 = vld [vmem:[%s3221_s0 + $0x44] ss:$8 sps:$4 sm:$0xff]  }
   0xc   :  { %v2180_v34 = vld [vmem:[%s3221_s0 + $0x1d4] ss:$8 sps:$4 sm:$0xff]   ;;  %v2182_v35 = vld [vmem:[%s3221_s0 + $0x40] ss:$8 sps:$4 sm:$0xff]   ;;  %v2183_v36 = vld [vmem:[%s3221_s0 + $0x1d0] ss:$8 sps:$4 sm:$0xff]  }
   0xd   :  { %v2184_v37 = vld [vmem:[%s3221_s0 + $0x54] ss:$8 sps:$4 sm:$0xff]   ;;  %v2186_v38 = vld [vmem:[%s3221_s0 + $0x1e4] ss:$8 sps:$4 sm:$0xff]   ;;  %v2188_v39 = vld [vmem:[%s3221_s0 + $0x50] ss:$8 sps:$4 sm:$0xff]  }
   0xe   :  { %757 = vmatpush1.bf16.msra.mxu0 %v2141_v4  ;;  %2124 = vmatpush1.bf16.msra.mxu1 %v2141_v4  ;;  %v2189_v40 = vld [vmem:[%s3221_s0 + $0x1e0] ss:$8 sps:$4 sm:$0xff]   ;;  %v2190_v41 = vld [vmem:[%s3221_s0 + $0x64] ss:$8 sps:$4 sm:$0xff]   ;;  %v2192_v42 = vld [vmem:[%s3221_s0 + $0x1f4] ss:$8 sps:$4 sm:$0xff]  }
   0xf   :  { %758 = vmatprep.subr.bf16.mxu0 %v2303_v0  ;;  %2109 = vmatprep.subr.bf16.mxu1 %v2303_v0  ;;  %v2194_v43 = vld [vmem:[%s3221_s0 + $0x60] ss:$8 sps:$4 sm:$0xff]   ;;  %v2195_v44 = vld [vmem:[%s3221_s0 + $0x1f0] ss:$8 sps:$4 sm:$0xff]   ;;  %v2196_v45 = vld [vmem:[%s3221_s0 + $0x74] ss:$8 sps:$4 sm:$0xff]  }
  0x10   :  { %v2198_v46 = vld [vmem:[%s3221_s0 + $0x204] ss:$8 sps:$4 sm:$0xff]   ;;  %v2200_v47 = vld [vmem:[%s3221_s0 + $0x70] ss:$8 sps:$4 sm:$0xff]   ;;  %v2201_v48 = vld [vmem:[%s3221_s0 + $0x200] ss:$8 sps:$4 sm:$0xff]  }
  0x11   :  { %v2202_v49 = vld [vmem:[%s3221_s0 + $0x84] ss:$8 sps:$4 sm:$0xff]   ;;  %v2204_v50 = vld [vmem:[%s3221_s0 + $0x214] ss:$8 sps:$4 sm:$0xff]   ;;  %v2206_v51 = vld [vmem:[%s3221_s0 + $0x80] ss:$8 sps:$4 sm:$0xff]  }
  0x12   :  { %759 = vmatpush1.bf16.msra.mxu0 %v2142_v5  ;;  %2125 = vmatpush1.bf16.msra.mxu1 %v2142_v5  ;;  %v2207_v52 = vld [vmem:[%s3221_s0 + $0x210] ss:$8 sps:$4 sm:$0xff]   ;;  %v2208_v53 = vld [vmem:[%s3221_s0 + $0x94] ss:$8 sps:$4 sm:$0xff]   ;;  %v2210_v54 = vld [vmem:[%s3221_s0 + $0x224] ss:$8 sps:$4 sm:$0xff]  }
  0x13   :  { %760 = vmatprep.subr.bf16.mxu0 %v2303_v0  ;;  %2110 = vmatprep.subr.bf16.mxu1 %v2303_v0  ;;  %v2212_v55 = vld [vmem:[%s3221_s0 + $0x90] ss:$8 sps:$4 sm:$0xff]   ;;  %v2213_v56 = vld [vmem:[%s3221_s0 + $0x220] ss:$8 sps:$4 sm:$0xff]   ;;  %v2214_v57 = vld [vmem:[%s3221_s0 + $0xa4] ss:$8 sps:$4 sm:$0xff]  }
  0x14   :  { %v2216_v58 = vld [vmem:[%s3221_s0 + $0x234] ss:$8 sps:$4 sm:$0xff]   ;;  %v2218_v59 = vld [vmem:[%s3221_s0 + $0xa0] ss:$8 sps:$4 sm:$0xff]   ;;  %v2219_v60 = vld [vmem:[%s3221_s0 + $0x230] ss:$8 sps:$4 sm:$0xff]  }
  0x15   :  { %v2220_v61 = vld [vmem:[%s3221_s0 + $0xb4] ss:$8 sps:$4 sm:$0xff]   ;;  %v2222_v62 = vld [vmem:[%s3221_s0 + $0x244] ss:$8 sps:$4 sm:$0xff]   ;;  %v2224_v63 = vld [vmem:[%s3221_s0 + $0xb0] ss:$8 sps:$4 sm:$0xff]  }
  0x16   :  { %761 = vmatpush1.bf16.msra.mxu0 %v2143_v7  ;;  %2126 = vmatpush1.bf16.msra.mxu1 %v2143_v7  ;;  %v2226_v1 = vld [vmem:[%s3221_s0 + $0xc4] ss:$8 sps:$4 sm:$0xff]   ;;  %v2228_v2 = vld [vmem:[%s3221_s0 + $0x254] ss:$8 sps:$4 sm:$0xff]   ;;  %v2230_v3 = vld [vmem:[%s3221_s0 + $0xc0] ss:$8 sps:$4 sm:$0xff]  }
  0x17   :  { %762 = vmatprep.subr.bf16.mxu0 %v2303_v0  ;;  %2111 = vmatprep.subr.bf16.mxu1 %v2303_v0  ;;  %v2231_v4 = vld [vmem:[%s3221_s0 + $0x250] ss:$8 sps:$4 sm:$0xff]   ;;  %v2232_v5 = vld [vmem:[%s3221_s0 + $0xd4] ss:$8 sps:$4 sm:$0xff]   ;;  %v2234_v6 = vld [vmem:[%s3221_s0 + $0x264] ss:$8 sps:$4 sm:$0xff]  }
  0x18   :  { %v2236_v7 = vld [vmem:[%s3221_s0 + $0xd0] ss:$8 sps:$4 sm:$0xff]   ;;  %v2237_v8 = vld [vmem:[%s3221_s0 + $0x260] ss:$8 sps:$4 sm:$0xff]  }
  0x1a   :  { %763 = vmatpush1.bf16.msra.mxu0 %v2144_v9  ;;  %2127 = vmatpush1.bf16.msra.mxu1 %v2144_v9  ;;  %v2238_v9 = vld [vmem:[%s3221_s0 + $0xe4] ss:$8 sps:$4 sm:$0xff]  }
  0x1b   :  { %764 = vmatprep.subr.bf16.mxu0 %v2303_v0  ;;  %2112 = vmatprep.subr.bf16.mxu1 %v2303_v0 }
  0x1e   :  { %765 = vmatpush1.bf16.msra.mxu0 %v2145_v10  ;;  %2128 = vmatpush1.bf16.msra.mxu1 %v2145_v10  ;;  %v2240_v10 = vld [vmem:[%s3221_s0 + $0x274] ss:$8 sps:$4 sm:$0xff]  }
  0x1f   :  { %766 = vmatprep.subr.bf16.mxu0 %v2303_v0  ;;  %2113 = vmatprep.subr.bf16.mxu1 %v2303_v0 }
  0x22   :  { %767 = vmatpush2.bf16.msra.mxu0 %v2146_v11  ;;  %2129 = vmatpush2.bf16.msra.mxu1 %v2146_v11  ;;  %v2242_v11 = vld [vmem:[%s3221_s0 + $0xe0] ss:$8 sps:$4 sm:$0xff]  }
  0x23   :  { %768 = vmatprep.subr.bf16.mxu0 %v2303_v0  ;;  %2114 = vmatprep.subr.bf16.mxu1 %v2303_v0 }
  0x26   :  { %769 = vmatpush2.bf16.msra.mxu0 %v2147_v12  ;;  %2130 = vmatpush2.bf16.msra.mxu1 %v2147_v12  ;;  %v2243_v12 = vld [vmem:[%s3221_s0 + $0x270] ss:$8 sps:$4 sm:$0xff]  }
  0x27   :  { %770 = vmatprep.subr.bf16.mxu0 %v2303_v0  ;;  %2115 = vmatprep.subr.bf16.mxu1 %v2303_v0 }
  0x2a   :  { %771 = vmatpush2.bf16.msra.mxu0 %v2148_v13  ;;  %2131 = vmatpush2.bf16.msra.mxu1 %v2148_v13  ;;  %v2244_v13 = vld [vmem:[%s3221_s0 + $0xf4] ss:$8 sps:$4 sm:$0xff]  }
  0x2b   :  { %772 = vmatprep.subr.bf16.mxu0 %v2303_v0  ;;  %2116 = vmatprep.subr.bf16.mxu1 %v2303_v0 }
  0x2e   :  { %773 = vmatpush2.bf16.msra.mxu0 %v2149_v14  ;;  %2132 = vmatpush2.bf16.msra.mxu1 %v2149_v14  ;;  %v2246_v14 = vld [vmem:[%s3221_s0 + $0x284] ss:$8 sps:$4 sm:$0xff]  }
  0x2f   :  { %774 = vmatprep.subr.bf16.mxu0 %v2303_v0  ;;  %2117 = vmatprep.subr.bf16.mxu1 %v2303_v0 }
  0x32   :  { %775 = vmatpush2.bf16.msra.mxu0 %v2150_v15  ;;  %2133 = vmatpush2.bf16.msra.mxu1 %v2150_v15  ;;  %v2248_v15 = vld [vmem:[%s3221_s0 + $0xf0] ss:$8 sps:$4 sm:$0xff]  }
  0x33   :  { %776 = vmatprep.subr.bf16.mxu0 %v2303_v0  ;;  %2118 = vmatprep.subr.bf16.mxu1 %v2303_v0 }
  0x36   :  { %777 = vmatpush2.bf16.msra.mxu0 %v2151_v16  ;;  %2134 = vmatpush2.bf16.msra.mxu1 %v2151_v16  ;;  %v2249_v16 = vld [vmem:[%s3221_s0 + $0x280] ss:$8 sps:$4 sm:$0xff]  }
  0x37   :  { %778 = vmatprep.subr.bf16.mxu0 %v2303_v0  ;;  %2119 = vmatprep.subr.bf16.mxu1 %v2303_v0 }
  0x3a   :  { %779 = vmatpush2.bf16.msra.mxu0 %v2152_v17  ;;  %2135 = vmatpush2.bf16.msra.mxu1 %v2152_v17  ;;  %v2250_v17 = vld [vmem:[%s3221_s0 + $0x104] ss:$8 sps:$4 sm:$0xff]  }
  0x3b   :  { %780 = vmatprep.subr.bf16.mxu0 %v2303_v0  ;;  %2120 = vmatprep.subr.bf16.mxu1 %v2303_v0  ;;  %v2225_v0 = vld [vmem:[%s3221_s0 + $0x240] ss:$8 sps:$4 sm:$0xff]  }
  0x3e   :  { %781 = vmatpush2.bf16.msra.mxu0 %v2153_v18  ;;  %2136 = vmatpush2.bf16.msra.mxu1 %v2153_v18  ;;  %v2252_v18 = vld [vmem:[%s3221_s0 + $0x294] ss:$8 sps:$4 sm:$0xff]  }
  0x41   :  { %783 = vmatmul.mubr.bf16.vlgmr.msra.gmra.mxu0 %v2154_v19  ;;  %983 = vmatmul.mubr.bf16.vlgmr.msra.gmra.mxu1 %v2157_v20  ;;  %v2254_v19 = vld [vmem:[%s3221_s0 + $0x100] ss:$8 sps:$4 sm:$0xff]   ;;  %v2255_v20 = vld [vmem:[%s3221_s0 + $0x290] ss:$8 sps:$4 sm:$0xff]  }
  0x42   :  { %790 = vmatprep.mubr.bf16.mxu0 %v2160_v21  ;;  %990 = vmatprep.mubr.bf16.mxu1 %v2162_v22  ;;  %v2256_v21 = vld [vmem:[%s3221_s0 + $0x114] ss:$8 sps:$4 sm:$0xff]   ;;  %v2258_v22 = vld [vmem:[%s3221_s0 + $0x2a4] ss:$8 sps:$4 sm:$0xff]  }
  0x49   :  { %791 = vmatmul.mubr.bf16.gmra.mxu0 %v2164_v23  ;;  %991 = vmatmul.mubr.bf16.gmra.mxu1 %v2165_v24  ;;  %v2260_v23 = vld [vmem:[%s3221_s0 + $0x110] ss:$8 sps:$4 sm:$0xff]   ;;  %v2261_v24 = vld [vmem:[%s3221_s0 + $0x2a0] ss:$8 sps:$4 sm:$0xff]  }
  0x4a   :  { %798 = vmatprep.mubr.bf16.mxu0 %v2166_v25  ;;  %998 = vmatprep.mubr.bf16.mxu1 %v2168_v26  ;;  %v2262_v25 = vld [vmem:[%s3221_s0 + $0x124] ss:$8 sps:$4 sm:$0xff]   ;;  %v2264_v26 = vld [vmem:[%s3221_s0 + $0x2b4] ss:$8 sps:$4 sm:$0xff]  }
  0x51   :  { %799 = vmatmul.mubr.bf16.gmra.mxu0 %v2170_v27  ;;  %999 = vmatmul.mubr.bf16.gmra.mxu1 %v2171_v28  ;;  %v2266_v27 = vld [vmem:[%s3221_s0 + $0x120] ss:$8 sps:$4 sm:$0xff]   ;;  %v2267_v28 = vld [vmem:[%s3221_s0 + $0x2b0] ss:$8 sps:$4 sm:$0xff]  }
  0x52   :  { %806 = vmatprep.mubr.bf16.mxu0 %v2172_v29  ;;  %1006 = vmatprep.mubr.bf16.mxu1 %v2174_v30  ;;  %v2268_v29 = vld [vmem:[%s3221_s0 + $0x134] ss:$8 sps:$4 sm:$0xff]   ;;  %v2270_v30 = vld [vmem:[%s3221_s0 + $0x2c4] ss:$8 sps:$4 sm:$0xff]  }
  0x59   :  { %807 = vmatmul.mubr.bf16.gmra.mxu0 %v2176_v31  ;;  %1007 = vmatmul.mubr.bf16.gmra.mxu1 %v2177_v32  ;;  %v2272_v31 = vld [vmem:[%s3221_s0 + $0x130] ss:$8 sps:$4 sm:$0xff]   ;;  %v2273_v32 = vld [vmem:[%s3221_s0 + $0x2c0] ss:$8 sps:$4 sm:$0xff]  }
  0x5a   :  { %814 = vmatprep.mubr.bf16.mxu0 %v2178_v33  ;;  %1014 = vmatprep.mubr.bf16.mxu1 %v2180_v34  ;;  %v2274_v33 = vld [vmem:[%s3221_s0 + $0x144] ss:$8 sps:$4 sm:$0xff]   ;;  %v2276_v34 = vld [vmem:[%s3221_s0 + $0x2d4] ss:$8 sps:$4 sm:$0xff]  }
  0x61   :  { %815 = vmatmul.mubr.bf16.gmra.mxu0 %v2182_v35  ;;  %1015 = vmatmul.mubr.bf16.gmra.mxu1 %v2183_v36  ;;  %v2278_v35 = vld [vmem:[%s3221_s0 + $0x140] ss:$8 sps:$4 sm:$0xff]   ;;  %v2279_v36 = vld [vmem:[%s3221_s0 + $0x2d0] ss:$8 sps:$4 sm:$0xff]  }
  0x62   :  { %822 = vmatprep.mubr.bf16.mxu0 %v2184_v37  ;;  %1022 = vmatprep.mubr.bf16.mxu1 %v2186_v38  ;;  %v2280_v37 = vld [vmem:[%s3221_s0 + $0x154] ss:$8 sps:$4 sm:$0xff]   ;;  %v2282_v38 = vld [vmem:[%s3221_s0 + $0x2e4] ss:$8 sps:$4 sm:$0xff]  }
  0x69   :  { %823 = vmatmul.mubr.bf16.gmra.mxu0 %v2188_v39  ;;  %1023 = vmatmul.mubr.bf16.gmra.mxu1 %v2189_v40  ;;  %v2284_v39 = vld [vmem:[%s3221_s0 + $0x150] ss:$8 sps:$4 sm:$0xff]   ;;  %v2285_v40 = vld [vmem:[%s3221_s0 + $0x2e0] ss:$8 sps:$4 sm:$0xff]  }
  0x6a   :  { %830 = vmatprep.mubr.bf16.mxu0 %v2190_v41  ;;  %1030 = vmatprep.mubr.bf16.mxu1 %v2192_v42  ;;  %v2286_v41 = vld [vmem:[%s3221_s0 + $0x164] ss:$8 sps:$4 sm:$0xff]   ;;  %v2288_v42 = vld [vmem:[%s3221_s0 + $0x2f4] ss:$8 sps:$4 sm:$0xff]  }
  0x71   :  { %831 = vmatmul.mubr.bf16.gmra.mxu0 %v2194_v43  ;;  %1031 = vmatmul.mubr.bf16.gmra.mxu1 %v2195_v44  ;;  %v2290_v43 = vld [vmem:[%s3221_s0 + $0x160] ss:$8 sps:$4 sm:$0xff]   ;;  %v2291_v44 = vld [vmem:[%s3221_s0 + $0x2f0] ss:$8 sps:$4 sm:$0xff]  }
  0x72   :  { %838 = vmatprep.mubr.bf16.mxu0 %v2196_v45  ;;  %1038 = vmatprep.mubr.bf16.mxu1 %v2198_v46  ;;  %v2292_v45 = vld [vmem:[%s3221_s0 + $0x174] ss:$8 sps:$4 sm:$0xff]   ;;  %v2294_v46 = vld [vmem:[%s3221_s0 + $0x304] ss:$8 sps:$4 sm:$0xff]  }
  0x79   :  { %839 = vmatmul.mubr.bf16.gmra.mxu0 %v2200_v47  ;;  %1039 = vmatmul.mubr.bf16.gmra.mxu1 %v2201_v48  ;;  %v2296_v47 = vld [vmem:[%s3221_s0 + $0x170] ss:$8 sps:$4 sm:$0xff]   ;;  %v2297_v48 = vld [vmem:[%s3221_s0 + $0x300] ss:$8 sps:$4 sm:$0xff]  }
  0x7a   :  { %846 = vmatprep.mubr.bf16.mxu0 %v2202_v49  ;;  %1046 = vmatprep.mubr.bf16.mxu1 %v2204_v50  ;;  %v2298_v49 = vld [vmem:[%s3221_s0 + $0x184] ss:$8 sps:$4 sm:$0xff]   ;;  %v2300_v50 = vld [vmem:[%s3221_s0 + $0x314] ss:$8 sps:$4 sm:$0xff]  }
  0x81   :  { %847 = vmatmul.mubr.bf16.gmra.mxu0 %v2206_v51  ;;  %1047 = vmatmul.mubr.bf16.gmra.mxu1 %v2207_v52  ;;  %v63_v51 = vld [vmem:[%s3221_s0 + $0x180] sm:$0xff]  ;;  %v64_v52 = vld [vmem:[%s3221_s0 + $0x188] sm:$0xff] }
  0x82   :  { %854 = vmatprep.mubr.bf16.mxu0 %v2208_v53  ;;  %1054 = vmatprep.mubr.bf16.mxu1 %v2210_v54  ;;  %v113_v53 = vld [vmem:[%s3221_s0 + $0x310] sm:$0xff]  ;;  %v114_v54 = vld [vmem:[%s3221_s0 + $0x318] sm:$0xff] }
  0x89   :  { %855 = vmatmul.mubr.bf16.gmra.mxu0 %v2212_v55  ;;  %1055 = vmatmul.mubr.bf16.gmra.mxu1 %v2213_v56  ;;  %v1837_v55 = vcombine.low %v63_v51, %v64_v52  ;;  %v1887_v56 = vcombine.low %v113_v53, %v114_v54 }
  0x8a   :  { %862 = vmatprep.mubr.bf16.mxu0 %v2214_v57  ;;  %1062 = vmatprep.mubr.bf16.mxu1 %v2216_v58  ;;  %v2713_v57 = vld [vmem:[%s3222_s2] ss:$0 sm:$0xff] }
  0x91   :  { %863 = vmatmul.mubr.bf16.gmra.mxu0 %v2218_v59  ;;  %1063 = vmatmul.mubr.bf16.gmra.mxu1 %v2219_v60 }
  0x92   :  { %870 = vmatprep.mubr.bf16.mxu0 %v2220_v61  ;;  %1070 = vmatprep.mubr.bf16.mxu1 %v2222_v62 }
  0x99   :  { %871 = vmatmul.mubr.bf16.gmra.mxu0 %v2224_v63  ;;  %1071 = vmatmul.mubr.bf16.gmra.mxu1 %v2225_v0 }
  0x9a   :  { %878 = vmatprep.mubr.bf16.mxu0 %v2226_v1  ;;  %1078 = vmatprep.mubr.bf16.mxu1 %v2228_v2 }
  0xa1   :  { %879 = vmatmul.mubr.bf16.gmra.mxu0 %v2230_v3  ;;  %1079 = vmatmul.mubr.bf16.gmra.mxu1 %v2231_v4 }
  0xa2   :  { %886 = vmatprep.mubr.bf16.mxu0 %v2232_v5  ;;  %1086 = vmatprep.mubr.bf16.mxu1 %v2234_v6 }
  0xa9   :  { %887 = vmatmul.mubr.bf16.gmra.mxu0 %v2236_v7  ;;  %1087 = vmatmul.mubr.bf16.gmra.mxu1 %v2237_v8 }
  0xaa   :  { %894 = vmatprep.mubr.bf16.mxu0 %v2238_v9  ;;  %1094 = vmatprep.mubr.bf16.mxu1 %v2240_v10 }
  0xb1   :  { %895 = vmatmul.mubr.bf16.gmra.mxu0 %v2242_v11  ;;  %1095 = vmatmul.mubr.bf16.gmra.mxu1 %v2243_v12 }
  0xb2   :  { %902 = vmatprep.mubr.bf16.mxu0 %v2244_v13  ;;  %1102 = vmatprep.mubr.bf16.mxu1 %v2246_v14 }
  0xb9   :  { %903 = vmatmul.mubr.bf16.gmra.mxu0 %v2248_v15  ;;  %1103 = vmatmul.mubr.bf16.gmra.mxu1 %v2249_v16 }
  0xba   :  { %910 = vmatprep.mubr.bf16.mxu0 %v2250_v17  ;;  %1110 = vmatprep.mubr.bf16.mxu1 %v2252_v18 }
  0xc1   :  { %911 = vmatmul.mubr.bf16.gmra.mxu0 %v2254_v19  ;;  %1111 = vmatmul.mubr.bf16.gmra.mxu1 %v2255_v20 }
  0xc2   :  { %918 = vmatprep.mubr.bf16.mxu0 %v2256_v21  ;;  %1118 = vmatprep.mubr.bf16.mxu1 %v2258_v22 }
  0xc9   :  { %919 = vmatmul.mubr.bf16.gmra.mxu0 %v2260_v23  ;;  %1119 = vmatmul.mubr.bf16.gmra.mxu1 %v2261_v24 }
  0xca   :  { %926 = vmatprep.mubr.bf16.mxu0 %v2262_v25  ;;  %1126 = vmatprep.mubr.bf16.mxu1 %v2264_v26 }
  0xd1   :  { %927 = vmatmul.mubr.bf16.gmra.mxu0 %v2266_v27  ;;  %1127 = vmatmul.mubr.bf16.gmra.mxu1 %v2267_v28 }
  0xd2   :  { %934 = vmatprep.mubr.bf16.mxu0 %v2268_v29  ;;  %1134 = vmatprep.mubr.bf16.mxu1 %v2270_v30 }
  0xd9   :  { %935 = vmatmul.mubr.bf16.gmra.mxu0 %v2272_v31  ;;  %1135 = vmatmul.mubr.bf16.gmra.mxu1 %v2273_v32 }
  0xda   :  { %942 = vmatprep.mubr.bf16.mxu0 %v2274_v33  ;;  %1142 = vmatprep.mubr.bf16.mxu1 %v2276_v34 }
  0xe1   :  { %943 = vmatmul.mubr.bf16.gmra.mxu0 %v2278_v35  ;;  %1143 = vmatmul.mubr.bf16.gmra.mxu1 %v2279_v36 }
  0xe2   :  { %950 = vmatprep.mubr.bf16.mxu0 %v2280_v37  ;;  %1150 = vmatprep.mubr.bf16.mxu1 %v2282_v38 }
  0xe9   :  { %951 = vmatmul.mubr.bf16.gmra.mxu0 %v2284_v39  ;;  %1151 = vmatmul.mubr.bf16.gmra.mxu1 %v2285_v40 }
  0xea   :  { %958 = vmatprep.mubr.bf16.mxu0 %v2286_v41  ;;  %1158 = vmatprep.mubr.bf16.mxu1 %v2288_v42 }
  0xf1   :  { %959 = vmatmul.mubr.bf16.gmra.mxu0 %v2290_v43  ;;  %1159 = vmatmul.mubr.bf16.gmra.mxu1 %v2291_v44 }
  0xf2   :  { %966 = vmatprep.mubr.bf16.mxu0 %v2292_v45  ;;  %1166 = vmatprep.mubr.bf16.mxu1 %v2294_v46 }
  0xf9   :  { %967 = vmatmul.mubr.bf16.gmra.mxu0 %v2296_v47  ;;  %1167 = vmatmul.mubr.bf16.gmra.mxu1 %v2297_v48 }
  0xfa   :  { %974 = vmatprep.mubr.bf16.mxu0 %v2298_v49  ;;  %1174 = vmatprep.mubr.bf16.mxu1 %v2300_v50 }
 0x101   :  { %v784_v58 = vpop.f32.mrf.mxu0  ;;  %975 = vmatmul.mubr.bf16.gmra.mxu0 %v1837_v55  ;;  %v984_v59 = vpop.f32.mrf.mxu1  ;;  %1175 = vmatmul.mubr.bf16.gmra.mxu1 %v1887_v56 }
 0x102   :  { %v785_v60 = vadd.f32 %v2713_v57, %v784_v58  ;;  %v985_v61 = vadd.f32 %v2713_v57, %v984_v59 }
 0x103   :  { %v786_v62 = vpop.f32.mrf.mxu0  ;;  %v986_v63 = vpop.f32.mrf.mxu1 }
 0x104   :  { %v1183_v0 = vmax.f32 %v785_v60, 0.0  ;;  %v1233_v1 = vmax.f32 %v985_v61, 0.0 }
 0x105   :  { %v787_v2 = vpop.f32.mrf.mxu0  ;;  %v987_v3 = vpop.f32.mrf.mxu1 }
 0x106   :  { %v2005_v4 = vpack.c.bf16 %v1183_v0, %v1183_v0  ;;  %v2055_v5 = vpack.c.bf16 %v1233_v1, %v1233_v1  ;;  %v788_v6 = vadd.f32 %v2713_v57, %v787_v2  ;;  %v988_v7 = vadd.f32 %v2713_v57, %v987_v3 }
 0x107   :  { %v789_v8 = vpop.f32.mrf.mxu0  ;;  %v989_v9 = vpop.f32.mrf.mxu1 }
 0x108   :  { %1684 = vst.msk [vmem:[%s3223_s3] sm:$0xf] %vm1683_vm0, %v2005_v4  ;;  %1734 = vst.msk [vmem:[%s3223_s3 + $0xc8] sm:$0xf] %vm1683_vm0, %v2055_v5  ;;  %v1184_v10 = vmax.f32 %v788_v6, 0.0  ;;  %v1234_v11 = vmax.f32 %v988_v7, 0.0 }
 0x109   :  { %v792_v12 = vpop.f32.mrf.mxu0  ;;  %v992_v13 = vpop.f32.mrf.mxu1 }
 0x10a   :  { %v2006_v14 = vpack.c.bf16 %v1184_v10, %v1184_v10  ;;  %v2056_v15 = vpack.c.bf16 %v1234_v11, %v1234_v11  ;;  %v793_v16 = vadd.f32 %v2713_v57, %v792_v12  ;;  %v993_v17 = vadd.f32 %v2713_v57, %v992_v13 }
 0x10b   :  { %v794_v18 = vpop.f32.mrf.mxu0  ;;  %v994_v19 = vpop.f32.mrf.mxu1 }
 0x10c   :  { %1685 = vst.msk [vmem:[%s3223_s3 + $0x4] sm:$0xf] %vm1683_vm0, %v2006_v14  ;;  %1735 = vst.msk [vmem:[%s3223_s3 + $0xcc] sm:$0xf] %vm1683_vm0, %v2056_v15  ;;  %v1185_v20 = vmax.f32 %v793_v16, 0.0  ;;  %v1235_v21 = vmax.f32 %v993_v17, 0.0 }
 0x10d   :  { %v795_v22 = vpop.f32.mrf.mxu0  ;;  %v995_v23 = vpop.f32.mrf.mxu1 }
 0x10e   :  { %v2007_v24 = vpack.c.bf16 %v1185_v20, %v1185_v20  ;;  %v2057_v25 = vpack.c.bf16 %v1235_v21, %v1235_v21  ;;  %v796_v26 = vadd.f32 %v2713_v57, %v795_v22  ;;  %v996_v27 = vadd.f32 %v2713_v57, %v995_v23 }
 0x10f   :  { %v797_v28 = vpop.f32.mrf.mxu0  ;;  %v997_v29 = vpop.f32.mrf.mxu1 }
 0x110   :  { %1686 = vst.msk [vmem:[%s3223_s3 + $0x8] sm:$0xf] %vm1683_vm0, %v2007_v24  ;;  %1736 = vst.msk [vmem:[%s3223_s3 + $0xd0] sm:$0xf] %vm1683_vm0, %v2057_v25  ;;  %v1186_v30 = vmax.f32 %v796_v26, 0.0  ;;  %v1236_v31 = vmax.f32 %v996_v27, 0.0 }
 0x111   :  { %v800_v32 = vpop.f32.mrf.mxu0  ;;  %v1000_v33 = vpop.f32.mrf.mxu1 }
 0x112   :  { %v2008_v34 = vpack.c.bf16 %v1186_v30, %v1186_v30  ;;  %v2058_v35 = vpack.c.bf16 %v1236_v31, %v1236_v31  ;;  %v801_v36 = vadd.f32 %v2713_v57, %v800_v32  ;;  %v1001_v37 = vadd.f32 %v2713_v57, %v1000_v33 }
 0x113   :  { %v802_v38 = vpop.f32.mrf.mxu0  ;;  %v1002_v39 = vpop.f32.mrf.mxu1 }
 0x114   :  { %1687 = vst.msk [vmem:[%s3223_s3 + $0xc] sm:$0xf] %vm1683_vm0, %v2008_v34  ;;  %1737 = vst.msk [vmem:[%s3223_s3 + $0xd4] sm:$0xf] %vm1683_vm0, %v2058_v35  ;;  %v1187_v40 = vmax.f32 %v801_v36, 0.0  ;;  %v1237_v41 = vmax.f32 %v1001_v37, 0.0 }
 0x115   :  { %v803_v42 = vpop.f32.mrf.mxu0  ;;  %v1003_v43 = vpop.f32.mrf.mxu1 }
 0x116   :  { %v2009_v44 = vpack.c.bf16 %v1187_v40, %v1187_v40  ;;  %v2059_v45 = vpack.c.bf16 %v1237_v41, %v1237_v41  ;;  %v804_v46 = vadd.f32 %v2713_v57, %v803_v42  ;;  %v1004_v47 = vadd.f32 %v2713_v57, %v1003_v43 }
 0x117   :  { %v805_v48 = vpop.f32.mrf.mxu0  ;;  %v1005_v49 = vpop.f32.mrf.mxu1 }
 0x118   :  { %1688 = vst.msk [vmem:[%s3223_s3 + $0x10] sm:$0xf] %vm1683_vm0, %v2009_v44  ;;  %1738 = vst.msk [vmem:[%s3223_s3 + $0xd8] sm:$0xf] %vm1683_vm0, %v2059_v45  ;;  %v1188_v50 = vmax.f32 %v804_v46, 0.0  ;;  %v1238_v51 = vmax.f32 %v1004_v47, 0.0 }
 0x119   :  { %v808_v52 = vpop.f32.mrf.mxu0  ;;  %v1008_v53 = vpop.f32.mrf.mxu1 }
 0x11a   :  { %v2010_v54 = vpack.c.bf16 %v1188_v50, %v1188_v50  ;;  %v2060_v55 = vpack.c.bf16 %v1238_v51, %v1238_v51  ;;  %v809_v56 = vadd.f32 %v2713_v57, %v808_v52  ;;  %v1009_v58 = vadd.f32 %v2713_v57, %v1008_v53 }
 0x11b   :  { %v810_v59 = vpop.f32.mrf.mxu0  ;;  %v1010_v60 = vpop.f32.mrf.mxu1 }
 0x11c   :  { %1689 = vst.msk [vmem:[%s3223_s3 + $0x14] sm:$0xf] %vm1683_vm0, %v2010_v54  ;;  %1739 = vst.msk [vmem:[%s3223_s3 + $0xdc] sm:$0xf] %vm1683_vm0, %v2060_v55  ;;  %v1189_v61 = vmax.f32 %v809_v56, 0.0  ;;  %v1239_v62 = vmax.f32 %v1009_v58, 0.0 }
 0x11d   :  { %v811_v63 = vpop.f32.mrf.mxu0  ;;  %v1011_v0 = vpop.f32.mrf.mxu1 }
 0x11e   :  { %v2011_v1 = vpack.c.bf16 %v1189_v61, %v1189_v61  ;;  %v2061_v2 = vpack.c.bf16 %v1239_v62, %v1239_v62  ;;  %v812_v3 = vadd.f32 %v2713_v57, %v811_v63  ;;  %v1012_v4 = vadd.f32 %v2713_v57, %v1011_v0 }
 0x11f   :  { %v813_v5 = vpop.f32.mrf.mxu0  ;;  %v1013_v6 = vpop.f32.mrf.mxu1 }
 0x120   :  { %1690 = vst.msk [vmem:[%s3223_s3 + $0x18] sm:$0xf] %vm1683_vm0, %v2011_v1  ;;  %1740 = vst.msk [vmem:[%s3223_s3 + $0xe0] sm:$0xf] %vm1683_vm0, %v2061_v2  ;;  %v1190_v7 = vmax.f32 %v812_v3, 0.0  ;;  %v1240_v8 = vmax.f32 %v1012_v4, 0.0 }
 0x121   :  { %v816_v9 = vpop.f32.mrf.mxu0  ;;  %v1016_v10 = vpop.f32.mrf.mxu1 }
 0x122   :  { %v2012_v11 = vpack.c.bf16 %v1190_v7, %v1190_v7  ;;  %v2062_v12 = vpack.c.bf16 %v1240_v8, %v1240_v8  ;;  %v817_v13 = vadd.f32 %v2713_v57, %v816_v9  ;;  %v1017_v14 = vadd.f32 %v2713_v57, %v1016_v10 }
 0x123   :  { %v818_v15 = vpop.f32.mrf.mxu0  ;;  %v1018_v16 = vpop.f32.mrf.mxu1 }
 0x124   :  { %1691 = vst.msk [vmem:[%s3223_s3 + $0x1c] sm:$0xf] %vm1683_vm0, %v2012_v11  ;;  %1741 = vst.msk [vmem:[%s3223_s3 + $0xe4] sm:$0xf] %vm1683_vm0, %v2062_v12  ;;  %v1191_v17 = vmax.f32 %v817_v13, 0.0  ;;  %v1241_v18 = vmax.f32 %v1017_v14, 0.0 }
 0x125   :  { %v819_v19 = vpop.f32.mrf.mxu0  ;;  %v1019_v20 = vpop.f32.mrf.mxu1 }
 0x126   :  { %v2013_v21 = vpack.c.bf16 %v1191_v17, %v1191_v17  ;;  %v2063_v22 = vpack.c.bf16 %v1241_v18, %v1241_v18  ;;  %v820_v23 = vadd.f32 %v2713_v57, %v819_v19  ;;  %v1020_v24 = vadd.f32 %v2713_v57, %v1019_v20 }
 0x127   :  { %v821_v25 = vpop.f32.mrf.mxu0  ;;  %v1021_v26 = vpop.f32.mrf.mxu1 }
 0x128   :  { %1692 = vst.msk [vmem:[%s3223_s3 + $0x20] sm:$0xf] %vm1683_vm0, %v2013_v21  ;;  %1742 = vst.msk [vmem:[%s3223_s3 + $0xe8] sm:$0xf] %vm1683_vm0, %v2063_v22  ;;  %v1192_v27 = vmax.f32 %v820_v23, 0.0  ;;  %v1242_v28 = vmax.f32 %v1020_v24, 0.0 }
 0x129   :  { %v824_v29 = vpop.f32.mrf.mxu0  ;;  %v1024_v30 = vpop.f32.mrf.mxu1 }
 0x12a   :  { %v2014_v31 = vpack.c.bf16 %v1192_v27, %v1192_v27  ;;  %v2064_v32 = vpack.c.bf16 %v1242_v28, %v1242_v28  ;;  %v825_v33 = vadd.f32 %v2713_v57, %v824_v29  ;;  %v1025_v34 = vadd.f32 %v2713_v57, %v1024_v30 }
 0x12b   :  { %v826_v35 = vpop.f32.mrf.mxu0  ;;  %v1026_v36 = vpop.f32.mrf.mxu1 }
 0x12c   :  { %1693 = vst.msk [vmem:[%s3223_s3 + $0x24] sm:$0xf] %vm1683_vm0, %v2014_v31  ;;  %1743 = vst.msk [vmem:[%s3223_s3 + $0xec] sm:$0xf] %vm1683_vm0, %v2064_v32  ;;  %v1193_v37 = vmax.f32 %v825_v33, 0.0  ;;  %v1243_v38 = vmax.f32 %v1025_v34, 0.0 }
 0x12d   :  { %v827_v39 = vpop.f32.mrf.mxu0  ;;  %v1027_v40 = vpop.f32.mrf.mxu1 }
 0x12e   :  { %v2015_v41 = vpack.c.bf16 %v1193_v37, %v1193_v37  ;;  %v2065_v42 = vpack.c.bf16 %v1243_v38, %v1243_v38  ;;  %v828_v43 = vadd.f32 %v2713_v57, %v827_v39  ;;  %v1028_v44 = vadd.f32 %v2713_v57, %v1027_v40 }
 0x12f   :  { %v829_v45 = vpop.f32.mrf.mxu0  ;;  %v1029_v46 = vpop.f32.mrf.mxu1 }
 0x130   :  { %1694 = vst.msk [vmem:[%s3223_s3 + $0x28] sm:$0xf] %vm1683_vm0, %v2015_v41  ;;  %1744 = vst.msk [vmem:[%s3223_s3 + $0xf0] sm:$0xf] %vm1683_vm0, %v2065_v42  ;;  %v1194_v47 = vmax.f32 %v828_v43, 0.0  ;;  %v1244_v48 = vmax.f32 %v1028_v44, 0.0 }
 0x131   :  { %v832_v49 = vpop.f32.mrf.mxu0  ;;  %v1032_v50 = vpop.f32.mrf.mxu1 }
 0x132   :  { %v2016_v51 = vpack.c.bf16 %v1194_v47, %v1194_v47  ;;  %v2066_v52 = vpack.c.bf16 %v1244_v48, %v1244_v48  ;;  %v833_v53 = vadd.f32 %v2713_v57, %v832_v49  ;;  %v1033_v54 = vadd.f32 %v2713_v57, %v1032_v50 }
 0x133   :  { %v834_v55 = vpop.f32.mrf.mxu0  ;;  %v1034_v56 = vpop.f32.mrf.mxu1 }
 0x134   :  { %1695 = vst.msk [vmem:[%s3223_s3 + $0x2c] sm:$0xf] %vm1683_vm0, %v2016_v51  ;;  %1745 = vst.msk [vmem:[%s3223_s3 + $0xf4] sm:$0xf] %vm1683_vm0, %v2066_v52  ;;  %v1195_v58 = vmax.f32 %v833_v53, 0.0  ;;  %v1245_v59 = vmax.f32 %v1033_v54, 0.0 }
 0x135   :  { %v835_v60 = vpop.f32.mrf.mxu0  ;;  %v1035_v61 = vpop.f32.mrf.mxu1 }
 0x136   :  { %v2017_v62 = vpack.c.bf16 %v1195_v58, %v1195_v58  ;;  %v2067_v63 = vpack.c.bf16 %v1245_v59, %v1245_v59  ;;  %v836_v0 = vadd.f32 %v2713_v57, %v835_v60  ;;  %v1036_v1 = vadd.f32 %v2713_v57, %v1035_v61 }
 0x137   :  { %v837_v2 = vpop.f32.mrf.mxu0  ;;  %v1037_v3 = vpop.f32.mrf.mxu1 }
 0x138   :  { %1696 = vst.msk [vmem:[%s3223_s3 + $0x30] sm:$0xf] %vm1683_vm0, %v2017_v62  ;;  %1746 = vst.msk [vmem:[%s3223_s3 + $0xf8] sm:$0xf] %vm1683_vm0, %v2067_v63  ;;  %v1196_v4 = vmax.f32 %v836_v0, 0.0  ;;  %v1246_v5 = vmax.f32 %v1036_v1, 0.0 }
 0x139   :  { %v840_v6 = vpop.f32.mrf.mxu0  ;;  %v1040_v7 = vpop.f32.mrf.mxu1 }
 0x13a   :  { %v2018_v8 = vpack.c.bf16 %v1196_v4, %v1196_v4  ;;  %v2068_v9 = vpack.c.bf16 %v1246_v5, %v1246_v5  ;;  %v841_v10 = vadd.f32 %v2713_v57, %v840_v6  ;;  %v1041_v11 = vadd.f32 %v2713_v57, %v1040_v7 }
 0x13b   :  { %v842_v12 = vpop.f32.mrf.mxu0  ;;  %v1042_v13 = vpop.f32.mrf.mxu1 }
 0x13c   :  { %1697 = vst.msk [vmem:[%s3223_s3 + $0x34] sm:$0xf] %vm1683_vm0, %v2018_v8  ;;  %1747 = vst.msk [vmem:[%s3223_s3 + $0xfc] sm:$0xf] %vm1683_vm0, %v2068_v9  ;;  %v1197_v14 = vmax.f32 %v841_v10, 0.0  ;;  %v1247_v15 = vmax.f32 %v1041_v11, 0.0 }
 0x13d   :  { %v843_v16 = vpop.f32.mrf.mxu0  ;;  %v1043_v17 = vpop.f32.mrf.mxu1 }
 0x13e   :  { %v2019_v18 = vpack.c.bf16 %v1197_v14, %v1197_v14  ;;  %v2069_v19 = vpack.c.bf16 %v1247_v15, %v1247_v15  ;;  %v844_v20 = vadd.f32 %v2713_v57, %v843_v16  ;;  %v1044_v21 = vadd.f32 %v2713_v57, %v1043_v17 }
 0x13f   :  { %v845_v22 = vpop.f32.mrf.mxu0  ;;  %v1045_v23 = vpop.f32.mrf.mxu1 }
 0x140   :  { %1698 = vst.msk [vmem:[%s3223_s3 + $0x38] sm:$0xf] %vm1683_vm0, %v2019_v18  ;;  %1748 = vst.msk [vmem:[%s3223_s3 + $0x100] sm:$0xf] %vm1683_vm0, %v2069_v19  ;;  %v1198_v24 = vmax.f32 %v844_v20, 0.0  ;;  %v1248_v25 = vmax.f32 %v1044_v21, 0.0 }
 0x141   :  { %v848_v26 = vpop.f32.mrf.mxu0  ;;  %v1048_v27 = vpop.f32.mrf.mxu1 }
 0x142   :  { %v2020_v28 = vpack.c.bf16 %v1198_v24, %v1198_v24  ;;  %v2070_v29 = vpack.c.bf16 %v1248_v25, %v1248_v25  ;;  %v849_v30 = vadd.f32 %v2713_v57, %v848_v26  ;;  %v1049_v31 = vadd.f32 %v2713_v57, %v1048_v27 }
 0x143   :  { %v850_v32 = vpop.f32.mrf.mxu0  ;;  %v1050_v33 = vpop.f32.mrf.mxu1 }
 0x144   :  { %1699 = vst.msk [vmem:[%s3223_s3 + $0x3c] sm:$0xf] %vm1683_vm0, %v2020_v28  ;;  %1749 = vst.msk [vmem:[%s3223_s3 + $0x104] sm:$0xf] %vm1683_vm0, %v2070_v29  ;;  %v1199_v34 = vmax.f32 %v849_v30, 0.0  ;;  %v1249_v35 = vmax.f32 %v1049_v31, 0.0 }
 0x145   :  { %v851_v36 = vpop.f32.mrf.mxu0  ;;  %v1051_v37 = vpop.f32.mrf.mxu1 }
 0x146   :  { %v2021_v38 = vpack.c.bf16 %v1199_v34, %v1199_v34  ;;  %v2071_v39 = vpack.c.bf16 %v1249_v35, %v1249_v35  ;;  %v852_v40 = vadd.f32 %v2713_v57, %v851_v36  ;;  %v1052_v41 = vadd.f32 %v2713_v57, %v1051_v37 }
 0x147   :  { %v853_v42 = vpop.f32.mrf.mxu0  ;;  %v1053_v43 = vpop.f32.mrf.mxu1 }
 0x148   :  { %1700 = vst.msk [vmem:[%s3223_s3 + $0x40] sm:$0xf] %vm1683_vm0, %v2021_v38  ;;  %1750 = vst.msk [vmem:[%s3223_s3 + $0x108] sm:$0xf] %vm1683_vm0, %v2071_v39  ;;  %v1200_v44 = vmax.f32 %v852_v40, 0.0  ;;  %v1250_v45 = vmax.f32 %v1052_v41, 0.0 }
 0x149   :  { %v856_v46 = vpop.f32.mrf.mxu0  ;;  %v1056_v47 = vpop.f32.mrf.mxu1 }
 0x14a   :  { %v2022_v48 = vpack.c.bf16 %v1200_v44, %v1200_v44  ;;  %v2072_v49 = vpack.c.bf16 %v1250_v45, %v1250_v45  ;;  %v857_v50 = vadd.f32 %v2713_v57, %v856_v46  ;;  %v1057_v51 = vadd.f32 %v2713_v57, %v1056_v47 }
 0x14b   :  { %v858_v52 = vpop.f32.mrf.mxu0  ;;  %v1058_v53 = vpop.f32.mrf.mxu1 }
 0x14c   :  { %1701 = vst.msk [vmem:[%s3223_s3 + $0x44] sm:$0xf] %vm1683_vm0, %v2022_v48  ;;  %1751 = vst.msk [vmem:[%s3223_s3 + $0x10c] sm:$0xf] %vm1683_vm0, %v2072_v49  ;;  %v1201_v54 = vmax.f32 %v857_v50, 0.0  ;;  %v1251_v55 = vmax.f32 %v1057_v51, 0.0 }
 0x14d   :  { %v859_v56 = vpop.f32.mrf.mxu0  ;;  %v1059_v58 = vpop.f32.mrf.mxu1 }
 0x14e   :  { %v2023_v59 = vpack.c.bf16 %v1201_v54, %v1201_v54  ;;  %v2073_v60 = vpack.c.bf16 %v1251_v55, %v1251_v55  ;;  %v860_v61 = vadd.f32 %v2713_v57, %v859_v56  ;;  %v1060_v62 = vadd.f32 %v2713_v57, %v1059_v58 }
 0x14f   :  { %v861_v63 = vpop.f32.mrf.mxu0  ;;  %v1061_v0 = vpop.f32.mrf.mxu1 }
 0x150   :  { %1702 = vst.msk [vmem:[%s3223_s3 + $0x48] sm:$0xf] %vm1683_vm0, %v2023_v59  ;;  %1752 = vst.msk [vmem:[%s3223_s3 + $0x110] sm:$0xf] %vm1683_vm0, %v2073_v60  ;;  %v1202_v1 = vmax.f32 %v860_v61, 0.0  ;;  %v1252_v2 = vmax.f32 %v1060_v62, 0.0 }
 0x151   :  { %v864_v3 = vpop.f32.mrf.mxu0  ;;  %v1064_v4 = vpop.f32.mrf.mxu1 }
 0x152   :  { %v2024_v5 = vpack.c.bf16 %v1202_v1, %v1202_v1  ;;  %v2074_v6 = vpack.c.bf16 %v1252_v2, %v1252_v2  ;;  %v865_v7 = vadd.f32 %v2713_v57, %v864_v3  ;;  %v1065_v8 = vadd.f32 %v2713_v57, %v1064_v4 }
 0x153   :  { %v866_v9 = vpop.f32.mrf.mxu0  ;;  %v1066_v10 = vpop.f32.mrf.mxu1 }
 0x154   :  { %1703 = vst.msk [vmem:[%s3223_s3 + $0x4c] sm:$0xf] %vm1683_vm0, %v2024_v5  ;;  %1753 = vst.msk [vmem:[%s3223_s3 + $0x114] sm:$0xf] %vm1683_vm0, %v2074_v6  ;;  %v1203_v11 = vmax.f32 %v865_v7, 0.0  ;;  %v1253_v12 = vmax.f32 %v1065_v8, 0.0 }
 0x155   :  { %v867_v13 = vpop.f32.mrf.mxu0  ;;  %v1067_v14 = vpop.f32.mrf.mxu1 }
 0x156   :  { %v2025_v15 = vpack.c.bf16 %v1203_v11, %v1203_v11  ;;  %v2075_v16 = vpack.c.bf16 %v1253_v12, %v1253_v12  ;;  %v868_v17 = vadd.f32 %v2713_v57, %v867_v13  ;;  %v1068_v18 = vadd.f32 %v2713_v57, %v1067_v14 }
 0x157   :  { %v869_v19 = vpop.f32.mrf.mxu0  ;;  %v1069_v20 = vpop.f32.mrf.mxu1 }
 0x158   :  { %1704 = vst.msk [vmem:[%s3223_s3 + $0x50] sm:$0xf] %vm1683_vm0, %v2025_v15  ;;  %1754 = vst.msk [vmem:[%s3223_s3 + $0x118] sm:$0xf] %vm1683_vm0, %v2075_v16  ;;  %v1204_v21 = vmax.f32 %v868_v17, 0.0  ;;  %v1254_v22 = vmax.f32 %v1068_v18, 0.0 }
 0x159   :  { %v872_v23 = vpop.f32.mrf.mxu0  ;;  %v1072_v24 = vpop.f32.mrf.mxu1 }
 0x15a   :  { %v2026_v25 = vpack.c.bf16 %v1204_v21, %v1204_v21  ;;  %v2076_v26 = vpack.c.bf16 %v1254_v22, %v1254_v22  ;;  %v873_v27 = vadd.f32 %v2713_v57, %v872_v23  ;;  %v1073_v28 = vadd.f32 %v2713_v57, %v1072_v24 }
 0x15b   :  { %v874_v29 = vpop.f32.mrf.mxu0  ;;  %v1074_v30 = vpop.f32.mrf.mxu1 }
 0x15c   :  { %1705 = vst.msk [vmem:[%s3223_s3 + $0x54] sm:$0xf] %vm1683_vm0, %v2026_v25  ;;  %1755 = vst.msk [vmem:[%s3223_s3 + $0x11c] sm:$0xf] %vm1683_vm0, %v2076_v26  ;;  %v1205_v31 = vmax.f32 %v873_v27, 0.0  ;;  %v1255_v32 = vmax.f32 %v1073_v28, 0.0 }
 0x15d   :  { %v875_v33 = vpop.f32.mrf.mxu0  ;;  %v1075_v34 = vpop.f32.mrf.mxu1 }
 0x15e   :  { %v2027_v35 = vpack.c.bf16 %v1205_v31, %v1205_v31  ;;  %v2077_v36 = vpack.c.bf16 %v1255_v32, %v1255_v32  ;;  %v876_v37 = vadd.f32 %v2713_v57, %v875_v33  ;;  %v1076_v38 = vadd.f32 %v2713_v57, %v1075_v34 }
 0x15f   :  { %v877_v39 = vpop.f32.mrf.mxu0  ;;  %v1077_v40 = vpop.f32.mrf.mxu1 }
 0x160   :  { %1706 = vst.msk [vmem:[%s3223_s3 + $0x58] sm:$0xf] %vm1683_vm0, %v2027_v35  ;;  %1756 = vst.msk [vmem:[%s3223_s3 + $0x120] sm:$0xf] %vm1683_vm0, %v2077_v36  ;;  %v1206_v41 = vmax.f32 %v876_v37, 0.0  ;;  %v1256_v42 = vmax.f32 %v1076_v38, 0.0 }
 0x161   :  { %v880_v43 = vpop.f32.mrf.mxu0  ;;  %v1080_v44 = vpop.f32.mrf.mxu1 }
 0x162   :  { %v2028_v45 = vpack.c.bf16 %v1206_v41, %v1206_v41  ;;  %v2078_v46 = vpack.c.bf16 %v1256_v42, %v1256_v42  ;;  %v881_v47 = vadd.f32 %v2713_v57, %v880_v43  ;;  %v1081_v48 = vadd.f32 %v2713_v57, %v1080_v44 }
 0x163   :  { %v882_v49 = vpop.f32.mrf.mxu0  ;;  %v1082_v50 = vpop.f32.mrf.mxu1 }
 0x164   :  { %1707 = vst.msk [vmem:[%s3223_s3 + $0x5c] sm:$0xf] %vm1683_vm0, %v2028_v45  ;;  %1757 = vst.msk [vmem:[%s3223_s3 + $0x124] sm:$0xf] %vm1683_vm0, %v2078_v46  ;;  %v1207_v51 = vmax.f32 %v881_v47, 0.0  ;;  %v1257_v52 = vmax.f32 %v1081_v48, 0.0 }
 0x165   :  { %v883_v53 = vpop.f32.mrf.mxu0  ;;  %v1083_v54 = vpop.f32.mrf.mxu1 }
 0x166   :  { %v2029_v55 = vpack.c.bf16 %v1207_v51, %v1207_v51  ;;  %v2079_v56 = vpack.c.bf16 %v1257_v52, %v1257_v52  ;;  %v884_v58 = vadd.f32 %v2713_v57, %v883_v53  ;;  %v1084_v59 = vadd.f32 %v2713_v57, %v1083_v54 }
 0x167   :  { %v885_v60 = vpop.f32.mrf.mxu0  ;;  %v1085_v61 = vpop.f32.mrf.mxu1 }
 0x168   :  { %1708 = vst.msk [vmem:[%s3223_s3 + $0x60] sm:$0xf] %vm1683_vm0, %v2029_v55  ;;  %1758 = vst.msk [vmem:[%s3223_s3 + $0x128] sm:$0xf] %vm1683_vm0, %v2079_v56  ;;  %v1208_v62 = vmax.f32 %v884_v58, 0.0  ;;  %v1258_v63 = vmax.f32 %v1084_v59, 0.0 }
 0x169   :  { %v888_v0 = vpop.f32.mrf.mxu0  ;;  %v1088_v1 = vpop.f32.mrf.mxu1 }
 0x16a   :  { %v2030_v2 = vpack.c.bf16 %v1208_v62, %v1208_v62  ;;  %v2080_v3 = vpack.c.bf16 %v1258_v63, %v1258_v63  ;;  %v889_v4 = vadd.f32 %v2713_v57, %v888_v0  ;;  %v1089_v5 = vadd.f32 %v2713_v57, %v1088_v1 }
 0x16b   :  { %v890_v6 = vpop.f32.mrf.mxu0  ;;  %v1090_v7 = vpop.f32.mrf.mxu1 }
 0x16c   :  { %1709 = vst.msk [vmem:[%s3223_s3 + $0x64] sm:$0xf] %vm1683_vm0, %v2030_v2  ;;  %1759 = vst.msk [vmem:[%s3223_s3 + $0x12c] sm:$0xf] %vm1683_vm0, %v2080_v3  ;;  %v1209_v8 = vmax.f32 %v889_v4, 0.0  ;;  %v1259_v9 = vmax.f32 %v1089_v5, 0.0 }
 0x16d   :  { %v891_v10 = vpop.f32.mrf.mxu0  ;;  %v1091_v11 = vpop.f32.mrf.mxu1 }
 0x16e   :  { %v2031_v12 = vpack.c.bf16 %v1209_v8, %v1209_v8  ;;  %v2081_v13 = vpack.c.bf16 %v1259_v9, %v1259_v9  ;;  %v892_v14 = vadd.f32 %v2713_v57, %v891_v10  ;;  %v1092_v15 = vadd.f32 %v2713_v57, %v1091_v11 }
 0x16f   :  { %v893_v16 = vpop.f32.mrf.mxu0  ;;  %v1093_v17 = vpop.f32.mrf.mxu1 }
 0x170   :  { %1710 = vst.msk [vmem:[%s3223_s3 + $0x68] sm:$0xf] %vm1683_vm0, %v2031_v12  ;;  %1760 = vst.msk [vmem:[%s3223_s3 + $0x130] sm:$0xf] %vm1683_vm0, %v2081_v13  ;;  %v1210_v18 = vmax.f32 %v892_v14, 0.0  ;;  %v1260_v19 = vmax.f32 %v1092_v15, 0.0 }
 0x171   :  { %v896_v20 = vpop.f32.mrf.mxu0  ;;  %v1096_v21 = vpop.f32.mrf.mxu1 }
 0x172   :  { %v2032_v22 = vpack.c.bf16 %v1210_v18, %v1210_v18  ;;  %v2082_v23 = vpack.c.bf16 %v1260_v19, %v1260_v19  ;;  %v897_v24 = vadd.f32 %v2713_v57, %v896_v20  ;;  %v1097_v25 = vadd.f32 %v2713_v57, %v1096_v21 }
 0x173   :  { %v898_v26 = vpop.f32.mrf.mxu0  ;;  %v1098_v27 = vpop.f32.mrf.mxu1 }
 0x174   :  { %1711 = vst.msk [vmem:[%s3223_s3 + $0x6c] sm:$0xf] %vm1683_vm0, %v2032_v22  ;;  %1761 = vst.msk [vmem:[%s3223_s3 + $0x134] sm:$0xf] %vm1683_vm0, %v2082_v23  ;;  %v1211_v28 = vmax.f32 %v897_v24, 0.0  ;;  %v1261_v29 = vmax.f32 %v1097_v25, 0.0 }
 0x175   :  { %v899_v30 = vpop.f32.mrf.mxu0  ;;  %v1099_v31 = vpop.f32.mrf.mxu1 }
 0x176   :  { %v2033_v32 = vpack.c.bf16 %v1211_v28, %v1211_v28  ;;  %v2083_v33 = vpack.c.bf16 %v1261_v29, %v1261_v29  ;;  %v900_v34 = vadd.f32 %v2713_v57, %v899_v30  ;;  %v1100_v35 = vadd.f32 %v2713_v57, %v1099_v31 }
 0x177   :  { %v901_v36 = vpop.f32.mrf.mxu0  ;;  %v1101_v37 = vpop.f32.mrf.mxu1 }
 0x178   :  { %1712 = vst.msk [vmem:[%s3223_s3 + $0x70] sm:$0xf] %vm1683_vm0, %v2033_v32  ;;  %1762 = vst.msk [vmem:[%s3223_s3 + $0x138] sm:$0xf] %vm1683_vm0, %v2083_v33  ;;  %v1212_v38 = vmax.f32 %v900_v34, 0.0  ;;  %v1262_v39 = vmax.f32 %v1100_v35, 0.0 }
 0x179   :  { %v904_v40 = vpop.f32.mrf.mxu0  ;;  %v1104_v41 = vpop.f32.mrf.mxu1 }
 0x17a   :  { %v2034_v42 = vpack.c.bf16 %v1212_v38, %v1212_v38  ;;  %v2084_v43 = vpack.c.bf16 %v1262_v39, %v1262_v39  ;;  %v905_v44 = vadd.f32 %v2713_v57, %v904_v40  ;;  %v1105_v45 = vadd.f32 %v2713_v57, %v1104_v41 }
 0x17b   :  { %v906_v46 = vpop.f32.mrf.mxu0  ;;  %v1106_v47 = vpop.f32.mrf.mxu1 }
 0x17c   :  { %1713 = vst.msk [vmem:[%s3223_s3 + $0x74] sm:$0xf] %vm1683_vm0, %v2034_v42  ;;  %1763 = vst.msk [vmem:[%s3223_s3 + $0x13c] sm:$0xf] %vm1683_vm0, %v2084_v43  ;;  %v1213_v48 = vmax.f32 %v905_v44, 0.0  ;;  %v1263_v49 = vmax.f32 %v1105_v45, 0.0 }
 0x17d   :  { %v907_v50 = vpop.f32.mrf.mxu0  ;;  %v1107_v51 = vpop.f32.mrf.mxu1 }
 0x17e   :  { %v2035_v52 = vpack.c.bf16 %v1213_v48, %v1213_v48  ;;  %v2085_v53 = vpack.c.bf16 %v1263_v49, %v1263_v49  ;;  %v908_v54 = vadd.f32 %v2713_v57, %v907_v50  ;;  %v1108_v55 = vadd.f32 %v2713_v57, %v1107_v51 }
 0x17f   :  { %v909_v56 = vpop.f32.mrf.mxu0  ;;  %v1109_v58 = vpop.f32.mrf.mxu1 }
 0x180   :  { %1714 = vst.msk [vmem:[%s3223_s3 + $0x78] sm:$0xf] %vm1683_vm0, %v2035_v52  ;;  %1764 = vst.msk [vmem:[%s3223_s3 + $0x140] sm:$0xf] %vm1683_vm0, %v2085_v53  ;;  %v1214_v59 = vmax.f32 %v908_v54, 0.0  ;;  %v1264_v60 = vmax.f32 %v1108_v55, 0.0 }
 0x181   :  { %v912_v61 = vpop.f32.mrf.mxu0  ;;  %v1112_v62 = vpop.f32.mrf.mxu1 }
 0x182   :  { %v2036_v63 = vpack.c.bf16 %v1214_v59, %v1214_v59  ;;  %v2086_v0 = vpack.c.bf16 %v1264_v60, %v1264_v60  ;;  %v913_v1 = vadd.f32 %v2713_v57, %v912_v61  ;;  %v1113_v2 = vadd.f32 %v2713_v57, %v1112_v62 }
 0x183   :  { %v914_v3 = vpop.f32.mrf.mxu0  ;;  %v1114_v4 = vpop.f32.mrf.mxu1 }
 0x184   :  { %1715 = vst.msk [vmem:[%s3223_s3 + $0x7c] sm:$0xf] %vm1683_vm0, %v2036_v63  ;;  %1765 = vst.msk [vmem:[%s3223_s3 + $0x144] sm:$0xf] %vm1683_vm0, %v2086_v0  ;;  %v1215_v5 = vmax.f32 %v913_v1, 0.0  ;;  %v1265_v6 = vmax.f32 %v1113_v2, 0.0 }
 0x185   :  { %v915_v7 = vpop.f32.mrf.mxu0  ;;  %v1115_v8 = vpop.f32.mrf.mxu1 }
 0x186   :  { %v2037_v9 = vpack.c.bf16 %v1215_v5, %v1215_v5  ;;  %v2087_v10 = vpack.c.bf16 %v1265_v6, %v1265_v6  ;;  %v916_v11 = vadd.f32 %v2713_v57, %v915_v7  ;;  %v1116_v12 = vadd.f32 %v2713_v57, %v1115_v8 }
 0x187   :  { %v917_v13 = vpop.f32.mrf.mxu0  ;;  %v1117_v14 = vpop.f32.mrf.mxu1 }
 0x188   :  { %1716 = vst.msk [vmem:[%s3223_s3 + $0x80] sm:$0xf] %vm1683_vm0, %v2037_v9  ;;  %1766 = vst.msk [vmem:[%s3223_s3 + $0x148] sm:$0xf] %vm1683_vm0, %v2087_v10  ;;  %v1216_v15 = vmax.f32 %v916_v11, 0.0  ;;  %v1266_v16 = vmax.f32 %v1116_v12, 0.0 }
 0x189   :  { %v920_v17 = vpop.f32.mrf.mxu0  ;;  %v1120_v18 = vpop.f32.mrf.mxu1 }
 0x18a   :  { %v2038_v19 = vpack.c.bf16 %v1216_v15, %v1216_v15  ;;  %v2088_v20 = vpack.c.bf16 %v1266_v16, %v1266_v16  ;;  %v921_v21 = vadd.f32 %v2713_v57, %v920_v17  ;;  %v1121_v22 = vadd.f32 %v2713_v57, %v1120_v18 }
 0x18b   :  { %v922_v23 = vpop.f32.mrf.mxu0  ;;  %v1122_v24 = vpop.f32.mrf.mxu1 }
 0x18c   :  { %1717 = vst.msk [vmem:[%s3223_s3 + $0x84] sm:$0xf] %vm1683_vm0, %v2038_v19  ;;  %1767 = vst.msk [vmem:[%s3223_s3 + $0x14c] sm:$0xf] %vm1683_vm0, %v2088_v20  ;;  %v1217_v25 = vmax.f32 %v921_v21, 0.0  ;;  %v1267_v26 = vmax.f32 %v1121_v22, 0.0 }
 0x18d   :  { %v923_v27 = vpop.f32.mrf.mxu0  ;;  %v1123_v28 = vpop.f32.mrf.mxu1 }
 0x18e   :  { %v2039_v29 = vpack.c.bf16 %v1217_v25, %v1217_v25  ;;  %v2089_v30 = vpack.c.bf16 %v1267_v26, %v1267_v26  ;;  %v924_v31 = vadd.f32 %v2713_v57, %v923_v27  ;;  %v1124_v32 = vadd.f32 %v2713_v57, %v1123_v28 }
 0x18f   :  { %v925_v33 = vpop.f32.mrf.mxu0  ;;  %v1125_v34 = vpop.f32.mrf.mxu1 }
 0x190   :  { %1718 = vst.msk [vmem:[%s3223_s3 + $0x88] sm:$0xf] %vm1683_vm0, %v2039_v29  ;;  %1768 = vst.msk [vmem:[%s3223_s3 + $0x150] sm:$0xf] %vm1683_vm0, %v2089_v30  ;;  %v1218_v35 = vmax.f32 %v924_v31, 0.0  ;;  %v1268_v36 = vmax.f32 %v1124_v32, 0.0 }
 0x191   :  { %v928_v37 = vpop.f32.mrf.mxu0  ;;  %v1128_v38 = vpop.f32.mrf.mxu1 }
 0x192   :  { %v2040_v39 = vpack.c.bf16 %v1218_v35, %v1218_v35  ;;  %v2090_v40 = vpack.c.bf16 %v1268_v36, %v1268_v36  ;;  %v929_v41 = vadd.f32 %v2713_v57, %v928_v37  ;;  %v1129_v42 = vadd.f32 %v2713_v57, %v1128_v38 }
 0x193   :  { %v930_v43 = vpop.f32.mrf.mxu0  ;;  %v1130_v44 = vpop.f32.mrf.mxu1 }
 0x194   :  { %1719 = vst.msk [vmem:[%s3223_s3 + $0x8c] sm:$0xf] %vm1683_vm0, %v2040_v39  ;;  %1769 = vst.msk [vmem:[%s3223_s3 + $0x154] sm:$0xf] %vm1683_vm0, %v2090_v40  ;;  %v1219_v45 = vmax.f32 %v929_v41, 0.0  ;;  %v1269_v46 = vmax.f32 %v1129_v42, 0.0 }
 0x195   :  { %v931_v47 = vpop.f32.mrf.mxu0  ;;  %v1131_v48 = vpop.f32.mrf.mxu1 }
 0x196   :  { %v2041_v49 = vpack.c.bf16 %v1219_v45, %v1219_v45  ;;  %v2091_v50 = vpack.c.bf16 %v1269_v46, %v1269_v46  ;;  %v932_v51 = vadd.f32 %v2713_v57, %v931_v47  ;;  %v1132_v52 = vadd.f32 %v2713_v57, %v1131_v48 }
 0x197   :  { %v933_v53 = vpop.f32.mrf.mxu0  ;;  %v1133_v54 = vpop.f32.mrf.mxu1 }
 0x198   :  { %1720 = vst.msk [vmem:[%s3223_s3 + $0x90] sm:$0xf] %vm1683_vm0, %v2041_v49  ;;  %1770 = vst.msk [vmem:[%s3223_s3 + $0x158] sm:$0xf] %vm1683_vm0, %v2091_v50  ;;  %v1220_v55 = vmax.f32 %v932_v51, 0.0  ;;  %v1270_v56 = vmax.f32 %v1132_v52, 0.0 }
 0x199   :  { %v936_v58 = vpop.f32.mrf.mxu0  ;;  %v1136_v59 = vpop.f32.mrf.mxu1 }
 0x19a   :  { %v2042_v60 = vpack.c.bf16 %v1220_v55, %v1220_v55  ;;  %v2092_v61 = vpack.c.bf16 %v1270_v56, %v1270_v56  ;;  %v937_v62 = vadd.f32 %v2713_v57, %v936_v58  ;;  %v1137_v63 = vadd.f32 %v2713_v57, %v1136_v59 }
 0x19b   :  { %v938_v0 = vpop.f32.mrf.mxu0  ;;  %v1138_v1 = vpop.f32.mrf.mxu1 }
 0x19c   :  { %1721 = vst.msk [vmem:[%s3223_s3 + $0x94] sm:$0xf] %vm1683_vm0, %v2042_v60  ;;  %1771 = vst.msk [vmem:[%s3223_s3 + $0x15c] sm:$0xf] %vm1683_vm0, %v2092_v61  ;;  %v1221_v2 = vmax.f32 %v937_v62, 0.0  ;;  %v1271_v3 = vmax.f32 %v1137_v63, 0.0 }
 0x19d   :  { %v939_v4 = vpop.f32.mrf.mxu0  ;;  %v1139_v5 = vpop.f32.mrf.mxu1 }
 0x19e   :  { %v2043_v6 = vpack.c.bf16 %v1221_v2, %v1221_v2  ;;  %v2093_v7 = vpack.c.bf16 %v1271_v3, %v1271_v3  ;;  %v940_v8 = vadd.f32 %v2713_v57, %v939_v4  ;;  %v1140_v9 = vadd.f32 %v2713_v57, %v1139_v5 }
 0x19f   :  { %v941_v10 = vpop.f32.mrf.mxu0  ;;  %v1141_v11 = vpop.f32.mrf.mxu1 }
 0x1a0   :  { %1722 = vst.msk [vmem:[%s3223_s3 + $0x98] sm:$0xf] %vm1683_vm0, %v2043_v6  ;;  %1772 = vst.msk [vmem:[%s3223_s3 + $0x160] sm:$0xf] %vm1683_vm0, %v2093_v7  ;;  %v1222_v12 = vmax.f32 %v940_v8, 0.0  ;;  %v1272_v13 = vmax.f32 %v1140_v9, 0.0 }
 0x1a1   :  { %v944_v14 = vpop.f32.mrf.mxu0  ;;  %v1144_v15 = vpop.f32.mrf.mxu1 }
 0x1a2   :  { %v2044_v16 = vpack.c.bf16 %v1222_v12, %v1222_v12  ;;  %v2094_v17 = vpack.c.bf16 %v1272_v13, %v1272_v13  ;;  %v945_v18 = vadd.f32 %v2713_v57, %v944_v14  ;;  %v1145_v19 = vadd.f32 %v2713_v57, %v1144_v15 }
 0x1a3   :  { %v946_v20 = vpop.f32.mrf.mxu0  ;;  %v1146_v21 = vpop.f32.mrf.mxu1 }
 0x1a4   :  { %1723 = vst.msk [vmem:[%s3223_s3 + $0x9c] sm:$0xf] %vm1683_vm0, %v2044_v16  ;;  %1773 = vst.msk [vmem:[%s3223_s3 + $0x164] sm:$0xf] %vm1683_vm0, %v2094_v17  ;;  %v1223_v22 = vmax.f32 %v945_v18, 0.0  ;;  %v1273_v23 = vmax.f32 %v1145_v19, 0.0 }
 0x1a5   :  { %v947_v24 = vpop.f32.mrf.mxu0  ;;  %v1147_v25 = vpop.f32.mrf.mxu1 }
 0x1a6   :  { %v2045_v26 = vpack.c.bf16 %v1223_v22, %v1223_v22  ;;  %v2095_v27 = vpack.c.bf16 %v1273_v23, %v1273_v23  ;;  %v948_v28 = vadd.f32 %v2713_v57, %v947_v24  ;;  %v1148_v29 = vadd.f32 %v2713_v57, %v1147_v25 }
 0x1a7   :  { %v949_v30 = vpop.f32.mrf.mxu0  ;;  %v1149_v31 = vpop.f32.mrf.mxu1 }
 0x1a8   :  { %1724 = vst.msk [vmem:[%s3223_s3 + $0xa0] sm:$0xf] %vm1683_vm0, %v2045_v26  ;;  %1774 = vst.msk [vmem:[%s3223_s3 + $0x168] sm:$0xf] %vm1683_vm0, %v2095_v27  ;;  %v1224_v32 = vmax.f32 %v948_v28, 0.0  ;;  %v1274_v33 = vmax.f32 %v1148_v29, 0.0 }
 0x1a9   :  { %v952_v34 = vpop.f32.mrf.mxu0  ;;  %v1152_v35 = vpop.f32.mrf.mxu1 }
 0x1aa   :  { %v2046_v36 = vpack.c.bf16 %v1224_v32, %v1224_v32  ;;  %v2096_v37 = vpack.c.bf16 %v1274_v33, %v1274_v33  ;;  %v953_v38 = vadd.f32 %v2713_v57, %v952_v34  ;;  %v1153_v39 = vadd.f32 %v2713_v57, %v1152_v35  ;;  %v3140_v57 = vld [vmem:[%s3222_s2] ss:$0 sm:$0xff] }
 0x1ab   :  { %v954_v40 = vpop.f32.mrf.mxu0  ;;  %v1154_v41 = vpop.f32.mrf.mxu1 }
 0x1ac   :  { %1725 = vst.msk [vmem:[%s3223_s3 + $0xa4] sm:$0xf] %vm1683_vm0, %v2046_v36  ;;  %1775 = vst.msk [vmem:[%s3223_s3 + $0x16c] sm:$0xf] %vm1683_vm0, %v2096_v37  ;;  %v1225_v42 = vmax.f32 %v953_v38, 0.0  ;;  %v1275_v43 = vmax.f32 %v1153_v39, 0.0 }
 0x1ad   :  { %v955_v44 = vpop.f32.mrf.mxu0  ;;  %v1155_v45 = vpop.f32.mrf.mxu1 }
 0x1ae   :  { %v2047_v46 = vpack.c.bf16 %v1225_v42, %v1225_v42  ;;  %v2097_v47 = vpack.c.bf16 %v1275_v43, %v1275_v43  ;;  %v956_v48 = vadd.f32 %v3140_v57, %v955_v44  ;;  %v1156_v49 = vadd.f32 %v3140_v57, %v1155_v45 }
 0x1af   :  { %v957_v50 = vpop.f32.mrf.mxu0  ;;  %v1157_v51 = vpop.f32.mrf.mxu1 }
 0x1b0   :  { %1726 = vst.msk [vmem:[%s3223_s3 + $0xa8] sm:$0xf] %vm1683_vm0, %v2047_v46  ;;  %1776 = vst.msk [vmem:[%s3223_s3 + $0x170] sm:$0xf] %vm1683_vm0, %v2097_v47  ;;  %v1226_v52 = vmax.f32 %v956_v48, 0.0  ;;  %v1276_v53 = vmax.f32 %v1156_v49, 0.0 }
 0x1b1   :  { %v960_v54 = vpop.f32.mrf.mxu0  ;;  %v1160_v55 = vpop.f32.mrf.mxu1 }
 0x1b2   :  { %v2048_v56 = vpack.c.bf16 %v1226_v52, %v1226_v52  ;;  %v2098_v58 = vpack.c.bf16 %v1276_v53, %v1276_v53  ;;  %v961_v59 = vadd.f32 %v3140_v57, %v960_v54  ;;  %v1161_v60 = vadd.f32 %v3140_v57, %v1160_v55 }
 0x1b3   :  { %v962_v61 = vpop.f32.mrf.mxu0  ;;  %v1162_v62 = vpop.f32.mrf.mxu1 }
 0x1b4   :  { %1727 = vst.msk [vmem:[%s3223_s3 + $0xac] sm:$0xf] %vm1683_vm0, %v2048_v56  ;;  %1777 = vst.msk [vmem:[%s3223_s3 + $0x174] sm:$0xf] %vm1683_vm0, %v2098_v58  ;;  %v1227_v63 = vmax.f32 %v961_v59, 0.0  ;;  %v1277_v0 = vmax.f32 %v1161_v60, 0.0 }
 0x1b5   :  { %v963_v1 = vpop.f32.mrf.mxu0  ;;  %v1163_v2 = vpop.f32.mrf.mxu1 }
 0x1b6   :  { %v2049_v3 = vpack.c.bf16 %v1227_v63, %v1227_v63  ;;  %v2099_v4 = vpack.c.bf16 %v1277_v0, %v1277_v0  ;;  %v964_v5 = vadd.f32 %v3140_v57, %v963_v1  ;;  %v1164_v6 = vadd.f32 %v3140_v57, %v1163_v2 }
 0x1b7   :  { %v965_v7 = vpop.f32.mrf.mxu0  ;;  %v1165_v8 = vpop.f32.mrf.mxu1 }
 0x1b8   :  { %1728 = vst.msk [vmem:[%s3223_s3 + $0xb0] sm:$0xf] %vm1683_vm0, %v2049_v3  ;;  %1778 = vst.msk [vmem:[%s3223_s3 + $0x178] sm:$0xf] %vm1683_vm0, %v2099_v4  ;;  %v1228_v9 = vmax.f32 %v964_v5, 0.0  ;;  %v1278_v10 = vmax.f32 %v1164_v6, 0.0 }
 0x1b9   :  { %v968_v11 = vpop.f32.mrf.mxu0  ;;  %v1168_v12 = vpop.f32.mrf.mxu1 }
 0x1ba   :  { %v2050_v13 = vpack.c.bf16 %v1228_v9, %v1228_v9  ;;  %v2100_v14 = vpack.c.bf16 %v1278_v10, %v1278_v10  ;;  %v969_v15 = vadd.f32 %v3140_v57, %v968_v11  ;;  %v1169_v16 = vadd.f32 %v3140_v57, %v1168_v12 }
 0x1bb   :  { %v970_v17 = vpop.f32.mrf.mxu0  ;;  %v1170_v18 = vpop.f32.mrf.mxu1 }
 0x1bc   :  { %1729 = vst.msk [vmem:[%s3223_s3 + $0xb4] sm:$0xf] %vm1683_vm0, %v2050_v13  ;;  %1779 = vst.msk [vmem:[%s3223_s3 + $0x17c] sm:$0xf] %vm1683_vm0, %v2100_v14  ;;  %v1229_v19 = vmax.f32 %v969_v15, 0.0  ;;  %v1279_v20 = vmax.f32 %v1169_v16, 0.0 }
 0x1bd   :  { %v971_v21 = vpop.f32.mrf.mxu0  ;;  %v1171_v22 = vpop.f32.mrf.mxu1 }
 0x1be   :  { %v2051_v23 = vpack.c.bf16 %v1229_v19, %v1229_v19  ;;  %v2101_v24 = vpack.c.bf16 %v1279_v20, %v1279_v20  ;;  %v972_v25 = vadd.f32 %v3140_v57, %v971_v21  ;;  %v1172_v26 = vadd.f32 %v3140_v57, %v1171_v22 }
 0x1bf   :  { %v973_v27 = vpop.f32.mrf.mxu0  ;;  %v1173_v28 = vpop.f32.mrf.mxu1 }
 0x1c0   :  { %1730 = vst.msk [vmem:[%s3223_s3 + $0xb8] sm:$0xf] %vm1683_vm0, %v2051_v23  ;;  %1780 = vst.msk [vmem:[%s3223_s3 + $0x180] sm:$0xf] %vm1683_vm0, %v2101_v24  ;;  %v1230_v29 = vmax.f32 %v972_v25, 0.0  ;;  %v1280_v30 = vmax.f32 %v1172_v26, 0.0 }
 0x1c1   :  { %v976_v31 = vpop.f32.mrf.mxu0  ;;  %v1176_v32 = vpop.f32.mrf.mxu1 }
 0x1c2   :  { %v2052_v33 = vpack.c.bf16 %v1230_v29, %v1230_v29  ;;  %v2102_v34 = vpack.c.bf16 %v1280_v30, %v1280_v30  ;;  %v977_v35 = vadd.f32 %v3140_v57, %v976_v31  ;;  %v1177_v36 = vadd.f32 %v3140_v57, %v1176_v32 }
 0x1c3   :  { %v978_v37 = vpop.f32.mrf.mxu0  ;;  %v1178_v38 = vpop.f32.mrf.mxu1 }
 0x1c4   :  { %1731 = vst.msk [vmem:[%s3223_s3 + $0xbc] sm:$0xf] %vm1683_vm0, %v2052_v33  ;;  %1781 = vst.msk [vmem:[%s3223_s3 + $0x184] sm:$0xf] %vm1683_vm0, %v2102_v34  ;;  %v1231_v39 = vmax.f32 %v977_v35, 0.0  ;;  %v1281_v40 = vmax.f32 %v1177_v36, 0.0 }
 0x1c5   :  { %v979_v41 = vpop.f32.mrf.mxu0  ;;  %v1179_v42 = vpop.f32.mrf.mxu1 }
 0x1c6   :  { %v2053_v43 = vpack.c.bf16 %v1231_v39, %v1231_v39  ;;  %v2103_v44 = vpack.c.bf16 %v1281_v40, %v1281_v40  ;;  %v980_v45 = vadd.f32 %v3140_v57, %v979_v41  ;;  %v1180_v46 = vadd.f32 %v3140_v57, %v1179_v42 }
 0x1c7   :  { %v981_v47 = vpop.f32.mrf.mxu0  ;;  %v1181_v48 = vpop.f32.mrf.mxu1 }
 0x1c8   :  { %1732 = vst.msk [vmem:[%s3223_s3 + $0xc0] sm:$0xf] %vm1683_vm0, %v2053_v43  ;;  %1782 = vst.msk [vmem:[%s3223_s3 + $0x188] sm:$0xf] %vm1683_vm0, %v2103_v44  ;;  %v1232_v49 = vmax.f32 %v980_v45, 0.0  ;;  %v1282_v50 = vmax.f32 %v1180_v46, 0.0 }
 0x1ca   :  { %v2054_v51 = vpack.c.bf16 %v1232_v49, %v1232_v49  ;;  %v2104_v52 = vpack.c.bf16 %v1282_v50, %v1282_v50 }
 0x1cc   :  { %1733 = vst.msk [vmem:[%s3223_s3 + $0xc4] sm:$0xf] %vm1683_vm0, %v2054_v51  ;;  %1783 = vst.msk [vmem:[%s3223_s3 + $0x18c] sm:$0xf] %vm1683_vm0, %v2104_v52 }

// kernel: actor_critic_forward.5
= control target key start
LH: loop header
LB: loop body
LE: loop exit
PB: predicated region body
PF: predicated region fallthrough
CT: control target
= control target key end

     0   :  { %vm880_vm0 = vcmask 519168   ;;  %vm901_vm1 = vcmask 516096   ;;  %s1637_s1 = inlined_call_operand.vmem [shape: bf16[512,64], index: 1, kind: input, shape index: {}]   ;;  %s1638_s0 = inlined_call_operand.vmem [shape: bf16[162,512], index: 0, kind: input, shape index: {}]   ;;  %s1639_s2 = inlined_call_operand.vmem [shape: f32[1,64], index: 2, kind: input, shape index: {}]   ;;  %s1640_s3 = inlined_call_operand.vmem [shape: bf16[162,64], index: 3, kind: output, shape index: {}]  }
   0x1   :  { %v1190_v0 = vld [vmem:[%s1637_s1 + $0x78] sm:$0xff]   ;;  %v1194_v4 = vld [vmem:[%s1637_s1 + $0x70] sm:$0xff]   ;;  %v1198_v8 = vld [vmem:[%s1637_s1 + $0x68] sm:$0xff]  }
   0x2   :  { %v1191_v1 = vld [vmem:[%s1637_s1 + $0xf8] sm:$0xff]   ;;  %1026 = vmatprep.subr.bf16.mxu0 %v1190_v0  ;;  %v1195_v5 = vld [vmem:[%s1637_s1 + $0xf0] sm:$0xff]   ;;  %v1199_v9 = vld [vmem:[%s1637_s1 + $0xe8] sm:$0xff]  }
   0x3   :  { %v1192_v2 = vld [vmem:[%s1637_s1 + $0x38] sm:$0xff]   ;;  %1108 = vmatprep.subr.bf16.mxu1 %v1191_v1  ;;  %v1196_v6 = vld [vmem:[%s1637_s1 + $0x30] sm:$0xff]   ;;  %v1200_v10 = vld [vmem:[%s1637_s1 + $0x28] sm:$0xff]  }
   0x4   :  { %v1193_v3 = vld [vmem:[%s1637_s1 + $0xb8] sm:$0xff]   ;;  %1027 = vmatpush3.bf16.msra.mxu0 %v1192_v2  ;;  %v1197_v7 = vld [vmem:[%s1637_s1 + $0xb0] sm:$0xff]   ;;  %v1201_v11 = vld [vmem:[%s1637_s1 + $0xa8] sm:$0xff]  }
   0x5   :  { %1109 = vmatpush3.bf16.msra.mxu1 %v1193_v3  ;;  %1028 = vmatprep.subr.bf16.mxu0 %v1194_v4  ;;  %v1202_v12 = vld [vmem:[%s1637_s1 + $0x60] sm:$0xff]   ;;  %v1206_v16 = vld [vmem:[%s1637_s1 + $0x58] sm:$0xff]   ;;  %v1210_v20 = vld [vmem:[%s1637_s1 + $0x50] sm:$0xff]  }
   0x6   :  { %1110 = vmatprep.subr.bf16.mxu1 %v1195_v5  ;;  %v1203_v13 = vld [vmem:[%s1637_s1 + $0xe0] sm:$0xff]   ;;  %v1207_v17 = vld [vmem:[%s1637_s1 + $0xd8] sm:$0xff]   ;;  %v1211_v21 = vld [vmem:[%s1637_s1 + $0xd0] sm:$0xff]  }
   0x7   :  { %v1204_v14 = vld [vmem:[%s1637_s1 + $0x20] sm:$0xff]   ;;  %v1208_v18 = vld [vmem:[%s1637_s1 + $0x18] sm:$0xff]   ;;  %v1212_v22 = vld [vmem:[%s1637_s1 + $0x10] sm:$0xff]  }
   0x8   :  { %1029 = vmatpush3.bf16.msra.mxu0 %v1196_v6  ;;  %v1205_v15 = vld [vmem:[%s1637_s1 + $0xa0] sm:$0xff]   ;;  %v1209_v19 = vld [vmem:[%s1637_s1 + $0x98] sm:$0xff]   ;;  %v1213_v23 = vld [vmem:[%s1637_s1 + $0x90] sm:$0xff]  }
   0x9   :  { %1111 = vmatpush3.bf16.msra.mxu1 %v1197_v7  ;;  %1030 = vmatprep.subr.bf16.mxu0 %v1198_v8  ;;  %v1214_v24 = vld [vmem:[%s1637_s1 + $0x48] sm:$0xff]   ;;  %v1218_v28 = vld [vmem:[%s1637_s1 + $0x40] sm:$0xff]  }
   0xa   :  { %1112 = vmatprep.subr.bf16.mxu1 %v1199_v9  ;;  %v1215_v25 = vld [vmem:[%s1637_s1 + $0xc8] sm:$0xff]   ;;  %v1219_v29 = vld [vmem:[%s1637_s1 + $0xc0] sm:$0xff]  }
   0xb   :  { %v1216_v26 = vld [vmem:[%s1637_s1 + $0x8] sm:$0xff]   ;;  %v1220_v30 = vld [vmem:[%s1637_s1] sm:$0xff]  }
   0xc   :  { %1031 = vmatpush3.bf16.msra.mxu0 %v1200_v10  ;;  %v1217_v27 = vld [vmem:[%s1637_s1 + $0x88] sm:$0xff]   ;;  %v1221_v31 = vld [vmem:[%s1637_s1 + $0x80] sm:$0xff]  }
   0xd   :  { %1113 = vmatpush3.bf16.msra.mxu1 %v1201_v11  ;;  %1032 = vmatprep.subr.bf16.mxu0 %v1202_v12  ;;  %v1222_v32 = vld [vmem:[%s1638_s0] ss:$16 sps:$4 sm:$0xff]   ;;  %v1224_v33 = vld [vmem:[%s1638_s0 + $0x4] ss:$16 sps:$4 sm:$0xff]   ;;  %v1225_v34 = vld [vmem:[%s1638_s0 + $0x8] ss:$16 sps:$4 sm:$0xff]  }
   0xe   :  { %1114 = vmatprep.subr.bf16.mxu1 %v1203_v13  ;;  %v1227_v35 = vld [vmem:[%s1638_s0 + $0xc] ss:$16 sps:$4 sm:$0xff]   ;;  %566 = vmatprep.mubr.bf16.mxu0 %v1224_v33  ;;  %v1228_v36 = vld [vmem:[%s1638_s0 + $0x24] ss:$16 sps:$4 sm:$0xff]   ;;  %v1232_v38 = vld [vmem:[%s1638_s0 + $0x20] ss:$16 sps:$4 sm:$0xff]  }
   0xf   :  { %686 = vmatprep.mubr.bf16.mxu1 %v1227_v35  ;;  %v1230_v37 = vld [vmem:[%s1638_s0 + $0x2c] ss:$16 sps:$4 sm:$0xff]   ;;  %v1233_v39 = vld [vmem:[%s1638_s0 + $0x28] ss:$16 sps:$4 sm:$0xff]   ;;  %v1234_v40 = vld [vmem:[%s1638_s0 + $0x44] ss:$16 sps:$4 sm:$0xff]  }
  0x10   :  { %1033 = vmatpush3.bf16.msra.mxu0 %v1204_v14  ;;  %v1236_v41 = vld [vmem:[%s1638_s0 + $0x4c] ss:$16 sps:$4 sm:$0xff]   ;;  %v1238_v42 = vld [vmem:[%s1638_s0 + $0x40] ss:$16 sps:$4 sm:$0xff]   ;;  %v1239_v43 = vld [vmem:[%s1638_s0 + $0x48] ss:$16 sps:$4 sm:$0xff]  }
  0x11   :  { %1115 = vmatpush3.bf16.msra.mxu1 %v1205_v15  ;;  %1034 = vmatprep.subr.bf16.mxu0 %v1206_v16  ;;  %v1240_v44 = vld [vmem:[%s1638_s0 + $0x64] ss:$16 sps:$4 sm:$0xff]   ;;  %v1242_v45 = vld [vmem:[%s1638_s0 + $0x6c] ss:$16 sps:$4 sm:$0xff]   ;;  %v1244_v46 = vld [vmem:[%s1638_s0 + $0x60] ss:$16 sps:$4 sm:$0xff]  }
  0x12   :  { %1116 = vmatprep.subr.bf16.mxu1 %v1207_v17  ;;  %v1245_v47 = vld [vmem:[%s1638_s0 + $0x68] ss:$16 sps:$4 sm:$0xff]   ;;  %v1246_v48 = vld [vmem:[%s1638_s0 + $0x84] ss:$16 sps:$4 sm:$0xff]   ;;  %v1248_v49 = vld [vmem:[%s1638_s0 + $0x8c] ss:$16 sps:$4 sm:$0xff]  }
  0x13   :  { %v1250_v50 = vld [vmem:[%s1638_s0 + $0x80] ss:$16 sps:$4 sm:$0xff]   ;;  %v1251_v51 = vld [vmem:[%s1638_s0 + $0x88] ss:$16 sps:$4 sm:$0xff]   ;;  %v1252_v52 = vld [vmem:[%s1638_s0 + $0xa4] ss:$16 sps:$4 sm:$0xff]  }
  0x14   :  { %1035 = vmatpush3.bf16.msra.mxu0 %v1208_v18  ;;  %v1254_v53 = vld [vmem:[%s1638_s0 + $0xac] ss:$16 sps:$4 sm:$0xff]   ;;  %v1256_v54 = vld [vmem:[%s1638_s0 + $0xa0] ss:$16 sps:$4 sm:$0xff]   ;;  %v1257_v55 = vld [vmem:[%s1638_s0 + $0xa8] ss:$16 sps:$4 sm:$0xff]  }
  0x15   :  { %1117 = vmatpush3.bf16.msra.mxu1 %v1209_v19  ;;  %1036 = vmatprep.subr.bf16.mxu0 %v1210_v20  ;;  %v1258_v56 = vld [vmem:[%s1638_s0 + $0xc4] ss:$16 sps:$4 sm:$0xff]   ;;  %v1260_v57 = vld [vmem:[%s1638_s0 + $0xcc] ss:$16 sps:$4 sm:$0xff]   ;;  %v1262_v58 = vld [vmem:[%s1638_s0 + $0xc0] ss:$16 sps:$4 sm:$0xff]  }
  0x16   :  { %1118 = vmatprep.subr.bf16.mxu1 %v1211_v21  ;;  %v1263_v59 = vld [vmem:[%s1638_s0 + $0xc8] ss:$16 sps:$4 sm:$0xff]   ;;  %v1264_v60 = vld [vmem:[%s1638_s0 + $0xe4] ss:$16 sps:$4 sm:$0xff]   ;;  %v1266_v61 = vld [vmem:[%s1638_s0 + $0xec] ss:$16 sps:$4 sm:$0xff]  }
  0x17   :  { %v1268_v62 = vld [vmem:[%s1638_s0 + $0xe0] ss:$16 sps:$4 sm:$0xff]   ;;  %v1269_v63 = vld [vmem:[%s1638_s0 + $0xe8] ss:$16 sps:$4 sm:$0xff]   ;;  %v1270_v0 = vld [vmem:[%s1638_s0 + $0x104] ss:$16 sps:$4 sm:$0xff]  }
  0x18   :  { %1037 = vmatpush3.bf16.msra.mxu0 %v1212_v22  ;;  %v1272_v1 = vld [vmem:[%s1638_s0 + $0x10c] ss:$16 sps:$4 sm:$0xff]   ;;  %v1274_v2 = vld [vmem:[%s1638_s0 + $0x100] ss:$16 sps:$4 sm:$0xff]   ;;  %v1275_v3 = vld [vmem:[%s1638_s0 + $0x108] ss:$16 sps:$4 sm:$0xff]  }
  0x19   :  { %1119 = vmatpush3.bf16.msra.mxu1 %v1213_v23  ;;  %1038 = vmatprep.subr.bf16.mxu0 %v1214_v24  ;;  %v1276_v4 = vld [vmem:[%s1638_s0 + $0x124] ss:$16 sps:$4 sm:$0xff]   ;;  %v1278_v5 = vld [vmem:[%s1638_s0 + $0x12c] ss:$16 sps:$4 sm:$0xff]   ;;  %v1280_v8 = vld [vmem:[%s1638_s0 + $0x120] ss:$16 sps:$4 sm:$0xff]  }
  0x1a   :  { %1120 = vmatprep.subr.bf16.mxu1 %v1215_v25  ;;  %v55_v6 = vld [vmem:[%s1638_s0 + $0x140] sm:$0x11]  ;;  %v56_v7 = vld [vmem:[%s1638_s0 + $0x148] sm:$0x11] }
  0x1b   :  { %v1281_v9 = vld [vmem:[%s1638_s0 + $0x128] ss:$16 sps:$4 sm:$0xff]   ;;  %v949_v10 = vcombine.high %v55_v6, %v55_v6  ;;  %v951_v11 = vcombine.high %v56_v7, %v56_v7  ;;  %v948_v12 = vcombine.low %v55_v6, %v55_v6  ;;  %v950_v13 = vcombine.low %v56_v7, %v56_v7  ;;  %v1531_v16 = vld [vmem:[%s1639_s2] ss:$0 sm:$0xff] }
  0x1c   :  { %1039 = vmatpush3.bf16.msra.mxu0 %v1216_v26 }
  0x1d   :  { %1121 = vmatpush3.bf16.msra.mxu1 %v1217_v27  ;;  %1040 = vmatprep.subr.bf16.mxu0 %v1218_v28 }
  0x1e   :  { %1122 = vmatprep.subr.bf16.mxu1 %v1219_v29 }
  0x20   :  { %1041 = vmatpush3.bf16.msra.mxu0 %v1220_v30 }
  0x21   :  { %1123 = vmatpush3.bf16.msra.mxu1 %v1221_v31 }
  0x23   :  { %567 = vmatmul.mubr.bf16.vlgmr.msra.gmra.mxu0 %v1222_v32 }
  0x24   :  { %687 = vmatmul.mubr.bf16.vlgmr.msra.gmra.mxu1 %v1225_v34  ;;  %574 = vmatprep.mubr.bf16.mxu0 %v1228_v36 }
  0x25   :  { %694 = vmatprep.mubr.bf16.mxu1 %v1230_v37 }
  0x2b   :  { %575 = vmatmul.mubr.bf16.gmra.mxu0 %v1232_v38 }
  0x2c   :  { %695 = vmatmul.mubr.bf16.gmra.mxu1 %v1233_v39  ;;  %582 = vmatprep.mubr.bf16.mxu0 %v1234_v40 }
  0x2d   :  { %702 = vmatprep.mubr.bf16.mxu1 %v1236_v41 }
  0x33   :  { %583 = vmatmul.mubr.bf16.gmra.mxu0 %v1238_v42 }
  0x34   :  { %703 = vmatmul.mubr.bf16.gmra.mxu1 %v1239_v43  ;;  %590 = vmatprep.mubr.bf16.mxu0 %v1240_v44 }
  0x35   :  { %710 = vmatprep.mubr.bf16.mxu1 %v1242_v45 }
  0x3b   :  { %591 = vmatmul.mubr.bf16.gmra.mxu0 %v1244_v46 }
  0x3c   :  { %711 = vmatmul.mubr.bf16.gmra.mxu1 %v1245_v47  ;;  %598 = vmatprep.mubr.bf16.mxu0 %v1246_v48 }
  0x3d   :  { %718 = vmatprep.mubr.bf16.mxu1 %v1248_v49 }
  0x43   :  { %599 = vmatmul.mubr.bf16.gmra.mxu0 %v1250_v50 }
  0x44   :  { %719 = vmatmul.mubr.bf16.gmra.mxu1 %v1251_v51  ;;  %606 = vmatprep.mubr.bf16.mxu0 %v1252_v52 }
  0x45   :  { %726 = vmatprep.mubr.bf16.mxu1 %v1254_v53 }
  0x4b   :  { %607 = vmatmul.mubr.bf16.gmra.mxu0 %v1256_v54 }
  0x4c   :  { %727 = vmatmul.mubr.bf16.gmra.mxu1 %v1257_v55  ;;  %614 = vmatprep.mubr.bf16.mxu0 %v1258_v56 }
  0x4d   :  { %734 = vmatprep.mubr.bf16.mxu1 %v1260_v57 }
  0x53   :  { %615 = vmatmul.mubr.bf16.gmra.mxu0 %v1262_v58 }
  0x54   :  { %735 = vmatmul.mubr.bf16.gmra.mxu1 %v1263_v59  ;;  %622 = vmatprep.mubr.bf16.mxu0 %v1264_v60 }
  0x55   :  { %742 = vmatprep.mubr.bf16.mxu1 %v1266_v61 }
  0x5b   :  { %623 = vmatmul.mubr.bf16.gmra.mxu0 %v1268_v62 }
  0x5c   :  { %743 = vmatmul.mubr.bf16.gmra.mxu1 %v1269_v63  ;;  %630 = vmatprep.mubr.bf16.mxu0 %v1270_v0 }
  0x5d   :  { %750 = vmatprep.mubr.bf16.mxu1 %v1272_v1 }
  0x63   :  { %631 = vmatmul.mubr.bf16.gmra.mxu0 %v1274_v2 }
  0x64   :  { %751 = vmatmul.mubr.bf16.gmra.mxu1 %v1275_v3  ;;  %638 = vmatprep.mubr.bf16.mxu0 %v1276_v4 }
  0x65   :  { %758 = vmatprep.mubr.bf16.mxu1 %v1278_v5 }
  0x6b   :  { %639 = vmatmul.mubr.bf16.gmra.mxu0 %v1280_v8 }
  0x6c   :  { %759 = vmatmul.mubr.bf16.gmra.mxu1 %v1281_v9  ;;  %646 = vmatprep.mubr.bf16.mxu0 %v949_v10 }
  0x6d   :  { %766 = vmatprep.mubr.bf16.mxu1 %v951_v11 }
  0x73   :  { %647 = vmatmul.mubr.bf16.gmra.mxu0 %v948_v12 }
  0x74   :  { %767 = vmatmul.mubr.bf16.gmra.mxu1 %v950_v13 }
  0xe3   :  { %v1042_v14 = vpop.f32.mrf.mxu0 }
  0xe4   :  { %v1124_v15 = vpop.f32.mrf.mxu1 }
  0xe5   :  { %v1043_v17 = vpop.f32.mrf.mxu0 }
  0xe6   :  { %v1044_v18 = vadd.f32 %v1043_v17, %v1042_v14  ;;  %v1125_v19 = vpop.f32.mrf.mxu1 }
  0xe7   :  { %v1045_v20 = vpop.f32.mrf.mxu0  ;;  %v1126_v22 = vadd.f32 %v1125_v19, %v1124_v15 }
  0xe8   :  { %v569_v21 = vadd.f32 %v1044_v18, %v1531_v16  ;;  %v1127_v23 = vpop.f32.mrf.mxu1 }
  0xe9   :  { %v1046_v24 = vpop.f32.mrf.mxu0 }
  0xea   :  { %v689_v25 = vadd.f32 %v1126_v22, %v569_v21  ;;  %v1047_v26 = vadd.f32 %v1046_v24, %v1045_v20  ;;  %v1128_v27 = vpop.f32.mrf.mxu1 }
  0xeb   :  { %v1048_v28 = vpop.f32.mrf.mxu0  ;;  %v1129_v31 = vadd.f32 %v1128_v27, %v1127_v23 }
  0xec   :  { %v774_v29 = vmax.f32 %v689_v25, 0.0  ;;  %v572_v30 = vadd.f32 %v1047_v26, %v1531_v16  ;;  %v1130_v32 = vpop.f32.mrf.mxu1 }
  0xed   :  { %v1049_v33 = vpop.f32.mrf.mxu0 }
  0xee   :  { %v1005_v34 = vpack.c.bf16 %v774_v29, %v774_v29  ;;  %v692_v35 = vadd.f32 %v1129_v31, %v572_v30  ;;  %v1050_v36 = vadd.f32 %v1049_v33, %v1048_v28  ;;  %v1131_v37 = vpop.f32.mrf.mxu1 }
  0xef   :  { %v1051_v38 = vpop.f32.mrf.mxu0  ;;  %v1132_v41 = vadd.f32 %v1131_v37, %v1130_v32 }
  0xf0   :  { %881 = vst.msk [vmem:[%s1640_s3] sm:$0xf] %vm880_vm0, %v1005_v34  ;;  %v775_v39 = vmax.f32 %v692_v35, 0.0  ;;  %v577_v40 = vadd.f32 %v1050_v36, %v1531_v16  ;;  %v1133_v42 = vpop.f32.mrf.mxu1 }
  0xf1   :  { %v1052_v43 = vpop.f32.mrf.mxu0 }
  0xf2   :  { %v1006_v44 = vpack.c.bf16 %v775_v39, %v775_v39  ;;  %v697_v45 = vadd.f32 %v1132_v41, %v577_v40  ;;  %v1053_v46 = vadd.f32 %v1052_v43, %v1051_v38  ;;  %v1134_v47 = vpop.f32.mrf.mxu1 }
  0xf3   :  { %v1054_v48 = vpop.f32.mrf.mxu0  ;;  %v1135_v51 = vadd.f32 %v1134_v47, %v1133_v42 }
  0xf4   :  { %882 = vst.msk [vmem:[%s1640_s3 + $0x4] sm:$0xf] %vm880_vm0, %v1006_v44  ;;  %v776_v49 = vmax.f32 %v697_v45, 0.0  ;;  %v580_v50 = vadd.f32 %v1053_v46, %v1531_v16  ;;  %v1136_v52 = vpop.f32.mrf.mxu1 }
  0xf5   :  { %v1055_v53 = vpop.f32.mrf.mxu0 }
  0xf6   :  { %v1007_v54 = vpack.c.bf16 %v776_v49, %v776_v49  ;;  %v700_v55 = vadd.f32 %v1135_v51, %v580_v50  ;;  %v1056_v56 = vadd.f32 %v1055_v53, %v1054_v48  ;;  %v1137_v57 = vpop.f32.mrf.mxu1 }
  0xf7   :  { %v1057_v58 = vpop.f32.mrf.mxu0  ;;  %v1138_v61 = vadd.f32 %v1137_v57, %v1136_v52 }
  0xf8   :  { %883 = vst.msk [vmem:[%s1640_s3 + $0x8] sm:$0xf] %vm880_vm0, %v1007_v54  ;;  %v777_v59 = vmax.f32 %v700_v55, 0.0  ;;  %v585_v60 = vadd.f32 %v1056_v56, %v1531_v16  ;;  %v1139_v62 = vpop.f32.mrf.mxu1 }
  0xf9   :  { %v1058_v63 = vpop.f32.mrf.mxu0 }
  0xfa   :  { %v1008_v0 = vpack.c.bf16 %v777_v59, %v777_v59  ;;  %v705_v1 = vadd.f32 %v1138_v61, %v585_v60  ;;  %v1059_v2 = vadd.f32 %v1058_v63, %v1057_v58  ;;  %v1140_v3 = vpop.f32.mrf.mxu1 }
  0xfb   :  { %v1060_v4 = vpop.f32.mrf.mxu0  ;;  %v1141_v7 = vadd.f32 %v1140_v3, %v1139_v62 }
  0xfc   :  { %884 = vst.msk [vmem:[%s1640_s3 + $0xc] sm:$0xf] %vm880_vm0, %v1008_v0  ;;  %v778_v5 = vmax.f32 %v705_v1, 0.0  ;;  %v588_v6 = vadd.f32 %v1059_v2, %v1531_v16  ;;  %v1142_v8 = vpop.f32.mrf.mxu1 }
  0xfd   :  { %v1061_v9 = vpop.f32.mrf.mxu0 }
  0xfe   :  { %v1009_v10 = vpack.c.bf16 %v778_v5, %v778_v5  ;;  %v708_v11 = vadd.f32 %v1141_v7, %v588_v6  ;;  %v1062_v12 = vadd.f32 %v1061_v9, %v1060_v4  ;;  %v1143_v13 = vpop.f32.mrf.mxu1 }
  0xff   :  { %v1063_v14 = vpop.f32.mrf.mxu0  ;;  %v1144_v18 = vadd.f32 %v1143_v13, %v1142_v8 }
 0x100   :  { %885 = vst.msk [vmem:[%s1640_s3 + $0x10] sm:$0xf] %vm880_vm0, %v1009_v10  ;;  %v779_v15 = vmax.f32 %v708_v11, 0.0  ;;  %v593_v17 = vadd.f32 %v1062_v12, %v1531_v16  ;;  %v1145_v19 = vpop.f32.mrf.mxu1 }
 0x101   :  { %v1064_v20 = vpop.f32.mrf.mxu0 }
 0x102   :  { %v1010_v21 = vpack.c.bf16 %v779_v15, %v779_v15  ;;  %v713_v22 = vadd.f32 %v1144_v18, %v593_v17  ;;  %v1065_v23 = vadd.f32 %v1064_v20, %v1063_v14  ;;  %v1146_v24 = vpop.f32.mrf.mxu1 }
 0x103   :  { %v1066_v25 = vpop.f32.mrf.mxu0  ;;  %v1147_v28 = vadd.f32 %v1146_v24, %v1145_v19 }
 0x104   :  { %886 = vst.msk [vmem:[%s1640_s3 + $0x14] sm:$0xf] %vm880_vm0, %v1010_v21  ;;  %v780_v26 = vmax.f32 %v713_v22, 0.0  ;;  %v596_v27 = vadd.f32 %v1065_v23, %v1531_v16  ;;  %v1148_v29 = vpop.f32.mrf.mxu1 }
 0x105   :  { %v1067_v30 = vpop.f32.mrf.mxu0 }
 0x106   :  { %v1011_v31 = vpack.c.bf16 %v780_v26, %v780_v26  ;;  %v716_v32 = vadd.f32 %v1147_v28, %v596_v27  ;;  %v1068_v33 = vadd.f32 %v1067_v30, %v1066_v25  ;;  %v1149_v34 = vpop.f32.mrf.mxu1 }
 0x107   :  { %v1069_v35 = vpop.f32.mrf.mxu0  ;;  %v1150_v38 = vadd.f32 %v1149_v34, %v1148_v29 }
 0x108   :  { %887 = vst.msk [vmem:[%s1640_s3 + $0x18] sm:$0xf] %vm880_vm0, %v1011_v31  ;;  %v781_v36 = vmax.f32 %v716_v32, 0.0  ;;  %v601_v37 = vadd.f32 %v1068_v33, %v1531_v16  ;;  %v1151_v39 = vpop.f32.mrf.mxu1 }
 0x109   :  { %v1070_v40 = vpop.f32.mrf.mxu0 }
 0x10a   :  { %v1012_v41 = vpack.c.bf16 %v781_v36, %v781_v36  ;;  %v721_v42 = vadd.f32 %v1150_v38, %v601_v37  ;;  %v1071_v43 = vadd.f32 %v1070_v40, %v1069_v35  ;;  %v1152_v44 = vpop.f32.mrf.mxu1 }
 0x10b   :  { %v1072_v45 = vpop.f32.mrf.mxu0  ;;  %v1153_v48 = vadd.f32 %v1152_v44, %v1151_v39 }
 0x10c   :  { %888 = vst.msk [vmem:[%s1640_s3 + $0x1c] sm:$0xf] %vm880_vm0, %v1012_v41  ;;  %v782_v46 = vmax.f32 %v721_v42, 0.0  ;;  %v604_v47 = vadd.f32 %v1071_v43, %v1531_v16  ;;  %v1154_v49 = vpop.f32.mrf.mxu1 }
 0x10d   :  { %v1073_v50 = vpop.f32.mrf.mxu0 }
 0x10e   :  { %v1013_v51 = vpack.c.bf16 %v782_v46, %v782_v46  ;;  %v724_v52 = vadd.f32 %v1153_v48, %v604_v47  ;;  %v1074_v53 = vadd.f32 %v1073_v50, %v1072_v45  ;;  %v1155_v54 = vpop.f32.mrf.mxu1 }
 0x10f   :  { %v1075_v55 = vpop.f32.mrf.mxu0  ;;  %v1156_v58 = vadd.f32 %v1155_v54, %v1154_v49 }
 0x110   :  { %889 = vst.msk [vmem:[%s1640_s3 + $0x20] sm:$0xf] %vm880_vm0, %v1013_v51  ;;  %v783_v56 = vmax.f32 %v724_v52, 0.0  ;;  %v609_v57 = vadd.f32 %v1074_v53, %v1531_v16  ;;  %v1157_v59 = vpop.f32.mrf.mxu1 }
 0x111   :  { %v1076_v60 = vpop.f32.mrf.mxu0 }
 0x112   :  { %v1014_v61 = vpack.c.bf16 %v783_v56, %v783_v56  ;;  %v729_v62 = vadd.f32 %v1156_v58, %v609_v57  ;;  %v1077_v63 = vadd.f32 %v1076_v60, %v1075_v55  ;;  %v1158_v0 = vpop.f32.mrf.mxu1 }
 0x113   :  { %v1078_v1 = vpop.f32.mrf.mxu0  ;;  %v1159_v4 = vadd.f32 %v1158_v0, %v1157_v59 }
 0x114   :  { %890 = vst.msk [vmem:[%s1640_s3 + $0x24] sm:$0xf] %vm880_vm0, %v1014_v61  ;;  %v784_v2 = vmax.f32 %v729_v62, 0.0  ;;  %v612_v3 = vadd.f32 %v1077_v63, %v1531_v16  ;;  %v1160_v5 = vpop.f32.mrf.mxu1 }
 0x115   :  { %v1079_v6 = vpop.f32.mrf.mxu0 }
 0x116   :  { %v1015_v7 = vpack.c.bf16 %v784_v2, %v784_v2  ;;  %v732_v8 = vadd.f32 %v1159_v4, %v612_v3  ;;  %v1080_v9 = vadd.f32 %v1079_v6, %v1078_v1  ;;  %v1161_v10 = vpop.f32.mrf.mxu1 }
 0x117   :  { %v1081_v11 = vpop.f32.mrf.mxu0  ;;  %v1162_v14 = vadd.f32 %v1161_v10, %v1160_v5 }
 0x118   :  { %891 = vst.msk [vmem:[%s1640_s3 + $0x28] sm:$0xf] %vm880_vm0, %v1015_v7  ;;  %v785_v12 = vmax.f32 %v732_v8, 0.0  ;;  %v617_v13 = vadd.f32 %v1080_v9, %v1531_v16  ;;  %v1163_v15 = vpop.f32.mrf.mxu1 }
 0x119   :  { %v1082_v17 = vpop.f32.mrf.mxu0 }
 0x11a   :  { %v1016_v18 = vpack.c.bf16 %v785_v12, %v785_v12  ;;  %v737_v19 = vadd.f32 %v1162_v14, %v617_v13  ;;  %v1083_v20 = vadd.f32 %v1082_v17, %v1081_v11  ;;  %v1164_v21 = vpop.f32.mrf.mxu1 }
 0x11b   :  { %v1084_v22 = vpop.f32.mrf.mxu0  ;;  %v1165_v25 = vadd.f32 %v1164_v21, %v1163_v15 }
 0x11c   :  { %892 = vst.msk [vmem:[%s1640_s3 + $0x2c] sm:$0xf] %vm880_vm0, %v1016_v18  ;;  %v786_v23 = vmax.f32 %v737_v19, 0.0  ;;  %v620_v24 = vadd.f32 %v1083_v20, %v1531_v16  ;;  %v1166_v26 = vpop.f32.mrf.mxu1 }
 0x11d   :  { %v1085_v27 = vpop.f32.mrf.mxu0 }
 0x11e   :  { %v1017_v28 = vpack.c.bf16 %v786_v23, %v786_v23  ;;  %v740_v29 = vadd.f32 %v1165_v25, %v620_v24  ;;  %v1086_v30 = vadd.f32 %v1085_v27, %v1084_v22  ;;  %v1167_v31 = vpop.f32.mrf.mxu1 }
 0x11f   :  { %v1087_v32 = vpop.f32.mrf.mxu0  ;;  %v1168_v35 = vadd.f32 %v1167_v31, %v1166_v26 }
 0x120   :  { %893 = vst.msk [vmem:[%s1640_s3 + $0x30] sm:$0xf] %vm880_vm0, %v1017_v28  ;;  %v787_v33 = vmax.f32 %v740_v29, 0.0  ;;  %v625_v34 = vadd.f32 %v1086_v30, %v1531_v16  ;;  %v1169_v36 = vpop.f32.mrf.mxu1 }
 0x121   :  { %v1088_v37 = vpop.f32.mrf.mxu0 }
 0x122   :  { %v1018_v38 = vpack.c.bf16 %v787_v33, %v787_v33  ;;  %v745_v39 = vadd.f32 %v1168_v35, %v625_v34  ;;  %v1089_v40 = vadd.f32 %v1088_v37, %v1087_v32  ;;  %v1170_v41 = vpop.f32.mrf.mxu1 }
 0x123   :  { %v1090_v42 = vpop.f32.mrf.mxu0  ;;  %v1171_v45 = vadd.f32 %v1170_v41, %v1169_v36 }
 0x124   :  { %894 = vst.msk [vmem:[%s1640_s3 + $0x34] sm:$0xf] %vm880_vm0, %v1018_v38  ;;  %v788_v43 = vmax.f32 %v745_v39, 0.0  ;;  %v628_v44 = vadd.f32 %v1089_v40, %v1531_v16  ;;  %v1172_v46 = vpop.f32.mrf.mxu1 }
 0x125   :  { %v1091_v47 = vpop.f32.mrf.mxu0 }
 0x126   :  { %v1019_v48 = vpack.c.bf16 %v788_v43, %v788_v43  ;;  %v748_v49 = vadd.f32 %v1171_v45, %v628_v44  ;;  %v1092_v50 = vadd.f32 %v1091_v47, %v1090_v42  ;;  %v1173_v51 = vpop.f32.mrf.mxu1 }
 0x127   :  { %v1093_v52 = vpop.f32.mrf.mxu0  ;;  %v1174_v55 = vadd.f32 %v1173_v51, %v1172_v46 }
 0x128   :  { %895 = vst.msk [vmem:[%s1640_s3 + $0x38] sm:$0xf] %vm880_vm0, %v1019_v48  ;;  %v789_v53 = vmax.f32 %v748_v49, 0.0  ;;  %v633_v54 = vadd.f32 %v1092_v50, %v1531_v16  ;;  %v1175_v56 = vpop.f32.mrf.mxu1 }
 0x129   :  { %v1094_v57 = vpop.f32.mrf.mxu0 }
 0x12a   :  { %v1020_v58 = vpack.c.bf16 %v789_v53, %v789_v53  ;;  %v753_v59 = vadd.f32 %v1174_v55, %v633_v54  ;;  %v1095_v60 = vadd.f32 %v1094_v57, %v1093_v52  ;;  %v1176_v61 = vpop.f32.mrf.mxu1 }
 0x12b   :  { %v1096_v62 = vpop.f32.mrf.mxu0  ;;  %v1177_v1 = vadd.f32 %v1176_v61, %v1175_v56 }
 0x12c   :  { %896 = vst.msk [vmem:[%s1640_s3 + $0x3c] sm:$0xf] %vm880_vm0, %v1020_v58  ;;  %v790_v63 = vmax.f32 %v753_v59, 0.0  ;;  %v636_v0 = vadd.f32 %v1095_v60, %v1531_v16  ;;  %v1178_v2 = vpop.f32.mrf.mxu1 }
 0x12d   :  { %v1097_v3 = vpop.f32.mrf.mxu0 }
 0x12e   :  { %v1021_v4 = vpack.c.bf16 %v790_v63, %v790_v63  ;;  %v756_v5 = vadd.f32 %v1177_v1, %v636_v0  ;;  %v1098_v6 = vadd.f32 %v1097_v3, %v1096_v62  ;;  %v1179_v7 = vpop.f32.mrf.mxu1 }
 0x12f   :  { %v1099_v8 = vpop.f32.mrf.mxu0  ;;  %v1180_v11 = vadd.f32 %v1179_v7, %v1178_v2 }
 0x130   :  { %897 = vst.msk [vmem:[%s1640_s3 + $0x40] sm:$0xf] %vm880_vm0, %v1021_v4  ;;  %v791_v9 = vmax.f32 %v756_v5, 0.0  ;;  %v641_v10 = vadd.f32 %v1098_v6, %v1531_v16  ;;  %v1181_v12 = vpop.f32.mrf.mxu1 }
 0x131   :  { %v1100_v13 = vpop.f32.mrf.mxu0 }
 0x132   :  { %v1022_v14 = vpack.c.bf16 %v791_v9, %v791_v9  ;;  %v761_v15 = vadd.f32 %v1180_v11, %v641_v10  ;;  %v1101_v17 = vadd.f32 %v1100_v13, %v1099_v8  ;;  %v1182_v18 = vpop.f32.mrf.mxu1 }
 0x133   :  { %v1102_v19 = vpop.f32.mrf.mxu0  ;;  %v1183_v22 = vadd.f32 %v1182_v18, %v1181_v12 }
 0x134   :  { %898 = vst.msk [vmem:[%s1640_s3 + $0x44] sm:$0xf] %vm880_vm0, %v1022_v14  ;;  %v792_v20 = vmax.f32 %v761_v15, 0.0  ;;  %v644_v21 = vadd.f32 %v1101_v17, %v1531_v16  ;;  %v1184_v23 = vpop.f32.mrf.mxu1 }
 0x135   :  { %v1103_v24 = vpop.f32.mrf.mxu0 }
 0x136   :  { %v1023_v25 = vpack.c.bf16 %v792_v20, %v792_v20  ;;  %v764_v26 = vadd.f32 %v1183_v22, %v644_v21  ;;  %v1104_v27 = vadd.f32 %v1103_v24, %v1102_v19  ;;  %v1185_v28 = vpop.f32.mrf.mxu1 }
 0x137   :  { %v1105_v29 = vpop.f32.mrf.mxu0  ;;  %v1186_v32 = vadd.f32 %v1185_v28, %v1184_v23 }
 0x138   :  { %899 = vst.msk [vmem:[%s1640_s3 + $0x48] sm:$0xf] %vm880_vm0, %v1023_v25  ;;  %v793_v30 = vmax.f32 %v764_v26, 0.0  ;;  %v649_v31 = vadd.f32 %v1104_v27, %v1531_v16  ;;  %v1187_v33 = vpop.f32.mrf.mxu1 }
 0x139   :  { %v1106_v34 = vpop.f32.mrf.mxu0 }
 0x13a   :  { %v1024_v35 = vpack.c.bf16 %v793_v30, %v793_v30  ;;  %v769_v36 = vadd.f32 %v1186_v32, %v649_v31  ;;  %v1188_v37 = vpop.f32.mrf.mxu1 }
 0x13c   :  { %900 = vst.msk [vmem:[%s1640_s3 + $0x4c] sm:$0xf] %vm880_vm0, %v1024_v35  ;;  %v794_v38 = vmax.f32 %v769_v36, 0.0 }
 0x13e   :  { %v1025_v39 = vpack.c.bf16 %v794_v38, %v794_v38 }
 0x140   :  { %902 = vst.msk [vmem:[%s1640_s3 + $0x50] sm:$0x1] %vm901_vm1, %v1025_v39 }

// kernel: actor_critic_forward.6
= control target key start
LH: loop header
LB: loop body
LE: loop exit
PB: predicated region body
PF: predicated region fallthrough
CT: control target
= control target key end

     0   :  { %v1248_v34 = vmov 0.0   ;;  %vm1249_vm0 = vmmov 0   ;;  %vm516_vm1 = vcmask 523264   ;;  %vm868_vm2 = vcmask 519168   ;;  %s1647_s1 = inlined_call_operand.vmem [shape: bf16[576,64], index: 1, kind: input, shape index: {}]   ;;  %s1648_s0 = inlined_call_operand.vmem [shape: bf16[98,576], index: 0, kind: input, shape index: {}]   ;;  %s1649_s2 = inlined_call_operand.vmem [shape: f32[1,64], index: 2, kind: input, shape index: {}]   ;;  %s1650_s3 = inlined_call_operand.vmem [shape: bf16[98,64], index: 3, kind: output, shape index: {}]  }
   0x1   :  { %v1165_v0 = vld [vmem:[%s1647_s1 + $0x78] sm:$0xff]   ;;  %v1169_v4 = vld [vmem:[%s1647_s1 + $0x70] sm:$0xff]   ;;  %v1173_v8 = vld [vmem:[%s1647_s1 + $0x68] sm:$0xff]   ;;  %vm881_vm3 = vcmask 516096  }
   0x2   :  { %v1166_v1 = vld [vmem:[%s1647_s1 + $0xf8] sm:$0xff]   ;;  %992 = vmatprep.subr.bf16.mxu0 %v1165_v0  ;;  %v1170_v5 = vld [vmem:[%s1647_s1 + $0xf0] sm:$0xff]   ;;  %v1174_v9 = vld [vmem:[%s1647_s1 + $0xe8] sm:$0xff]  }
   0x3   :  { %v1167_v2 = vld [vmem:[%s1647_s1 + $0x38] sm:$0xff]   ;;  %1050 = vmatprep.subr.bf16.mxu1 %v1166_v1  ;;  %v1171_v6 = vld [vmem:[%s1647_s1 + $0x30] sm:$0xff]   ;;  %v1175_v10 = vld [vmem:[%s1647_s1 + $0x28] sm:$0xff]  }
   0x4   :  { %v1168_v3 = vld [vmem:[%s1647_s1 + $0xb8] sm:$0xff]   ;;  %993 = vmatpush3.bf16.msra.mxu0 %v1167_v2  ;;  %v1172_v7 = vld [vmem:[%s1647_s1 + $0xb0] sm:$0xff]   ;;  %v1176_v11 = vld [vmem:[%s1647_s1 + $0xa8] sm:$0xff]  }
   0x5   :  { %1051 = vmatpush3.bf16.msra.mxu1 %v1168_v3  ;;  %994 = vmatprep.subr.bf16.mxu0 %v1169_v4  ;;  %v1177_v12 = vld [vmem:[%s1647_s1 + $0x60] sm:$0xff]   ;;  %v1181_v16 = vld [vmem:[%s1647_s1 + $0x58] sm:$0xff]   ;;  %v1185_v20 = vld [vmem:[%s1647_s1 + $0x50] sm:$0xff]  }
   0x6   :  { %1052 = vmatprep.subr.bf16.mxu1 %v1170_v5  ;;  %v1178_v13 = vld [vmem:[%s1647_s1 + $0xe0] sm:$0xff]   ;;  %v1182_v17 = vld [vmem:[%s1647_s1 + $0xd8] sm:$0xff]   ;;  %v1186_v21 = vld [vmem:[%s1647_s1 + $0xd0] sm:$0xff]  }
   0x7   :  { %v1179_v14 = vld [vmem:[%s1647_s1 + $0x20] sm:$0xff]   ;;  %v1183_v18 = vld [vmem:[%s1647_s1 + $0x18] sm:$0xff]   ;;  %v1187_v22 = vld [vmem:[%s1647_s1 + $0x10] sm:$0xff]  }
   0x8   :  { %995 = vmatpush3.bf16.msra.mxu0 %v1171_v6  ;;  %v1180_v15 = vld [vmem:[%s1647_s1 + $0xa0] sm:$0xff]   ;;  %v1184_v19 = vld [vmem:[%s1647_s1 + $0x98] sm:$0xff]   ;;  %v1188_v23 = vld [vmem:[%s1647_s1 + $0x90] sm:$0xff]  }
   0x9   :  { %1053 = vmatpush3.bf16.msra.mxu1 %v1172_v7  ;;  %996 = vmatprep.subr.bf16.mxu0 %v1173_v8  ;;  %v1189_v24 = vld [vmem:[%s1647_s1 + $0x48] sm:$0xff]   ;;  %v1193_v28 = vld [vmem:[%s1647_s1 + $0x40] sm:$0xff]   ;;  %v1203_v37 = vld [vmem:[%s1647_s1 + $0x118] sm:$0xff]  }
   0xa   :  { %1054 = vmatprep.subr.bf16.mxu1 %v1174_v9  ;;  %v1190_v25 = vld [vmem:[%s1647_s1 + $0xc8] sm:$0xff]   ;;  %v1194_v29 = vld [vmem:[%s1647_s1 + $0xc0] sm:$0xff]   ;;  %v1214_v43 = vld [vmem:[%s1647_s1 + $0x110] sm:$0xff]  }
   0xb   :  { %v1191_v26 = vld [vmem:[%s1647_s1 + $0x8] sm:$0xff]   ;;  %v1195_v30 = vld [vmem:[%s1647_s1] sm:$0xff]   ;;  %v1212_v44 = vld [vmem:[%s1648_s0 + $0x5c] ss:$20 sps:$4 sm:$0xff]  }
   0xc   :  { %997 = vmatpush3.bf16.msra.mxu0 %v1175_v10  ;;  %v1192_v27 = vld [vmem:[%s1647_s1 + $0x88] sm:$0xff]   ;;  %v1196_v31 = vld [vmem:[%s1647_s1 + $0x80] sm:$0xff]   ;;  %v1217_v48 = vld [vmem:[%s1648_s0 + $0x7c] ss:$20 sps:$4 sm:$0xff]  }
   0xd   :  { %1055 = vmatpush3.bf16.msra.mxu1 %v1176_v11  ;;  %998 = vmatprep.subr.bf16.mxu0 %v1177_v12  ;;  %v1197_v32 = vld [vmem:[%s1648_s0] ss:$20 sps:$4 sm:$0xff]   ;;  %v1199_v33 = vld [vmem:[%s1648_s0 + $0x4] ss:$20 sps:$4 sm:$0xff]   ;;  %v1200_v35 = vld [vmem:[%s1648_s0 + $0x8] ss:$20 sps:$4 sm:$0xff]  }
   0xe   :  { %1056 = vmatprep.subr.bf16.mxu1 %v1178_v13  ;;  %v1202_v36 = vld [vmem:[%s1648_s0 + $0xc] ss:$20 sps:$4 sm:$0xff]   ;;  %570 = vmatprep.mubr.bf16.mxu0 %v1199_v33  ;;  %v1206_v39 = vld [vmem:[%s1648_s0 + $0x34] ss:$20 sps:$4 sm:$0xff]   ;;  %v1209_v41 = vld [vmem:[%s1648_s0 + $0x30] ss:$20 sps:$4 sm:$0xff]  }
   0xf   :  { %658 = vmatprep.mubr.bf16.mxu1 %v1202_v36  ;;  %v1204_v38 = vld [vmem:[%s1648_s0 + $0x2c] ss:$20 sps:$4 sm:$0xff]   ;;  %v1208_v40 = vld [vmem:[%s1648_s0 + $0x28] ss:$20 sps:$4 sm:$0xff]   ;;  %v1215_v46 = vld [vmem:[%s1648_s0 + $0x50] ss:$20 sps:$4 sm:$0xff]  }
  0x10   :  { %999 = vmatpush3.bf16.msra.mxu0 %v1179_v14  ;;  %v1210_v42 = vld [vmem:[%s1648_s0 + $0x54] ss:$20 sps:$4 sm:$0xff]   ;;  %v1216_v47 = vld [vmem:[%s1648_s0 + $0x58] ss:$20 sps:$4 sm:$0xff]   ;;  %v1236_v50 = vld [vmem:[%s1647_s1 + $0x100] sm:$0xff]  }
  0x11   :  { %1057 = vmatpush3.bf16.msra.mxu1 %v1180_v15  ;;  %1000 = vmatprep.subr.bf16.mxu0 %v1181_v16  ;;  %v1223_v45 = vld [vmem:[%s1647_s1 + $0x108] sm:$0xff]   ;;  %v1219_v49 = vld [vmem:[%s1648_s0 + $0x84] ss:$20 sps:$4 sm:$0xff]   ;;  %v1222_v52 = vld [vmem:[%s1648_s0 + $0x80] ss:$20 sps:$4 sm:$0xff]  }
  0x12   :  { %1058 = vmatprep.subr.bf16.mxu1 %v1182_v17  ;;  %v1221_v51 = vld [vmem:[%s1648_s0 + $0x78] ss:$20 sps:$4 sm:$0xff]   ;;  %v1228_v55 = vld [vmem:[%s1648_s0 + $0xa0] ss:$20 sps:$4 sm:$0xff]   ;;  %v1229_v56 = vld [vmem:[%s1648_s0 + $0xa8] ss:$20 sps:$4 sm:$0xff]  }
  0x13   :  { %v1224_v53 = vld [vmem:[%s1648_s0 + $0xa4] ss:$20 sps:$4 sm:$0xff]   ;;  %v1226_v54 = vld [vmem:[%s1648_s0 + $0xac] ss:$20 sps:$4 sm:$0xff]   ;;  %v1232_v58 = vld [vmem:[%s1648_s0 + $0xd4] ss:$20 sps:$4 sm:$0xff]  }
  0x14   :  { %1001 = vmatpush3.bf16.msra.mxu0 %v1183_v18  ;;  %v1230_v57 = vld [vmem:[%s1648_s0 + $0xcc] ss:$20 sps:$4 sm:$0xff]   ;;  %v51_v59 = vld [vmem:[%s1648_s0 + $0xf0] sm:$0x11]  ;;  %v52_v60 = vld [vmem:[%s1648_s0 + $0xf8] sm:$0x11] }
  0x15   :  { %1059 = vmatpush3.bf16.msra.mxu1 %v1184_v19  ;;  %1002 = vmatprep.subr.bf16.mxu0 %v1185_v20  ;;  %v1234_v61 = vld [vmem:[%s1648_s0 + $0xc8] ss:$20 sps:$4 sm:$0xff]   ;;  %v1235_v62 = vld [vmem:[%s1648_s0 + $0xd0] ss:$20 sps:$4 sm:$0xff]   ;;  %v919_v63 = vcombine.high %v51_v59, %v51_v59  ;;  %v921_v0 = vcombine.high %v52_v60, %v52_v60  ;;  %v918_v1 = vcombine.low %v51_v59, %v51_v59  ;;  %v1243_v5 = vld [vmem:[%s1648_s0 + $0x38] ss:$20 sps:$4 sm:$0xff]  }
  0x16   :  { %1060 = vmatprep.subr.bf16.mxu1 %v1186_v21  ;;  %v920_v2 = vcombine.low %v52_v60, %v52_v60  ;;  %v1241_v3 = vld [vmem:[%s1648_s0 + $0x10] ss:$20 sps:$4 sm:$0xff]   ;;  %v1244_v6 = vld [vmem:[%s1648_s0 + $0xd8] ss:$20 sps:$4 sm:$0xff]   ;;  %v1245_v7 = vld [vmem:[%s1648_s0 + $0x60] ss:$20 sps:$4 sm:$0xff]  }
  0x17   :  { %v1242_v4 = vld [vmem:[%s1648_s0 + $0xb0] ss:$20 sps:$4 sm:$0xff]   ;;  %v1246_v8 = vld [vmem:[%s1648_s0 + $0x100] ss:$0 sps:$4 sm:$0x11]  }
  0x18   :  { %1003 = vmatpush3.bf16.msra.mxu0 %v1187_v22  ;;  %v1247_v9 = vld [vmem:[%s1648_s0 + $0x88] ss:$20 sps:$4 sm:$0xff]   ;;  %v1553_v59 = vld [vmem:[%s1649_s2] ss:$0 sm:$0xff] }
  0x19   :  { %1061 = vmatpush3.bf16.msra.mxu1 %v1188_v23  ;;  %1004 = vmatprep.subr.bf16.mxu0 %v1189_v24 }
  0x1a   :  { %1062 = vmatprep.subr.bf16.mxu1 %v1190_v25 }
  0x1c   :  { %1005 = vmatpush3.bf16.msra.mxu0 %v1191_v26 }
  0x1d   :  { %1063 = vmatpush3.bf16.msra.mxu1 %v1192_v27  ;;  %1006 = vmatprep.subr.bf16.mxu0 %v1193_v28 }
  0x1e   :  { %1064 = vmatprep.subr.bf16.mxu1 %v1194_v29 }
  0x20   :  { %1007 = vmatpush3.bf16.msra.mxu0 %v1195_v30 }
  0x21   :  { %1065 = vmatpush3.bf16.msra.mxu1 %v1196_v31  ;;  %1119 = vmatprep.subr.bf16.mxu0 %v1248_v34 }
  0x22   :  { %1155 = vmatprep.subr.bf16.mxu1 %v1248_v34 }
  0x23   :  { %571 = vmatmul.mubr.bf16.vlgmr.msra.gmra.mxu0 %v1197_v32 }
  0x24   :  { %659 = vmatmul.mubr.bf16.vlgmr.msra.gmra.mxu1 %v1200_v35  ;;  %1120 = vmatpush3.bf16.msra.mxu0 %v1203_v37 }
  0x25   :  { %578 = vmatprep.mubr.bf16.mxu0 %v1204_v38  ;;  %1159 = vmatpush3.bf16.msra.mxu1 %v1203_v37 }
  0x26   :  { %666 = vmatprep.mubr.bf16.mxu1 %v1206_v39  ;;  %1121 = vmatprep.subr.bf16.mxu0 %v1248_v34 }
  0x27   :  { %1156 = vmatprep.subr.bf16.mxu1 %v1248_v34 }
  0x28   :  { %1122 = vmatpush3.bf16.msra.mxu0 %v1214_v43 }
  0x29   :  { %1160 = vmatpush3.bf16.msra.mxu1 %v1214_v43  ;;  %1123 = vmatprep.subr.bf16.mxu0 %v1248_v34 }
  0x2a   :  { %1157 = vmatprep.subr.bf16.mxu1 %v1248_v34 }
  0x2b   :  { %579 = vmatmul.mubr.bf16.gmra.mxu0 %v1208_v40 }
  0x2c   :  { %667 = vmatmul.mubr.bf16.gmra.mxu1 %v1209_v41  ;;  %586 = vmatprep.mubr.bf16.mxu0 %v1210_v42 }
  0x2d   :  { %674 = vmatprep.mubr.bf16.mxu1 %v1212_v44  ;;  %1124 = vmatpush3.bf16.msra.mxu0 %v1223_v45 }
  0x2e   :  { %1161 = vmatpush3.bf16.msra.mxu1 %v1223_v45  ;;  %1125 = vmatprep.subr.bf16.mxu0 %v1248_v34 }
  0x2f   :  { %1158 = vmatprep.subr.bf16.mxu1 %v1248_v34 }
  0x31   :  { %1126 = vmatpush3.bf16.msra.mxu0 %v1236_v50 }
  0x32   :  { %1162 = vmatpush3.bf16.msra.mxu1 %v1236_v50 }
  0x33   :  { %587 = vmatmul.mubr.bf16.gmra.mxu0 %v1215_v46 }
  0x34   :  { %675 = vmatmul.mubr.bf16.gmra.mxu1 %v1216_v47  ;;  %594 = vmatprep.mubr.bf16.mxu0 %v1217_v48 }
  0x35   :  { %682 = vmatprep.mubr.bf16.mxu1 %v1219_v49 }
  0x3b   :  { %595 = vmatmul.mubr.bf16.gmra.mxu0 %v1221_v51 }
  0x3c   :  { %683 = vmatmul.mubr.bf16.gmra.mxu1 %v1222_v52  ;;  %602 = vmatprep.mubr.bf16.mxu0 %v1224_v53 }
  0x3d   :  { %690 = vmatprep.mubr.bf16.mxu1 %v1226_v54 }
  0x43   :  { %603 = vmatmul.mubr.bf16.gmra.mxu0 %v1228_v55 }
  0x44   :  { %691 = vmatmul.mubr.bf16.gmra.mxu1 %v1229_v56  ;;  %610 = vmatprep.mubr.bf16.mxu0 %v1230_v57 }
  0x45   :  { %698 = vmatprep.mubr.bf16.mxu1 %v1232_v58 }
  0x4b   :  { %611 = vmatmul.mubr.bf16.gmra.mxu0 %v1234_v61 }
  0x4c   :  { %699 = vmatmul.mubr.bf16.gmra.mxu1 %v1235_v62  ;;  %618 = vmatprep.mubr.bf16.mxu0 %v919_v63 }
  0x4d   :  { %706 = vmatprep.mubr.bf16.mxu1 %v921_v0 }
  0x53   :  { %619 = vmatmul.mubr.bf16.gmra.mxu0 %v918_v1 }
  0x54   :  { %707 = vmatmul.mubr.bf16.gmra.mxu1 %v920_v2  ;;  %1127 = vmatprep.mubr.msk.bf16.mxu0 %vm1249_vm0, %v1248_v34 }
  0x55   :  { %1143 = vmatprep.mubr.msk.bf16.mxu1 %vm1249_vm0, %v1248_v34 }
  0x5b   :  { %1128 = vmatmul.mubr.msk.bf16.vlgmr.msra.gmra.mxu0 %vm516_vm1, %v1241_v3 }
  0x5c   :  { %1144 = vmatmul.mubr.msk.bf16.vlgmr.msra.gmra.mxu1 %vm516_vm1, %v1242_v4  ;;  %1131 = vmatprep.mubr.msk.bf16.mxu0 %vm1249_vm0, %v1248_v34 }
  0x5d   :  { %1147 = vmatprep.mubr.msk.bf16.mxu1 %vm1249_vm0, %v1248_v34 }
  0x63   :  { %1132 = vmatmul.mubr.msk.bf16.gmra.mxu0 %vm516_vm1, %v1243_v5 }
  0x64   :  { %1148 = vmatmul.mubr.msk.bf16.gmra.mxu1 %vm516_vm1, %v1244_v6  ;;  %1135 = vmatprep.mubr.msk.bf16.mxu0 %vm1249_vm0, %v1248_v34 }
  0x65   :  { %1151 = vmatprep.mubr.msk.bf16.mxu1 %vm1249_vm0, %v1248_v34 }
  0x6b   :  { %1136 = vmatmul.mubr.msk.bf16.gmra.mxu0 %vm516_vm1, %v1245_v7 }
  0x6c   :  { %1152 = vmatmul.mubr.msk.bf16.gmra.mxu1 %vm516_vm1, %v1246_v8  ;;  %1139 = vmatprep.mubr.msk.bf16.mxu0 %vm1249_vm0, %v1248_v34 }
  0x73   :  { %1140 = vmatmul.mubr.msk.bf16.gmra.mxu0 %vm516_vm1, %v1247_v9 }
  0xe3   :  { %v1008_v10 = vpop.f32.mrf.mxu0 }
  0xe4   :  { %v1066_v11 = vpop.f32.mrf.mxu1 }
  0xe5   :  { %v1009_v12 = vpop.f32.mrf.mxu0 }
  0xe6   :  { %v1067_v13 = vpop.f32.mrf.mxu1  ;;  %v1010_v57 = vadd.f32 %v1009_v12, %v1008_v10 }
  0xe7   :  { %v1011_v14 = vpop.f32.mrf.mxu0  ;;  %v1068_v2 = vadd.f32 %v1067_v13, %v1066_v11 }
  0xe8   :  { %v1069_v15 = vpop.f32.mrf.mxu1  ;;  %v573_v1 = vadd.f32 %v1010_v57, %v1553_v59 }
  0xe9   :  { %v1012_v16 = vpop.f32.mrf.mxu0 }
  0xea   :  { %v1070_v17 = vpop.f32.mrf.mxu1  ;;  %v1013_v63 = vadd.f32 %v1012_v16, %v1011_v14  ;;  %v661_v14 = vadd.f32 %v1068_v2, %v573_v1 }
  0xeb   :  { %v1014_v18 = vpop.f32.mrf.mxu0  ;;  %v1071_v10 = vadd.f32 %v1070_v17, %v1069_v15 }
  0xec   :  { %v1506_v19 = vpop.f32.mrf.mxu1  ;;  %v576_v9 = vadd.f32 %v1013_v63, %v1553_v59 }
  0xed   :  { %v1015_v20 = vpop.f32.mrf.mxu0 }
  0xee   :  { %v1508_v21 = vpop.f32.mrf.mxu1  ;;  %v1016_v12 = vadd.f32 %v1015_v20, %v1014_v18  ;;  %v664_v15 = vadd.f32 %v1071_v10, %v576_v9 }
  0xef   :  { %v1510_v22 = vpop.f32.mrf.mxu0 }
  0xf0   :  { %v1512_v23 = vpop.f32.mrf.mxu1 }
  0xf1   :  { %v1514_v24 = vpop.f32.mrf.mxu0 }
  0xf2   :  { %v1516_v25 = vpop.f32.mrf.mxu1  ;;  %v1019_v17 = vadd.f32 %v1514_v24, %v1510_v22 }
  0xf3   :  { %v1518_v26 = vpop.f32.mrf.mxu0 }
  0xf4   :  { %v1520_v27 = vpop.f32.mrf.mxu1  ;;  %v584_v24 = vadd.f32 %v1019_v17, %v1553_v59 }
  0xf5   :  { %v1522_v28 = vpop.f32.mrf.mxu0 }
  0xf6   :  { %v1524_v29 = vpop.f32.mrf.mxu1 }
  0xf7   :  { %v1526_v30 = vpop.f32.mrf.mxu0 }
  0xf8   :  { %v1528_v31 = vpop.f32.mrf.mxu1 }
  0xf9   :  { %v1530_v32 = vpop.f32.mrf.mxu0 }
  0xfa   :  { %v1532_v33 = vpop.f32.mrf.mxu1 }
  0xfb   :  { %v1534_v34 = vpop.f32.mrf.mxu0 }
  0xfc   :  { %v1536_v35 = vpop.f32.mrf.mxu1 }
  0xfd   :  { %v1538_v36 = vpop.f32.mrf.mxu0 }
  0xfe   :  { %v1540_v37 = vpop.f32.mrf.mxu1 }
  0xff   :  { %v1542_v38 = vpop.f32.mrf.mxu0 }
 0x100   :  { %v1544_v39 = vpop.f32.mrf.mxu1 }
 0x101   :  { %1651 = vst [vmem:[#allocation2_spill] sm:$0xff] %v1544_v39  ;;  %v1546_v40 = vpop.f32.mrf.mxu0 }
 0x102   :  { %1652 = vst [vmem:[#allocation3_spill] sm:$0xff] %v1546_v40  ;;  %v1548_v41 = vpop.f32.mrf.mxu1 }
 0x103   :  { %1653 = vst [vmem:[#allocation4_spill] sm:$0xff] %v1548_v41  ;;  %v1032_v42 = vpop.f32.mrf.mxu0 }
 0x104   :  { %v1090_v43 = vpop.f32.mrf.mxu1 }
 0x105   :  { %v1033_v44 = vpop.f32.mrf.mxu0 }
 0x106   :  { %v1091_v45 = vpop.f32.mrf.mxu1  ;;  %v1034_v60 = vadd.f32 %v1033_v44, %v1032_v42 }
 0x107   :  { %v1035_v46 = vpop.f32.mrf.mxu0  ;;  %v1092_v5 = vadd.f32 %v1091_v45, %v1090_v43  ;;  %v581_v43 = vadd.f32 %v1016_v12, %v1553_v59  ;;  %v1074_v45 = vadd.f32 %v1508_v21, %v1506_v19  ;;  %v1077_v19 = vadd.f32 %v1516_v25, %v1512_v23 }
 0x108   :  { %v1093_v47 = vpop.f32.mrf.mxu1  ;;  %v605_v4 = vadd.f32 %v1034_v60, %v1553_v59 }
 0x109   :  { %v1036_v48 = vpop.f32.mrf.mxu0  ;;  %v669_v22 = vadd.f32 %v1074_v45, %v581_v43 }
 0x10a   :  { %v1094_v49 = vpop.f32.mrf.mxu1  ;;  %v1037_v6 = vadd.f32 %v1036_v48, %v1035_v46  ;;  %v693_v13 = vadd.f32 %v1092_v5, %v605_v4 }
 0x10b   :  { %v1038_v50 = vpop.f32.mrf.mxu0  ;;  %v1095_v57 = vadd.f32 %v1094_v49, %v1093_v47 }
 0x10c   :  { %v1096_v51 = vpop.f32.mrf.mxu1  ;;  %v608_v16 = vadd.f32 %v1037_v6, %v1553_v59 }
 0x10d   :  { %v1039_v52 = vpop.f32.mrf.mxu0 }
 0x10e   :  { %v1097_v53 = vpop.f32.mrf.mxu1  ;;  %v1040_v44 = vadd.f32 %v1039_v52, %v1038_v50  ;;  %v696_v60 = vadd.f32 %v1095_v57, %v608_v16 }
 0x10f   :  { %v1041_v54 = vpop.f32.mrf.mxu0  ;;  %v1098_v20 = vadd.f32 %v1097_v53, %v1096_v51 }
 0x110   :  { %v1099_v55 = vpop.f32.mrf.mxu1  ;;  %v613_v18 = vadd.f32 %v1040_v44, %v1553_v59 }
 0x111   :  { %v1042_v56 = vpop.f32.mrf.mxu0 }
 0x112   :  { %v1100_v58 = vpop.f32.mrf.mxu1  ;;  %v1043_v49 = vadd.f32 %v1042_v56, %v1041_v54  ;;  %v701_v54 = vadd.f32 %v1098_v20, %v613_v18 }
 0x113   :  { %v1044_v61 = vpop.f32.mrf.mxu0  ;;  %v1101_v23 = vadd.f32 %v1100_v58, %v1099_v55  ;;  %v1080_v55 = vadd.f32 %v1524_v29, %v1520_v27 }
 0x114   :  { %v1555_v62 = vpop.f32.mrf.mxu1  ;;  %v616_v56 = vadd.f32 %v1043_v49, %v1553_v59 }
 0x115   :  { %v1045_v0 = vpop.f32.mrf.mxu0 }
 0x116   :  { %v1558_v3 = vpop.f32.mrf.mxu1  ;;  %v1046_v25 = vadd.f32 %v1045_v0, %v1044_v61  ;;  %v672_v0 = vadd.f32 %v1077_v19, %v584_v24  ;;  %v704_v29 = vadd.f32 %v1101_v23, %v616_v56  ;;  %v1655_v24 = vld [vmem:[#allocation2_spill] sm:$0xff] }
 0x117   :  { %v1047_v7 = vpop.f32.mrf.mxu0 }
 0x118   :  { %v1105_v8 = vpop.f32.mrf.mxu1  ;;  %v621_v44 = vadd.f32 %v1046_v25, %v1553_v59 }
 0x119   :  { %v1048_v42 = vpop.f32.mrf.mxu0  ;;  %v1025_v8 = vadd.f32 %v1530_v32, %v1526_v30  ;;  %v1104_v30 = vadd.f32 %v1558_v3, %v1555_v62  ;;  %v1028_v62 = vadd.f32 %v1538_v36, %v1534_v34 }
 0x11a   :  { %v1106_v41 = vpop.f32.mrf.mxu1 }
 0x11b   :  { %v748_v11 = vpop.f32.mrf.mxu0  ;;  %v709_v17 = vadd.f32 %v1104_v30, %v621_v44 }
 0x11c   :  { %v749_v39 = vadd.f32 %v748_v11, %v661_v14  ;;  %v780_v40 = vpop.f32.mrf.mxu1  ;;  %v592_v11 = vadd.f32 %v1025_v8, %v1553_v59 }
 0x11d   :  { %v781_v46 = vadd.f32 %v780_v40, %v693_v13  ;;  %v1129_v48 = vpop.f32.mrf.mxu0  ;;  %v1083_v13 = vadd.f32 %v1532_v33, %v1528_v31 }
 0x11e   :  { %v802_v41 = vmax.f32 %v749_v39, 0.0  ;;  %v1145_v47 = vpop.f32.mrf.mxu1  ;;  %v1022_v39 = vadd.f32 %v1522_v28, %v1518_v26 }
 0x11f   :  { %v810_v50 = vmax.f32 %v781_v46, 0.0  ;;  %v751_v52 = vpop.f32.mrf.mxu0  ;;  %v680_v49 = vadd.f32 %v1083_v13, %v592_v11 }
 0x120   :  { %v979_v63 = vpack.c.bf16 %v802_v41, %v802_v41  ;;  %v752_v1 = vadd.f32 %v751_v52, %v664_v15  ;;  %v783_v2 = vpop.f32.mrf.mxu1  ;;  %v589_v42 = vadd.f32 %v1022_v39, %v1553_v59  ;;  %v1086_v52 = vadd.f32 %v1540_v37, %v1536_v35  ;;  %v1656_v39 = vld [vmem:[#allocation4_spill] sm:$0xff] }
 0x121   :  { %v987_v21 = vpack.c.bf16 %v810_v50, %v810_v50  ;;  %v784_v40 = vadd.f32 %v783_v2, %v696_v60  ;;  %v1130_v4 = vpop.f32.mrf.mxu0  ;;  %v597_v50 = vadd.f32 %v1028_v62, %v1553_v59  ;;  %v1654_v60 = vld [vmem:[#allocation3_spill] sm:$0xff] }
 0x122   :  { %869 = vst.msk [vmem:[%s1650_s3] sm:$0xf] %vm868_vm2, %v979_v63  ;;  %v803_v51 = vmax.f32 %v752_v1, 0.0  ;;  %v1146_v53 = vpop.f32.mrf.mxu1  ;;  %v677_v15 = vadd.f32 %v1080_v55, %v589_v42  ;;  %v1031_v63 = vadd.f32 %v1654_v60, %v1542_v38 }
 0x123   :  { %877 = vst.msk [vmem:[%s1650_s3 + $0x20] sm:$0xf] %vm868_vm2, %v987_v21  ;;  %v811_v5 = vmax.f32 %v784_v40, 0.0  ;;  %v756_v6 = vpop.f32.mrf.mxu0 }
 0x124   :  { %v980_v26 = vpack.c.bf16 %v803_v51, %v803_v51  ;;  %v757_v28 = vadd.f32 %v756_v6, %v669_v22  ;;  %v788_v7 = vpop.f32.mrf.mxu1  ;;  %v600_v22 = vadd.f32 %v1031_v63, %v1553_v59  ;;  %v1089_v51 = vadd.f32 %v1656_v39, %v1655_v24 }
 0x125   :  { %v988_v9 = vpack.c.bf16 %v811_v5, %v811_v5  ;;  %v789_v10 = vadd.f32 %v788_v7, %v701_v54  ;;  %v1133_v12 = vpop.f32.mrf.mxu0  ;;  %v685_v54 = vadd.f32 %v1086_v52, %v597_v50 }
 0x126   :  { %870 = vst.msk [vmem:[%s1650_s3 + $0x4] sm:$0xf] %vm868_vm2, %v980_v26  ;;  %v804_v58 = vmax.f32 %v757_v28, 0.0  ;;  %v1149_v61 = vpop.f32.mrf.mxu1  ;;  %v688_v26 = vadd.f32 %v1089_v51, %v600_v22 }
 0x127   :  { %878 = vst.msk [vmem:[%s1650_s3 + $0x24] sm:$0xf] %vm868_vm2, %v988_v9  ;;  %v812_v32 = vmax.f32 %v789_v10, 0.0  ;;  %v759_v27 = vpop.f32.mrf.mxu0 }
 0x128   :  { %v981_v14 = vpack.c.bf16 %v804_v58, %v804_v58  ;;  %v760_v16 = vadd.f32 %v759_v27, %v672_v0  ;;  %v791_v57 = vpop.f32.mrf.mxu1 }
 0x129   :  { %v989_v43 = vpack.c.bf16 %v812_v32, %v812_v32  ;;  %v792_v45 = vadd.f32 %v791_v57, %v704_v29  ;;  %v1134_v46 = vpop.f32.mrf.mxu0 }
 0x12a   :  { %871 = vst.msk [vmem:[%s1650_s3 + $0x8] sm:$0xf] %vm868_vm2, %v981_v14  ;;  %v805_v3 = vmax.f32 %v760_v16, 0.0  ;;  %v1150_v48 = vpop.f32.mrf.mxu1 }
 0x12b   :  { %879 = vst.msk [vmem:[%s1650_s3 + $0x28] sm:$0xf] %vm868_vm2, %v989_v43  ;;  %v813_v31 = vmax.f32 %v792_v45, 0.0  ;;  %v764_v33 = vpop.f32.mrf.mxu0 }
 0x12c   :  { %v982_v18 = vpack.c.bf16 %v805_v3, %v805_v3  ;;  %v765_v20 = vadd.f32 %v764_v33, %v677_v15  ;;  %v796_v41 = vpop.f32.mrf.mxu1 }
 0x12d   :  { %v990_v34 = vpack.c.bf16 %v813_v31, %v813_v31  ;;  %v797_v36 = vadd.f32 %v796_v41, %v709_v17  ;;  %v1137_v47 = vpop.f32.mrf.mxu0 }
 0x12e   :  { %872 = vst.msk [vmem:[%s1650_s3 + $0xc] sm:$0xf] %vm868_vm2, %v982_v18  ;;  %v806_v1 = vmax.f32 %v765_v20, 0.0  ;;  %v1153_v2 = vpop.f32.mrf.mxu1 }
 0x12f   :  { %880 = vst.msk [vmem:[%s1650_s3 + $0x2c] sm:$0xf] %vm868_vm2, %v990_v34  ;;  %v814_v19 = vmax.f32 %v797_v36, 0.0  ;;  %v767_v21 = vpop.f32.mrf.mxu0 }
 0x130   :  { %v983_v40 = vpack.c.bf16 %v806_v1, %v806_v1  ;;  %v768_v35 = vadd.f32 %v767_v21, %v680_v49  ;;  %v799_v37 = vpop.f32.mrf.mxu1 }
 0x131   :  { %v991_v4 = vpack.c.bf16 %v814_v19, %v814_v19  ;;  %v1138_v38 = vpop.f32.mrf.mxu0 }
 0x132   :  { %873 = vst.msk [vmem:[%s1650_s3 + $0x10] sm:$0xf] %vm868_vm2, %v983_v40  ;;  %v807_v53 = vmax.f32 %v768_v35, 0.0  ;;  %v1154_v56 = vpop.f32.mrf.mxu1 }
 0x133   :  { %882 = vst.msk [vmem:[%s1650_s3 + $0x30] sm:$0x1] %vm881_vm3, %v991_v4  ;;  %v772_v23 = vpop.f32.mrf.mxu0 }
 0x134   :  { %v984_v25 = vpack.c.bf16 %v807_v53, %v807_v53  ;;  %v773_v5 = vadd.f32 %v772_v23, %v685_v54 }
 0x135   :  { %v1141_v6 = vpop.f32.mrf.mxu0 }
 0x136   :  { %874 = vst.msk [vmem:[%s1650_s3 + $0x14] sm:$0xf] %vm868_vm2, %v984_v25  ;;  %v808_v59 = vmax.f32 %v773_v5, 0.0 }
 0x137   :  { %v775_v28 = vpop.f32.mrf.mxu0 }
 0x138   :  { %v985_v7 = vpack.c.bf16 %v808_v59, %v808_v59  ;;  %v776_v8 = vadd.f32 %v775_v28, %v688_v26 }
 0x139   :  { %v1142_v9 = vpop.f32.mrf.mxu0 }
 0x13a   :  { %875 = vst.msk [vmem:[%s1650_s3 + $0x18] sm:$0xf] %vm868_vm2, %v985_v7  ;;  %v809_v10 = vmax.f32 %v776_v8, 0.0 }
 0x13c   :  { %v986_v12 = vpack.c.bf16 %v809_v10, %v809_v10 }
 0x13e   :  { %876 = vst.msk [vmem:[%s1650_s3 + $0x1c] sm:$0xf] %vm868_vm2, %v986_v12 }

// kernel: actor_critic_forward.7
= control target key start
LH: loop header
LB: loop body
LE: loop exit
PB: predicated region body
PF: predicated region fallthrough
CT: control target
= control target key end

     0   :  { %v440_v36 = vlaneseq  ;;  %v7872_v37 = vmov 1966171168   ;;  %vm2599_vm0 = vcmask 523264   ;;  %s10362_s1 = inlined_call_operand.vmem [shape: bf16[3136,256], index: 1, kind: input, shape index: {}]   ;;  %s10363_s0 = inlined_call_operand.vmem [shape: bf16[2,3136], index: 0, kind: input, shape index: {}]   ;;  %s10364_s2 = inlined_call_operand.vmem [shape: f32[1,256], index: 2, kind: input, shape index: {}]   ;;  %s10365_s3 = inlined_call_operand.vmem [shape: bf16[256,448], index: 3, kind: input, shape index: {}]   ;;  %s10366_s5 = inlined_call_operand.vmem [shape: bf16[448,448], index: 5, kind: input, shape index: {}]   ;;  %s10367_s7 = inlined_call_operand.vmem [shape: bf16[448,448], index: 7, kind: input, shape index: {}]   ;;  %s10368_s4 = inlined_call_operand.vmem [shape: f32[1,448], index: 4, kind: input, shape index: {}]   ;;  %s10369_s10 = inlined_call_operand.vmem [shape: bf16[448,128], index: 10, kind: input, shape index: {}]   ;;  %s10370_s9 = inlined_call_operand.vmem [shape: bf16[448,128], index: 9, kind: input, shape index: {}]   ;;  %s10371_s6 = inlined_call_operand.vmem [shape: f32[1,448], index: 6, kind: input, shape index: {}]   ;;  %s10372_s8 = inlined_call_operand.vmem [shape: f32[1,448], index: 8, kind: input, shape index: {}]   ;;  %s10373_s11 = inlined_call_operand.vmem [shape: f32[1,128], index: 11, kind: input, shape index: {}]   ;;  %s10374_s12 = inlined_call_operand.vmem [shape: f32[2,128], index: 12, kind: output, shape index: {}]  }
   0x1   :  { %v6793_v0 = vld [vmem:[%s10362_s1 + $0x74] ss:$8 sps:$4 sm:$0xff]   ;;  %v6797_v2 = vld [vmem:[%s10362_s1 + $0x70] ss:$8 sps:$4 sm:$0xff]   ;;  %v6799_v4 = vld [vmem:[%s10362_s1 + $0x64] ss:$8 sps:$4 sm:$0xff]   ;;  %v456_v38 = vunpack.c.l.s4 %v7872_v37 }
   0x2   :  { %v6795_v1 = vld [vmem:[%s10362_s1 + $0x174] ss:$8 sps:$4 sm:$0xff]   ;;  %2603 = vmatprep.subr.bf16.mxu0 %v6793_v0  ;;  %v6798_v3 = vld [vmem:[%s10362_s1 + $0x170] ss:$8 sps:$4 sm:$0xff]   ;;  %v6801_v5 = vld [vmem:[%s10362_s1 + $0x164] ss:$8 sps:$4 sm:$0xff]  }
   0x3   :  { %2644 = vmatprep.subr.bf16.mxu1 %v6795_v1  ;;  %2604 = vmatpush1.bf16.msra.mxu0 %v6797_v2  ;;  %v6803_v6 = vld [vmem:[%s10362_s1 + $0x60] ss:$8 sps:$4 sm:$0xff]   ;;  %v6805_v8 = vld [vmem:[%s10362_s1 + $0x54] ss:$8 sps:$4 sm:$0xff]   ;;  %v6809_v10 = vld [vmem:[%s10362_s1 + $0x50] ss:$8 sps:$4 sm:$0xff]   ;;  %v457_v43 = vunpack.c.0.s8 %v456_v38 }
   0x4   :  { %2645 = vmatpush1.bf16.msra.mxu1 %v6798_v3  ;;  %2605 = vmatprep.subr.bf16.mxu0 %v6799_v4  ;;  %v6804_v7 = vld [vmem:[%s10362_s1 + $0x160] ss:$8 sps:$4 sm:$0xff]   ;;  %v6807_v9 = vld [vmem:[%s10362_s1 + $0x154] ss:$8 sps:$4 sm:$0xff]   ;;  %v6810_v11 = vld [vmem:[%s10362_s1 + $0x150] ss:$8 sps:$4 sm:$0xff]  }
   0x5   :  { %2646 = vmatprep.subr.bf16.mxu1 %v6801_v5  ;;  %v6811_v12 = vld [vmem:[%s10362_s1 + $0x44] ss:$8 sps:$4 sm:$0xff]   ;;  %v6815_v14 = vld [vmem:[%s10362_s1 + $0x40] ss:$8 sps:$4 sm:$0xff]   ;;  %v6817_v16 = vld [vmem:[%s10362_s1 + $0x34] ss:$8 sps:$4 sm:$0xff]  }
   0x6   :  { %v6813_v13 = vld [vmem:[%s10362_s1 + $0x144] ss:$8 sps:$4 sm:$0xff]   ;;  %v6816_v15 = vld [vmem:[%s10362_s1 + $0x140] ss:$8 sps:$4 sm:$0xff]   ;;  %v6819_v17 = vld [vmem:[%s10362_s1 + $0x134] ss:$8 sps:$4 sm:$0xff]  }
   0x7   :  { %2606 = vmatpush1.bf16.msra.mxu0 %v6803_v6  ;;  %v6821_v18 = vld [vmem:[%s10362_s1 + $0x30] ss:$8 sps:$4 sm:$0xff]   ;;  %v6823_v20 = vld [vmem:[%s10362_s1 + $0x24] ss:$8 sps:$4 sm:$0xff]   ;;  %v6827_v22 = vld [vmem:[%s10362_s1 + $0x20] ss:$8 sps:$4 sm:$0xff]  }
   0x8   :  { %2647 = vmatpush1.bf16.msra.mxu1 %v6804_v7  ;;  %2607 = vmatprep.subr.bf16.mxu0 %v6805_v8  ;;  %v6822_v19 = vld [vmem:[%s10362_s1 + $0x130] ss:$8 sps:$4 sm:$0xff]   ;;  %v6825_v21 = vld [vmem:[%s10362_s1 + $0x124] ss:$8 sps:$4 sm:$0xff]   ;;  %v6828_v23 = vld [vmem:[%s10362_s1 + $0x120] ss:$8 sps:$4 sm:$0xff]  }
   0x9   :  { %2648 = vmatprep.subr.bf16.mxu1 %v6807_v9  ;;  %v6829_v24 = vld [vmem:[%s10362_s1 + $0x14] ss:$8 sps:$4 sm:$0xff]   ;;  %v6833_v26 = vld [vmem:[%s10362_s1 + $0x10] ss:$8 sps:$4 sm:$0xff]   ;;  %v6835_v28 = vld [vmem:[%s10362_s1 + $0x4] ss:$8 sps:$4 sm:$0xff]  }
   0xa   :  { %v6831_v25 = vld [vmem:[%s10362_s1 + $0x114] ss:$8 sps:$4 sm:$0xff]   ;;  %v6834_v27 = vld [vmem:[%s10362_s1 + $0x110] ss:$8 sps:$4 sm:$0xff]   ;;  %v6837_v29 = vld [vmem:[%s10362_s1 + $0x104] ss:$8 sps:$4 sm:$0xff]  }
   0xb   :  { %2608 = vmatpush1.bf16.msra.mxu0 %v6809_v10  ;;  %v6839_v30 = vld [vmem:[%s10362_s1] ss:$8 sps:$4 sm:$0xff]   ;;  %v6841_v32 = vld [vmem:[%s10362_s1 + $0xf4] ss:$8 sps:$4 sm:$0xff]   ;;  %v6845_v34 = vld [vmem:[%s10362_s1 + $0xf0] ss:$8 sps:$4 sm:$0xff]  }
   0xc   :  { %2649 = vmatpush1.bf16.msra.mxu1 %v6810_v11  ;;  %2609 = vmatprep.subr.bf16.mxu0 %v6811_v12  ;;  %v6840_v31 = vld [vmem:[%s10362_s1 + $0x100] ss:$8 sps:$4 sm:$0xff]   ;;  %v6843_v33 = vld [vmem:[%s10362_s1 + $0x1f4] ss:$8 sps:$4 sm:$0xff]   ;;  %v6846_v35 = vld [vmem:[%s10362_s1 + $0x1f0] ss:$8 sps:$4 sm:$0xff]  }
   0xd   :  { %2650 = vmatprep.subr.bf16.mxu1 %v6813_v13  ;;  %v6847_v39 = vld [vmem:[%s10362_s1 + $0xe4] ss:$8 sps:$4 sm:$0xff]   ;;  %v6851_v41 = vld [vmem:[%s10362_s1 + $0xe0] ss:$8 sps:$4 sm:$0xff]   ;;  %v8056_v42 = vshrl.u32 %v440_v36, 7 }
   0xe   :  { %v6849_v40 = vld [vmem:[%s10362_s1 + $0x1e4] ss:$8 sps:$4 sm:$0xff]   ;;  %v6852_v44 = vld [vmem:[%s10362_s1 + $0x1e0] ss:$8 sps:$4 sm:$0xff]   ;;  %v6853_v45 = vld [vmem:[%s10362_s1 + $0xd4] ss:$8 sps:$4 sm:$0xff]  }
   0xf   :  { %2610 = vmatpush1.bf16.msra.mxu0 %v6815_v14  ;;  %v6855_v46 = vld [vmem:[%s10362_s1 + $0x1d4] ss:$8 sps:$4 sm:$0xff]   ;;  %v6857_v47 = vld [vmem:[%s10362_s1 + $0xd0] ss:$8 sps:$4 sm:$0xff]   ;;  %v8074_v49 = vsub.s32 %v457_v43, %v8056_v42  ;;  %v6859_v50 = vld [vmem:[%s10362_s1 + $0xc4] ss:$8 sps:$4 sm:$0xff]  }
  0x10   :  { %2651 = vmatpush1.bf16.msra.mxu1 %v6816_v15  ;;  %2611 = vmatprep.subr.bf16.mxu0 %v6817_v16  ;;  %v6858_v48 = vld [vmem:[%s10362_s1 + $0x1d0] ss:$8 sps:$4 sm:$0xff]   ;;  %v6861_v51 = vld [vmem:[%s10362_s1 + $0x1c4] ss:$8 sps:$4 sm:$0xff]   ;;  %v6863_v53 = vld [vmem:[%s10362_s1 + $0xc0] ss:$8 sps:$4 sm:$0xff]  }
  0x11   :  { %2652 = vmatprep.subr.bf16.mxu1 %v6819_v17  ;;  %v42_v52 = vld [vmem:[%s10363_s0] sm:$0xff]  ;;  %v6865_v56 = vld [vmem:[%s10362_s1 + $0xb4] ss:$8 sps:$4 sm:$0xff]   ;;  %v6869_v59 = vld [vmem:[%s10362_s1 + $0xb0] ss:$8 sps:$4 sm:$0xff]  }
  0x12   :  { %v461_v54 = vrot.slane %v42_v52, %v8074_v49  ;;  %v6864_v55 = vld [vmem:[%s10362_s1 + $0x1c0] ss:$8 sps:$4 sm:$0xff]   ;;  %v6867_v57 = vld [vmem:[%s10362_s1 + $0x1b4] ss:$8 sps:$4 sm:$0xff]   ;;  %v6870_v61 = vld [vmem:[%s10362_s1 + $0x1b0] ss:$8 sps:$4 sm:$0xff]   ;;  %v454_v1 = vcombine.high %v42_v52, %v42_v52 }
  0x13   :  { %2612 = vmatpush1.bf16.msra.mxu0 %v6821_v18  ;;  %v6871_v62 = vld [vmem:[%s10362_s1 + $0xa4] ss:$8 sps:$4 sm:$0xff]   ;;  %v6875_v2 = vld [vmem:[%s10362_s1 + $0xa0] ss:$8 sps:$4 sm:$0xff]   ;;  %v6877_v4 = vld [vmem:[%s10362_s1 + $0x94] ss:$8 sps:$4 sm:$0xff]  }
  0x14   :  { %2653 = vmatpush1.bf16.msra.mxu1 %v6822_v19  ;;  %2613 = vmatprep.subr.bf16.mxu0 %v6823_v20  ;;  %v469_v58 = vcombine.high %v461_v54, %v461_v54  ;;  %v6873_v63 = vld [vmem:[%s10362_s1 + $0x1a4] ss:$8 sps:$4 sm:$0xff]   ;;  %v6876_v3 = vld [vmem:[%s10362_s1 + $0x1a0] ss:$8 sps:$4 sm:$0xff]   ;;  %v6879_v5 = vld [vmem:[%s10362_s1 + $0x194] ss:$8 sps:$4 sm:$0xff]   ;;  %v8124_v6 = vrot.slane %v454_v1, %v8074_v49  ;;  %v477_v13 = vrot.slane %v461_v54, %v8074_v49 }
  0x15   :  { %2654 = vmatprep.subr.bf16.mxu1 %v6825_v21  ;;  %v6881_v7 = vld [vmem:[%s10362_s1 + $0x90] ss:$8 sps:$4 sm:$0xff]   ;;  %v6883_v9 = vld [vmem:[%s10362_s1 + $0x84] ss:$8 sps:$4 sm:$0xff]   ;;  %v6887_v12 = vld [vmem:[%s10362_s1 + $0x80] ss:$8 sps:$4 sm:$0xff]  }
  0x16   :  { %v491_v60 = vrot.slane %v469_v58, %v8074_v49  ;;  %v6882_v8 = vld [vmem:[%s10362_s1 + $0x190] ss:$8 sps:$4 sm:$0xff]   ;;  %v6885_v10 = vld [vmem:[%s10362_s1 + $0x184] ss:$8 sps:$4 sm:$0xff]   ;;  %v470_v11 = vcombine.high %v8124_v6, %v8124_v6  ;;  %v6888_v14 = vld [vmem:[%s10362_s1 + $0x180] ss:$8 sps:$4 sm:$0xff]   ;;  %v499_v18 = vcombine.high %v477_v13, %v477_v13 }
  0x17   :  { %2614 = vmatpush1.bf16.msra.mxu0 %v6827_v22  ;;  %v6892_v15 = vld [vmem:[%s10362_s1 + $0x274] ss:$8 sps:$4 sm:$0xff]   ;;  %v6890_v19 = vld [vmem:[%s10362_s1 + $0x270] ss:$8 sps:$4 sm:$0xff]   ;;  %v6898_v21 = vld [vmem:[%s10362_s1 + $0x264] ss:$8 sps:$4 sm:$0xff]  }
  0x18   :  { %2655 = vmatpush1.bf16.msra.mxu1 %v6828_v23  ;;  %2615 = vmatprep.subr.bf16.mxu0 %v6829_v24  ;;  %v501_v0 = vcombine.high %v491_v60, %v491_v60  ;;  %v6895_v16 = vld [vmem:[%s10362_s1 + $0x374] ss:$8 sps:$4 sm:$0xff]   ;;  %v498_v17 = vrot.slane %v470_v11, %v8074_v49  ;;  %v6893_v20 = vld [vmem:[%s10362_s1 + $0x370] ss:$8 sps:$4 sm:$0xff]   ;;  %v6901_v22 = vld [vmem:[%s10362_s1 + $0x364] ss:$8 sps:$4 sm:$0xff]  }
  0x19   :  { %2656 = vmatprep.subr.bf16.mxu1 %v6831_v25  ;;  %2635 = vmatprep.mubr.bf16.mxu0 %v491_v60  ;;  %v6896_v24 = vld [vmem:[%s10362_s1 + $0x260] ss:$8 sps:$4 sm:$0xff]   ;;  %v6914_v36 = vld [vmem:[%s10362_s1 + $0x230] ss:$8 sps:$4 sm:$0xff]   ;;  %v6922_v38 = vld [vmem:[%s10362_s1 + $0x224] ss:$8 sps:$4 sm:$0xff]  }
  0x1a   :  { %2676 = vmatprep.mubr.bf16.mxu1 %v501_v0  ;;  %v502_v23 = vcombine.high %v498_v17, %v498_v17  ;;  %v6899_v25 = vld [vmem:[%s10362_s1 + $0x360] ss:$8 sps:$4 sm:$0xff]   ;;  %v6917_v37 = vld [vmem:[%s10362_s1 + $0x330] ss:$8 sps:$4 sm:$0xff]   ;;  %v6928_v43 = vld [vmem:[%s10362_s1 + $0x214] ss:$8 sps:$4 sm:$0xff]  }
  0x1b   :  { %2616 = vmatpush1.bf16.msra.mxu0 %v6833_v26  ;;  %v6904_v26 = vld [vmem:[%s10362_s1 + $0x254] ss:$8 sps:$4 sm:$0xff]   ;;  %v6938_v54 = vld [vmem:[%s10362_s1 + $0x2f0] ss:$8 sps:$4 sm:$0xff]   ;;  %v6944_v58 = vld [vmem:[%s10362_s1 + $0x2e0] ss:$8 sps:$4 sm:$0xff]  }
  0x1c   :  { %2657 = vmatpush1.bf16.msra.mxu1 %v6834_v27  ;;  %2617 = vmatprep.subr.bf16.mxu0 %v6835_v28  ;;  %v6907_v27 = vld [vmem:[%s10362_s1 + $0x354] ss:$8 sps:$4 sm:$0xff]   ;;  %v6902_v28 = vld [vmem:[%s10362_s1 + $0x250] ss:$8 sps:$4 sm:$0xff]   ;;  %v6958_v0 = vld [vmem:[%s10362_s1 + $0x2c4] ss:$8 sps:$4 sm:$0xff]  }
  0x1d   :  { %2658 = vmatprep.subr.bf16.mxu1 %v6837_v29  ;;  %v6905_v29 = vld [vmem:[%s10362_s1 + $0x350] ss:$8 sps:$4 sm:$0xff]   ;;  %v6940_v52 = vld [vmem:[%s10362_s1 + $0x2f4] ss:$8 sps:$4 sm:$0xff]   ;;  %v6961_v1 = vld [vmem:[%s10362_s1 + $0x3c4] ss:$8 sps:$4 sm:$0xff]  }
  0x1e   :  { %v6952_v60 = vld [vmem:[%s10362_s1 + $0x2d4] ss:$8 sps:$4 sm:$0xff]   ;;  %v6968_v11 = vld [vmem:[%s10362_s1 + $0x2a0] ss:$8 sps:$4 sm:$0xff]  }
  0x1f   :  { %2618 = vmatpush1.bf16.msra.mxu0 %v6839_v30  ;;  %v6910_v30 = vld [vmem:[%s10362_s1 + $0x244] ss:$8 sps:$4 sm:$0xff]  }
  0x20   :  { %2659 = vmatpush1.bf16.msra.mxu1 %v6840_v31  ;;  %2619 = vmatprep.subr.bf16.mxu0 %v6841_v32  ;;  %v6913_v31 = vld [vmem:[%s10362_s1 + $0x344] ss:$8 sps:$4 sm:$0xff]   ;;  %v6908_v32 = vld [vmem:[%s10362_s1 + $0x240] ss:$8 sps:$4 sm:$0xff]  }
  0x21   :  { %2660 = vmatprep.subr.bf16.mxu1 %v6843_v33  ;;  %v6911_v33 = vld [vmem:[%s10362_s1 + $0x340] ss:$8 sps:$4 sm:$0xff]  }
  0x23   :  { %2620 = vmatpush2.bf16.msra.mxu0 %v6845_v34  ;;  %v6916_v34 = vld [vmem:[%s10362_s1 + $0x234] ss:$8 sps:$4 sm:$0xff]  }
  0x24   :  { %2661 = vmatpush2.bf16.msra.mxu1 %v6846_v35  ;;  %2621 = vmatprep.subr.bf16.mxu0 %v6847_v39  ;;  %v6919_v35 = vld [vmem:[%s10362_s1 + $0x334] ss:$8 sps:$4 sm:$0xff]   ;;  %v6925_v39 = vld [vmem:[%s10362_s1 + $0x324] ss:$8 sps:$4 sm:$0xff]  }
  0x25   :  { %2662 = vmatprep.subr.bf16.mxu1 %v6849_v40  ;;  %v6920_v40 = vld [vmem:[%s10362_s1 + $0x220] ss:$8 sps:$4 sm:$0xff]  }
  0x27   :  { %2622 = vmatpush2.bf16.msra.mxu0 %v6851_v41  ;;  %v6923_v41 = vld [vmem:[%s10362_s1 + $0x320] ss:$8 sps:$4 sm:$0xff]  }
  0x28   :  { %2663 = vmatpush2.bf16.msra.mxu1 %v6852_v44  ;;  %2623 = vmatprep.subr.bf16.mxu0 %v6853_v45  ;;  %v6931_v44 = vld [vmem:[%s10362_s1 + $0x314] ss:$8 sps:$4 sm:$0xff]   ;;  %v6926_v45 = vld [vmem:[%s10362_s1 + $0x210] ss:$8 sps:$4 sm:$0xff]  }
  0x29   :  { %2664 = vmatprep.subr.bf16.mxu1 %v6855_v46  ;;  %v6929_v46 = vld [vmem:[%s10362_s1 + $0x310] ss:$8 sps:$4 sm:$0xff]  }
  0x2b   :  { %2624 = vmatpush2.bf16.msra.mxu0 %v6857_v47  ;;  %v6934_v47 = vld [vmem:[%s10362_s1 + $0x204] ss:$8 sps:$4 sm:$0xff]  }
  0x2c   :  { %2665 = vmatpush2.bf16.msra.mxu1 %v6858_v48  ;;  %2625 = vmatprep.subr.bf16.mxu0 %v6859_v50  ;;  %v6937_v48 = vld [vmem:[%s10362_s1 + $0x304] ss:$8 sps:$4 sm:$0xff]   ;;  %v6932_v50 = vld [vmem:[%s10362_s1 + $0x200] ss:$8 sps:$4 sm:$0xff]  }
  0x2d   :  { %2666 = vmatprep.subr.bf16.mxu1 %v6861_v51  ;;  %v6935_v51 = vld [vmem:[%s10362_s1 + $0x300] ss:$8 sps:$4 sm:$0xff]  }
  0x2f   :  { %2626 = vmatpush2.bf16.msra.mxu0 %v6863_v53  ;;  %v6943_v53 = vld [vmem:[%s10362_s1 + $0x3f4] ss:$8 sps:$4 sm:$0xff]  }
  0x30   :  { %2667 = vmatpush2.bf16.msra.mxu1 %v6864_v55  ;;  %2627 = vmatprep.subr.bf16.mxu0 %v6865_v56  ;;  %v6941_v55 = vld [vmem:[%s10362_s1 + $0x3f0] ss:$8 sps:$4 sm:$0xff]   ;;  %v6946_v56 = vld [vmem:[%s10362_s1 + $0x2e4] ss:$8 sps:$4 sm:$0xff]  }
  0x31   :  { %2668 = vmatprep.subr.bf16.mxu1 %v6867_v57  ;;  %v6949_v57 = vld [vmem:[%s10362_s1 + $0x3e4] ss:$8 sps:$4 sm:$0xff]  }
  0x33   :  { %2628 = vmatpush2.bf16.msra.mxu0 %v6869_v59  ;;  %v6947_v59 = vld [vmem:[%s10362_s1 + $0x3e0] ss:$8 sps:$4 sm:$0xff]  }
  0x34   :  { %2669 = vmatpush2.bf16.msra.mxu1 %v6870_v61  ;;  %2629 = vmatprep.subr.bf16.mxu0 %v6871_v62  ;;  %v6955_v61 = vld [vmem:[%s10362_s1 + $0x3d4] ss:$8 sps:$4 sm:$0xff]   ;;  %v6950_v62 = vld [vmem:[%s10362_s1 + $0x2d0] ss:$8 sps:$4 sm:$0xff]  }
  0x35   :  { %2670 = vmatprep.subr.bf16.mxu1 %v6873_v63  ;;  %v6953_v63 = vld [vmem:[%s10362_s1 + $0x3d0] ss:$8 sps:$4 sm:$0xff]  }
  0x37   :  { %2630 = vmatpush2.bf16.msra.mxu0 %v6875_v2  ;;  %v6956_v2 = vld [vmem:[%s10362_s1 + $0x2c0] ss:$8 sps:$4 sm:$0xff]  }
  0x38   :  { %2671 = vmatpush2.bf16.msra.mxu1 %v6876_v3  ;;  %2631 = vmatprep.subr.bf16.mxu0 %v6877_v4  ;;  %v6959_v3 = vld [vmem:[%s10362_s1 + $0x3c0] ss:$8 sps:$4 sm:$0xff]   ;;  %v6964_v4 = vld [vmem:[%s10362_s1 + $0x2b4] ss:$8 sps:$4 sm:$0xff]  }
  0x39   :  { %2672 = vmatprep.subr.bf16.mxu1 %v6879_v5  ;;  %v6967_v5 = vld [vmem:[%s10362_s1 + $0x3b4] ss:$8 sps:$4 sm:$0xff]  }
  0x3b   :  { %2632 = vmatpush2.bf16.msra.mxu0 %v6881_v7  ;;  %v6962_v7 = vld [vmem:[%s10362_s1 + $0x2b0] ss:$8 sps:$4 sm:$0xff]  }
  0x3c   :  { %2673 = vmatpush2.bf16.msra.mxu1 %v6882_v8  ;;  %2633 = vmatprep.subr.bf16.mxu0 %v6883_v9  ;;  %v6965_v8 = vld [vmem:[%s10362_s1 + $0x3b0] ss:$8 sps:$4 sm:$0xff]   ;;  %v6970_v9 = vld [vmem:[%s10362_s1 + $0x2a4] ss:$8 sps:$4 sm:$0xff]  }
  0x3d   :  { %2674 = vmatprep.subr.bf16.mxu1 %v6885_v10  ;;  %v6973_v10 = vld [vmem:[%s10362_s1 + $0x3a4] ss:$8 sps:$4 sm:$0xff]  }
  0x3f   :  { %2634 = vmatpush2.bf16.msra.mxu0 %v6887_v12  ;;  %v6971_v12 = vld [vmem:[%s10362_s1 + $0x3a0] ss:$8 sps:$4 sm:$0xff]  }
  0x40   :  { %2675 = vmatpush2.bf16.msra.mxu1 %v6888_v14  ;;  %2685 = vmatprep.subr.bf16.mxu0 %v6892_v15  ;;  %v6979_v14 = vld [vmem:[%s10362_s1 + $0x394] ss:$8 sps:$4 sm:$0xff]   ;;  %v6974_v15 = vld [vmem:[%s10362_s1 + $0x290] ss:$8 sps:$4 sm:$0xff]  }
  0x41   :  { %2726 = vmatprep.subr.bf16.mxu1 %v6895_v16  ;;  %v6977_v16 = vld [vmem:[%s10362_s1 + $0x390] ss:$8 sps:$4 sm:$0xff]  }
  0x42   :  { %2636 = vmatmul.mubr.bf16.vlgmr.msra.gmra.mxu0 %v477_v13  ;;  %v6976_v13 = vld [vmem:[%s10362_s1 + $0x294] ss:$8 sps:$4 sm:$0xff]  }
  0x43   :  { %2677 = vmatmul.mubr.bf16.vlgmr.msra.gmra.mxu1 %v499_v18  ;;  %2686 = vmatpush1.bf16.msra.mxu0 %v6890_v19  ;;  %v6985_v18 = vld [vmem:[%s10362_s1 + $0x384] ss:$8 sps:$4 sm:$0xff]   ;;  %v6980_v19 = vld [vmem:[%s10362_s1 + $0x280] ss:$8 sps:$4 sm:$0xff]  }
  0x44   :  { %2727 = vmatpush1.bf16.msra.mxu1 %v6893_v20  ;;  %2687 = vmatprep.subr.bf16.mxu0 %v6898_v21  ;;  %v484_v20 = vrot.slane %v8124_v6, %v8074_v49  ;;  %v6983_v21 = vld [vmem:[%s10362_s1 + $0x380] ss:$8 sps:$4 sm:$0xff]   ;;  %v6986_v6 = vld [vmem:[%s10362_s1 + $0x470] ss:$8 sps:$4 sm:$0xff]  }
  0x45   :  { %2728 = vmatprep.subr.bf16.mxu1 %v6901_v22  ;;  %2717 = vmatprep.mubr.bf16.mxu0 %v498_v17  ;;  %v6982_v17 = vld [vmem:[%s10362_s1 + $0x284] ss:$8 sps:$4 sm:$0xff]   ;;  %v6988_v22 = vld [vmem:[%s10362_s1 + $0x474] ss:$8 sps:$4 sm:$0xff]  }
  0x46   :  { %2758 = vmatprep.mubr.bf16.mxu1 %v502_v23  ;;  %v6991_v23 = vld [vmem:[%s10362_s1 + $0x574] ss:$8 sps:$4 sm:$0xff]  }
  0x47   :  { %2688 = vmatpush1.bf16.msra.mxu0 %v6896_v24  ;;  %v500_v24 = vcombine.high %v484_v20, %v484_v20 }
  0x48   :  { %2729 = vmatpush1.bf16.msra.mxu1 %v6899_v25  ;;  %2689 = vmatprep.subr.bf16.mxu0 %v6904_v26  ;;  %v6989_v25 = vld [vmem:[%s10362_s1 + $0x570] ss:$8 sps:$4 sm:$0xff]   ;;  %v8357_v26 = vld [vmem:[%s10363_s0 + $0x8] sm:$0xff] }
  0x49   :  { %2730 = vmatprep.subr.bf16.mxu1 %v6907_v27  ;;  %v6994_v27 = vld [vmem:[%s10362_s1 + $0x464] ss:$8 sps:$4 sm:$0xff]  }
  0x4b   :  { %2690 = vmatpush1.bf16.msra.mxu0 %v6902_v28  ;;  %v6997_v28 = vld [vmem:[%s10362_s1 + $0x564] ss:$8 sps:$4 sm:$0xff]  }
  0x4c   :  { %2731 = vmatpush1.bf16.msra.mxu1 %v6905_v29  ;;  %2691 = vmatprep.subr.bf16.mxu0 %v6910_v30  ;;  %v8367_v29 = vrot.slane %v8357_v26, %v8074_v49 }
  0x4d   :  { %2732 = vmatprep.subr.bf16.mxu1 %v6913_v31  ;;  %v6992_v31 = vld [vmem:[%s10362_s1 + $0x460] ss:$8 sps:$4 sm:$0xff]  }
  0x4e   :  { %v518_v30 = vcombine.high %v8367_v29, %v8367_v29 }
  0x4f   :  { %2692 = vmatpush1.bf16.msra.mxu0 %v6908_v32  ;;  %v6995_v32 = vld [vmem:[%s10362_s1 + $0x560] ss:$8 sps:$4 sm:$0xff]  }
  0x50   :  { %2733 = vmatpush1.bf16.msra.mxu1 %v6911_v33  ;;  %2693 = vmatprep.subr.bf16.mxu0 %v6916_v34  ;;  %v7000_v33 = vld [vmem:[%s10362_s1 + $0x454] ss:$8 sps:$4 sm:$0xff]  }
  0x51   :  { %2734 = vmatprep.subr.bf16.mxu1 %v6919_v35  ;;  %v7003_v34 = vld [vmem:[%s10362_s1 + $0x554] ss:$8 sps:$4 sm:$0xff]   ;;  %v540_v35 = vrot.slane %v518_v30, %v8074_v49 }
  0x53   :  { %2694 = vmatpush1.bf16.msra.mxu0 %v6914_v36  ;;  %v550_v36 = vcombine.high %v540_v35, %v540_v35 }
  0x54   :  { %2735 = vmatpush1.bf16.msra.mxu1 %v6917_v37  ;;  %2695 = vmatprep.subr.bf16.mxu0 %v6922_v38  ;;  %v6998_v37 = vld [vmem:[%s10362_s1 + $0x450] ss:$8 sps:$4 sm:$0xff]  }
  0x55   :  { %2736 = vmatprep.subr.bf16.mxu1 %v6925_v39  ;;  %v7001_v38 = vld [vmem:[%s10362_s1 + $0x550] ss:$8 sps:$4 sm:$0xff]   ;;  %v7006_v39 = vld [vmem:[%s10362_s1 + $0x444] ss:$8 sps:$4 sm:$0xff]  }
  0x57   :  { %2696 = vmatpush1.bf16.msra.mxu0 %v6920_v40  ;;  %v7009_v40 = vld [vmem:[%s10362_s1 + $0x544] ss:$8 sps:$4 sm:$0xff]  }
  0x58   :  { %2737 = vmatpush1.bf16.msra.mxu1 %v6923_v41  ;;  %2697 = vmatprep.subr.bf16.mxu0 %v6928_v43  ;;  %v7004_v41 = vld [vmem:[%s10362_s1 + $0x440] ss:$8 sps:$4 sm:$0xff]  }
  0x59   :  { %2738 = vmatprep.subr.bf16.mxu1 %v6931_v44  ;;  %v7007_v43 = vld [vmem:[%s10362_s1 + $0x540] ss:$8 sps:$4 sm:$0xff]   ;;  %v7012_v44 = vld [vmem:[%s10362_s1 + $0x434] ss:$8 sps:$4 sm:$0xff]  }
  0x5b   :  { %2698 = vmatpush1.bf16.msra.mxu0 %v6926_v45  ;;  %v7015_v45 = vld [vmem:[%s10362_s1 + $0x534] ss:$8 sps:$4 sm:$0xff]  }
  0x5c   :  { %2739 = vmatpush1.bf16.msra.mxu1 %v6929_v46  ;;  %2699 = vmatprep.subr.bf16.mxu0 %v6934_v47  ;;  %v7010_v46 = vld [vmem:[%s10362_s1 + $0x430] ss:$8 sps:$4 sm:$0xff]  }
  0x5d   :  { %2740 = vmatprep.subr.bf16.mxu1 %v6937_v48  ;;  %v7013_v47 = vld [vmem:[%s10362_s1 + $0x530] ss:$8 sps:$4 sm:$0xff]   ;;  %v7018_v48 = vld [vmem:[%s10362_s1 + $0x424] ss:$8 sps:$4 sm:$0xff]  }
  0x5f   :  { %2700 = vmatpush1.bf16.msra.mxu0 %v6932_v50  ;;  %v7021_v50 = vld [vmem:[%s10362_s1 + $0x524] ss:$8 sps:$4 sm:$0xff]  }
  0x60   :  { %2741 = vmatpush1.bf16.msra.mxu1 %v6935_v51  ;;  %2701 = vmatprep.subr.bf16.mxu0 %v6940_v52  ;;  %v7016_v51 = vld [vmem:[%s10362_s1 + $0x420] ss:$8 sps:$4 sm:$0xff]  }
  0x61   :  { %2742 = vmatprep.subr.bf16.mxu1 %v6943_v53  ;;  %v7019_v52 = vld [vmem:[%s10362_s1 + $0x520] ss:$8 sps:$4 sm:$0xff]   ;;  %v7024_v53 = vld [vmem:[%s10362_s1 + $0x414] ss:$8 sps:$4 sm:$0xff]  }
  0x63   :  { %2702 = vmatpush2.bf16.msra.mxu0 %v6938_v54  ;;  %v7027_v54 = vld [vmem:[%s10362_s1 + $0x514] ss:$8 sps:$4 sm:$0xff]  }
  0x64   :  { %2743 = vmatpush2.bf16.msra.mxu1 %v6941_v55  ;;  %2703 = vmatprep.subr.bf16.mxu0 %v6946_v56  ;;  %v7022_v55 = vld [vmem:[%s10362_s1 + $0x410] ss:$8 sps:$4 sm:$0xff]  }
  0x65   :  { %2744 = vmatprep.subr.bf16.mxu1 %v6949_v57  ;;  %v7025_v56 = vld [vmem:[%s10362_s1 + $0x510] ss:$8 sps:$4 sm:$0xff]   ;;  %v7030_v57 = vld [vmem:[%s10362_s1 + $0x404] ss:$8 sps:$4 sm:$0xff]  }
  0x67   :  { %2704 = vmatpush2.bf16.msra.mxu0 %v6944_v58  ;;  %v7033_v58 = vld [vmem:[%s10362_s1 + $0x504] ss:$8 sps:$4 sm:$0xff]  }
  0x68   :  { %2745 = vmatpush2.bf16.msra.mxu1 %v6947_v59  ;;  %2705 = vmatprep.subr.bf16.mxu0 %v6952_v60  ;;  %v7028_v59 = vld [vmem:[%s10362_s1 + $0x400] ss:$8 sps:$4 sm:$0xff]  }
  0x69   :  { %2746 = vmatprep.subr.bf16.mxu1 %v6955_v61  ;;  %v7031_v60 = vld [vmem:[%s10362_s1 + $0x500] ss:$8 sps:$4 sm:$0xff]   ;;  %v7036_v61 = vld [vmem:[%s10362_s1 + $0x4f4] ss:$8 sps:$4 sm:$0xff]  }
  0x6b   :  { %2706 = vmatpush2.bf16.msra.mxu0 %v6950_v62  ;;  %v7039_v62 = vld [vmem:[%s10362_s1 + $0x5f4] ss:$8 sps:$4 sm:$0xff]  }
  0x6c   :  { %2747 = vmatpush2.bf16.msra.mxu1 %v6953_v63  ;;  %2707 = vmatprep.subr.bf16.mxu0 %v6958_v0  ;;  %v7034_v63 = vld [vmem:[%s10362_s1 + $0x4f0] ss:$8 sps:$4 sm:$0xff]  }
  0x6d   :  { %2748 = vmatprep.subr.bf16.mxu1 %v6961_v1  ;;  %v7037_v0 = vld [vmem:[%s10362_s1 + $0x5f0] ss:$8 sps:$4 sm:$0xff]   ;;  %v7042_v1 = vld [vmem:[%s10362_s1 + $0x4e4] ss:$8 sps:$4 sm:$0xff]  }
  0x6f   :  { %2708 = vmatpush2.bf16.msra.mxu0 %v6956_v2  ;;  %v7045_v2 = vld [vmem:[%s10362_s1 + $0x5e4] ss:$8 sps:$4 sm:$0xff]  }
  0x70   :  { %2749 = vmatpush2.bf16.msra.mxu1 %v6959_v3  ;;  %2709 = vmatprep.subr.bf16.mxu0 %v6964_v4  ;;  %v7040_v3 = vld [vmem:[%s10362_s1 + $0x4e0] ss:$8 sps:$4 sm:$0xff]  }
  0x71   :  { %2750 = vmatprep.subr.bf16.mxu1 %v6967_v5  ;;  %v7043_v4 = vld [vmem:[%s10362_s1 + $0x5e0] ss:$8 sps:$4 sm:$0xff]   ;;  %v7048_v5 = vld [vmem:[%s10362_s1 + $0x4d4] ss:$8 sps:$4 sm:$0xff]  }
  0x73   :  { %2710 = vmatpush2.bf16.msra.mxu0 %v6962_v7  ;;  %v7051_v7 = vld [vmem:[%s10362_s1 + $0x5d4] ss:$8 sps:$4 sm:$0xff]  }
  0x74   :  { %2751 = vmatpush2.bf16.msra.mxu1 %v6965_v8  ;;  %2711 = vmatprep.subr.bf16.mxu0 %v6970_v9  ;;  %v7046_v8 = vld [vmem:[%s10362_s1 + $0x4d0] ss:$8 sps:$4 sm:$0xff]  }
  0x75   :  { %2752 = vmatprep.subr.bf16.mxu1 %v6973_v10  ;;  %v7049_v9 = vld [vmem:[%s10362_s1 + $0x5d0] ss:$8 sps:$4 sm:$0xff]   ;;  %v7054_v10 = vld [vmem:[%s10362_s1 + $0x4c4] ss:$8 sps:$4 sm:$0xff]  }
  0x77   :  { %2712 = vmatpush2.bf16.msra.mxu0 %v6968_v11  ;;  %v7057_v11 = vld [vmem:[%s10362_s1 + $0x5c4] ss:$8 sps:$4 sm:$0xff]  }
  0x78   :  { %2753 = vmatpush2.bf16.msra.mxu1 %v6971_v12  ;;  %2713 = vmatprep.subr.bf16.mxu0 %v6976_v13  ;;  %v7052_v12 = vld [vmem:[%s10362_s1 + $0x4c0] ss:$8 sps:$4 sm:$0xff]  }
  0x79   :  { %2754 = vmatprep.subr.bf16.mxu1 %v6979_v14  ;;  %v7055_v13 = vld [vmem:[%s10362_s1 + $0x5c0] ss:$8 sps:$4 sm:$0xff]   ;;  %v7060_v14 = vld [vmem:[%s10362_s1 + $0x4b4] ss:$8 sps:$4 sm:$0xff]  }
  0x7b   :  { %2714 = vmatpush2.bf16.msra.mxu0 %v6974_v15  ;;  %v7063_v15 = vld [vmem:[%s10362_s1 + $0x5b4] ss:$8 sps:$4 sm:$0xff]  }
  0x7c   :  { %2755 = vmatpush2.bf16.msra.mxu1 %v6977_v16  ;;  %2715 = vmatprep.subr.bf16.mxu0 %v6982_v17  ;;  %v7058_v16 = vld [vmem:[%s10362_s1 + $0x4b0] ss:$8 sps:$4 sm:$0xff]  }
  0x7d   :  { %2756 = vmatprep.subr.bf16.mxu1 %v6985_v18  ;;  %v7061_v17 = vld [vmem:[%s10362_s1 + $0x5b0] ss:$8 sps:$4 sm:$0xff]   ;;  %v7066_v18 = vld [vmem:[%s10362_s1 + $0x4a4] ss:$8 sps:$4 sm:$0xff]  }
  0x7f   :  { %2716 = vmatpush2.bf16.msra.mxu0 %v6980_v19  ;;  %v7069_v19 = vld [vmem:[%s10362_s1 + $0x5a4] ss:$8 sps:$4 sm:$0xff]  }
  0x80   :  { %2757 = vmatpush2.bf16.msra.mxu1 %v6983_v21  ;;  %2767 = vmatprep.subr.bf16.mxu0 %v6988_v22  ;;  %v7064_v21 = vld [vmem:[%s10362_s1 + $0x4a0] ss:$8 sps:$4 sm:$0xff]  }
  0x81   :  { %2808 = vmatprep.subr.bf16.mxu1 %v6991_v23  ;;  %v7067_v22 = vld [vmem:[%s10362_s1 + $0x5a0] ss:$8 sps:$4 sm:$0xff]   ;;  %v7072_v23 = vld [vmem:[%s10362_s1 + $0x494] ss:$8 sps:$4 sm:$0xff]  }
  0x82   :  { %2718 = vmatmul.mubr.bf16.vlgmr.msra.gmra.mxu0 %v484_v20  ;;  %v503_v20 = vcombine.high %v8357_v26, %v8357_v26  ;;  %v7073_v26 = vld [vmem:[%s10362_s1 + $0x590] ss:$8 sps:$4 sm:$0xff]  }
  0x83   :  { %2759 = vmatmul.mubr.bf16.vlgmr.msra.gmra.mxu1 %v500_v24  ;;  %2768 = vmatpush1.bf16.msra.mxu0 %v6986_v6  ;;  %v7075_v24 = vld [vmem:[%s10362_s1 + $0x594] ss:$8 sps:$4 sm:$0xff]  }
  0x84   :  { %2809 = vmatpush1.bf16.msra.mxu1 %v6989_v25  ;;  %2769 = vmatprep.subr.bf16.mxu0 %v6994_v27  ;;  %v8531_v6 = vrot.slane %v503_v20, %v8074_v49  ;;  %v7070_v25 = vld [vmem:[%s10362_s1 + $0x490] ss:$8 sps:$4 sm:$0xff]   ;;  %v7078_v27 = vld [vmem:[%s10362_s1 + $0x484] ss:$8 sps:$4 sm:$0xff]  }
  0x85   :  { %2810 = vmatprep.subr.bf16.mxu1 %v6997_v28  ;;  %2799 = vmatprep.mubr.bf16.mxu0 %v540_v35  ;;  %v7081_v28 = vld [vmem:[%s10362_s1 + $0x584] ss:$8 sps:$4 sm:$0xff]   ;;  %v7087_v35 = vld [vmem:[%s10362_s1 + $0x774] ss:$8 sps:$4 sm:$0xff]  }
  0x86   :  { %2840 = vmatprep.mubr.bf16.mxu1 %v550_v36  ;;  %v519_v30 = vcombine.high %v8531_v6, %v8531_v6  ;;  %v7153_v20 = vld [vmem:[%s10362_s1 + $0x7c4] ss:$8 sps:$4 sm:$0xff]  }
  0x87   :  { %2770 = vmatpush1.bf16.msra.mxu0 %v6992_v31  ;;  %v7076_v31 = vld [vmem:[%s10362_s1 + $0x480] ss:$8 sps:$4 sm:$0xff]  }
  0x88   :  { %2811 = vmatpush1.bf16.msra.mxu1 %v6995_v32  ;;  %2771 = vmatprep.subr.bf16.mxu0 %v7000_v33  ;;  %v526_v32 = vrot.slane %v8367_v29, %v8074_v49  ;;  %v7079_v33 = vld [vmem:[%s10362_s1 + $0x580] ss:$8 sps:$4 sm:$0xff]   ;;  %v547_v36 = vrot.slane %v519_v30, %v8074_v49  ;;  %v7082_v29 = vld [vmem:[%s10362_s1 + $0x670] ss:$8 sps:$4 sm:$0xff]  }
  0x89   :  { %2812 = vmatprep.subr.bf16.mxu1 %v7003_v34  ;;  %v7084_v34 = vld [vmem:[%s10362_s1 + $0x674] ss:$8 sps:$4 sm:$0xff]   ;;  %v7160_v30 = vld [vmem:[%s10362_s1 + $0x6a0] ss:$8 sps:$4 sm:$0xff]  }
  0x8b   :  { %2772 = vmatpush1.bf16.msra.mxu0 %v6998_v37  ;;  %v548_v37 = vcombine.high %v526_v32, %v526_v32 }
  0x8c   :  { %2813 = vmatpush1.bf16.msra.mxu1 %v7001_v38  ;;  %2773 = vmatprep.subr.bf16.mxu0 %v7006_v39  ;;  %v7085_v38 = vld [vmem:[%s10362_s1 + $0x770] ss:$8 sps:$4 sm:$0xff]   ;;  %v7090_v39 = vld [vmem:[%s10362_s1 + $0x664] ss:$8 sps:$4 sm:$0xff]  }
  0x8d   :  { %2814 = vmatprep.subr.bf16.mxu1 %v7009_v40  ;;  %v7093_v40 = vld [vmem:[%s10362_s1 + $0x764] ss:$8 sps:$4 sm:$0xff]  }
  0x8f   :  { %2774 = vmatpush1.bf16.msra.mxu0 %v7004_v41  ;;  %v551_v41 = vcombine.high %v547_v36, %v547_v36 }
  0x90   :  { %2815 = vmatpush1.bf16.msra.mxu1 %v7007_v43  ;;  %2775 = vmatprep.subr.bf16.mxu0 %v7012_v44  ;;  %v7088_v43 = vld [vmem:[%s10362_s1 + $0x660] ss:$8 sps:$4 sm:$0xff]  }
  0x91   :  { %2816 = vmatprep.subr.bf16.mxu1 %v7015_v45  ;;  %v7091_v44 = vld [vmem:[%s10362_s1 + $0x760] ss:$8 sps:$4 sm:$0xff]   ;;  %v7096_v45 = vld [vmem:[%s10362_s1 + $0x654] ss:$8 sps:$4 sm:$0xff]  }
  0x93   :  { %2776 = vmatpush1.bf16.msra.mxu0 %v7010_v46  ;;  %v7099_v46 = vld [vmem:[%s10362_s1 + $0x754] ss:$8 sps:$4 sm:$0xff]  }
  0x94   :  { %2817 = vmatpush1.bf16.msra.mxu1 %v7013_v47  ;;  %2777 = vmatprep.subr.bf16.mxu0 %v7018_v48  ;;  %v7094_v47 = vld [vmem:[%s10362_s1 + $0x650] ss:$8 sps:$4 sm:$0xff]  }
  0x95   :  { %2818 = vmatprep.subr.bf16.mxu1 %v7021_v50  ;;  %v7097_v48 = vld [vmem:[%s10362_s1 + $0x750] ss:$8 sps:$4 sm:$0xff]   ;;  %v7102_v50 = vld [vmem:[%s10362_s1 + $0x644] ss:$8 sps:$4 sm:$0xff]  }
  0x97   :  { %2778 = vmatpush1.bf16.msra.mxu0 %v7016_v51  ;;  %v7105_v51 = vld [vmem:[%s10362_s1 + $0x744] ss:$8 sps:$4 sm:$0xff]  }
  0x98   :  { %2819 = vmatpush1.bf16.msra.mxu1 %v7019_v52  ;;  %2779 = vmatprep.subr.bf16.mxu0 %v7024_v53  ;;  %v7100_v52 = vld [vmem:[%s10362_s1 + $0x640] ss:$8 sps:$4 sm:$0xff]  }
  0x99   :  { %2820 = vmatprep.subr.bf16.mxu1 %v7027_v54  ;;  %v7103_v53 = vld [vmem:[%s10362_s1 + $0x740] ss:$8 sps:$4 sm:$0xff]   ;;  %v7108_v54 = vld [vmem:[%s10362_s1 + $0x634] ss:$8 sps:$4 sm:$0xff]  }
  0x9b   :  { %2780 = vmatpush1.bf16.msra.mxu0 %v7022_v55  ;;  %v7111_v55 = vld [vmem:[%s10362_s1 + $0x734] ss:$8 sps:$4 sm:$0xff]  }
  0x9c   :  { %2821 = vmatpush1.bf16.msra.mxu1 %v7025_v56  ;;  %2781 = vmatprep.subr.bf16.mxu0 %v7030_v57  ;;  %v7106_v56 = vld [vmem:[%s10362_s1 + $0x630] ss:$8 sps:$4 sm:$0xff]  }
  0x9d   :  { %2822 = vmatprep.subr.bf16.mxu1 %v7033_v58  ;;  %v7109_v57 = vld [vmem:[%s10362_s1 + $0x730] ss:$8 sps:$4 sm:$0xff]   ;;  %v7114_v58 = vld [vmem:[%s10362_s1 + $0x624] ss:$8 sps:$4 sm:$0xff]  }
  0x9f   :  { %2782 = vmatpush1.bf16.msra.mxu0 %v7028_v59  ;;  %v7117_v59 = vld [vmem:[%s10362_s1 + $0x724] ss:$8 sps:$4 sm:$0xff]  }
  0xa0   :  { %2823 = vmatpush1.bf16.msra.mxu1 %v7031_v60  ;;  %2783 = vmatprep.subr.bf16.mxu0 %v7036_v61  ;;  %v7112_v60 = vld [vmem:[%s10362_s1 + $0x620] ss:$8 sps:$4 sm:$0xff]  }
  0xa1   :  { %2824 = vmatprep.subr.bf16.mxu1 %v7039_v62  ;;  %v7115_v61 = vld [vmem:[%s10362_s1 + $0x720] ss:$8 sps:$4 sm:$0xff]   ;;  %v7120_v62 = vld [vmem:[%s10362_s1 + $0x614] ss:$8 sps:$4 sm:$0xff]  }
  0xa3   :  { %2784 = vmatpush2.bf16.msra.mxu0 %v7034_v63  ;;  %v7123_v63 = vld [vmem:[%s10362_s1 + $0x714] ss:$8 sps:$4 sm:$0xff]  }
  0xa4   :  { %2825 = vmatpush2.bf16.msra.mxu1 %v7037_v0  ;;  %2785 = vmatprep.subr.bf16.mxu0 %v7042_v1  ;;  %v7118_v0 = vld [vmem:[%s10362_s1 + $0x610] ss:$8 sps:$4 sm:$0xff]  }
  0xa5   :  { %2826 = vmatprep.subr.bf16.mxu1 %v7045_v2  ;;  %v7121_v1 = vld [vmem:[%s10362_s1 + $0x710] ss:$8 sps:$4 sm:$0xff]   ;;  %v7126_v2 = vld [vmem:[%s10362_s1 + $0x604] ss:$8 sps:$4 sm:$0xff]  }
  0xa7   :  { %2786 = vmatpush2.bf16.msra.mxu0 %v7040_v3  ;;  %v7129_v3 = vld [vmem:[%s10362_s1 + $0x704] ss:$8 sps:$4 sm:$0xff]  }
  0xa8   :  { %2827 = vmatpush2.bf16.msra.mxu1 %v7043_v4  ;;  %2787 = vmatprep.subr.bf16.mxu0 %v7048_v5  ;;  %v7124_v4 = vld [vmem:[%s10362_s1 + $0x600] ss:$8 sps:$4 sm:$0xff]  }
  0xa9   :  { %2828 = vmatprep.subr.bf16.mxu1 %v7051_v7  ;;  %v7127_v5 = vld [vmem:[%s10362_s1 + $0x700] ss:$8 sps:$4 sm:$0xff]   ;;  %v7132_v7 = vld [vmem:[%s10362_s1 + $0x6f4] ss:$8 sps:$4 sm:$0xff]  }
  0xab   :  { %2788 = vmatpush2.bf16.msra.mxu0 %v7046_v8  ;;  %v7135_v8 = vld [vmem:[%s10362_s1 + $0x7f4] ss:$8 sps:$4 sm:$0xff]  }
  0xac   :  { %2829 = vmatpush2.bf16.msra.mxu1 %v7049_v9  ;;  %2789 = vmatprep.subr.bf16.mxu0 %v7054_v10  ;;  %v7130_v9 = vld [vmem:[%s10362_s1 + $0x6f0] ss:$8 sps:$4 sm:$0xff]  }
  0xad   :  { %2830 = vmatprep.subr.bf16.mxu1 %v7057_v11  ;;  %v7133_v10 = vld [vmem:[%s10362_s1 + $0x7f0] ss:$8 sps:$4 sm:$0xff]   ;;  %v7138_v11 = vld [vmem:[%s10362_s1 + $0x6e4] ss:$8 sps:$4 sm:$0xff]  }
  0xaf   :  { %2790 = vmatpush2.bf16.msra.mxu0 %v7052_v12  ;;  %v7141_v12 = vld [vmem:[%s10362_s1 + $0x7e4] ss:$8 sps:$4 sm:$0xff]  }
  0xb0   :  { %2831 = vmatpush2.bf16.msra.mxu1 %v7055_v13  ;;  %2791 = vmatprep.subr.bf16.mxu0 %v7060_v14  ;;  %v7136_v13 = vld [vmem:[%s10362_s1 + $0x6e0] ss:$8 sps:$4 sm:$0xff]  }
  0xb1   :  { %2832 = vmatprep.subr.bf16.mxu1 %v7063_v15  ;;  %v7139_v14 = vld [vmem:[%s10362_s1 + $0x7e0] ss:$8 sps:$4 sm:$0xff]   ;;  %v7144_v15 = vld [vmem:[%s10362_s1 + $0x6d4] ss:$8 sps:$4 sm:$0xff]  }
  0xb3   :  { %2792 = vmatpush2.bf16.msra.mxu0 %v7058_v16  ;;  %v7147_v16 = vld [vmem:[%s10362_s1 + $0x7d4] ss:$8 sps:$4 sm:$0xff]  }
  0xb4   :  { %2833 = vmatpush2.bf16.msra.mxu1 %v7061_v17  ;;  %2793 = vmatprep.subr.bf16.mxu0 %v7066_v18  ;;  %v7142_v17 = vld [vmem:[%s10362_s1 + $0x6d0] ss:$8 sps:$4 sm:$0xff]  }
  0xb5   :  { %2834 = vmatprep.subr.bf16.mxu1 %v7069_v19  ;;  %v7145_v18 = vld [vmem:[%s10362_s1 + $0x7d0] ss:$8 sps:$4 sm:$0xff]   ;;  %v7150_v19 = vld [vmem:[%s10362_s1 + $0x6c4] ss:$8 sps:$4 sm:$0xff]  }
  0xb7   :  { %2794 = vmatpush2.bf16.msra.mxu0 %v7064_v21  ;;  %v7148_v21 = vld [vmem:[%s10362_s1 + $0x6c0] ss:$8 sps:$4 sm:$0xff]  }
  0xb8   :  { %2835 = vmatpush2.bf16.msra.mxu1 %v7067_v22  ;;  %2795 = vmatprep.subr.bf16.mxu0 %v7072_v23  ;;  %v7151_v22 = vld [vmem:[%s10362_s1 + $0x7c0] ss:$8 sps:$4 sm:$0xff]   ;;  %v7156_v23 = vld [vmem:[%s10362_s1 + $0x6b4] ss:$8 sps:$4 sm:$0xff]  }
  0xb9   :  { %2836 = vmatprep.subr.bf16.mxu1 %v7075_v24  ;;  %v7159_v24 = vld [vmem:[%s10362_s1 + $0x7b4] ss:$8 sps:$4 sm:$0xff]  }
  0xbb   :  { %2796 = vmatpush2.bf16.msra.mxu0 %v7070_v25  ;;  %v7154_v25 = vld [vmem:[%s10362_s1 + $0x6b0] ss:$8 sps:$4 sm:$0xff]  }
  0xbc   :  { %2837 = vmatpush2.bf16.msra.mxu1 %v7073_v26  ;;  %2797 = vmatprep.subr.bf16.mxu0 %v7078_v27  ;;  %v7157_v26 = vld [vmem:[%s10362_s1 + $0x7b0] ss:$8 sps:$4 sm:$0xff]   ;;  %v7162_v27 = vld [vmem:[%s10362_s1 + $0x6a4] ss:$8 sps:$4 sm:$0xff]  }
  0xbd   :  { %2838 = vmatprep.subr.bf16.mxu1 %v7081_v28  ;;  %v7165_v28 = vld [vmem:[%s10362_s1 + $0x7a4] ss:$8 sps:$4 sm:$0xff]  }
  0xbf   :  { %2798 = vmatpush2.bf16.msra.mxu0 %v7076_v31  ;;  %v7163_v31 = vld [vmem:[%s10362_s1 + $0x7a0] ss:$8 sps:$4 sm:$0xff]  }
  0xc0   :  { %2839 = vmatpush2.bf16.msra.mxu1 %v7079_v33  ;;  %2849 = vmatprep.subr.bf16.mxu0 %v7084_v34  ;;  %v7168_v33 = vld [vmem:[%s10362_s1 + $0x694] ss:$8 sps:$4 sm:$0xff]  }
  0xc1   :  { %2890 = vmatprep.subr.bf16.mxu1 %v7087_v35  ;;  %v7171_v34 = vld [vmem:[%s10362_s1 + $0x794] ss:$8 sps:$4 sm:$0xff]  }
  0xc2   :  { %2800 = vmatmul.mubr.bf16.vlgmr.msra.gmra.mxu0 %v526_v32  ;;  %v8727_v32 = vld [vmem:[%s10363_s0 + $0x10] sm:$0xff] }
  0xc3   :  { %2841 = vmatmul.mubr.bf16.vlgmr.msra.gmra.mxu1 %v548_v37  ;;  %2850 = vmatpush1.bf16.msra.mxu0 %v7082_v29  ;;  %v8737_v35 = vrot.slane %v8727_v32, %v8074_v49  ;;  %v7169_v37 = vld [vmem:[%s10362_s1 + $0x790] ss:$8 sps:$4 sm:$0xff]   ;;  %v7174_v29 = vld [vmem:[%s10362_s1 + $0x684] ss:$8 sps:$4 sm:$0xff]  }
  0xc4   :  { %2891 = vmatpush1.bf16.msra.mxu1 %v7085_v38  ;;  %2851 = vmatprep.subr.bf16.mxu0 %v7090_v39  ;;  %v7177_v38 = vld [vmem:[%s10362_s1 + $0x784] ss:$8 sps:$4 sm:$0xff]   ;;  %v7172_v39 = vld [vmem:[%s10362_s1 + $0x680] ss:$8 sps:$4 sm:$0xff]  }
  0xc5   :  { %2892 = vmatprep.subr.bf16.mxu1 %v7093_v40  ;;  %2881 = vmatprep.mubr.bf16.mxu0 %v547_v36  ;;  %v7166_v36 = vld [vmem:[%s10362_s1 + $0x690] ss:$8 sps:$4 sm:$0xff]   ;;  %v567_v40 = vcombine.high %v8737_v35, %v8737_v35 }
  0xc6   :  { %2922 = vmatprep.mubr.bf16.mxu1 %v551_v41  ;;  %v7175_v41 = vld [vmem:[%s10362_s1 + $0x780] ss:$8 sps:$4 sm:$0xff]  }
  0xc7   :  { %2852 = vmatpush1.bf16.msra.mxu0 %v7088_v43  ;;  %v438_v43 = vld [vmem:[%s10364_s2] sm:$0x3] }
  0xc8   :  { %2893 = vmatpush1.bf16.msra.mxu1 %v7091_v44  ;;  %2853 = vmatprep.subr.bf16.mxu0 %v7096_v45  ;;  %v533_v44 = vrot.slane %v8531_v6, %v8074_v49  ;;  %v8765_v45 = vsub.s32 0, %v8056_v42  ;;  %v589_v6 = vrot.slane %v567_v40, %v8074_v49  ;;  %v7238_v40 = vld [vmem:[%s10362_s1 + $0x9e4] ss:$8 sps:$4 sm:$0xff]  }
  0xc9   :  { %2894 = vmatprep.subr.bf16.mxu1 %v7099_v46  ;;  %v7181_v46 = vld [vmem:[%s10362_s1 + $0x874] ss:$8 sps:$4 sm:$0xff]  }
  0xcb   :  { %2854 = vmatpush1.bf16.msra.mxu0 %v7094_v47  ;;  %v7184_v47 = vld [vmem:[%s10362_s1 + $0x974] ss:$8 sps:$4 sm:$0xff]  }
  0xcc   :  { %2895 = vmatpush1.bf16.msra.mxu1 %v7097_v48  ;;  %2855 = vmatprep.subr.bf16.mxu0 %v7102_v50  ;;  %v8774_v48 = vsub.s32 1, %v8056_v42  ;;  %v549_v50 = vcombine.high %v533_v44, %v533_v44 }
  0xcd   :  { %2896 = vmatprep.subr.bf16.mxu1 %v7105_v51  ;;  %v7179_v51 = vld [vmem:[%s10362_s1 + $0x870] ss:$8 sps:$4 sm:$0xff]  }
  0xcf   :  { %2856 = vmatpush1.bf16.msra.mxu0 %v7100_v52  ;;  %v7182_v52 = vld [vmem:[%s10362_s1 + $0x970] ss:$8 sps:$4 sm:$0xff]  }
  0xd0   :  { %2897 = vmatpush1.bf16.msra.mxu1 %v7103_v53  ;;  %2857 = vmatprep.subr.bf16.mxu0 %v7108_v54  ;;  %v443_v53 = vrot.slane %v438_v43, %v8765_v45  ;;  %v7187_v54 = vld [vmem:[%s10362_s1 + $0x864] ss:$8 sps:$4 sm:$0xff]  }
  0xd1   :  { %2898 = vmatprep.subr.bf16.mxu1 %v7111_v55  ;;  %v7190_v55 = vld [vmem:[%s10362_s1 + $0x964] ss:$8 sps:$4 sm:$0xff]  }
  0xd3   :  { %2858 = vmatpush1.bf16.msra.mxu0 %v7106_v56  ;;  %v447_v56 = vrot.slane %v438_v43, %v8774_v48  ;;  %v7236_v43 = vld [vmem:[%s10362_s1 + $0x9e0] ss:$8 sps:$4 sm:$0xff]  }
  0xd4   :  { %2899 = vmatpush1.bf16.msra.mxu1 %v7109_v57  ;;  %2859 = vmatprep.subr.bf16.mxu0 %v7114_v58  ;;  %v7185_v57 = vld [vmem:[%s10362_s1 + $0x860] ss:$8 sps:$4 sm:$0xff]   ;;  %v599_v58 = vcombine.high %v589_v6, %v589_v6 }
  0xd5   :  { %2900 = vmatprep.subr.bf16.mxu1 %v7117_v59 }
  0xd7   :  { %2860 = vmatpush1.bf16.msra.mxu0 %v7112_v60 }
  0xd8   :  { %2901 = vmatpush1.bf16.msra.mxu1 %v7115_v61  ;;  %2861 = vmatprep.subr.bf16.mxu0 %v7120_v62  ;;  %v7188_v62 = vld [vmem:[%s10362_s1 + $0x960] ss:$8 sps:$4 sm:$0xff]  }
  0xd9   :  { %2902 = vmatprep.subr.bf16.mxu1 %v7123_v63 }
  0xdb   :  { %2862 = vmatpush1.bf16.msra.mxu0 %v7118_v0 }
  0xdc   :  { %2903 = vmatpush1.bf16.msra.mxu1 %v7121_v1  ;;  %2863 = vmatprep.subr.bf16.mxu0 %v7126_v2  ;;  %v7193_v1 = vld [vmem:[%s10362_s1 + $0x854] ss:$8 sps:$4 sm:$0xff]  }
  0xdd   :  { %2904 = vmatprep.subr.bf16.mxu1 %v7129_v3  ;;  %v7196_v2 = vld [vmem:[%s10362_s1 + $0x954] ss:$8 sps:$4 sm:$0xff]  }
  0xdf   :  { %2864 = vmatpush1.bf16.msra.mxu0 %v7124_v4 }
  0xe0   :  { %2905 = vmatpush1.bf16.msra.mxu1 %v7127_v5  ;;  %2865 = vmatprep.subr.bf16.mxu0 %v7132_v7 }
  0xe1   :  { %2906 = vmatprep.subr.bf16.mxu1 %v7135_v8 }
  0xe3   :  { %2866 = vmatpush2.bf16.msra.mxu0 %v7130_v9  ;;  %v7191_v9 = vld [vmem:[%s10362_s1 + $0x850] ss:$8 sps:$4 sm:$0xff]  }
  0xe4   :  { %2907 = vmatpush2.bf16.msra.mxu1 %v7133_v10  ;;  %2867 = vmatprep.subr.bf16.mxu0 %v7138_v11  ;;  %v7194_v10 = vld [vmem:[%s10362_s1 + $0x950] ss:$8 sps:$4 sm:$0xff]  }
  0xe5   :  { %2908 = vmatprep.subr.bf16.mxu1 %v7141_v12  ;;  %v7199_v12 = vld [vmem:[%s10362_s1 + $0x844] ss:$8 sps:$4 sm:$0xff]  }
  0xe7   :  { %2868 = vmatpush2.bf16.msra.mxu0 %v7136_v13  ;;  %v7202_v13 = vld [vmem:[%s10362_s1 + $0x944] ss:$8 sps:$4 sm:$0xff]  }
  0xe8   :  { %2909 = vmatpush2.bf16.msra.mxu1 %v7139_v14  ;;  %2869 = vmatprep.subr.bf16.mxu0 %v7144_v15  ;;  %v7197_v15 = vld [vmem:[%s10362_s1 + $0x840] ss:$8 sps:$4 sm:$0xff]  }
  0xe9   :  { %2910 = vmatprep.subr.bf16.mxu1 %v7147_v16  ;;  %v7200_v16 = vld [vmem:[%s10362_s1 + $0x940] ss:$8 sps:$4 sm:$0xff]  }
  0xeb   :  { %2870 = vmatpush2.bf16.msra.mxu0 %v7142_v17  ;;  %v7205_v17 = vld [vmem:[%s10362_s1 + $0x834] ss:$8 sps:$4 sm:$0xff]  }
  0xec   :  { %2911 = vmatpush2.bf16.msra.mxu1 %v7145_v18  ;;  %2871 = vmatprep.subr.bf16.mxu0 %v7150_v19  ;;  %v7208_v18 = vld [vmem:[%s10362_s1 + $0x934] ss:$8 sps:$4 sm:$0xff]   ;;  %v7203_v19 = vld [vmem:[%s10362_s1 + $0x830] ss:$8 sps:$4 sm:$0xff]  }
  0xed   :  { %2912 = vmatprep.subr.bf16.mxu1 %v7153_v20  ;;  %v7206_v20 = vld [vmem:[%s10362_s1 + $0x930] ss:$8 sps:$4 sm:$0xff]  }
  0xef   :  { %2872 = vmatpush2.bf16.msra.mxu0 %v7148_v21  ;;  %v7211_v21 = vld [vmem:[%s10362_s1 + $0x824] ss:$8 sps:$4 sm:$0xff]  }
  0xf0   :  { %2913 = vmatpush2.bf16.msra.mxu1 %v7151_v22  ;;  %2873 = vmatprep.subr.bf16.mxu0 %v7156_v23  ;;  %v7214_v22 = vld [vmem:[%s10362_s1 + $0x924] ss:$8 sps:$4 sm:$0xff]   ;;  %v7209_v23 = vld [vmem:[%s10362_s1 + $0x820] ss:$8 sps:$4 sm:$0xff]  }
  0xf1   :  { %2914 = vmatprep.subr.bf16.mxu1 %v7159_v24  ;;  %v7212_v24 = vld [vmem:[%s10362_s1 + $0x920] ss:$8 sps:$4 sm:$0xff]  }
  0xf3   :  { %2874 = vmatpush2.bf16.msra.mxu0 %v7154_v25  ;;  %v7217_v25 = vld [vmem:[%s10362_s1 + $0x814] ss:$8 sps:$4 sm:$0xff]  }
  0xf4   :  { %2915 = vmatpush2.bf16.msra.mxu1 %v7157_v26  ;;  %2875 = vmatprep.subr.bf16.mxu0 %v7162_v27  ;;  %v7220_v26 = vld [vmem:[%s10362_s1 + $0x914] ss:$8 sps:$4 sm:$0xff]   ;;  %v7215_v27 = vld [vmem:[%s10362_s1 + $0x810] ss:$8 sps:$4 sm:$0xff]  }
  0xf5   :  { %2916 = vmatprep.subr.bf16.mxu1 %v7165_v28  ;;  %v7218_v28 = vld [vmem:[%s10362_s1 + $0x910] ss:$8 sps:$4 sm:$0xff]  }
  0xf7   :  { %2876 = vmatpush2.bf16.msra.mxu0 %v7160_v30  ;;  %v7223_v30 = vld [vmem:[%s10362_s1 + $0x804] ss:$8 sps:$4 sm:$0xff]  }
  0xf8   :  { %2917 = vmatpush2.bf16.msra.mxu1 %v7163_v31  ;;  %2877 = vmatprep.subr.bf16.mxu0 %v7168_v33  ;;  %v7226_v31 = vld [vmem:[%s10362_s1 + $0x904] ss:$8 sps:$4 sm:$0xff]   ;;  %v7221_v33 = vld [vmem:[%s10362_s1 + $0x800] ss:$8 sps:$4 sm:$0xff]  }
  0xf9   :  { %2918 = vmatprep.subr.bf16.mxu1 %v7171_v34  ;;  %v7224_v34 = vld [vmem:[%s10362_s1 + $0x900] ss:$8 sps:$4 sm:$0xff]  }
  0xfb   :  { %2878 = vmatpush2.bf16.msra.mxu0 %v7166_v36  ;;  %v7229_v36 = vld [vmem:[%s10362_s1 + $0x8f4] ss:$8 sps:$4 sm:$0xff]  }
  0xfc   :  { %2919 = vmatpush2.bf16.msra.mxu1 %v7169_v37  ;;  %2879 = vmatprep.subr.bf16.mxu0 %v7174_v29  ;;  %v7232_v37 = vld [vmem:[%s10362_s1 + $0x9f4] ss:$8 sps:$4 sm:$0xff]   ;;  %v7227_v29 = vld [vmem:[%s10362_s1 + $0x8f0] ss:$8 sps:$4 sm:$0xff]  }
  0xfd   :  { %2920 = vmatprep.subr.bf16.mxu1 %v7177_v38  ;;  %v7230_v38 = vld [vmem:[%s10362_s1 + $0x9f0] ss:$8 sps:$4 sm:$0xff]  }
  0xff   :  { %2880 = vmatpush2.bf16.msra.mxu0 %v7172_v39  ;;  %v7235_v39 = vld [vmem:[%s10362_s1 + $0x8e4] ss:$8 sps:$4 sm:$0xff]  }
 0x100   :  { %2921 = vmatpush2.bf16.msra.mxu1 %v7175_v41  ;;  %2931 = vmatprep.subr.bf16.mxu0 %v7181_v46  ;;  %v7233_v41 = vld [vmem:[%s10362_s1 + $0x8e0] ss:$8 sps:$4 sm:$0xff]   ;;  %v7244_v46 = vld [vmem:[%s10362_s1 + $0x9d4] ss:$8 sps:$4 sm:$0xff]  }
 0x101   :  { %2972 = vmatprep.subr.bf16.mxu1 %v7184_v47  ;;  %v7239_v47 = vld [vmem:[%s10362_s1 + $0x8d0] ss:$8 sps:$4 sm:$0xff]  }
 0x102   :  { %v2637_v59 = vpop.f32.mrf.mxu0  ;;  %2882 = vmatmul.mubr.bf16.vlgmr.msra.gmra.mxu0 %v533_v44  ;;  %v7241_v44 = vld [vmem:[%s10362_s1 + $0x8d4] ss:$8 sps:$4 sm:$0xff]  }
 0x103   :  { %v2678_v60 = vpop.f32.mrf.mxu1  ;;  %2923 = vmatmul.mubr.bf16.vlgmr.msra.gmra.mxu1 %v549_v50  ;;  %v2638_v61 = vadd.f32 %v2637_v59, %v443_v53  ;;  %2932 = vmatpush1.bf16.msra.mxu0 %v7179_v51  ;;  %v7247_v50 = vld [vmem:[%s10362_s1 + $0x8c4] ss:$8 sps:$4 sm:$0xff]   ;;  %v7248_v53 = vld [vmem:[%s10362_s1 + $0x9c0] ss:$8 sps:$4 sm:$0xff]  }
 0x104   :  { %2973 = vmatpush1.bf16.msra.mxu1 %v7182_v52  ;;  %v2639_v63 = vpop.f32.mrf.mxu0  ;;  %2933 = vmatprep.subr.bf16.mxu0 %v7187_v54  ;;  %v7250_v51 = vld [vmem:[%s10362_s1 + $0x9c4] ss:$8 sps:$4 sm:$0xff]   ;;  %v7245_v52 = vld [vmem:[%s10362_s1 + $0x8c0] ss:$8 sps:$4 sm:$0xff]   ;;  %v7253_v54 = vld [vmem:[%s10362_s1 + $0x8b4] ss:$8 sps:$4 sm:$0xff]  }
 0x105   :  { %v2680_v0 = vpop.f32.mrf.mxu1  ;;  %2974 = vmatprep.subr.bf16.mxu1 %v7190_v55  ;;  %v8803_v3 = vadd.f32 %v2678_v60, %v2638_v61  ;;  %v2640_v4 = vadd.f32 %v2639_v63, %v447_v56  ;;  %2963 = vmatprep.mubr.bf16.mxu0 %v589_v6  ;;  %v7242_v6 = vld [vmem:[%s10362_s1 + $0x9d0] ss:$8 sps:$4 sm:$0xff]   ;;  %v7256_v55 = vld [vmem:[%s10362_s1 + $0x9b4] ss:$8 sps:$4 sm:$0xff]   ;;  %v7262_v59 = vld [vmem:[%s10362_s1 + $0x9a4] ss:$8 sps:$4 sm:$0xff]   ;;  %v552_v60 = vcombine.high %v8727_v32, %v8727_v32 }
 0x106   :  { %3004 = vmatprep.mubr.bf16.mxu1 %v599_v58  ;;  %v2641_v7 = vpop.f32.mrf.mxu0  ;;  %v7251_v56 = vld [vmem:[%s10362_s1 + $0x8b0] ss:$8 sps:$4 sm:$0xff]   ;;  %v7259_v58 = vld [vmem:[%s10362_s1 + $0x8a4] ss:$8 sps:$4 sm:$0xff]   ;;  %v7257_v61 = vld [vmem:[%s10362_s1 + $0x8a0] ss:$8 sps:$4 sm:$0xff]  }
 0x107   :  { %v2682_v5 = vpop.f32.mrf.mxu1  ;;  %v8805_v8 = vadd.f32 %v2680_v0, %v2640_v4  ;;  %2934 = vmatpush1.bf16.msra.mxu0 %v7185_v57  ;;  %v7254_v57 = vld [vmem:[%s10362_s1 + $0x9b0] ss:$8 sps:$4 sm:$0xff]   ;;  %v7265_v63 = vld [vmem:[%s10362_s1 + $0x894] ss:$8 sps:$4 sm:$0xff]   ;;  %v8954_v0 = vrot.slane %v552_v60, %v8074_v49  ;;  %v7271_v4 = vld [vmem:[%s10362_s1 + $0x884] ss:$8 sps:$4 sm:$0xff]  }
 0x108   :  { %2975 = vmatpush1.bf16.msra.mxu1 %v7188_v62  ;;  %2935 = vmatprep.subr.bf16.mxu0 %v7193_v1  ;;  %v2642_v14 = vpop.f32.mrf.mxu0  ;;  %v7260_v62 = vld [vmem:[%s10362_s1 + $0x9a0] ss:$8 sps:$4 sm:$0xff]   ;;  %v7268_v32 = vld [vmem:[%s10362_s1 + $0x994] ss:$8 sps:$4 sm:$0xff]   ;;  %v7263_v1 = vld [vmem:[%s10362_s1 + $0x890] ss:$8 sps:$4 sm:$0xff]  }
 0x109   :  { %v2683_v11 = vpop.f32.mrf.mxu1  ;;  %2976 = vmatprep.subr.bf16.mxu1 %v7196_v2  ;;  %v7266_v2 = vld [vmem:[%s10362_s1 + $0x990] ss:$8 sps:$4 sm:$0xff]   ;;  %v7274_v5 = vld [vmem:[%s10362_s1 + $0x984] ss:$8 sps:$4 sm:$0xff]   ;;  %v568_v7 = vcombine.high %v8954_v0, %v8954_v0  ;;  %v7320_v60 = vld [vmem:[%s10362_s1 + $0xb00] ss:$8 sps:$4 sm:$0xff]  }
 0x10a   :  { %v7272_v11 = vld [vmem:[%s10362_s1 + $0x980] ss:$8 sps:$4 sm:$0xff]  }
 0x10b   :  { %2936 = vmatpush1.bf16.msra.mxu0 %v7191_v9  ;;  %v575_v9 = vrot.slane %v8737_v35, %v8074_v49  ;;  %v7280_v35 = vld [vmem:[%s10362_s1 + $0xb74] ss:$8 sps:$4 sm:$0xff]  }
 0x10c   :  { %2977 = vmatpush1.bf16.msra.mxu1 %v7194_v10  ;;  %2937 = vmatprep.subr.bf16.mxu0 %v7199_v12  ;;  %v7269_v10 = vld [vmem:[%s10362_s1 + $0x880] ss:$8 sps:$4 sm:$0xff]   ;;  %v7277_v12 = vld [vmem:[%s10362_s1 + $0xa74] ss:$8 sps:$4 sm:$0xff]  }
 0x10d   :  { %2978 = vmatprep.subr.bf16.mxu1 %v7202_v13  ;;  %v596_v13 = vrot.slane %v568_v7, %v8074_v49  ;;  %v597_v14 = vcombine.high %v575_v9, %v575_v9  ;;  %v7337_v7 = vld [vmem:[%s10362_s1 + $0xad4] ss:$8 sps:$4 sm:$0xff]  }
 0x10f   :  { %2938 = vmatpush1.bf16.msra.mxu0 %v7197_v15  ;;  %v7275_v15 = vld [vmem:[%s10362_s1 + $0xa70] ss:$8 sps:$4 sm:$0xff]  }
 0x110   :  { %2979 = vmatpush1.bf16.msra.mxu1 %v7200_v16  ;;  %2939 = vmatprep.subr.bf16.mxu0 %v7205_v17  ;;  %v7278_v16 = vld [vmem:[%s10362_s1 + $0xb70] ss:$8 sps:$4 sm:$0xff]   ;;  %v7283_v17 = vld [vmem:[%s10362_s1 + $0xa64] ss:$8 sps:$4 sm:$0xff]  }
 0x111   :  { %2980 = vmatprep.subr.bf16.mxu1 %v7208_v18  ;;  %v7286_v18 = vld [vmem:[%s10362_s1 + $0xb64] ss:$8 sps:$4 sm:$0xff]  }
 0x113   :  { %2940 = vmatpush1.bf16.msra.mxu0 %v7203_v19  ;;  %v600_v19 = vcombine.high %v596_v13, %v596_v13 }
 0x114   :  { %2981 = vmatpush1.bf16.msra.mxu1 %v7206_v20  ;;  %2941 = vmatprep.subr.bf16.mxu0 %v7211_v21 }
 0x115   :  { %2982 = vmatprep.subr.bf16.mxu1 %v7214_v22 }
 0x117   :  { %2942 = vmatpush1.bf16.msra.mxu0 %v7209_v23  ;;  %v7281_v23 = vld [vmem:[%s10362_s1 + $0xa60] ss:$8 sps:$4 sm:$0xff]  }
 0x118   :  { %2983 = vmatpush1.bf16.msra.mxu1 %v7212_v24  ;;  %2943 = vmatprep.subr.bf16.mxu0 %v7217_v25  ;;  %v7284_v24 = vld [vmem:[%s10362_s1 + $0xb60] ss:$8 sps:$4 sm:$0xff]  }
 0x119   :  { %2984 = vmatprep.subr.bf16.mxu1 %v7220_v26 }
 0x11b   :  { %2944 = vmatpush1.bf16.msra.mxu0 %v7215_v27  ;;  %v7289_v27 = vld [vmem:[%s10362_s1 + $0xa54] ss:$8 sps:$4 sm:$0xff]  }
 0x11c   :  { %2985 = vmatpush1.bf16.msra.mxu1 %v7218_v28  ;;  %2945 = vmatprep.subr.bf16.mxu0 %v7223_v30 }
 0x11d   :  { %2986 = vmatprep.subr.bf16.mxu1 %v7226_v31 }
 0x11f   :  { %2946 = vmatpush1.bf16.msra.mxu0 %v7221_v33 }
 0x120   :  { %2987 = vmatpush1.bf16.msra.mxu1 %v7224_v34  ;;  %2947 = vmatprep.subr.bf16.mxu0 %v7229_v36  ;;  %v7287_v36 = vld [vmem:[%s10362_s1 + $0xa50] ss:$8 sps:$4 sm:$0xff]  }
 0x121   :  { %2988 = vmatprep.subr.bf16.mxu1 %v7232_v37  ;;  %v7290_v37 = vld [vmem:[%s10362_s1 + $0xb50] ss:$8 sps:$4 sm:$0xff]  }
 0x123   :  { %2948 = vmatpush2.bf16.msra.mxu0 %v7227_v29 }
 0x124   :  { %2989 = vmatpush2.bf16.msra.mxu1 %v7230_v38  ;;  %2949 = vmatprep.subr.bf16.mxu0 %v7235_v39  ;;  %v7298_v38 = vld [vmem:[%s10362_s1 + $0xb44] ss:$8 sps:$4 sm:$0xff]  }
 0x125   :  { %2990 = vmatprep.subr.bf16.mxu1 %v7238_v40  ;;  %v7293_v40 = vld [vmem:[%s10362_s1 + $0xa40] ss:$8 sps:$4 sm:$0xff]  }
 0x127   :  { %2950 = vmatpush2.bf16.msra.mxu0 %v7233_v41  ;;  %v7296_v41 = vld [vmem:[%s10362_s1 + $0xb40] ss:$8 sps:$4 sm:$0xff]  }
 0x128   :  { %2991 = vmatpush2.bf16.msra.mxu1 %v7236_v43  ;;  %2951 = vmatprep.subr.bf16.mxu0 %v7241_v44  ;;  %v7301_v43 = vld [vmem:[%s10362_s1 + $0xa34] ss:$8 sps:$4 sm:$0xff]  }
 0x129   :  { %2992 = vmatprep.subr.bf16.mxu1 %v7244_v46  ;;  %v7304_v44 = vld [vmem:[%s10362_s1 + $0xb34] ss:$8 sps:$4 sm:$0xff]   ;;  %v7299_v46 = vld [vmem:[%s10362_s1 + $0xa30] ss:$8 sps:$4 sm:$0xff]  }
 0x12b   :  { %2952 = vmatpush2.bf16.msra.mxu0 %v7239_v47  ;;  %v7302_v47 = vld [vmem:[%s10362_s1 + $0xb30] ss:$8 sps:$4 sm:$0xff]  }
 0x12c   :  { %2993 = vmatpush2.bf16.msra.mxu1 %v7242_v6  ;;  %2953 = vmatprep.subr.bf16.mxu0 %v7247_v50  ;;  %v7307_v6 = vld [vmem:[%s10362_s1 + $0xa24] ss:$8 sps:$4 sm:$0xff]  }
 0x12d   :  { %2994 = vmatprep.subr.bf16.mxu1 %v7250_v51  ;;  %v7310_v50 = vld [vmem:[%s10362_s1 + $0xb24] ss:$8 sps:$4 sm:$0xff]   ;;  %v7305_v51 = vld [vmem:[%s10362_s1 + $0xa20] ss:$8 sps:$4 sm:$0xff]  }
 0x12f   :  { %2954 = vmatpush2.bf16.msra.mxu0 %v7245_v52  ;;  %v7308_v52 = vld [vmem:[%s10362_s1 + $0xb20] ss:$8 sps:$4 sm:$0xff]  }
 0x130   :  { %2995 = vmatpush2.bf16.msra.mxu1 %v7248_v53  ;;  %2955 = vmatprep.subr.bf16.mxu0 %v7253_v54  ;;  %v7313_v53 = vld [vmem:[%s10362_s1 + $0xa14] ss:$8 sps:$4 sm:$0xff]  }
 0x131   :  { %2996 = vmatprep.subr.bf16.mxu1 %v7256_v55  ;;  %v7316_v54 = vld [vmem:[%s10362_s1 + $0xb14] ss:$8 sps:$4 sm:$0xff]   ;;  %v7311_v55 = vld [vmem:[%s10362_s1 + $0xa10] ss:$8 sps:$4 sm:$0xff]  }
 0x133   :  { %2956 = vmatpush2.bf16.msra.mxu0 %v7251_v56  ;;  %v7314_v56 = vld [vmem:[%s10362_s1 + $0xb10] ss:$8 sps:$4 sm:$0xff]  }
 0x134   :  { %2997 = vmatpush2.bf16.msra.mxu1 %v7254_v57  ;;  %2957 = vmatprep.subr.bf16.mxu0 %v7259_v58  ;;  %v7319_v57 = vld [vmem:[%s10362_s1 + $0xa04] ss:$8 sps:$4 sm:$0xff]  }
 0x135   :  { %2998 = vmatprep.subr.bf16.mxu1 %v7262_v59  ;;  %v7322_v58 = vld [vmem:[%s10362_s1 + $0xb04] ss:$8 sps:$4 sm:$0xff]   ;;  %v7317_v59 = vld [vmem:[%s10362_s1 + $0xa00] ss:$8 sps:$4 sm:$0xff]  }
 0x137   :  { %2958 = vmatpush2.bf16.msra.mxu0 %v7257_v61  ;;  %v7325_v61 = vld [vmem:[%s10362_s1 + $0xaf4] ss:$8 sps:$4 sm:$0xff]  }
 0x138   :  { %2999 = vmatpush2.bf16.msra.mxu1 %v7260_v62  ;;  %2959 = vmatprep.subr.bf16.mxu0 %v7265_v63  ;;  %v7328_v62 = vld [vmem:[%s10362_s1 + $0xbf4] ss:$8 sps:$4 sm:$0xff]   ;;  %v7323_v63 = vld [vmem:[%s10362_s1 + $0xaf0] ss:$8 sps:$4 sm:$0xff]  }
 0x139   :  { %3000 = vmatprep.subr.bf16.mxu1 %v7268_v32  ;;  %v7326_v32 = vld [vmem:[%s10362_s1 + $0xbf0] ss:$8 sps:$4 sm:$0xff]  }
 0x13b   :  { %2960 = vmatpush2.bf16.msra.mxu0 %v7263_v1  ;;  %v7331_v1 = vld [vmem:[%s10362_s1 + $0xae4] ss:$8 sps:$4 sm:$0xff]  }
 0x13c   :  { %3001 = vmatpush2.bf16.msra.mxu1 %v7266_v2  ;;  %2961 = vmatprep.subr.bf16.mxu0 %v7271_v4  ;;  %v7334_v2 = vld [vmem:[%s10362_s1 + $0xbe4] ss:$8 sps:$4 sm:$0xff]   ;;  %v7329_v4 = vld [vmem:[%s10362_s1 + $0xae0] ss:$8 sps:$4 sm:$0xff]  }
 0x13d   :  { %3002 = vmatprep.subr.bf16.mxu1 %v7274_v5  ;;  %v7332_v5 = vld [vmem:[%s10362_s1 + $0xbe0] ss:$8 sps:$4 sm:$0xff]  }
 0x13f   :  { %2962 = vmatpush2.bf16.msra.mxu0 %v7269_v10  ;;  %v7335_v10 = vld [vmem:[%s10362_s1 + $0xad0] ss:$8 sps:$4 sm:$0xff]  }
 0x140   :  { %3003 = vmatpush2.bf16.msra.mxu1 %v7272_v11  ;;  %3013 = vmatprep.subr.bf16.mxu0 %v7277_v12  ;;  %v7338_v11 = vld [vmem:[%s10362_s1 + $0xbd0] ss:$8 sps:$4 sm:$0xff]   ;;  %v7343_v12 = vld [vmem:[%s10362_s1 + $0xac4] ss:$8 sps:$4 sm:$0xff]  }
 0x141   :  { %3054 = vmatprep.subr.bf16.mxu1 %v7280_v35  ;;  %v7346_v35 = vld [vmem:[%s10362_s1 + $0xbc4] ss:$8 sps:$4 sm:$0xff]  }
 0x142   :  { %v2719_v20 = vpop.f32.mrf.mxu0  ;;  %2964 = vmatmul.mubr.bf16.vlgmr.msra.gmra.mxu0 %v575_v9  ;;  %v7340_v9 = vld [vmem:[%s10362_s1 + $0xbd4] ss:$8 sps:$4 sm:$0xff]  }
 0x143   :  { %v2760_v21 = vpop.f32.mrf.mxu1  ;;  %3005 = vmatmul.mubr.bf16.vlgmr.msra.gmra.mxu1 %v597_v14  ;;  %v2720_v22 = vadd.f32 %v2719_v20, %v8803_v3  ;;  %3014 = vmatpush1.bf16.msra.mxu0 %v7275_v15  ;;  %v7292_v3 = vld [vmem:[%s10362_s1 + $0xb54] ss:$8 sps:$4 sm:$0xff]   ;;  %v7344_v14 = vld [vmem:[%s10362_s1 + $0xbc0] ss:$8 sps:$4 sm:$0xff]   ;;  %v7358_v20 = vld [vmem:[%s10362_s1 + $0xba4] ss:$8 sps:$4 sm:$0xff]  }
 0x144   :  { %3055 = vmatpush1.bf16.msra.mxu1 %v7278_v16  ;;  %v2721_v25 = vpop.f32.mrf.mxu0  ;;  %3015 = vmatprep.subr.bf16.mxu0 %v7283_v17  ;;  %v7349_v15 = vld [vmem:[%s10362_s1 + $0xab4] ss:$8 sps:$4 sm:$0xff]   ;;  %v7347_v17 = vld [vmem:[%s10362_s1 + $0xab0] ss:$8 sps:$4 sm:$0xff]  }
 0x145   :  { %v2762_v26 = vpop.f32.mrf.mxu1  ;;  %3056 = vmatprep.subr.bf16.mxu1 %v7286_v18  ;;  %v9010_v28 = vadd.f32 %v2760_v21, %v2720_v22  ;;  %v2722_v30 = vadd.f32 %v2721_v25, %v8805_v8  ;;  %3045 = vmatprep.mubr.bf16.mxu0 %v596_v13  ;;  %v7295_v8 = vld [vmem:[%s10362_s1 + $0xa44] ss:$8 sps:$4 sm:$0xff]   ;;  %v7341_v13 = vld [vmem:[%s10362_s1 + $0xac0] ss:$8 sps:$4 sm:$0xff]   ;;  %v7352_v16 = vld [vmem:[%s10362_s1 + $0xbb4] ss:$8 sps:$4 sm:$0xff]  }
 0x146   :  { %3086 = vmatprep.mubr.bf16.mxu1 %v600_v19  ;;  %v2723_v33 = vpop.f32.mrf.mxu0  ;;  %v7350_v18 = vld [vmem:[%s10362_s1 + $0xbb0] ss:$8 sps:$4 sm:$0xff]   ;;  %v7355_v19 = vld [vmem:[%s10362_s1 + $0xaa4] ss:$8 sps:$4 sm:$0xff]   ;;  %v7353_v21 = vld [vmem:[%s10362_s1 + $0xaa0] ss:$8 sps:$4 sm:$0xff]  }
 0x147   :  { %v2764_v31 = vpop.f32.mrf.mxu1  ;;  %v9013_v34 = vadd.f32 %v2762_v26, %v2722_v30  ;;  %3016 = vmatpush1.bf16.msra.mxu0 %v7281_v23  ;;  %v7356_v22 = vld [vmem:[%s10362_s1 + $0xba0] ss:$8 sps:$4 sm:$0xff]   ;;  %v7361_v23 = vld [vmem:[%s10362_s1 + $0xa94] ss:$8 sps:$4 sm:$0xff]   ;;  %v7359_v25 = vld [vmem:[%s10362_s1 + $0xa90] ss:$8 sps:$4 sm:$0xff]   ;;  %v582_v30 = vrot.slane %v8954_v0, %v8074_v49 }
 0x148   :  { %3057 = vmatpush1.bf16.msra.mxu1 %v7284_v24  ;;  %3017 = vmatprep.subr.bf16.mxu0 %v7289_v27  ;;  %v2724_v39 = vpop.f32.mrf.mxu0  ;;  %v7364_v24 = vld [vmem:[%s10362_s1 + $0xb94] ss:$8 sps:$4 sm:$0xff]   ;;  %v7362_v26 = vld [vmem:[%s10362_s1 + $0xb90] ss:$8 sps:$4 sm:$0xff]   ;;  %v7367_v27 = vld [vmem:[%s10362_s1 + $0xa84] ss:$8 sps:$4 sm:$0xff]  }
 0x149   :  { %v2765_v29 = vpop.f32.mrf.mxu1  ;;  %3058 = vmatprep.subr.bf16.mxu1 %v7292_v3  ;;  %v7370_v3 = vld [vmem:[%s10362_s1 + $0xb84] ss:$8 sps:$4 sm:$0xff]   ;;  %v7365_v31 = vld [vmem:[%s10362_s1 + $0xa80] ss:$8 sps:$4 sm:$0xff]   ;;  %v7372_v0 = vld [vmem:[%s10362_s1 + $0xc30] ss:$8 sps:$4 sm:$0xff]  }
 0x14a   :  { %v7368_v33 = vld [vmem:[%s10362_s1 + $0xb80] ss:$8 sps:$4 sm:$0xff]   ;;  %v7377_v29 = vld [vmem:[%s10362_s1 + $0xc24] ss:$8 sps:$4 sm:$0xff]  }
 0x14b   :  { %3018 = vmatpush1.bf16.msra.mxu0 %v7287_v36  ;;  %v7374_v36 = vld [vmem:[%s10362_s1 + $0xc34] ss:$8 sps:$4 sm:$0xff]  }
 0x14c   :  { %3059 = vmatpush1.bf16.msra.mxu1 %v7290_v37  ;;  %3019 = vmatprep.subr.bf16.mxu0 %v7295_v8  ;;  %v598_v37 = vcombine.high %v582_v30, %v582_v30 }
 0x14d   :  { %3060 = vmatprep.subr.bf16.mxu1 %v7298_v38 }
 0x14f   :  { %3020 = vmatpush1.bf16.msra.mxu0 %v7293_v40  ;;  %v7375_v40 = vld [vmem:[%s10362_s1 + $0xc20] ss:$8 sps:$4 sm:$0xff]  }
 0x150   :  { %3061 = vmatpush1.bf16.msra.mxu1 %v7296_v41  ;;  %3021 = vmatprep.subr.bf16.mxu0 %v7301_v43  ;;  %v7873_v41 = vmov 0  }
 0x151   :  { %3062 = vmatprep.subr.bf16.mxu1 %v7304_v44 }
 0x153   :  { %3022 = vmatpush1.bf16.msra.mxu0 %v7299_v46  ;;  %v7380_v46 = vld [vmem:[%s10362_s1 + $0xc14] ss:$8 sps:$4 sm:$0xff]  }
 0x154   :  { %3063 = vmatpush1.bf16.msra.mxu1 %v7302_v47  ;;  %3023 = vmatprep.subr.bf16.mxu0 %v7307_v6 }
 0x155   :  { %3064 = vmatprep.subr.bf16.mxu1 %v7310_v50 }
 0x157   :  { %3024 = vmatpush1.bf16.msra.mxu0 %v7305_v51 }
 0x158   :  { %3065 = vmatpush1.bf16.msra.mxu1 %v7308_v52  ;;  %3025 = vmatprep.subr.bf16.mxu0 %v7313_v53  ;;  %v7378_v52 = vld [vmem:[%s10362_s1 + $0xc10] ss:$8 sps:$4 sm:$0xff]  }
 0x159   :  { %3066 = vmatprep.subr.bf16.mxu1 %v7316_v54  ;;  %v7383_v54 = vld [vmem:[%s10362_s1 + $0xc04] ss:$8 sps:$4 sm:$0xff]  }
 0x15b   :  { %3026 = vmatpush1.bf16.msra.mxu0 %v7311_v55 }
 0x15c   :  { %3067 = vmatpush1.bf16.msra.mxu1 %v7314_v56  ;;  %3027 = vmatprep.subr.bf16.mxu0 %v7319_v57  ;;  %v6002_v56 = vld.sshfl [vmem:[%s10363_s0 + $0x18] sm:$0x1 pattern:$0x75316420] }
 0x15d   :  { %3068 = vmatprep.subr.bf16.mxu1 %v7322_v58  ;;  %v7387_v57 = vld [vmem:[%s10365_s3 + $0xe8] ss:$16 sps:$4 sm:$0xff]   ;;  %v7389_v58 = vld [vmem:[%s10365_s3 + $0xec] ss:$16 sps:$4 sm:$0xff]  }
 0x15f   :  { %3028 = vmatpush1.bf16.msra.mxu0 %v7317_v59  ;;  %v7386_v59 = vld [vmem:[%s10365_s3 + $0xe4] ss:$16 sps:$4 sm:$0xff]  }
 0x160   :  { %3069 = vmatpush1.bf16.msra.mxu1 %v7320_v60  ;;  %3029 = vmatprep.subr.bf16.mxu0 %v7325_v61  ;;  %v7393_v60 = vld [vmem:[%s10365_s3 + $0xc8] ss:$16 sps:$4 sm:$0xff]   ;;  %v614_v61 = vrot.slane %v6002_v56, %v8074_v49  ;;  %v7401_v49 = vld [vmem:[%s10365_s3 + $0xac] ss:$16 sps:$4 sm:$0xff]  }
 0x161   :  { %3070 = vmatprep.subr.bf16.mxu1 %v7328_v62  ;;  %v7395_v62 = vld [vmem:[%s10365_s3 + $0xcc] ss:$16 sps:$4 sm:$0xff]  }
 0x163   :  { %3030 = vmatpush2.bf16.msra.mxu0 %v7323_v63  ;;  %v7384_v63 = vld [vmem:[%s10365_s3 + $0xe0] ss:$16 sps:$4 sm:$0xff]  }
 0x164   :  { %3071 = vmatpush2.bf16.msra.mxu1 %v7326_v32  ;;  %3031 = vmatprep.subr.bf16.mxu0 %v7331_v1  ;;  %v7392_v32 = vld [vmem:[%s10365_s3 + $0xc4] ss:$16 sps:$4 sm:$0xff]   ;;  %v7399_v1 = vld [vmem:[%s10365_s3 + $0xa8] ss:$16 sps:$4 sm:$0xff]  }
 0x165   :  { %3072 = vmatprep.subr.bf16.mxu1 %v7334_v2  ;;  %v7390_v2 = vld [vmem:[%s10365_s3 + $0xc0] ss:$16 sps:$4 sm:$0xff]  }
 0x167   :  { %3032 = vmatpush2.bf16.msra.mxu0 %v7329_v4  ;;  %v7407_v4 = vld [vmem:[%s10365_s3 + $0x8c] ss:$16 sps:$4 sm:$0xff]  }
 0x168   :  { %3073 = vmatpush2.bf16.msra.mxu1 %v7332_v5  ;;  %3033 = vmatprep.subr.bf16.mxu0 %v7337_v7  ;;  %v7398_v5 = vld [vmem:[%s10365_s3 + $0xa4] ss:$16 sps:$4 sm:$0xff]   ;;  %v7405_v7 = vld [vmem:[%s10365_s3 + $0x88] ss:$16 sps:$4 sm:$0xff]  }
 0x169   :  { %3074 = vmatprep.subr.bf16.mxu1 %v7340_v9  ;;  %v7396_v9 = vld [vmem:[%s10365_s3 + $0xa0] ss:$16 sps:$4 sm:$0xff]  }
 0x16b   :  { %3034 = vmatpush2.bf16.msra.mxu0 %v7335_v10  ;;  %v7413_v10 = vld [vmem:[%s10365_s3 + $0x6c] ss:$16 sps:$4 sm:$0xff]  }
 0x16c   :  { %3075 = vmatpush2.bf16.msra.mxu1 %v7338_v11  ;;  %3035 = vmatprep.subr.bf16.mxu0 %v7343_v12  ;;  %v7404_v11 = vld [vmem:[%s10365_s3 + $0x84] ss:$16 sps:$4 sm:$0xff]   ;;  %v7411_v12 = vld [vmem:[%s10365_s3 + $0x68] ss:$16 sps:$4 sm:$0xff]  }
 0x16d   :  { %3076 = vmatprep.subr.bf16.mxu1 %v7346_v35  ;;  %v7402_v35 = vld [vmem:[%s10365_s3 + $0x80] ss:$16 sps:$4 sm:$0xff]  }
 0x16f   :  { %3036 = vmatpush2.bf16.msra.mxu0 %v7341_v13  ;;  %v7419_v13 = vld [vmem:[%s10365_s3 + $0x4c] ss:$16 sps:$4 sm:$0xff]  }
 0x170   :  { %3077 = vmatpush2.bf16.msra.mxu1 %v7344_v14  ;;  %3037 = vmatprep.subr.bf16.mxu0 %v7349_v15  ;;  %v7410_v14 = vld [vmem:[%s10365_s3 + $0x64] ss:$16 sps:$4 sm:$0xff]   ;;  %v7417_v15 = vld [vmem:[%s10365_s3 + $0x48] ss:$16 sps:$4 sm:$0xff]  }
 0x171   :  { %3078 = vmatprep.subr.bf16.mxu1 %v7352_v16  ;;  %v7408_v16 = vld [vmem:[%s10365_s3 + $0x60] ss:$16 sps:$4 sm:$0xff]  }
 0x173   :  { %3038 = vmatpush2.bf16.msra.mxu0 %v7347_v17  ;;  %v7425_v17 = vld [vmem:[%s10365_s3 + $0x2c] ss:$16 sps:$4 sm:$0xff]  }
 0x174   :  { %3079 = vmatpush2.bf16.msra.mxu1 %v7350_v18  ;;  %3039 = vmatprep.subr.bf16.mxu0 %v7355_v19  ;;  %v7416_v18 = vld [vmem:[%s10365_s3 + $0x44] ss:$16 sps:$4 sm:$0xff]   ;;  %v7414_v19 = vld [vmem:[%s10365_s3 + $0x40] ss:$16 sps:$4 sm:$0xff]  }
 0x175   :  { %3080 = vmatprep.subr.bf16.mxu1 %v7358_v20  ;;  %v7423_v20 = vld [vmem:[%s10365_s3 + $0x28] ss:$16 sps:$4 sm:$0xff]  }
 0x177   :  { %3040 = vmatpush2.bf16.msra.mxu0 %v7353_v21  ;;  %v7422_v21 = vld [vmem:[%s10365_s3 + $0x24] ss:$16 sps:$4 sm:$0xff]  }
 0x178   :  { %3081 = vmatpush2.bf16.msra.mxu1 %v7356_v22  ;;  %3041 = vmatprep.subr.bf16.mxu0 %v7361_v23  ;;  %v7431_v22 = vld [vmem:[%s10365_s3 + $0xc] ss:$16 sps:$4 sm:$0xff]   ;;  %v7429_v23 = vld [vmem:[%s10365_s3 + $0x8] ss:$16 sps:$4 sm:$0xff]  }
 0x179   :  { %3082 = vmatprep.subr.bf16.mxu1 %v7364_v24  ;;  %v7420_v24 = vld [vmem:[%s10365_s3 + $0x20] ss:$16 sps:$4 sm:$0xff]  }
 0x17b   :  { %3042 = vmatpush2.bf16.msra.mxu0 %v7359_v25  ;;  %v7437_v25 = vld [vmem:[%s10365_s3 + $0x1ec] ss:$16 sps:$4 sm:$0xff]  }
 0x17c   :  { %3083 = vmatpush2.bf16.msra.mxu1 %v7362_v26  ;;  %3043 = vmatprep.subr.bf16.mxu0 %v7367_v27  ;;  %v7428_v26 = vld [vmem:[%s10365_s3 + $0x4] ss:$16 sps:$4 sm:$0xff]   ;;  %v7435_v27 = vld [vmem:[%s10365_s3 + $0x1e8] ss:$16 sps:$4 sm:$0xff]  }
 0x17d   :  { %3084 = vmatprep.subr.bf16.mxu1 %v7370_v3  ;;  %v7426_v3 = vld [vmem:[%s10365_s3] ss:$16 sps:$4 sm:$0xff]  }
 0x17f   :  { %3044 = vmatpush2.bf16.msra.mxu0 %v7365_v31  ;;  %v7434_v31 = vld [vmem:[%s10365_s3 + $0x1e4] ss:$16 sps:$4 sm:$0xff]  }
 0x180   :  { %3085 = vmatpush2.bf16.msra.mxu1 %v7368_v33  ;;  %3587 = vmatprep.subr.bf16.mxu0 %v7389_v58  ;;  %v7441_v33 = vld [vmem:[%s10365_s3 + $0x1c8] ss:$16 sps:$4 sm:$0xff]   ;;  %v7458_v58 = vld [vmem:[%s10365_s3 + $0x164] ss:$16 sps:$4 sm:$0xff]  }
 0x181   :  { %3103 = vmatprep.subr.bf16.mxu1 %v7374_v36  ;;  %v7432_v36 = vld [vmem:[%s10365_s3 + $0x1e0] ss:$16 sps:$4 sm:$0xff]  }
 0x182   :  { %v2801_v8 = vpop.f32.mrf.mxu0  ;;  %3046 = vmatmul.mubr.bf16.vlgmr.msra.gmra.mxu0 %v582_v30  ;;  %v7443_v30 = vld [vmem:[%s10365_s3 + $0x1cc] ss:$16 sps:$4 sm:$0xff]  }
 0x183   :  { %v2842_v38 = vpop.f32.mrf.mxu1  ;;  %3087 = vmatmul.mubr.bf16.vlgmr.msra.gmra.mxu1 %v598_v37  ;;  %v2802_v39 = vadd.f32 %v2801_v8, %v9010_v28  ;;  %3588 = vmatpush1.bf16.msra.mxu0 %v7387_v57  ;;  %v7440_v37 = vld [vmem:[%s10365_s3 + $0x1c4] ss:$16 sps:$4 sm:$0xff]  }
 0x184   :  { %3104 = vmatpush1.bf16.msra.mxu1 %v7372_v0  ;;  %3127 = vmatprep.mubr.bf16.mxu1 %v7873_v41  ;;  %v2803_v43 = vpop.f32.mrf.mxu0  ;;  %v7438_v0 = vld [vmem:[%s10365_s3 + $0x1c0] ss:$16 sps:$4 sm:$0xff]  }
 0x185   :  { %v2844_v44 = vpop.f32.mrf.mxu1  ;;  %3105 = vmatprep.subr.bf16.mxu1 %v7377_v29  ;;  %v9196_v47 = vadd.f32 %v2842_v38, %v2802_v39  ;;  %v2804_v6 = vadd.f32 %v2803_v43, %v9013_v34  ;;  %v7381_v34 = vld [vmem:[%s10362_s1 + $0xc00] ss:$8 sps:$4 sm:$0xff]   ;;  %3589 = vmatprep.subr.bf16.mxu0 %v7395_v62  ;;  %v7446_v38 = vld [vmem:[%s10365_s3 + $0x1a4] ss:$16 sps:$4 sm:$0xff]   ;;  %v7449_v39 = vld [vmem:[%s10365_s3 + $0x1ac] ss:$16 sps:$4 sm:$0xff]  }
 0x186   :  { %v2805_v50 = vpop.f32.mrf.mxu0  ;;  %v7444_v43 = vld [vmem:[%s10365_s3 + $0x1a0] ss:$16 sps:$4 sm:$0xff]   ;;  %v7464_v62 = vld [vmem:[%s10365_s3 + $0x144] ss:$16 sps:$4 sm:$0xff]  }
 0x187   :  { %v2846_v28 = vpop.f32.mrf.mxu1  ;;  %v9199_v51 = vadd.f32 %v2844_v44, %v2804_v6  ;;  %3590 = vmatpush1.bf16.msra.mxu0 %v7393_v60  ;;  %v7447_v44 = vld [vmem:[%s10365_s3 + $0x1a8] ss:$16 sps:$4 sm:$0xff]  }
 0x188   :  { %3106 = vmatpush1.bf16.msra.mxu1 %v7375_v40  ;;  %v2806_v55 = vpop.f32.mrf.mxu0  ;;  %3591 = vmatprep.subr.bf16.mxu0 %v7401_v49  ;;  %v7459_v60 = vld [vmem:[%s10365_s3 + $0x168] ss:$16 sps:$4 sm:$0xff]  }
 0x189   :  { %v2847_v53 = vpop.f32.mrf.mxu1  ;;  %3107 = vmatprep.subr.bf16.mxu1 %v7380_v46  ;;  %v7465_v49 = vld [vmem:[%s10365_s3 + $0x148] ss:$16 sps:$4 sm:$0xff]  }
 0x18b   :  { %3592 = vmatpush1.bf16.msra.mxu0 %v7399_v1  ;;  %v7470_v1 = vld [vmem:[%s10365_s3 + $0x124] ss:$16 sps:$4 sm:$0xff]  }
 0x18c   :  { %3108 = vmatpush1.bf16.msra.mxu1 %v7378_v52  ;;  %3593 = vmatprep.subr.bf16.mxu0 %v7407_v4  ;;  %v7468_v4 = vld [vmem:[%s10365_s3 + $0x120] ss:$16 sps:$4 sm:$0xff]  }
 0x18d   :  { %3109 = vmatprep.subr.bf16.mxu1 %v7383_v54  ;;  %v7455_v54 = vld [vmem:[%s10365_s3 + $0x18c] ss:$16 sps:$4 sm:$0xff]  }
 0x18f   :  { %3594 = vmatpush1.bf16.msra.mxu0 %v7405_v7  ;;  %v7476_v7 = vld [vmem:[%s10365_s3 + $0x104] ss:$16 sps:$4 sm:$0xff]  }
 0x190   :  { %3110 = vmatpush1.bf16.msra.mxu1 %v7381_v34  ;;  %3595 = vmatprep.subr.bf16.mxu0 %v7413_v10  ;;  %v7450_v34 = vld [vmem:[%s10365_s3 + $0x180] ss:$16 sps:$4 sm:$0xff]  }
 0x191   :  { %3546 = vmatprep.subr.bf16.mxu1 %v7386_v59  ;;  %v7456_v59 = vld [vmem:[%s10365_s3 + $0x160] ss:$16 sps:$4 sm:$0xff]  }
 0x192   :  { %v7474_v10 = vld [vmem:[%s10365_s3 + $0x100] ss:$16 sps:$4 sm:$0xff]  }
 0x193   :  { %6395 = vmatmul.mubr.msk.bf16.vlgmr.msra.gmra.mxu1 %vm2599_vm0, %v614_v61  ;;  %3596 = vmatpush1.bf16.msra.mxu0 %v7411_v12  ;;  %v7461_v61 = vld [vmem:[%s10365_s3 + $0x16c] ss:$16 sps:$4 sm:$0xff]   ;;  %v7482_v12 = vld [vmem:[%s10366_s5 + $0xe4] ss:$16 sps:$4 sm:$0xff]  }
 0x194   :  { %3547 = vmatpush1.bf16.msra.mxu1 %v7384_v63  ;;  %3597 = vmatprep.subr.bf16.mxu0 %v7419_v13  ;;  %v7467_v63 = vld [vmem:[%s10365_s3 + $0x14c] ss:$16 sps:$4 sm:$0xff]  }
 0x195   :  { %3548 = vmatprep.subr.bf16.mxu1 %v7392_v32  ;;  %v7462_v32 = vld [vmem:[%s10365_s3 + $0x140] ss:$16 sps:$4 sm:$0xff]  }
 0x197   :  { %3598 = vmatpush1.bf16.msra.mxu0 %v7417_v15 }
 0x198   :  { %3549 = vmatpush1.bf16.msra.mxu1 %v7390_v2  ;;  %3599 = vmatprep.subr.bf16.mxu0 %v7425_v17  ;;  %v7473_v2 = vld [vmem:[%s10365_s3 + $0x12c] ss:$16 sps:$4 sm:$0xff]  }
 0x199   :  { %3550 = vmatprep.subr.bf16.mxu1 %v7398_v5  ;;  %v7471_v5 = vld [vmem:[%s10365_s3 + $0x128] ss:$16 sps:$4 sm:$0xff]  }
 0x19b   :  { %3600 = vmatpush1.bf16.msra.mxu0 %v7423_v20 }
 0x19c   :  { %3551 = vmatpush1.bf16.msra.mxu1 %v7396_v9  ;;  %3601 = vmatprep.subr.bf16.mxu0 %v7431_v22  ;;  %v7479_v9 = vld [vmem:[%s10365_s3 + $0x10c] ss:$16 sps:$4 sm:$0xff]  }
 0x19d   :  { %3552 = vmatprep.subr.bf16.mxu1 %v7404_v11  ;;  %v7477_v11 = vld [vmem:[%s10365_s3 + $0x108] ss:$16 sps:$4 sm:$0xff]  }
 0x19f   :  { %3602 = vmatpush1.bf16.msra.mxu0 %v7429_v23 }
 0x1a0   :  { %3553 = vmatpush1.bf16.msra.mxu1 %v7402_v35  ;;  %3603 = vmatprep.subr.bf16.mxu0 %v7437_v25  ;;  %v7497_v35 = vld [vmem:[%s10366_s5 + $0x2e4] ss:$16 sps:$4 sm:$0xff]  }
 0x1a1   :  { %3554 = vmatprep.subr.bf16.mxu1 %v7410_v14 }
 0x1a3   :  { %3604 = vmatpush2.bf16.msra.mxu0 %v7435_v27 }
 0x1a4   :  { %3555 = vmatpush1.bf16.msra.mxu1 %v7408_v16  ;;  %3605 = vmatprep.subr.bf16.mxu0 %v7443_v30 }
 0x1a5   :  { %3556 = vmatprep.subr.bf16.mxu1 %v7416_v18 }
 0x1a7   :  { %3606 = vmatpush2.bf16.msra.mxu0 %v7441_v33 }
 0x1a8   :  { %3557 = vmatpush1.bf16.msra.mxu1 %v7414_v19  ;;  %3607 = vmatprep.subr.bf16.mxu0 %v7449_v39 }
 0x1a9   :  { %3558 = vmatprep.subr.bf16.mxu1 %v7422_v21 }
 0x1ab   :  { %3608 = vmatpush2.bf16.msra.mxu0 %v7447_v44 }
 0x1ac   :  { %3559 = vmatpush1.bf16.msra.mxu1 %v7420_v24  ;;  %3609 = vmatprep.subr.bf16.mxu0 %v7455_v54  ;;  %v7485_v54 = vld [vmem:[%s10366_s5 + $0xc4] ss:$16 sps:$4 sm:$0xff]  }
 0x1ad   :  { %3560 = vmatprep.subr.bf16.mxu1 %v7428_v26 }
 0x1b0   :  { %3561 = vmatpush1.bf16.msra.mxu1 %v7426_v3 }
 0x1b1   :  { %3562 = vmatprep.subr.bf16.mxu1 %v7434_v31 }
 0x1b4   :  { %3563 = vmatpush2.bf16.msra.mxu1 %v7432_v36 }
 0x1b5   :  { %3564 = vmatprep.subr.bf16.mxu1 %v7440_v37 }
 0x1b8   :  { %3565 = vmatpush2.bf16.msra.mxu1 %v7438_v0 }
 0x1b9   :  { %3566 = vmatprep.subr.bf16.mxu1 %v7446_v38 }
 0x1bc   :  { %3567 = vmatpush2.bf16.msra.mxu1 %v7444_v43 }
 0x1c2   :  { %v2883_v29 = vpop.f32.mrf.mxu0 }
 0x1c3   :  { %v2924_v8 = vpop.f32.mrf.mxu1  ;;  %v2884_v40 = vadd.f32 %v2883_v29, %v9196_v47  ;;  %v7452_v47 = vld [vmem:[%s10365_s3 + $0x184] ss:$16 sps:$4 sm:$0xff]  }
 0x1c4   :  { %v2885_v46 = vpop.f32.mrf.mxu0  ;;  %3568 = vmatprep.subr.bf16.mxu1 %v7452_v47 }
 0x1c5   :  { %v2926_v6 = vpop.f32.mrf.mxu1  ;;  %v2925_v28 = vadd.f32 %v2924_v8, %v2884_v40  ;;  %v2886_v50 = vadd.f32 %v2885_v46, %v9199_v51  ;;  %v7453_v51 = vld [vmem:[%s10365_s3 + $0x188] ss:$16 sps:$4 sm:$0xff]   ;;  %3569 = vmatpush2.bf16.msra.mxu1 %v7450_v34  ;;  %v7483_v34 = vld [vmem:[%s10366_s5 + $0xc0] ss:$16 sps:$4 sm:$0xff]  }
 0x1c6   :  { %v2887_v53 = vpop.f32.mrf.mxu0  ;;  %3610 = vmatpush2.bf16.msra.mxu0 %v7453_v51  ;;  %3570 = vmatprep.subr.bf16.mxu1 %v7458_v58  ;;  %v7501_v51 = vld [vmem:[%s10366_s5 + $0x2c0] ss:$16 sps:$4 sm:$0xff]  }
 0x1c7   :  { %v2928_v52 = vpop.f32.mrf.mxu1  ;;  %v2927_v55 = vadd.f32 %v2926_v6, %v2886_v50  ;;  %3611 = vmatprep.subr.bf16.mxu0 %v7461_v61  ;;  %v7495_v53 = vld [vmem:[%s10366_s5 + $0x2e0] ss:$16 sps:$4 sm:$0xff]   ;;  %v7515_v61 = vld [vmem:[%s10366_s5 + $0x284] ss:$16 sps:$4 sm:$0xff]  }
 0x1c8   :  { %v2888_v57 = vpop.f32.mrf.mxu0  ;;  %v7480_v52 = vld [vmem:[%s10366_s5 + $0xe0] ss:$16 sps:$4 sm:$0xff]  }
 0x1c9   :  { %v2929_v56 = vpop.f32.mrf.mxu1  ;;  %3571 = vmatpush2.bf16.msra.mxu1 %v7456_v59  ;;  %v7509_v57 = vld [vmem:[%s10366_s5 + $0x2a4] ss:$16 sps:$4 sm:$0xff]   ;;  %v7486_v58 = vld [vmem:[%s10366_s5 + $0xa0] ss:$16 sps:$4 sm:$0xff]  }
 0x1ca   :  { %3612 = vmatpush2.bf16.msra.mxu0 %v7459_v60  ;;  %3572 = vmatprep.subr.bf16.mxu1 %v7464_v62  ;;  %v7488_v56 = vld [vmem:[%s10366_s5 + $0xa4] ss:$16 sps:$4 sm:$0xff]   ;;  %v7507_v59 = vld [vmem:[%s10366_s5 + $0x2a0] ss:$16 sps:$4 sm:$0xff]  }
 0x1cb   :  { %3613 = vmatprep.subr.bf16.mxu0 %v7467_v63  ;;  %v7491_v60 = vld [vmem:[%s10366_s5 + $0x84] ss:$16 sps:$4 sm:$0xff]   ;;  %v7489_v62 = vld [vmem:[%s10366_s5 + $0x80] ss:$16 sps:$4 sm:$0xff]  }
 0x1cc   :  { %v7513_v63 = vld [vmem:[%s10366_s5 + $0x280] ss:$16 sps:$4 sm:$0xff]  }
 0x1cd   :  { %3573 = vmatpush2.bf16.msra.mxu1 %v7462_v32  ;;  %v7494_v32 = vld [vmem:[%s10366_s5 + $0x64] ss:$16 sps:$4 sm:$0xff]  }
 0x1ce   :  { %3614 = vmatpush2.bf16.msra.mxu0 %v7465_v49  ;;  %3574 = vmatprep.subr.bf16.mxu1 %v7470_v1  ;;  %v7521_v49 = vld [vmem:[%s10366_s5 + $0x264] ss:$16 sps:$4 sm:$0xff]   ;;  %v7492_v1 = vld [vmem:[%s10366_s5 + $0x60] ss:$16 sps:$4 sm:$0xff]  }
 0x1cf   :  { %3615 = vmatprep.subr.bf16.mxu0 %v7473_v2  ;;  %v7519_v2 = vld [vmem:[%s10366_s5 + $0x260] ss:$16 sps:$4 sm:$0xff]  }
 0x1d1   :  { %3575 = vmatpush2.bf16.msra.mxu1 %v7468_v4  ;;  %v7500_v4 = vld [vmem:[%s10366_s5 + $0x44] ss:$16 sps:$4 sm:$0xff]  }
 0x1d2   :  { %3616 = vmatpush2.bf16.msra.mxu0 %v7471_v5  ;;  %3576 = vmatprep.subr.bf16.mxu1 %v7476_v7  ;;  %v7527_v5 = vld [vmem:[%s10366_s5 + $0x244] ss:$16 sps:$4 sm:$0xff]   ;;  %v7498_v7 = vld [vmem:[%s10366_s5 + $0x40] ss:$16 sps:$4 sm:$0xff]  }
 0x1d3   :  { %3617 = vmatprep.subr.bf16.mxu0 %v7479_v9  ;;  %v7525_v9 = vld [vmem:[%s10366_s5 + $0x240] ss:$16 sps:$4 sm:$0xff]  }
 0x1d5   :  { %3577 = vmatpush2.bf16.msra.mxu1 %v7474_v10  ;;  %v7506_v10 = vld [vmem:[%s10366_s5 + $0x24] ss:$16 sps:$4 sm:$0xff]  }
 0x1d6   :  { %3618 = vmatpush2.bf16.msra.mxu0 %v7477_v11  ;;  %4333 = vmatprep.subr.bf16.mxu1 %v7482_v12  ;;  %v7533_v11 = vld [vmem:[%s10366_s5 + $0x224] ss:$16 sps:$4 sm:$0xff]   ;;  %v7504_v12 = vld [vmem:[%s10366_s5 + $0x20] ss:$16 sps:$4 sm:$0xff]  }
 0x1d7   :  { %4374 = vmatprep.subr.bf16.mxu0 %v7497_v35  ;;  %v7531_v35 = vld [vmem:[%s10366_s5 + $0x220] ss:$16 sps:$4 sm:$0xff]  }
 0x202   :  { %v2965_v13 = vpop.f32.mrf.mxu0 }
 0x203   :  { %v3006_v14 = vpop.f32.mrf.mxu1  ;;  %v2966_v15 = vadd.f32 %v2965_v13, %v2925_v28  ;;  %v7512_v13 = vld [vmem:[%s10366_s5 + $0x4] ss:$16 sps:$4 sm:$0xff]  }
 0x204   :  { %v2967_v16 = vpop.f32.mrf.mxu0 }
 0x205   :  { %v3008_v17 = vpop.f32.mrf.mxu1  ;;  %v3007_v18 = vadd.f32 %v3006_v14, %v2966_v15  ;;  %v2968_v19 = vadd.f32 %v2967_v16, %v2927_v55  ;;  %v7503_v55 = vld [vmem:[%s10366_s5 + $0x2c4] ss:$16 sps:$4 sm:$0xff]   ;;  %v7510_v15 = vld [vmem:[%s10366_s5] ss:$16 sps:$4 sm:$0xff]  }
 0x206   :  { %v2969_v21 = vpop.f32.mrf.mxu0  ;;  %v7539_v14 = vld [vmem:[%s10366_s5 + $0x204] ss:$16 sps:$4 sm:$0xff]   ;;  %v7537_v16 = vld [vmem:[%s10366_s5 + $0x200] ss:$16 sps:$4 sm:$0xff]  }
 0x207   :  { %v3010_v20 = vpop.f32.mrf.mxu1  ;;  %v3009_v22 = vadd.f32 %v3008_v17, %v2968_v19  ;;  %v7518_v17 = vld [vmem:[%s10366_s5 + $0x1e4] ss:$16 sps:$4 sm:$0xff]   ;;  %v7516_v19 = vld [vmem:[%s10366_s5 + $0x1e0] ss:$16 sps:$4 sm:$0xff]  }
 0x208   :  { %v2970_v24 = vpop.f32.mrf.mxu0  ;;  %v7543_v20 = vld [vmem:[%s10366_s5 + $0x360] ss:$16 sps:$4 sm:$0xff]   ;;  %v7524_v21 = vld [vmem:[%s10366_s5 + $0x1c4] ss:$16 sps:$4 sm:$0xff]  }
 0x209   :  { %v3011_v23 = vpop.f32.mrf.mxu1  ;;  %v7549_v24 = vld [vmem:[%s10366_s5 + $0x340] ss:$16 sps:$4 sm:$0xff]  }
 0x20a   :  { %v7522_v23 = vld [vmem:[%s10366_s5 + $0x1c0] ss:$16 sps:$4 sm:$0xff]  }
 0x242   :  { %v3047_v25 = vpop.f32.mrf.mxu0 }
 0x243   :  { %v3088_v26 = vpop.f32.mrf.mxu1  ;;  %v3048_v37 = vadd.f32 %v3047_v25, %v3007_v18  ;;  %v7545_v18 = vld [vmem:[%s10366_s5 + $0x364] ss:$16 sps:$4 sm:$0xff]  }
 0x244   :  { %v3049_v27 = vpop.f32.mrf.mxu0  ;;  %v7530_v25 = vld [vmem:[%s10366_s5 + $0x1a4] ss:$16 sps:$4 sm:$0xff]  }
 0x245   :  { %v3090_v3 = vpop.f32.mrf.mxu1  ;;  %v3050_v0 = vadd.f32 %v3049_v27, %v3009_v22  ;;  %v3089_v29 = vadd.f32 %v3088_v26, %v3048_v37  ;;  %v7551_v22 = vld [vmem:[%s10366_s5 + $0x344] ss:$16 sps:$4 sm:$0xff]   ;;  %v7528_v26 = vld [vmem:[%s10366_s5 + $0x1a0] ss:$16 sps:$4 sm:$0xff]  }
 0x246   :  { %v3051_v31 = vpop.f32.mrf.mxu0  ;;  %v7536_v27 = vld [vmem:[%s10366_s5 + $0x184] ss:$16 sps:$4 sm:$0xff]  }
 0x247   :  { %v3092_v30 = vpop.f32.mrf.mxu1  ;;  %v3091_v38 = vadd.f32 %v3090_v3, %v3050_v0  ;;  %v7534_v3 = vld [vmem:[%s10366_s5 + $0x180] ss:$16 sps:$4 sm:$0xff]   ;;  %v7554_v37 = vld [vmem:[%s10366_s5 + $0x124] ss:$16 sps:$4 sm:$0xff]  }
 0x248   :  { %v3052_v36 = vpop.f32.mrf.mxu0  ;;  %v7542_v30 = vld [vmem:[%s10366_s5 + $0x164] ss:$16 sps:$4 sm:$0xff]   ;;  %v7540_v31 = vld [vmem:[%s10366_s5 + $0x160] ss:$16 sps:$4 sm:$0xff]  }
 0x249   :  { %v3093_v33 = vpop.f32.mrf.mxu1  ;;  %v7546_v36 = vld [vmem:[%s10366_s5 + $0x140] ss:$16 sps:$4 sm:$0xff]   ;;  %v7557_v0 = vld [vmem:[%s10366_s5 + $0x324] ss:$16 sps:$4 sm:$0xff]  }
 0x24a   :  { %v7548_v33 = vld [vmem:[%s10366_s5 + $0x144] ss:$16 sps:$4 sm:$0xff]  }
 0x253   :  { %v3129_v8 = vpop.f32.mrf.mxu1 }
 0x254   :  { %v3130_v39 = vadd.f32 %v3129_v8, %v3089_v29  ;;  %v7552_v29 = vld [vmem:[%s10366_s5 + $0x120] ss:$16 sps:$4 sm:$0xff]  }
 0x255   :  { %v3131_v40 = vpop.f32.mrf.mxu1  ;;  %v7555_v8 = vld [vmem:[%s10366_s5 + $0x320] ss:$16 sps:$4 sm:$0xff]  }
 0x256   :  { %v3132_v43 = vadd.f32 %v3131_v40, %v3091_v38  ;;  %v3136_v44 = vmax.f32 %v3130_v39, 0.0  ;;  %v7560_v38 = vld [vmem:[%s10366_s5 + $0x104] ss:$16 sps:$4 sm:$0xff]   ;;  %v7558_v40 = vld [vmem:[%s10366_s5 + $0x100] ss:$16 sps:$4 sm:$0xff]  }
 0x257   :  { %v3133_v46 = vpop.f32.mrf.mxu1  ;;  %v7563_v39 = vld [vmem:[%s10366_s5 + $0x304] ss:$16 sps:$4 sm:$0xff]  }
 0x258   :  { %v3137_v6 = vmax.f32 %v3132_v43, 0.0  ;;  %v3138_v47 = vpack.c.bf16 %v3136_v44, %v3136_v44  ;;  %v7561_v43 = vld [vmem:[%s10366_s5 + $0x300] ss:$16 sps:$4 sm:$0xff]   ;;  %v7566_v44 = vld [vmem:[%s10366_s5 + $0xec] ss:$16 sps:$4 sm:$0xff]  }
 0x259   :  { %v3134_v28 = vpop.f32.mrf.mxu1  ;;  %v7569_v46 = vld [vmem:[%s10366_s5 + $0x2ec] ss:$16 sps:$4 sm:$0xff]  }
 0x25a   :  { %v3139_v50 = vpack.c.bf16 %v3137_v6, %v3137_v6  ;;  %v9584_v6 = vsub.s32 2, %v8056_v42  ;;  %v3204_v28 = vld [vmem:[%s10368_s4] sm:$0xf] }
 0x25c   :  { %3578 = vmatprep.mubr.bf16.mxu1 %v3139_v50  ;;  %3619 = vmatprep.mubr.bf16.mxu0 %v3139_v50  ;;  %v9590_v50 = vsub.s32 3, %v8056_v42 }
 0x25d   :  { %3579 = vmatmul.mubr.bf16.vlgmr.msra.gmra.mxu1 %v3138_v47  ;;  %3620 = vmatmul.mubr.bf16.vlgmr.msra.gmra.mxu0 %v3138_v47  ;;  %v3213_v47 = vrot.slane %v3204_v28, %v8774_v48 }
 0x25e   :  { %4334 = vmatpush1.bf16.msra.mxu1 %v7480_v52  ;;  %4375 = vmatpush1.bf16.msra.mxu0 %v7495_v53  ;;  %v3209_v52 = vrot.slane %v3204_v28, %v8765_v45  ;;  %v3217_v53 = vrot.slane %v3204_v28, %v9584_v6 }
 0x25f   :  { %4335 = vmatprep.subr.bf16.mxu1 %v7485_v54  ;;  %4376 = vmatprep.subr.bf16.mxu0 %v7503_v55  ;;  %v3221_v54 = vrot.slane %v3204_v28, %v9590_v50  ;;  %v7620_v28 = vld [vmem:[%s10366_s5 + $0x1cc] ss:$16 sps:$4 sm:$0xff]  }
 0x262   :  { %4336 = vmatpush1.bf16.msra.mxu1 %v7483_v34  ;;  %4377 = vmatpush1.bf16.msra.mxu0 %v7501_v51 }
 0x263   :  { %4337 = vmatprep.subr.bf16.mxu1 %v7488_v56  ;;  %4378 = vmatprep.subr.bf16.mxu0 %v7509_v57 }
 0x266   :  { %4338 = vmatpush1.bf16.msra.mxu1 %v7486_v58  ;;  %4379 = vmatpush1.bf16.msra.mxu0 %v7507_v59 }
 0x267   :  { %4339 = vmatprep.subr.bf16.mxu1 %v7491_v60  ;;  %4380 = vmatprep.subr.bf16.mxu0 %v7515_v61 }
 0x26a   :  { %4340 = vmatpush1.bf16.msra.mxu1 %v7489_v62  ;;  %4381 = vmatpush1.bf16.msra.mxu0 %v7513_v63 }
 0x26b   :  { %4341 = vmatprep.subr.bf16.mxu1 %v7494_v32  ;;  %4382 = vmatprep.subr.bf16.mxu0 %v7521_v49 }
 0x26e   :  { %4342 = vmatpush1.bf16.msra.mxu1 %v7492_v1  ;;  %4383 = vmatpush1.bf16.msra.mxu0 %v7519_v2 }
 0x26f   :  { %4343 = vmatprep.subr.bf16.mxu1 %v7500_v4  ;;  %4384 = vmatprep.subr.bf16.mxu0 %v7527_v5 }
 0x272   :  { %4344 = vmatpush1.bf16.msra.mxu1 %v7498_v7  ;;  %4385 = vmatpush1.bf16.msra.mxu0 %v7525_v9  ;;  %v7564_v7 = vld [vmem:[%s10366_s5 + $0xe8] ss:$16 sps:$4 sm:$0xff]  }
 0x273   :  { %4345 = vmatprep.subr.bf16.mxu1 %v7506_v10  ;;  %4386 = vmatprep.subr.bf16.mxu0 %v7533_v11  ;;  %v7567_v9 = vld [vmem:[%s10366_s5 + $0x2e8] ss:$16 sps:$4 sm:$0xff]  }
 0x276   :  { %4346 = vmatpush1.bf16.msra.mxu1 %v7504_v12  ;;  %4387 = vmatpush1.bf16.msra.mxu0 %v7531_v35  ;;  %v7572_v12 = vld [vmem:[%s10366_s5 + $0xcc] ss:$16 sps:$4 sm:$0xff]  }
 0x277   :  { %4347 = vmatprep.subr.bf16.mxu1 %v7512_v13  ;;  %4388 = vmatprep.subr.bf16.mxu0 %v7539_v14  ;;  %v7575_v35 = vld [vmem:[%s10366_s5 + $0x2cc] ss:$16 sps:$4 sm:$0xff]   ;;  %v7570_v13 = vld [vmem:[%s10366_s5 + $0xc8] ss:$16 sps:$4 sm:$0xff]  }
 0x278   :  { %v7573_v14 = vld [vmem:[%s10366_s5 + $0x2c8] ss:$16 sps:$4 sm:$0xff]  }
 0x27a   :  { %4348 = vmatpush1.bf16.msra.mxu1 %v7510_v15  ;;  %4389 = vmatpush1.bf16.msra.mxu0 %v7537_v16  ;;  %v7578_v15 = vld [vmem:[%s10366_s5 + $0xac] ss:$16 sps:$4 sm:$0xff]  }
 0x27b   :  { %4349 = vmatprep.subr.bf16.mxu1 %v7518_v17  ;;  %4398 = vmatprep.subr.bf16.mxu0 %v7545_v18  ;;  %v7581_v16 = vld [vmem:[%s10366_s5 + $0x2ac] ss:$16 sps:$4 sm:$0xff]   ;;  %v7576_v17 = vld [vmem:[%s10366_s5 + $0xa8] ss:$16 sps:$4 sm:$0xff]  }
 0x27c   :  { %v7579_v18 = vld [vmem:[%s10366_s5 + $0x2a8] ss:$16 sps:$4 sm:$0xff]  }
 0x27e   :  { %4350 = vmatpush2.bf16.msra.mxu1 %v7516_v19  ;;  %4399 = vmatpush2.bf16.msra.mxu0 %v7543_v20  ;;  %v7584_v19 = vld [vmem:[%s10366_s5 + $0x8c] ss:$16 sps:$4 sm:$0xff]  }
 0x27f   :  { %4351 = vmatprep.subr.bf16.mxu1 %v7524_v21  ;;  %4400 = vmatprep.subr.bf16.mxu0 %v7551_v22  ;;  %v7587_v20 = vld [vmem:[%s10366_s5 + $0x28c] ss:$16 sps:$4 sm:$0xff]   ;;  %v7582_v21 = vld [vmem:[%s10366_s5 + $0x88] ss:$16 sps:$4 sm:$0xff]  }
 0x280   :  { %v7585_v22 = vld [vmem:[%s10366_s5 + $0x288] ss:$16 sps:$4 sm:$0xff]  }
 0x282   :  { %4352 = vmatpush2.bf16.msra.mxu1 %v7522_v23  ;;  %4401 = vmatpush2.bf16.msra.mxu0 %v7549_v24  ;;  %v7590_v23 = vld [vmem:[%s10366_s5 + $0x6c] ss:$16 sps:$4 sm:$0xff]  }
 0x283   :  { %4353 = vmatprep.subr.bf16.mxu1 %v7530_v25  ;;  %4402 = vmatprep.subr.bf16.mxu0 %v7557_v0  ;;  %v7593_v24 = vld [vmem:[%s10366_s5 + $0x26c] ss:$16 sps:$4 sm:$0xff]   ;;  %v7588_v25 = vld [vmem:[%s10366_s5 + $0x68] ss:$16 sps:$4 sm:$0xff]  }
 0x284   :  { %v7603_v0 = vld [vmem:[%s10366_s5 + $0x228] ss:$16 sps:$4 sm:$0xff]  }
 0x286   :  { %4354 = vmatpush2.bf16.msra.mxu1 %v7528_v26  ;;  %4403 = vmatpush2.bf16.msra.mxu0 %v7555_v8  ;;  %v7591_v26 = vld [vmem:[%s10366_s5 + $0x268] ss:$16 sps:$4 sm:$0xff]   ;;  %v7611_v8 = vld [vmem:[%s10366_s5 + $0x20c] ss:$16 sps:$4 sm:$0xff]  }
 0x287   :  { %4355 = vmatprep.subr.bf16.mxu1 %v7536_v27  ;;  %4404 = vmatprep.subr.bf16.mxu0 %v7563_v39  ;;  %v7596_v27 = vld [vmem:[%s10366_s5 + $0x4c] ss:$16 sps:$4 sm:$0xff]   ;;  %v7609_v39 = vld [vmem:[%s10366_s5 + $0x208] ss:$16 sps:$4 sm:$0xff]  }
 0x28a   :  { %4356 = vmatpush2.bf16.msra.mxu1 %v7534_v3  ;;  %4405 = vmatpush2.bf16.msra.mxu0 %v7561_v43  ;;  %v7599_v3 = vld [vmem:[%s10366_s5 + $0x24c] ss:$16 sps:$4 sm:$0xff]  }
 0x28b   :  { %4357 = vmatprep.subr.bf16.mxu1 %v7542_v30  ;;  %4415 = vmatprep.subr.bf16.mxu0 %v7566_v44  ;;  %v7594_v30 = vld [vmem:[%s10366_s5 + $0x48] ss:$16 sps:$4 sm:$0xff]   ;;  %v7617_v43 = vld [vmem:[%s10366_s5 + $0x36c] ss:$16 sps:$4 sm:$0xff]  }
 0x28c   :  { %v7612_v44 = vld [vmem:[%s10366_s5 + $0x1e8] ss:$16 sps:$4 sm:$0xff]  }
 0x28e   :  { %4358 = vmatpush2.bf16.msra.mxu1 %v7540_v31  ;;  %v7597_v31 = vld [vmem:[%s10366_s5 + $0x248] ss:$16 sps:$4 sm:$0xff]  }
 0x28f   :  { %4359 = vmatprep.subr.bf16.mxu1 %v7548_v33  ;;  %v7602_v33 = vld [vmem:[%s10366_s5 + $0x2c] ss:$16 sps:$4 sm:$0xff]  }
 0x292   :  { %4360 = vmatpush2.bf16.msra.mxu1 %v7546_v36  ;;  %v7605_v36 = vld [vmem:[%s10366_s5 + $0x22c] ss:$16 sps:$4 sm:$0xff]  }
 0x293   :  { %4361 = vmatprep.subr.bf16.mxu1 %v7554_v37  ;;  %v7600_v37 = vld [vmem:[%s10366_s5 + $0x28] ss:$16 sps:$4 sm:$0xff]  }
 0x296   :  { %4362 = vmatpush2.bf16.msra.mxu1 %v7552_v29  ;;  %v7608_v29 = vld [vmem:[%s10366_s5 + $0xc] ss:$16 sps:$4 sm:$0xff]  }
 0x297   :  { %4363 = vmatprep.subr.bf16.mxu1 %v7560_v38  ;;  %v7606_v38 = vld [vmem:[%s10366_s5 + $0x8] ss:$16 sps:$4 sm:$0xff]  }
 0x29a   :  { %4364 = vmatpush2.bf16.msra.mxu1 %v7558_v40  ;;  %v7614_v40 = vld [vmem:[%s10366_s5 + $0x1ec] ss:$16 sps:$4 sm:$0xff]  }
 0x29b   :  { %4456 = vmatprep.subr.bf16.mxu1 %v7569_v46  ;;  %v7615_v46 = vld [vmem:[%s10366_s5 + $0x368] ss:$16 sps:$4 sm:$0xff]  }
 0x31d   :  { %v3580_v55 = vpop.f32.mrf.mxu1  ;;  %v3621_v34 = vpop.f32.mrf.mxu0 }
 0x31e   :  { %v3581_v51 = vadd.f32 %v3580_v55, %v3209_v52  ;;  %v3622_v56 = vadd.f32 %v3621_v34, %v3217_v53  ;;  %v7623_v52 = vld [vmem:[%s10366_s5 + $0x34c] ss:$16 sps:$4 sm:$0xff]   ;;  %v7618_v53 = vld [vmem:[%s10366_s5 + $0x1c8] ss:$16 sps:$4 sm:$0xff]  }
 0x31f   :  { %v3582_v57 = vpop.f32.mrf.mxu1  ;;  %v3623_v58 = vpop.f32.mrf.mxu0  ;;  %v7629_v55 = vld [vmem:[%s10366_s5 + $0x32c] ss:$16 sps:$4 sm:$0xff]   ;;  %v7624_v34 = vld [vmem:[%s10366_s5 + $0x1a8] ss:$16 sps:$4 sm:$0xff]  }
 0x320   :  { %v3583_v59 = vadd.f32 %v3582_v57, %v3213_v47  ;;  %v3624_v60 = vadd.f32 %v3623_v58, %v3221_v54  ;;  %v9596_v61 = vmax.f32 %v3581_v51, 0.0  ;;  %v9598_v42 = vmax.f32 %v3622_v56, 0.0  ;;  %v7621_v47 = vld [vmem:[%s10366_s5 + $0x348] ss:$16 sps:$4 sm:$0xff]   ;;  %v7626_v54 = vld [vmem:[%s10366_s5 + $0x1ac] ss:$16 sps:$4 sm:$0xff]  }
 0x321   :  { %v3584_v62 = vpop.f32.mrf.mxu1  ;;  %v3625_v63 = vpop.f32.mrf.mxu0  ;;  %v7627_v51 = vld [vmem:[%s10366_s5 + $0x328] ss:$16 sps:$4 sm:$0xff]   ;;  %v7632_v56 = vld [vmem:[%s10366_s5 + $0x18c] ss:$16 sps:$4 sm:$0xff]  }
 0x322   :  { %v9600_v32 = vmax.f32 %v3583_v59, 0.0  ;;  %v9602_v49 = vmax.f32 %v3624_v60, 0.0  ;;  %v9620_v10 = vpack.c.bf16 %v9596_v61, %v9596_v61  ;;  %v9624_v11 = vpack.c.bf16 %v9598_v42, %v9598_v42  ;;  %v7635_v57 = vld [vmem:[%s10366_s5 + $0x30c] ss:$16 sps:$4 sm:$0xff]   ;;  %v7630_v58 = vld [vmem:[%s10366_s5 + $0x188] ss:$16 sps:$4 sm:$0xff]  }
 0x323   :  { %v3585_v1 = vpop.f32.mrf.mxu1  ;;  %v3626_v2 = vpop.f32.mrf.mxu0  ;;  %v7633_v59 = vld [vmem:[%s10366_s5 + $0x308] ss:$16 sps:$4 sm:$0xff]   ;;  %v7638_v60 = vld [vmem:[%s10366_s5 + $0x16c] ss:$16 sps:$4 sm:$0xff]   ;;  %v7641_v62 = vld [vmem:[%s10367_s7 + $0xe4] ss:$16 sps:$4 sm:$0xff]  }
 0x324   :  { %v9606_v4 = vpack.c.bf16 %v9600_v32, %v9600_v32  ;;  %v9610_v5 = vpack.c.bf16 %v9602_v49, %v9602_v49  ;;  %v7636_v63 = vld [vmem:[%s10366_s5 + $0x168] ss:$16 sps:$4 sm:$0xff]   ;;  %v7639_v1 = vld [vmem:[%s10367_s7 + $0xe0] ss:$16 sps:$4 sm:$0xff]   ;;  %v7644_v2 = vld [vmem:[%s10366_s5 + $0x14c] ss:$16 sps:$4 sm:$0xff]  }
 0x326   :  { %4365 = vmatprep.mubr.bf16.mxu1 %v9606_v4  ;;  %6572 = vmatprep.mubr.msk.bf16.mxu0 %vm2599_vm0, %v9610_v5 }
 0x327   :  { %4366 = vmatmul.mubr.bf16.vlgmr.msra.gmra.mxu1 %v9620_v10  ;;  %4407 = vmatmul.mubr.bf16.vlgmr.msra.gmra.mxu0 %v9624_v11 }
 0x328   :  { %4416 = vmatpush1.bf16.msra.mxu0 %v7564_v7  ;;  %4457 = vmatpush1.bf16.msra.mxu1 %v7567_v9  ;;  %v7642_v7 = vld [vmem:[%s10366_s5 + $0x148] ss:$16 sps:$4 sm:$0xff]   ;;  %v7647_v9 = vld [vmem:[%s10367_s7 + $0xc4] ss:$16 sps:$4 sm:$0xff]  }
 0x329   :  { %4447 = vmatprep.mubr.bf16.mxu0 %v9606_v4  ;;  %6573 = vmatprep.mubr.msk.bf16.mxu1 %vm2599_vm0, %v9610_v5 }
 0x32a   :  { %4417 = vmatprep.subr.bf16.mxu0 %v7572_v12  ;;  %4458 = vmatprep.subr.bf16.mxu1 %v7575_v35  ;;  %v7645_v12 = vld [vmem:[%s10367_s7 + $0xc0] ss:$16 sps:$4 sm:$0xff]   ;;  %v7650_v35 = vld [vmem:[%s10366_s5 + $0x12c] ss:$16 sps:$4 sm:$0xff]  }
 0x32c   :  { %4418 = vmatpush1.bf16.msra.mxu0 %v7570_v13  ;;  %4459 = vmatpush1.bf16.msra.mxu1 %v7573_v14  ;;  %v7653_v13 = vld [vmem:[%s10367_s7 + $0xa4] ss:$16 sps:$4 sm:$0xff]   ;;  %v7648_v14 = vld [vmem:[%s10366_s5 + $0x128] ss:$16 sps:$4 sm:$0xff]  }
 0x32d   :  { %4419 = vmatprep.subr.bf16.mxu0 %v7578_v15  ;;  %4460 = vmatprep.subr.bf16.mxu1 %v7581_v16  ;;  %v7651_v15 = vld [vmem:[%s10367_s7 + $0xa0] ss:$16 sps:$4 sm:$0xff]   ;;  %v7656_v16 = vld [vmem:[%s10366_s5 + $0x10c] ss:$16 sps:$4 sm:$0xff]  }
 0x330   :  { %4420 = vmatpush1.bf16.msra.mxu0 %v7576_v17  ;;  %4461 = vmatpush1.bf16.msra.mxu1 %v7579_v18  ;;  %v7659_v17 = vld [vmem:[%s10367_s7 + $0x84] ss:$16 sps:$4 sm:$0xff]   ;;  %v7654_v18 = vld [vmem:[%s10366_s5 + $0x108] ss:$16 sps:$4 sm:$0xff]  }
 0x331   :  { %4421 = vmatprep.subr.bf16.mxu0 %v7584_v19  ;;  %4462 = vmatprep.subr.bf16.mxu1 %v7587_v20  ;;  %v7657_v19 = vld [vmem:[%s10367_s7 + $0x80] ss:$16 sps:$4 sm:$0xff]   ;;  %v7662_v20 = vld [vmem:[%s10367_s7 + $0x64] ss:$16 sps:$4 sm:$0xff]  }
 0x334   :  { %4422 = vmatpush1.bf16.msra.mxu0 %v7582_v21  ;;  %4463 = vmatpush1.bf16.msra.mxu1 %v7585_v22  ;;  %v7665_v21 = vld [vmem:[%s10367_s7 + $0x2e4] ss:$16 sps:$4 sm:$0xff]   ;;  %v7660_v22 = vld [vmem:[%s10367_s7 + $0x60] ss:$16 sps:$4 sm:$0xff]  }
 0x335   :  { %4423 = vmatprep.subr.bf16.mxu0 %v7590_v23  ;;  %4464 = vmatprep.subr.bf16.mxu1 %v7593_v24  ;;  %v7663_v23 = vld [vmem:[%s10367_s7 + $0x2e0] ss:$16 sps:$4 sm:$0xff]   ;;  %v7668_v24 = vld [vmem:[%s10367_s7 + $0x44] ss:$16 sps:$4 sm:$0xff]  }
 0x338   :  { %4424 = vmatpush1.bf16.msra.mxu0 %v7588_v25  ;;  %4465 = vmatpush1.bf16.msra.mxu1 %v7591_v26  ;;  %v7671_v25 = vld [vmem:[%s10367_s7 + $0x2c4] ss:$16 sps:$4 sm:$0xff]   ;;  %v7666_v26 = vld [vmem:[%s10367_s7 + $0x40] ss:$16 sps:$4 sm:$0xff]  }
 0x339   :  { %4425 = vmatprep.subr.bf16.mxu0 %v7596_v27  ;;  %4466 = vmatprep.subr.bf16.mxu1 %v7599_v3  ;;  %v7669_v27 = vld [vmem:[%s10367_s7 + $0x2c0] ss:$16 sps:$4 sm:$0xff]   ;;  %v7674_v3 = vld [vmem:[%s10367_s7 + $0x24] ss:$16 sps:$4 sm:$0xff]  }
 0x33c   :  { %4426 = vmatpush1.bf16.msra.mxu0 %v7594_v30  ;;  %4467 = vmatpush1.bf16.msra.mxu1 %v7597_v31  ;;  %v7677_v30 = vld [vmem:[%s10367_s7 + $0x2a4] ss:$16 sps:$4 sm:$0xff]   ;;  %v7672_v31 = vld [vmem:[%s10367_s7 + $0x20] ss:$16 sps:$4 sm:$0xff]  }
 0x33d   :  { %4427 = vmatprep.subr.bf16.mxu0 %v7602_v33  ;;  %4468 = vmatprep.subr.bf16.mxu1 %v7605_v36  ;;  %v7675_v33 = vld [vmem:[%s10367_s7 + $0x2a0] ss:$16 sps:$4 sm:$0xff]   ;;  %v7680_v36 = vld [vmem:[%s10367_s7 + $0x4] ss:$16 sps:$4 sm:$0xff]  }
 0x340   :  { %4428 = vmatpush1.bf16.msra.mxu0 %v7600_v37  ;;  %4469 = vmatpush1.bf16.msra.mxu1 %v7603_v0  ;;  %v7683_v37 = vld [vmem:[%s10367_s7 + $0x284] ss:$16 sps:$4 sm:$0xff]   ;;  %v7678_v0 = vld [vmem:[%s10367_s7] ss:$16 sps:$4 sm:$0xff]  }
 0x341   :  { %4429 = vmatprep.subr.bf16.mxu0 %v7608_v29  ;;  %4470 = vmatprep.subr.bf16.mxu1 %v7611_v8  ;;  %v7681_v29 = vld [vmem:[%s10367_s7 + $0x280] ss:$16 sps:$4 sm:$0xff]   ;;  %v7686_v8 = vld [vmem:[%s10367_s7 + $0x1e4] ss:$16 sps:$4 sm:$0xff]  }
 0x344   :  { %4430 = vmatpush1.bf16.msra.mxu0 %v7606_v38  ;;  %4471 = vmatpush1.bf16.msra.mxu1 %v7609_v39  ;;  %v7689_v38 = vld [vmem:[%s10367_s7 + $0x264] ss:$16 sps:$4 sm:$0xff]   ;;  %v7684_v39 = vld [vmem:[%s10367_s7 + $0x1e0] ss:$16 sps:$4 sm:$0xff]  }
 0x345   :  { %4431 = vmatprep.subr.bf16.mxu0 %v7614_v40  ;;  %4480 = vmatprep.subr.bf16.mxu1 %v7617_v43  ;;  %v7687_v40 = vld [vmem:[%s10367_s7 + $0x260] ss:$16 sps:$4 sm:$0xff]   ;;  %v7692_v43 = vld [vmem:[%s10367_s7 + $0x1c4] ss:$16 sps:$4 sm:$0xff]  }
 0x348   :  { %4432 = vmatpush2.bf16.msra.mxu0 %v7612_v44  ;;  %4481 = vmatpush2.bf16.msra.mxu1 %v7615_v46  ;;  %v7695_v44 = vld [vmem:[%s10367_s7 + $0x244] ss:$16 sps:$4 sm:$0xff]   ;;  %v7690_v46 = vld [vmem:[%s10367_s7 + $0x1c0] ss:$16 sps:$4 sm:$0xff]  }
 0x349   :  { %4433 = vmatprep.subr.bf16.mxu0 %v7620_v28  ;;  %4482 = vmatprep.subr.bf16.mxu1 %v7623_v52  ;;  %v7693_v28 = vld [vmem:[%s10367_s7 + $0x240] ss:$16 sps:$4 sm:$0xff]   ;;  %v7698_v52 = vld [vmem:[%s10367_s7 + $0x1a4] ss:$16 sps:$4 sm:$0xff]  }
 0x34c   :  { %4434 = vmatpush2.bf16.msra.mxu0 %v7618_v53  ;;  %4483 = vmatpush2.bf16.msra.mxu1 %v7621_v47  ;;  %v7701_v53 = vld [vmem:[%s10367_s7 + $0x224] ss:$16 sps:$4 sm:$0xff]   ;;  %v7696_v47 = vld [vmem:[%s10367_s7 + $0x1a0] ss:$16 sps:$4 sm:$0xff]  }
 0x34d   :  { %4435 = vmatprep.subr.bf16.mxu0 %v7626_v54  ;;  %4484 = vmatprep.subr.bf16.mxu1 %v7629_v55  ;;  %v7699_v54 = vld [vmem:[%s10367_s7 + $0x220] ss:$16 sps:$4 sm:$0xff]   ;;  %v7704_v55 = vld [vmem:[%s10367_s7 + $0x184] ss:$16 sps:$4 sm:$0xff]  }
 0x350   :  { %4436 = vmatpush2.bf16.msra.mxu0 %v7624_v34  ;;  %4485 = vmatpush2.bf16.msra.mxu1 %v7627_v51  ;;  %v7707_v34 = vld [vmem:[%s10367_s7 + $0x204] ss:$16 sps:$4 sm:$0xff]   ;;  %v7702_v51 = vld [vmem:[%s10367_s7 + $0x180] ss:$16 sps:$4 sm:$0xff]  }
 0x351   :  { %4437 = vmatprep.subr.bf16.mxu0 %v7632_v56  ;;  %4486 = vmatprep.subr.bf16.mxu1 %v7635_v57  ;;  %v7705_v56 = vld [vmem:[%s10367_s7 + $0x200] ss:$16 sps:$4 sm:$0xff]   ;;  %v7710_v57 = vld [vmem:[%s10367_s7 + $0x164] ss:$16 sps:$4 sm:$0xff]  }
 0x354   :  { %4438 = vmatpush2.bf16.msra.mxu0 %v7630_v58  ;;  %4487 = vmatpush2.bf16.msra.mxu1 %v7633_v59  ;;  %v7713_v58 = vld [vmem:[%s10367_s7 + $0x364] ss:$16 sps:$4 sm:$0xff]   ;;  %v7708_v59 = vld [vmem:[%s10367_s7 + $0x160] ss:$16 sps:$4 sm:$0xff]  }
 0x355   :  { %4439 = vmatprep.subr.bf16.mxu0 %v7638_v60  ;;  %5203 = vmatprep.subr.bf16.mxu1 %v7641_v62  ;;  %v7711_v60 = vld [vmem:[%s10367_s7 + $0x360] ss:$16 sps:$4 sm:$0xff]   ;;  %v7716_v62 = vld [vmem:[%s10367_s7 + $0x144] ss:$16 sps:$4 sm:$0xff]  }
 0x357   :  { %4489 = vmatmul.mubr.bf16.vlgmr.msra.gmra.mxu1 %v9624_v11 }
 0x358   :  { %4440 = vmatpush2.bf16.msra.mxu0 %v7636_v63  ;;  %5204 = vmatpush1.bf16.msra.mxu1 %v7639_v1  ;;  %v7719_v63 = vld [vmem:[%s10367_s7 + $0x344] ss:$16 sps:$4 sm:$0xff]   ;;  %v7714_v1 = vld [vmem:[%s10367_s7 + $0x140] ss:$16 sps:$4 sm:$0xff]  }
 0x359   :  { %5235 = vmatprep.mubr.bf16.mxu1 %v9606_v4  ;;  %4441 = vmatprep.subr.bf16.mxu0 %v7644_v2  ;;  %v7717_v2 = vld [vmem:[%s10367_s7 + $0x340] ss:$16 sps:$4 sm:$0xff]  }
 0x35a   :  { %5205 = vmatprep.subr.bf16.mxu1 %v7647_v9  ;;  %v7725_v9 = vld [vmem:[%s10367_s7 + $0x324] ss:$16 sps:$4 sm:$0xff]  }
 0x35c   :  { %4442 = vmatpush2.bf16.msra.mxu0 %v7642_v7  ;;  %5206 = vmatpush1.bf16.msra.mxu1 %v7645_v12  ;;  %v7722_v7 = vld [vmem:[%s10367_s7 + $0x124] ss:$16 sps:$4 sm:$0xff]   ;;  %v7720_v12 = vld [vmem:[%s10367_s7 + $0x120] ss:$16 sps:$4 sm:$0xff]  }
 0x35d   :  { %4443 = vmatprep.subr.bf16.mxu0 %v7650_v35  ;;  %5207 = vmatprep.subr.bf16.mxu1 %v7653_v13  ;;  %v7723_v35 = vld [vmem:[%s10367_s7 + $0x320] ss:$16 sps:$4 sm:$0xff]   ;;  %v7728_v13 = vld [vmem:[%s10367_s7 + $0x104] ss:$16 sps:$4 sm:$0xff]  }
 0x360   :  { %4444 = vmatpush2.bf16.msra.mxu0 %v7648_v14  ;;  %5208 = vmatpush1.bf16.msra.mxu1 %v7651_v15  ;;  %v7731_v14 = vld [vmem:[%s10367_s7 + $0x304] ss:$16 sps:$4 sm:$0xff]   ;;  %v7726_v15 = vld [vmem:[%s10367_s7 + $0x100] ss:$16 sps:$4 sm:$0xff]  }
 0x361   :  { %4445 = vmatprep.subr.bf16.mxu0 %v7656_v16  ;;  %5209 = vmatprep.subr.bf16.mxu1 %v7659_v17  ;;  %v7729_v16 = vld [vmem:[%s10367_s7 + $0x300] ss:$16 sps:$4 sm:$0xff]   ;;  %v7734_v17 = vld [vmem:[%s10367_s7 + $0xec] ss:$16 sps:$4 sm:$0xff]  }
 0x364   :  { %4446 = vmatpush2.bf16.msra.mxu0 %v7654_v18  ;;  %5210 = vmatpush1.bf16.msra.mxu1 %v7657_v19  ;;  %v7737_v18 = vld [vmem:[%s10367_s7 + $0x2ec] ss:$16 sps:$4 sm:$0xff]   ;;  %v7732_v19 = vld [vmem:[%s10367_s7 + $0xe8] ss:$16 sps:$4 sm:$0xff]  }
 0x365   :  { %5211 = vmatprep.subr.bf16.mxu1 %v7662_v20  ;;  %5244 = vmatprep.subr.bf16.mxu0 %v7665_v21  ;;  %v7735_v20 = vld [vmem:[%s10367_s7 + $0x2e8] ss:$16 sps:$4 sm:$0xff]   ;;  %v7740_v21 = vld [vmem:[%s10367_s7 + $0xcc] ss:$16 sps:$4 sm:$0xff]  }
 0x367   :  { %4448 = vmatmul.mubr.bf16.vlgmr.msra.gmra.mxu0 %v9620_v10 }
 0x368   :  { %5212 = vmatpush1.bf16.msra.mxu1 %v7660_v22  ;;  %5245 = vmatpush1.bf16.msra.mxu0 %v7663_v23  ;;  %v7743_v22 = vld [vmem:[%s10367_s7 + $0x2cc] ss:$16 sps:$4 sm:$0xff]   ;;  %v7738_v23 = vld [vmem:[%s10367_s7 + $0xc8] ss:$16 sps:$4 sm:$0xff]  }
 0x369   :  { %6686 = vmatprep.mubr.msk.bf16.mxu0 %vm2599_vm0, %v9610_v5  ;;  %5213 = vmatprep.subr.bf16.mxu1 %v7668_v24  ;;  %v7741_v24 = vld [vmem:[%s10367_s7 + $0x2c8] ss:$16 sps:$4 sm:$0xff]  }
 0x36a   :  { %5246 = vmatprep.subr.bf16.mxu0 %v7671_v25  ;;  %v7746_v25 = vld [vmem:[%s10367_s7 + $0xac] ss:$16 sps:$4 sm:$0xff]  }
 0x36c   :  { %5214 = vmatpush1.bf16.msra.mxu1 %v7666_v26  ;;  %5247 = vmatpush1.bf16.msra.mxu0 %v7669_v27  ;;  %v7744_v26 = vld [vmem:[%s10367_s7 + $0xa8] ss:$16 sps:$4 sm:$0xff]   ;;  %v7752_v27 = vld [vmem:[%s10367_s7 + $0x8c] ss:$16 sps:$4 sm:$0xff]  }
 0x36d   :  { %5215 = vmatprep.subr.bf16.mxu1 %v7674_v3  ;;  %5248 = vmatprep.subr.bf16.mxu0 %v7677_v30  ;;  %v7755_v3 = vld [vmem:[%s10367_s7 + $0x28c] ss:$16 sps:$4 sm:$0xff]   ;;  %v7750_v30 = vld [vmem:[%s10367_s7 + $0x88] ss:$16 sps:$4 sm:$0xff]  }
 0x370   :  { %5216 = vmatpush1.bf16.msra.mxu1 %v7672_v31  ;;  %5249 = vmatpush1.bf16.msra.mxu0 %v7675_v33  ;;  %v7753_v31 = vld [vmem:[%s10367_s7 + $0x288] ss:$16 sps:$4 sm:$0xff]   ;;  %v7758_v33 = vld [vmem:[%s10367_s7 + $0x6c] ss:$16 sps:$4 sm:$0xff]  }
 0x371   :  { %5217 = vmatprep.subr.bf16.mxu1 %v7680_v36  ;;  %5250 = vmatprep.subr.bf16.mxu0 %v7683_v37  ;;  %v7761_v36 = vld [vmem:[%s10367_s7 + $0x26c] ss:$16 sps:$4 sm:$0xff]   ;;  %v7756_v37 = vld [vmem:[%s10367_s7 + $0x68] ss:$16 sps:$4 sm:$0xff]  }
 0x374   :  { %5218 = vmatpush1.bf16.msra.mxu1 %v7678_v0  ;;  %5251 = vmatpush1.bf16.msra.mxu0 %v7681_v29  ;;  %v7759_v0 = vld [vmem:[%s10367_s7 + $0x268] ss:$16 sps:$4 sm:$0xff]   ;;  %v7764_v29 = vld [vmem:[%s10367_s7 + $0x4c] ss:$16 sps:$4 sm:$0xff]  }
 0x375   :  { %5219 = vmatprep.subr.bf16.mxu1 %v7686_v8  ;;  %5252 = vmatprep.subr.bf16.mxu0 %v7689_v38  ;;  %v7767_v8 = vld [vmem:[%s10367_s7 + $0x24c] ss:$16 sps:$4 sm:$0xff]   ;;  %v7762_v38 = vld [vmem:[%s10367_s7 + $0x48] ss:$16 sps:$4 sm:$0xff]  }
 0x378   :  { %5220 = vmatpush2.bf16.msra.mxu1 %v7684_v39  ;;  %5253 = vmatpush1.bf16.msra.mxu0 %v7687_v40  ;;  %v7765_v39 = vld [vmem:[%s10367_s7 + $0x248] ss:$16 sps:$4 sm:$0xff]   ;;  %v7770_v40 = vld [vmem:[%s10367_s7 + $0x2c] ss:$16 sps:$4 sm:$0xff]  }
 0x379   :  { %5221 = vmatprep.subr.bf16.mxu1 %v7692_v43  ;;  %5254 = vmatprep.subr.bf16.mxu0 %v7695_v44  ;;  %v7773_v43 = vld [vmem:[%s10367_s7 + $0x22c] ss:$16 sps:$4 sm:$0xff]   ;;  %v7768_v44 = vld [vmem:[%s10367_s7 + $0x28] ss:$16 sps:$4 sm:$0xff]  }
 0x37c   :  { %5222 = vmatpush2.bf16.msra.mxu1 %v7690_v46  ;;  %5255 = vmatpush1.bf16.msra.mxu0 %v7693_v28  ;;  %v7771_v46 = vld [vmem:[%s10367_s7 + $0x228] ss:$16 sps:$4 sm:$0xff]   ;;  %v7776_v28 = vld [vmem:[%s10367_s7 + $0xc] ss:$16 sps:$4 sm:$0xff]  }
 0x37d   :  { %5223 = vmatprep.subr.bf16.mxu1 %v7698_v52  ;;  %5256 = vmatprep.subr.bf16.mxu0 %v7701_v53  ;;  %v7779_v52 = vld [vmem:[%s10367_s7 + $0x20c] ss:$16 sps:$4 sm:$0xff]   ;;  %v7774_v53 = vld [vmem:[%s10367_s7 + $0x8] ss:$16 sps:$4 sm:$0xff]  }
 0x380   :  { %5224 = vmatpush2.bf16.msra.mxu1 %v7696_v47  ;;  %5257 = vmatpush1.bf16.msra.mxu0 %v7699_v54  ;;  %v7777_v47 = vld [vmem:[%s10367_s7 + $0x208] ss:$16 sps:$4 sm:$0xff]   ;;  %v7782_v54 = vld [vmem:[%s10367_s7 + $0x1ec] ss:$16 sps:$4 sm:$0xff]  }
 0x381   :  { %5225 = vmatprep.subr.bf16.mxu1 %v7704_v55  ;;  %5258 = vmatprep.subr.bf16.mxu0 %v7707_v34  ;;  %v7785_v55 = vld [vmem:[%s10367_s7 + $0x36c] ss:$16 sps:$4 sm:$0xff]   ;;  %v7780_v34 = vld [vmem:[%s10367_s7 + $0x1e8] ss:$16 sps:$4 sm:$0xff]  }
 0x384   :  { %5226 = vmatpush2.bf16.msra.mxu1 %v7702_v51  ;;  %5259 = vmatpush1.bf16.msra.mxu0 %v7705_v56  ;;  %v7783_v51 = vld [vmem:[%s10367_s7 + $0x368] ss:$16 sps:$4 sm:$0xff]   ;;  %v7788_v56 = vld [vmem:[%s10367_s7 + $0x1cc] ss:$16 sps:$4 sm:$0xff]  }
 0x385   :  { %5227 = vmatprep.subr.bf16.mxu1 %v7710_v57  ;;  %5268 = vmatprep.subr.bf16.mxu0 %v7713_v58  ;;  %v7791_v57 = vld [vmem:[%s10367_s7 + $0x34c] ss:$16 sps:$4 sm:$0xff]   ;;  %v7786_v58 = vld [vmem:[%s10367_s7 + $0x1c8] ss:$16 sps:$4 sm:$0xff]  }
 0x388   :  { %5228 = vmatpush2.bf16.msra.mxu1 %v7708_v59  ;;  %5269 = vmatpush2.bf16.msra.mxu0 %v7711_v60  ;;  %v7789_v59 = vld [vmem:[%s10367_s7 + $0x348] ss:$16 sps:$4 sm:$0xff]   ;;  %v7794_v60 = vld [vmem:[%s10367_s7 + $0x1ac] ss:$16 sps:$4 sm:$0xff]  }
 0x389   :  { %5229 = vmatprep.subr.bf16.mxu1 %v7716_v62  ;;  %5270 = vmatprep.subr.bf16.mxu0 %v7719_v63  ;;  %v7797_v62 = vld [vmem:[%s10367_s7 + $0x32c] ss:$16 sps:$4 sm:$0xff]   ;;  %v7792_v63 = vld [vmem:[%s10367_s7 + $0x1a8] ss:$16 sps:$4 sm:$0xff]  }
 0x38c   :  { %5230 = vmatpush2.bf16.msra.mxu1 %v7714_v1  ;;  %5271 = vmatpush2.bf16.msra.mxu0 %v7717_v2  ;;  %v7795_v1 = vld [vmem:[%s10367_s7 + $0x328] ss:$16 sps:$4 sm:$0xff]   ;;  %v7800_v2 = vld [vmem:[%s10367_s7 + $0x18c] ss:$16 sps:$4 sm:$0xff]  }
 0x38d   :  { %5231 = vmatprep.subr.bf16.mxu1 %v7722_v7  ;;  %5272 = vmatprep.subr.bf16.mxu0 %v7725_v9  ;;  %v7798_v7 = vld [vmem:[%s10367_s7 + $0x188] ss:$16 sps:$4 sm:$0xff]   ;;  %v7803_v9 = vld [vmem:[%s10367_s7 + $0x30c] ss:$16 sps:$4 sm:$0xff]  }
 0x390   :  { %5232 = vmatpush2.bf16.msra.mxu1 %v7720_v12  ;;  %5273 = vmatpush2.bf16.msra.mxu0 %v7723_v35  ;;  %v7801_v12 = vld [vmem:[%s10367_s7 + $0x308] ss:$16 sps:$4 sm:$0xff]   ;;  %v7806_v35 = vld [vmem:[%s10367_s7 + $0x16c] ss:$16 sps:$4 sm:$0xff]  }
 0x391   :  { %5233 = vmatprep.subr.bf16.mxu1 %v7728_v13  ;;  %5274 = vmatprep.subr.bf16.mxu0 %v7731_v14  ;;  %v7816_v13 = vld [vmem:[%s10369_s10 + $0x78] sm:$0xff]  }
 0x392   :  { %v7804_v14 = vld [vmem:[%s10367_s7 + $0x168] ss:$16 sps:$4 sm:$0xff]  }
 0x394   :  { %5234 = vmatpush2.bf16.msra.mxu1 %v7726_v15  ;;  %5275 = vmatpush2.bf16.msra.mxu0 %v7729_v16  ;;  %v7809_v15 = vld [vmem:[%s10367_s7 + $0x14c] ss:$16 sps:$4 sm:$0xff]  }
 0x395   :  { %5285 = vmatprep.subr.bf16.mxu0 %v7734_v17  ;;  %5326 = vmatprep.subr.bf16.mxu1 %v7737_v18  ;;  %v7817_v16 = vld [vmem:[%s10369_s10 + $0x38] sm:$0xff]   ;;  %v7818_v17 = vld [vmem:[%s10369_s10 + $0x70] sm:$0xff]  }
 0x396   :  { %v7807_v18 = vld [vmem:[%s10367_s7 + $0x148] ss:$16 sps:$4 sm:$0xff]  }
 0x397   :  { %5236 = vmatmul.mubr.bf16.vlgmr.msra.gmra.mxu1 %v9620_v10  ;;  %5277 = vmatmul.mubr.bf16.vlgmr.msra.gmra.mxu0 %v9624_v11 }
 0x398   :  { %5286 = vmatpush1.bf16.msra.mxu0 %v7732_v19  ;;  %5317 = vmatprep.mubr.bf16.mxu0 %v9606_v4  ;;  %v7749_v4 = vld [vmem:[%s10367_s7 + $0x2ac] ss:$16 sps:$4 sm:$0xff]  }
 0x399   :  { %5327 = vmatpush1.bf16.msra.mxu1 %v7735_v20  ;;  %6687 = vmatprep.mubr.msk.bf16.mxu1 %vm2599_vm0, %v9610_v5  ;;  %v7747_v5 = vld [vmem:[%s10367_s7 + $0x2a8] ss:$16 sps:$4 sm:$0xff]   ;;  %v7812_v19 = vld [vmem:[%s10367_s7 + $0x12c] ss:$16 sps:$4 sm:$0xff]   ;;  %v7819_v20 = vld [vmem:[%s10369_s10 + $0x30] sm:$0xff]  }
 0x39a   :  { %5287 = vmatprep.subr.bf16.mxu0 %v7740_v21  ;;  %5328 = vmatprep.subr.bf16.mxu1 %v7743_v22  ;;  %v7820_v21 = vld [vmem:[%s10369_s10 + $0x68] sm:$0xff]  }
 0x39b   :  { %v7810_v22 = vld [vmem:[%s10367_s7 + $0x128] ss:$16 sps:$4 sm:$0xff]  }
 0x39c   :  { %5288 = vmatpush1.bf16.msra.mxu0 %v7738_v23  ;;  %v7815_v23 = vld [vmem:[%s10367_s7 + $0x10c] ss:$16 sps:$4 sm:$0xff]  }
 0x39d   :  { %5329 = vmatpush1.bf16.msra.mxu1 %v7741_v24  ;;  %5289 = vmatprep.subr.bf16.mxu0 %v7746_v25  ;;  %v7822_v24 = vld [vmem:[%s10369_s10 + $0x60] sm:$0xff]   ;;  %v7813_v25 = vld [vmem:[%s10367_s7 + $0x108] ss:$16 sps:$4 sm:$0xff]  }
 0x39e   :  { %5330 = vmatprep.subr.bf16.mxu1 %v7749_v4  ;;  %v7823_v4 = vld [vmem:[%s10369_s10 + $0x20] sm:$0xff]  }
 0x3a0   :  { %5290 = vmatpush1.bf16.msra.mxu0 %v7744_v26  ;;  %v7824_v26 = vld [vmem:[%s10369_s10 + $0x58] sm:$0xff]  }
 0x3a1   :  { %5331 = vmatpush1.bf16.msra.mxu1 %v7747_v5  ;;  %5291 = vmatprep.subr.bf16.mxu0 %v7752_v27  ;;  %v7832_v5 = vld [vmem:[%s10369_s10 + $0xb8] sm:$0xff]  }
 0x3a2   :  { %5332 = vmatprep.subr.bf16.mxu1 %v7755_v3  ;;  %v7825_v27 = vld [vmem:[%s10369_s10 + $0x18] sm:$0xff]   ;;  %v7826_v3 = vld [vmem:[%s10369_s10 + $0x50] sm:$0xff]  }
 0x3a4   :  { %5292 = vmatpush1.bf16.msra.mxu0 %v7750_v30  ;;  %v7833_v30 = vld [vmem:[%s10369_s10 + $0xb0] sm:$0xff]  }
 0x3a5   :  { %5333 = vmatpush1.bf16.msra.mxu1 %v7753_v31  ;;  %5293 = vmatprep.subr.bf16.mxu0 %v7758_v33  ;;  %v7827_v31 = vld [vmem:[%s10369_s10 + $0x10] sm:$0xff]   ;;  %v7828_v33 = vld [vmem:[%s10369_s10 + $0x48] sm:$0xff]  }
 0x3a6   :  { %5334 = vmatprep.subr.bf16.mxu1 %v7761_v36  ;;  %v7829_v36 = vld [vmem:[%s10369_s10 + $0x8] sm:$0xff]  }
 0x3a8   :  { %5294 = vmatpush1.bf16.msra.mxu0 %v7756_v37  ;;  %v7830_v37 = vld [vmem:[%s10369_s10 + $0x40] sm:$0xff]  }
 0x3a9   :  { %5335 = vmatpush1.bf16.msra.mxu1 %v7759_v0  ;;  %5295 = vmatprep.subr.bf16.mxu0 %v7764_v29  ;;  %v7835_v0 = vld [vmem:[%s10369_s10 + $0xa0] sm:$0xff]  }
 0x3aa   :  { %5336 = vmatprep.subr.bf16.mxu1 %v7767_v8  ;;  %v10201_v29 = vld [vmem:[%s10371_s6] sm:$0xf] }
 0x3ab   :  { %v7831_v8 = vld [vmem:[%s10369_s10] sm:$0xff]  }
 0x3ac   :  { %5296 = vmatpush1.bf16.msra.mxu0 %v7762_v38  ;;  %v7844_v38 = vld [vmem:[%s10370_s9 + $0x78] sm:$0xff]  }
 0x3ad   :  { %5337 = vmatpush1.bf16.msra.mxu1 %v7765_v39  ;;  %5297 = vmatprep.subr.bf16.mxu0 %v7770_v40  ;;  %v3753_v39 = vrot.slane %v10201_v29, %v8765_v45  ;;  %v7836_v40 = vld [vmem:[%s10369_s10 + $0x98] sm:$0xff]  }
 0x3ae   :  { %5338 = vmatprep.subr.bf16.mxu1 %v7773_v43  ;;  %v3757_v43 = vrot.slane %v10201_v29, %v8774_v48 }
 0x3b0   :  { %5298 = vmatpush1.bf16.msra.mxu0 %v7768_v44 }
 0x3b1   :  { %5339 = vmatpush1.bf16.msra.mxu1 %v7771_v46  ;;  %5299 = vmatprep.subr.bf16.mxu0 %v7776_v28 }
 0x3b2   :  { %5340 = vmatprep.subr.bf16.mxu1 %v7779_v52  ;;  %v7837_v52 = vld [vmem:[%s10369_s10 + $0x90] sm:$0xff]  }
 0x3b4   :  { %5300 = vmatpush1.bf16.msra.mxu0 %v7774_v53 }
 0x3b5   :  { %5341 = vmatpush1.bf16.msra.mxu1 %v7777_v47  ;;  %5301 = vmatprep.subr.bf16.mxu0 %v7782_v54 }
 0x3b6   :  { %5350 = vmatprep.subr.bf16.mxu1 %v7785_v55 }
 0x3b8   :  { %5302 = vmatpush2.bf16.msra.mxu0 %v7780_v34 }
 0x3b9   :  { %5351 = vmatpush2.bf16.msra.mxu1 %v7783_v51  ;;  %5303 = vmatprep.subr.bf16.mxu0 %v7788_v56 }
 0x3ba   :  { %5352 = vmatprep.subr.bf16.mxu1 %v7791_v57 }
 0x3bc   :  { %5304 = vmatpush2.bf16.msra.mxu0 %v7786_v58  ;;  %v7838_v58 = vld [vmem:[%s10369_s10 + $0x88] sm:$0xff]  }
 0x3bd   :  { %5353 = vmatpush2.bf16.msra.mxu1 %v7789_v59  ;;  %5305 = vmatprep.subr.bf16.mxu0 %v7794_v60 }
 0x3be   :  { %5354 = vmatprep.subr.bf16.mxu1 %v7797_v62 }
 0x3c0   :  { %5306 = vmatpush2.bf16.msra.mxu0 %v7792_v63 }
 0x3c1   :  { %5355 = vmatpush2.bf16.msra.mxu1 %v7795_v1  ;;  %5307 = vmatprep.subr.bf16.mxu0 %v7800_v2  ;;  %v7839_v2 = vld [vmem:[%s10369_s10 + $0x80] sm:$0xff]  }
 0x3c2   :  { %5356 = vmatprep.subr.bf16.mxu1 %v7803_v9  ;;  %v7845_v9 = vld [vmem:[%s10370_s9 + $0x38] sm:$0xff]  }
 0x3c4   :  { %5308 = vmatpush2.bf16.msra.mxu0 %v7798_v7 }
 0x3c5   :  { %5357 = vmatpush2.bf16.msra.mxu1 %v7801_v12  ;;  %5309 = vmatprep.subr.bf16.mxu0 %v7806_v35  ;;  %v7846_v35 = vld [vmem:[%s10370_s9 + $0x70] sm:$0xff]  }
 0x3c6   :  { %6747 = vmatprep.subr.bf16.mxu1 %v7816_v13  ;;  %v7848_v13 = vld [vmem:[%s10370_s9 + $0x68] sm:$0xff]  }
 0x3c8   :  { %5359 = vmatmul.mubr.bf16.vlgmr.msra.gmra.mxu1 %v9624_v11  ;;  %5310 = vmatpush2.bf16.msra.mxu0 %v7804_v14  ;;  %v7821_v11 = vld [vmem:[%s10369_s10 + $0x28] sm:$0xff]   ;;  %v7841_v14 = vld [vmem:[%s10369_s10 + $0xd0] sm:$0xff]  }
 0x3c9   :  { %5311 = vmatprep.subr.bf16.mxu0 %v7809_v15  ;;  %6748 = vmatpush3.bf16.msra.mxu1 %v7817_v16  ;;  %v7849_v15 = vld [vmem:[%s10370_s9 + $0x28] sm:$0xff]   ;;  %v7850_v16 = vld [vmem:[%s10370_s9 + $0x60] sm:$0xff]  }
 0x3ca   :  { %6749 = vmatprep.subr.bf16.mxu1 %v7818_v17  ;;  %v7842_v17 = vld [vmem:[%s10369_s10 + $0xc8] sm:$0xff]  }
 0x3cc   :  { %5312 = vmatpush2.bf16.msra.mxu0 %v7807_v18  ;;  %v7851_v18 = vld [vmem:[%s10370_s9 + $0x20] sm:$0xff]  }
 0x3cd   :  { %5313 = vmatprep.subr.bf16.mxu0 %v7812_v19  ;;  %6750 = vmatpush3.bf16.msra.mxu1 %v7819_v20  ;;  %v7852_v19 = vld [vmem:[%s10370_s9 + $0x58] sm:$0xff]   ;;  %v7843_v20 = vld [vmem:[%s10369_s10 + $0xc0] sm:$0xff]  }
 0x3ce   :  { %6751 = vmatprep.subr.bf16.mxu1 %v7820_v21  ;;  %v7853_v21 = vld [vmem:[%s10370_s9 + $0x18] sm:$0xff]  }
 0x3d0   :  { %5314 = vmatpush2.bf16.msra.mxu0 %v7810_v22  ;;  %v7854_v22 = vld [vmem:[%s10370_s9 + $0x50] sm:$0xff]  }
 0x3d1   :  { %5315 = vmatprep.subr.bf16.mxu0 %v7815_v23  ;;  %6752 = vmatpush3.bf16.msra.mxu1 %v7821_v11  ;;  %v7855_v23 = vld [vmem:[%s10370_s9 + $0x10] sm:$0xff]   ;;  %v7856_v11 = vld [vmem:[%s10370_s9 + $0x48] sm:$0xff]  }
 0x3d2   :  { %6753 = vmatprep.subr.bf16.mxu1 %v7822_v24  ;;  %v7857_v24 = vld [vmem:[%s10370_s9 + $0x8] sm:$0xff]  }
 0x3d4   :  { %5316 = vmatpush2.bf16.msra.mxu0 %v7813_v25  ;;  %v7858_v25 = vld [vmem:[%s10370_s9 + $0x40] sm:$0xff]  }
 0x3d5   :  { %6754 = vmatpush3.bf16.msra.mxu1 %v7823_v4  ;;  %5698 = vmatprep.subr.bf16.mxu0 %v7873_v41  ;;  %v7859_v4 = vld [vmem:[%s10370_s9] sm:$0xff]  }
 0x3d6   :  { %6755 = vmatprep.subr.bf16.mxu1 %v7824_v26 }
 0x3d7   :  { %5318 = vmatmul.mubr.bf16.vlgmr.msra.gmra.mxu0 %v9620_v10  ;;  %v7834_v10 = vld [vmem:[%s10369_s10 + $0xa8] sm:$0xff]  }
 0x3d8   :  { %5699 = vmatpush1.bf16.msra.mxu0 %v7832_v5 }
 0x3d9   :  { %6756 = vmatpush3.bf16.msra.mxu1 %v7825_v27  ;;  %5700 = vmatprep.subr.bf16.mxu0 %v7873_v41 }
 0x3da   :  { %6757 = vmatprep.subr.bf16.mxu1 %v7826_v3 }
 0x3dc   :  { %5701 = vmatpush1.bf16.msra.mxu0 %v7833_v30  ;;  %v3761_v30 = vrot.slane %v10201_v29, %v9584_v6 }
 0x3dd   :  { %6758 = vmatpush3.bf16.msra.mxu1 %v7827_v31  ;;  %5702 = vmatprep.subr.bf16.mxu0 %v7873_v41  ;;  %v3765_v31 = vrot.slane %v10201_v29, %v9590_v50 }
 0x3de   :  { %6759 = vmatprep.subr.bf16.mxu1 %v7828_v33 }
 0x3e0   :  { %5703 = vmatpush1.bf16.msra.mxu0 %v7834_v10 }
 0x3e1   :  { %6760 = vmatpush3.bf16.msra.mxu1 %v7829_v36  ;;  %5704 = vmatprep.subr.bf16.mxu0 %v7873_v41 }
 0x3e2   :  { %6761 = vmatprep.subr.bf16.mxu1 %v7830_v37 }
 0x3e4   :  { %5705 = vmatpush1.bf16.msra.mxu0 %v7835_v0 }
 0x3e5   :  { %6762 = vmatpush3.bf16.msra.mxu1 %v7831_v8  ;;  %5706 = vmatprep.subr.bf16.mxu0 %v7873_v41 }
 0x3e6   :  { %6769 = vmatprep.subr.bf16.mxu1 %v7844_v38 }
 0x3e7   :  { %v4367_v44 = vpop.f32.mrf.mxu1  ;;  %v4408_v46 = vpop.f32.mrf.mxu0 }
 0x3e8   :  { %v4368_v28 = vadd.f32 %v4367_v44, %v3753_v39  ;;  %5707 = vmatpush1.bf16.msra.mxu0 %v7836_v40 }
 0x3e9   :  { %v4369_v53 = vpop.f32.mrf.mxu1  ;;  %v4410_v47 = vpop.f32.mrf.mxu0  ;;  %5708 = vmatprep.subr.bf16.mxu0 %v7873_v41 }
 0x3ea   :  { %v4409_v54 = vadd.f32 %v4408_v46, %v4368_v28  ;;  %v4370_v55 = vadd.f32 %v4369_v53, %v3757_v43  ;;  %v7861_v53 = vld [vmem:[%s10370_s9 + $0xb0] sm:$0xff]  }
 0x3eb   :  { %v4371_v34 = vpop.f32.mrf.mxu1  ;;  %v4412_v51 = vpop.f32.mrf.mxu0 }
 0x3ec   :  { %v4497_v56 = vmax.f32 %v4409_v54, 0.0  ;;  %v4411_v57 = vadd.f32 %v4410_v47, %v4370_v55  ;;  %5709 = vmatpush1.bf16.msra.mxu0 %v7837_v52  ;;  %v7860_v52 = vld [vmem:[%s10370_s9 + $0xb8] sm:$0xff]   ;;  %v7865_v54 = vld [vmem:[%s10370_s9 + $0x90] sm:$0xff]   ;;  %v7866_v55 = vld [vmem:[%s10370_s9 + $0x88] sm:$0xff]  }
 0x3ed   :  { %v4372_v59 = vpop.f32.mrf.mxu1  ;;  %v4413_v60 = vpop.f32.mrf.mxu0  ;;  %5710 = vmatprep.subr.bf16.mxu0 %v7873_v41  ;;  %v7864_v47 = vld [vmem:[%s10370_s9 + $0x98] sm:$0xff]   ;;  %v7867_v34 = vld [vmem:[%s10370_s9 + $0x80] sm:$0xff]  }
 0x3ee   :  { %v4498_v62 = vmax.f32 %v4411_v57, 0.0  ;;  %v4501_v63 = vadd.f32 %v4497_v56, %v9596_v61  ;;  %v7840_v61 = vld [vmem:[%s10369_s10 + $0xd8] sm:$0xff]   ;;  %v4621_v51 = vld [vmem:[%s10372_s8] sm:$0xf]  ;;  %v7869_v59 = vld [vmem:[%s10370_s9 + $0xd0] sm:$0xff]  }
 0x3ef   :  { %v7868_v56 = vld [vmem:[%s10370_s9 + $0xd8] sm:$0xff]   ;;  %v4626_v57 = vrot.slane %v4621_v51, %v8765_v45  ;;  %v7870_v45 = vld [vmem:[%s10370_s9 + $0xc8] sm:$0xff]  }
 0x3f0   :  { %v4502_v1 = vadd.f32 %v4498_v62, %v9600_v32  ;;  %5711 = vmatpush1.bf16.msra.mxu0 %v7838_v58  ;;  %v4505_v12 = vpack.c.bf16 %v4501_v63, %v4501_v63  ;;  %v7847_v32 = vld [vmem:[%s10370_s9 + $0x30] sm:$0xff]   ;;  %v4630_v58 = vrot.slane %v4621_v51, %v8774_v48 }
 0x3f1   :  { %5712 = vmatprep.subr.bf16.mxu0 %v7873_v41 }
 0x3f2   :  { %v4506_v7 = vpack.c.bf16 %v4502_v1, %v4502_v1 }
 0x3f4   :  { %5690 = vmatprep.mubr.bf16.mxu1 %v4506_v7  ;;  %5713 = vmatpush1.bf16.msra.mxu0 %v7839_v2 }
 0x3f5   :  { %5691 = vmatmul.mubr.bf16.vlgmr.msra.gmra.mxu1 %v4505_v12  ;;  %5722 = vmatprep.subr.bf16.mxu0 %v7873_v41 }
 0x3f6   :  { %6770 = vmatpush3.bf16.msra.mxu1 %v7845_v9 }
 0x3f7   :  { %6771 = vmatprep.subr.bf16.mxu1 %v7846_v35 }
 0x3f8   :  { %5723 = vmatpush2.bf16.msra.mxu0 %v7840_v61 }
 0x3f9   :  { %5724 = vmatprep.subr.bf16.mxu0 %v7873_v41 }
 0x3fa   :  { %6772 = vmatpush3.bf16.msra.mxu1 %v7847_v32 }
 0x3fb   :  { %6773 = vmatprep.subr.bf16.mxu1 %v7848_v13 }
 0x3fc   :  { %5725 = vmatpush2.bf16.msra.mxu0 %v7841_v14 }
 0x3fd   :  { %5726 = vmatprep.subr.bf16.mxu0 %v7873_v41 }
 0x3fe   :  { %6774 = vmatpush3.bf16.msra.mxu1 %v7849_v15  ;;  %v7871_v15 = vld [vmem:[%s10370_s9 + $0xc0] sm:$0xff]  }
 0x3ff   :  { %6775 = vmatprep.subr.bf16.mxu1 %v7850_v16 }
 0x400   :  { %5727 = vmatpush2.bf16.msra.mxu0 %v7842_v17 }
 0x401   :  { %5728 = vmatprep.subr.bf16.mxu0 %v7873_v41 }
 0x402   :  { %6776 = vmatpush3.bf16.msra.mxu1 %v7851_v18 }
 0x403   :  { %6777 = vmatprep.subr.bf16.mxu1 %v7852_v19 }
 0x404   :  { %5729 = vmatpush2.bf16.msra.mxu0 %v7843_v20 }
 0x405   :  { %5949 = vmatprep.subr.bf16.mxu0 %v7873_v41 }
 0x406   :  { %6778 = vmatpush3.bf16.msra.mxu1 %v7853_v21 }
 0x407   :  { %6779 = vmatprep.subr.bf16.mxu1 %v7854_v22  ;;  %v4634_v22 = vrot.slane %v4621_v51, %v9584_v6 }
 0x40a   :  { %6780 = vmatpush3.bf16.msra.mxu1 %v7855_v23  ;;  %v4638_v23 = vrot.slane %v4621_v51, %v9590_v50 }
 0x40b   :  { %6781 = vmatprep.subr.bf16.mxu1 %v7856_v11 }
 0x40e   :  { %6782 = vmatpush3.bf16.msra.mxu1 %v7857_v24 }
 0x40f   :  { %6783 = vmatprep.subr.bf16.mxu1 %v7858_v25 }
 0x412   :  { %6784 = vmatpush3.bf16.msra.mxu1 %v7859_v4 }
 0x417   :  { %v4490_v26 = vpop.f32.mrf.mxu1 }
 0x419   :  { %v4492_v5 = vpop.f32.mrf.mxu1 }
 0x41b   :  { %v4494_v27 = vpop.f32.mrf.mxu1 }
 0x41d   :  { %v4495_v3 = vpop.f32.mrf.mxu1 }
 0x427   :  { %v4449_v33 = vpop.f32.mrf.mxu0 }
 0x428   :  { %v4450_v10 = vadd.f32 %v4449_v33, %v3761_v30 }
 0x429   :  { %v4451_v36 = vpop.f32.mrf.mxu0 }
 0x42a   :  { %v4491_v37 = vadd.f32 %v4490_v26, %v4450_v10  ;;  %v4452_v0 = vadd.f32 %v4451_v36, %v3765_v31 }
 0x42b   :  { %v4453_v8 = vpop.f32.mrf.mxu0 }
 0x42c   :  { %v4499_v38 = vmax.f32 %v4491_v37, 0.0  ;;  %v4493_v39 = vadd.f32 %v4492_v5, %v4452_v0 }
 0x42d   :  { %v4454_v40 = vpop.f32.mrf.mxu0 }
 0x42e   :  { %v4500_v43 = vmax.f32 %v4493_v39, 0.0  ;;  %v4503_v44 = vadd.f32 %v4499_v38, %v9598_v42  ;;  %v7862_v42 = vld [vmem:[%s10370_s9 + $0xa8] sm:$0xff]  }
 0x430   :  { %v4504_v46 = vadd.f32 %v4500_v43, %v9602_v49  ;;  %v4507_v29 = vpack.c.bf16 %v4503_v44, %v4503_v44  ;;  %v7863_v49 = vld [vmem:[%s10370_s9 + $0xa0] sm:$0xff]  }
 0x432   :  { %v4508_v28 = vpack.c.bf16 %v4504_v46, %v4504_v46 }
 0x434   :  { %6716 = vmatprep.mubr.msk.bf16.mxu0 %vm2599_vm0, %v4508_v28 }
 0x435   :  { %5731 = vmatmul.mubr.bf16.vlgmr.msra.gmra.mxu0 %v4507_v29 }
 0x436   :  { %5950 = vmatpush1.bf16.msra.mxu0 %v7860_v52 }
 0x437   :  { %5951 = vmatprep.subr.bf16.mxu0 %v7873_v41 }
 0x43a   :  { %5952 = vmatpush1.bf16.msra.mxu0 %v7861_v53 }
 0x43b   :  { %5953 = vmatprep.subr.bf16.mxu0 %v7873_v41 }
 0x43e   :  { %5954 = vmatpush1.bf16.msra.mxu0 %v7862_v42  ;;  %v6746_v42 = vld [vmem:[%s10373_s11] ss:$0 sm:$0xff] }
 0x43f   :  { %5955 = vmatprep.subr.bf16.mxu0 %v7873_v41 }
 0x442   :  { %5956 = vmatpush1.bf16.msra.mxu0 %v7863_v49 }
 0x443   :  { %5957 = vmatprep.subr.bf16.mxu0 %v7873_v41 }
 0x446   :  { %5958 = vmatpush1.bf16.msra.mxu0 %v7864_v47 }
 0x447   :  { %5959 = vmatprep.subr.bf16.mxu0 %v7873_v41 }
 0x44a   :  { %5960 = vmatpush1.bf16.msra.mxu0 %v7865_v54 }
 0x44b   :  { %5961 = vmatprep.subr.bf16.mxu0 %v7873_v41 }
 0x44e   :  { %5962 = vmatpush1.bf16.msra.mxu0 %v7866_v55 }
 0x44f   :  { %5963 = vmatprep.subr.bf16.mxu0 %v7873_v41 }
 0x452   :  { %5964 = vmatpush1.bf16.msra.mxu0 %v7867_v34 }
 0x453   :  { %5973 = vmatprep.subr.bf16.mxu0 %v7873_v41 }
 0x456   :  { %5974 = vmatpush2.bf16.msra.mxu0 %v7868_v56 }
 0x457   :  { %v5237_v60 = vpop.f32.mrf.mxu1  ;;  %v5278_v62 = vpop.f32.mrf.mxu0  ;;  %5975 = vmatprep.subr.bf16.mxu0 %v7873_v41 }
 0x458   :  { %v5238_v63 = vadd.f32 %v5237_v60, %v4626_v57 }
 0x459   :  { %v5239_v1 = vpop.f32.mrf.mxu1  ;;  %v5280_v2 = vpop.f32.mrf.mxu0 }
 0x45a   :  { %v5279_v7 = vadd.f32 %v5278_v62, %v5238_v63  ;;  %v5240_v9 = vadd.f32 %v5239_v1, %v4630_v58  ;;  %5976 = vmatpush2.bf16.msra.mxu0 %v7869_v59 }
 0x45b   :  { %v5241_v48 = vpop.f32.mrf.mxu1  ;;  %v5282_v12 = vpop.f32.mrf.mxu0  ;;  %5977 = vmatprep.subr.bf16.mxu0 %v7873_v41 }
 0x45c   :  { %v5281_v35 = vadd.f32 %v5280_v2, %v5240_v9  ;;  %v5367_v61 = vmax.f32 %v5279_v7, 0.0 }
 0x45d   :  { %v5242_v32 = vpop.f32.mrf.mxu1  ;;  %v5283_v13 = vpop.f32.mrf.mxu0 }
 0x45e   :  { %v5368_v14 = vmax.f32 %v5281_v35, 0.0  ;;  %5978 = vmatpush2.bf16.msra.mxu0 %v7870_v45  ;;  %v5371_v17 = vpack.c.bf16 %v5367_v61, %v5367_v61 }
 0x45f   :  { %5979 = vmatprep.subr.bf16.mxu0 %v7873_v41 }
 0x460   :  { %v5372_v16 = vpack.c.bf16 %v5368_v14, %v5368_v14 }
 0x462   :  { %5941 = vmatprep.mubr.bf16.mxu1 %v5372_v16  ;;  %5980 = vmatpush2.bf16.msra.mxu0 %v7871_v15 }
 0x463   :  { %5942 = vmatmul.mubr.bf16.vlgmr.msra.gmra.mxu1 %v5371_v17 }
 0x488   :  { %v5360_v18 = vpop.f32.mrf.mxu1 }
 0x48a   :  { %v5362_v19 = vpop.f32.mrf.mxu1 }
 0x48c   :  { %v5364_v20 = vpop.f32.mrf.mxu1 }
 0x48e   :  { %v5365_v21 = vpop.f32.mrf.mxu1 }
 0x497   :  { %v5319_v11 = vpop.f32.mrf.mxu0 }
 0x498   :  { %v5320_v24 = vadd.f32 %v5319_v11, %v4634_v22 }
 0x499   :  { %v5321_v25 = vpop.f32.mrf.mxu0 }
 0x49a   :  { %v5361_v4 = vadd.f32 %v5360_v18, %v5320_v24  ;;  %v5322_v26 = vadd.f32 %v5321_v25, %v4638_v23 }
 0x49b   :  { %v5323_v5 = vpop.f32.mrf.mxu0 }
 0x49c   :  { %v5363_v41 = vadd.f32 %v5362_v19, %v5322_v26  ;;  %v5369_v27 = vmax.f32 %v5361_v4, 0.0 }
 0x49d   :  { %v5324_v3 = vpop.f32.mrf.mxu0 }
 0x49e   :  { %v5370_v30 = vmax.f32 %v5363_v41, 0.0  ;;  %v5373_v33 = vpack.c.bf16 %v5369_v27, %v5369_v27 }
 0x4a0   :  { %v5374_v31 = vpack.c.bf16 %v5370_v30, %v5370_v30 }
 0x4a2   :  { %6745 = vmatprep.mubr.msk.bf16.mxu0 %vm2599_vm0, %v5374_v31 }
 0x4a3   :  { %5982 = vmatmul.mubr.bf16.vlgmr.msra.gmra.mxu0 %v5373_v33 }
 0x4b5   :  { %v6763_v10 = vpop.f32.mrf.mxu1 }
 0x4b7   :  { %v6764_v36 = vpop.f32.mrf.mxu1 }
 0x4b8   :  { %v6765_v6 = vadd.f32 %v6764_v36, %v6763_v10 }
 0x4b9   :  { %v6766_v37 = vpop.f32.mrf.mxu1 }
 0x4bb   :  { %v6767_v50 = vpop.f32.mrf.mxu1 }
 0x4f5   :  { %v5732_v0 = vpop.f32.mrf.mxu0 }
 0x4f6   :  { %v5733_v8 = vadd.f32 %v6765_v6, %v5732_v0 }
 0x4f7   :  { %v5734_v38 = vpop.f32.mrf.mxu0 }
 0x4f9   :  { %v5735_v39 = vpop.f32.mrf.mxu0 }
 0x4fb   :  { %v5736_v40 = vpop.f32.mrf.mxu0 }
 0x523   :  { %v6785_v43 = vpop.f32.mrf.mxu1 }
 0x525   :  { %v6786_v44 = vpop.f32.mrf.mxu1 }
 0x526   :  { %v6787_v52 = vadd.f32 %v6786_v44, %v6785_v43 }
 0x527   :  { %v6788_v46 = vpop.f32.mrf.mxu1 }
 0x528   :  { %v5944_v29 = vadd.f32 %v6787_v52, %v5733_v8 }
 0x529   :  { %v6789_v28 = vpop.f32.mrf.mxu1 }
 0x563   :  { %v5983_v53 = vpop.f32.mrf.mxu0 }
 0x564   :  { %v5984_v49 = vadd.f32 %v5983_v53, %v5944_v29 }
 0x565   :  { %v5985_v47 = vpop.f32.mrf.mxu0 }
 0x566   :  { %v5996_v54 = vadd.f32 %v6746_v42, %v5984_v49 }
 0x567   :  { %v5986_v55 = vpop.f32.mrf.mxu0 }
 0x568   :  { %5997 = vst [vmem:[%s10374_s12] sm:$0x3] %v5996_v54 }
 0x569   :  { %v5987_v34 = vpop.f32.mrf.mxu0 }

</bundles_post_ra>
